<compile_context>
chip_gen: v7x
topology: tpu7x:2x2x1
jax: 0.10.0
libtpu: 0.0.40
codegen_flags: <defaults>
</compile_context>

<pallas_src>
import functools

import jax
import jax.numpy as jnp
from jax.experimental import pallas as pl
from jax.experimental.pallas import tpu as pltpu

_LANE = 128
_PROJ_TM_CAP = 2048          # ~10.5 MiB double-buffered working set; safe on v7x


def _round_up(n, m):
    return ((n + m - 1) // m) * m


def _vmem_limit(working_set_bytes):
    """Scoped-VMEM request sized to the working set, capped by the chip."""
    phys = 64 * 1024 * 1024                     # conservative default (v7x)
    try:
        info = pltpu.get_tpu_info()
        phys = int(getattr(info, "vmem_capacity_bytes", phys))
    except Exception:
        pass
    want = int(working_set_bytes) + (6 << 20)   # headroom for Mosaic scratch
    lo = 16 << 20
    hi = max(lo, (phys * 3) // 4)
    return int(max(lo, min(want, hi)))


# ----------------------------------------------------------------------------
# Pallas kernel 1: random projection as a tiled matmul
#   px, py: (N, Kpad) bf16 patch rows   w: (Kpad, P) bf16   ->  (N, P) f32 x2
# ----------------------------------------------------------------------------
def _proj_kernel(px_ref, py_ref, w_ref, ox_ref, oy_ref):
    w = w_ref[...]                                    # (Kpad, P) bf16, resident
    ox_ref[...] = jnp.dot(px_ref[...], w, preferred_element_type=jnp.float32)
    oy_ref[...] = jnp.dot(py_ref[...], w, preferred_element_type=jnp.float32)


def project_pair(px_blocks, py_blocks, w_t):
    """Project a list of (rows, Kpad) bf16 blocks (x and y) with one call."""
    kpad, p = w_t.shape
    n = sum(int(blk.shape[0]) for blk in px_blocks)
    tm = min(_PROJ_TM_CAP, _round_up(max(n, 1), 256))
    n_pad = _round_up(n, tm)
    if n_pad > n:                                     # pad folded into the concat
        zpad = jnp.zeros((n_pad - n, kpad), jnp.bfloat16)
        px_blocks = list(px_blocks) + [zpad]
        py_blocks = list(py_blocks) + [zpad]
    px = jnp.concatenate(px_blocks, axis=0)
    py = jnp.concatenate(py_blocks, axis=0)

    grid = (n_pad // tm,)
    patch_spec = pl.BlockSpec((tm, kpad), lambda i: (i, 0))
    out_spec = pl.BlockSpec((tm, p), lambda i: (i, 0))
    # Double-buffered working set: 2 * (px + py + ox + oy tiles) + weight.
    ws = 2 * (2 * tm * kpad * 2 + 2 * tm * p * 4) + 2 * kpad * p * 2

    ox, oy = pl.pallas_call(
        _proj_kernel,
        out_shape=(jax.ShapeDtypeStruct((n_pad, p), jnp.float32),
                   jax.ShapeDtypeStruct((n_pad, p), jnp.float32)),
        grid=grid,
        in_specs=[patch_spec, patch_spec,
                  pl.BlockSpec((kpad, p), lambda i: (0, 0))],   # weight resident
        out_specs=(out_spec, out_spec),
        compiler_params=pltpu.CompilerParams(
            dimension_semantics=("parallel",),
            vmem_limit_bytes=_vmem_limit(ws)),
    )(px, py, w_t)
    return ox[:n], oy[:n]


# ----------------------------------------------------------------------------
# Pallas kernel 2: SWD reduction  sum(|projx - projy|) over (HW, P) per batch
#   projx, projy: (B, HWpad, P) f32 (sorted along HW; pad rows are zero-zero)
#   -> per-(batch, outer-chunk) partial sums of shape (B, n_outer, 8, P)
# ----------------------------------------------------------------------------
def _swd_kernel(px_ref, py_ref, out_ref, acc_ref):
    t = pl.program_id(2)

    @pl.when(t == 0)
    def _():
        acc_ref[...] = jnp.zeros_like(acc_ref)

    d = jnp.abs(px_ref[0] - py_ref[0])                # (TH, P) f32
    th, p = d.shape
    # VPU-only row-group partial sums onto an (8, P) accumulator; the final
    # cross-sublane reduce happens outside the kernel on a tiny array.
    acc_ref[...] += jnp.sum(d.reshape(th // 8, 8, p), axis=0)

    @pl.when(t == pl.num_programs(2) - 1)
    def _():
        out_ref[0, 0] = acc_ref[...]


def _reduce_tile(hw):
    for t in (512, 256, 128, 64, 32, 16, 8):
        if hw % t == 0:
            return t, hw
    t = 256 if hw > 256 else _round_up(hw, 8)
    return t, _round_up(hw, t)


def _split_chunks(chunks, max_outer=8):
    for o in range(min(chunks, max_outer), 0, -1):
        if chunks % o == 0:
            return o, chunks // o
    return 1, chunks


def swd_reduce(projx, projy):
    b, hw, p = projx.shape
    th, hw_pad = _reduce_tile(hw)
    if hw_pad != hw:
        pad = ((0, 0), (0, hw_pad - hw), (0, 0))
        projx = jnp.pad(projx, pad)                   # zero-zero rows: no effect
        projy = jnp.pad(projy, pad)
    chunks = hw_pad // th
    n_outer, n_inner = _split_chunks(chunks)

    in_spec = pl.BlockSpec((1, th, p), lambda i, o, t: (i, o * n_inner + t, 0))
    out_spec = pl.BlockSpec((1, 1, 8, p), lambda i, o, t: (i, o, 0, 0))
    ws = 2 * 2 * th * p * 4 + 2 * 8 * p * 4 + 8 * p * 4

    partials = pl.pallas_call(
        _swd_kernel,
        out_shape=jax.ShapeDtypeStruct((b, n_outer, 8, p), jnp.float32),
        grid=(b, n_outer, n_inner),
        in_specs=[in_spec, in_spec],
        out_specs=out_spec,
        scratch_shapes=[pltpu.VMEM((8, p), jnp.float32)],
        compiler_params=pltpu.CompilerParams(
            dimension_semantics=("parallel", "parallel", "arbitrary"),
            vmem_limit_bytes=_vmem_limit(ws)),
    )(projx, projy)
    return jnp.sum(partials, axis=(1, 2, 3)) * (1.0 / float(hw * p))


# ----------------------------------------------------------------------------
# Plain-JAX glue: separable Gaussian pyramid, sRGB->Lab, taps-last im2col
# ----------------------------------------------------------------------------
def gaussian_blur(x):
    """Separable 5-tap binomial blur (1,4,6,4,1)/16 per axis, reflect padding."""
    taps = (1.0 / 16, 4.0 / 16, 6.0 / 16, 4.0 / 16, 1.0 / 16)
    _, _, h, w = x.shape
    xp = jnp.pad(x, ((0, 0), (0, 0), (2, 2), (0, 0)), mode="reflect")
    x = sum(taps[i] * xp[:, :, i:i + h, :] for i in range(5))
    xp = jnp.pad(x, ((0, 0), (0, 0), (0, 0), (2, 2)), mode="reflect")
    x = sum(taps[j] * xp[:, :, :, j:j + w] for j in range(5))
    return x


def gaussian_pyramid(x, num_scale):
    pyr = [x]
    cur = x
    for _ in range(num_scale - 1):
        cur = gaussian_blur(cur)[:, :, ::2, ::2]
        pyr.append(cur)
    return pyr


def srgb2lab_cl(x):
    """(B, 3, H, W) sRGB in [0,1] -> (B, H, W, 3) CIELAB, channels-last."""
    limit = 0.04045
    lin = jnp.where(x > limit, ((x + 0.055) / 1.055) ** 2.4, x / 12.92)
    r, g, b = lin[:, 0], lin[:, 1], lin[:, 2]
    X = 0.4124 * r + 0.3576 * g + 0.1805 * b
    Y = 0.2126 * r + 0.7152 * g + 0.0722 * b
    Z = 0.0193 * r + 0.1192 * g + 0.9505 * b
    xn, yn, zn = 0.950428545, 1.0, 1.088900371
    delta = 6.0 / 29.0

    def f(t):
        return jnp.where(t > delta ** 3, jnp.cbrt(t),
                         t / (3.0 * delta ** 2) + 4.0 / 29.0)

    fx, fy, fz = f(X / xn), f(Y / yn), f(Z / zn)
    L = 116.0 * fy - 16.0
    a = 500.0 * (fx - fy)
    bb = 200.0 * (fy - fz)
    return jnp.stack([L, a, bb], axis=-1)


def patches_of(lab_cl, ps, kpad):
    """Taps-last im2col: (B, H, W, C) -> (B*H*W, Kpad) bf16, K ordered (i, j, c).

    No final transpose; the K zero-pad is folded into the same stack as extra
    zero "taps" when (Kpad - K) is a multiple of C.
    """
    b, h, w, c = lab_cl.shape
    k = ps * ps * c
    pad = ps // 2
    xp = jnp.pad(lab_cl, ((0, 0), (pad, pad), (pad, pad), (0, 0)),
                 mode="reflect").astype(jnp.bfloat16)
    cols = [xp[:, i:i + h, j:j + w, :] for i in range(ps) for j in range(ps)]
    extra = kpad - k
    if extra % c == 0:
        cols = cols + [jnp.zeros_like(cols[0])] * (extra // c)
        patches = jnp.stack(cols, axis=3).reshape(b, h * w, kpad)
    else:
        patches = jnp.stack(cols, axis=3).reshape(b, h * w, k)
        patches = jnp.pad(patches, ((0, 0), (0, 0), (0, extra)))
    return patches.reshape(b * h * w, kpad)


# ----------------------------------------------------------------------------
# MS_SWD forward
# ----------------------------------------------------------------------------
def ms_swd_forward(x, y, w_t_pad, num_scale, patch_size):
    b = x.shape[0]
    kpad, p = w_t_pad.shape

    x_pyr = gaussian_pyramid(x, num_scale)
    y_pyr = gaussian_pyramid(y, num_scale)

    px_blocks, py_blocks, hw_per_scale = [], [], []
    for n in range(num_scale):
        x_lab = srgb2lab_cl(x_pyr[n])
        y_lab = srgb2lab_cl(y_pyr[n])
        h, w = x_lab.shape[1], x_lab.shape[2]
        px_blocks.append(patches_of(x_lab, patch_size, kpad))
        py_blocks.append(patches_of(y_lab, patch_size, kpad))
        hw_per_scale.append(h * w)

    # One projection pallas_call covering every scale (weight loaded once).
    projx_all, projy_all = project_pair(px_blocks, py_blocks, w_t_pad)

    total = jnp.zeros((b,), dtype=jnp.float32)
    off = 0
    for hw in hw_per_scale:
        rows = b * hw
        projx = projx_all[off:off + rows].reshape(b, hw, p)
        projy = projy_all[off:off + rows].reshape(b, hw, p)
        off += rows
        # TODO(synk): sort along the spatial axis stays in XLA (jnp.sort).
        projx = jnp.sort(projx, axis=1)
        projy = jnp.sort(projy, axis=1)
        total = total + swd_reduce(projx, projy)
    return total / num_scale


# ----------------------------------------------------------------------------
# Driver
# ----------------------------------------------------------------------------
if __name__ == "__main__":
    # Reflect pad of 5 requires the coarsest pyramid level to be > 5 pixels, so
    # num_scale=3 with 32x32 inputs (levels 32 / 16 / 8).
    B, C, H, W = 2, 3, 32, 32
    num_scale, num_proj, patch_size = 3, 128, 11

    key = jax.random.PRNGKey(0)
    kx, ky, kr = jax.random.split(key, 3)
    x = jax.random.uniform(kx, (B, C, H, W), dtype=jnp.float32)
    y = jax.random.uniform(ky, (B, C, H, W), dtype=jnp.float32)

    # Deterministic projection weights (sampled once instead of per-call
    # resampling; the compute path is identical).  Generated in the PyTorch
    # (c, i, j) K ordering, then permuted ONCE to the taps-last (i, j, c)
    # ordering used by the in-script im2col, padded K 363 -> 384, bf16.
    k = C * patch_size ** 2                                  # 363
    rand = jax.random.normal(kr, (num_proj, k), dtype=jnp.float32)
    rand = rand / jnp.linalg.norm(rand, axis=1, keepdims=True)   # (P, K)
    w_ijc = rand.reshape(num_proj, C, patch_size, patch_size)
    w_ijc = jnp.transpose(w_ijc, (0, 2, 3, 1)).reshape(num_proj, k)
    kpad = _round_up(k, _LANE)                                   # 384
    w_t_pad = jnp.pad(w_ijc.T, ((0, kpad - k), (0, 0))).astype(jnp.bfloat16)

    fwd = jax.jit(functools.partial(ms_swd_forward, num_scale=num_scale,
                                    patch_size=patch_size))
    out = fwd(x, y, w_t_pad)
    out = jax.block_until_ready(out)

    assert out.shape == (B,), out.shape
    assert bool(jnp.all(jnp.isfinite(out)))
    print("KERNEL_OK")
</pallas_src>

<mosaic_0001>
module attributes {stable_mosaic.version = 11 : i64} {
  func.func @_proj_kernel(%arg0: i32, %arg1: memref<2048x384xbf16, #tpu.memory_space<vmem>>, %arg2: memref<2048x384xbf16, #tpu.memory_space<vmem>>, %arg3: memref<384x128xbf16, #tpu.memory_space<vmem>>, %arg4: memref<2048x128xf32, #tpu.memory_space<vmem>>, %arg5: memref<2048x128xf32, #tpu.memory_space<vmem>>) attributes {dimension_semantics = [#tpu.dimension_semantics<parallel>], iteration_bounds = array<i64: 2>, scalar_prefetch = 0 : i64, scratch_operands = 0 : i64, tpu.core_type = #tpu.core_type<tc>, window_params = [{transform_indices = @transform_0, window_bounds = array<i64: 2048, 384>}, {transform_indices = @transform_1, window_bounds = array<i64: 2048, 384>}, {pipeline_mode = #tpu.pipeline_mode<synchronous>, transform_indices = @transform_2, window_bounds = array<i64: 384, 128>}, {transform_indices = @transform_3, window_bounds = array<i64: 2048, 128>}, {transform_indices = @transform_4, window_bounds = array<i64: 2048, 128>}]} {
    %c0 = arith.constant 0 : index
    %c0_0 = arith.constant 0 : index
    %0 = vector.load %arg3[%c0, %c0_0] : memref<384x128xbf16, #tpu.memory_space<vmem>>, vector<384x128xbf16>
    %c0_1 = arith.constant 0 : index
    %c0_2 = arith.constant 0 : index
    %1 = vector.load %arg1[%c0_1, %c0_2] : memref<2048x384xbf16, #tpu.memory_space<vmem>>, vector<2048x384xbf16>
    %cst = arith.constant dense<0.000000e+00> : vector<2048x128xf32>
    %2 = tpu.matmul %1, %0, %cst {dimension_numbers = #tpu.dot_dimension_numbers<[1], [0], [0], [1], [0, 0, 1, 1], [], []>} : vector<2048x384xbf16>, vector<384x128xbf16>, vector<2048x128xf32> -> vector<2048x128xf32>
    %c0_3 = arith.constant 0 : index
    %c0_4 = arith.constant 0 : index
    %3 = vector.load %arg4[%c0_3, %c0_4] : memref<2048x128xf32, #tpu.memory_space<vmem>>, vector<2048x128xf32>
    tpu.vector_store %arg4[%c0_3, %c0_4], %2 {strides = array<i32>} : memref<2048x128xf32, #tpu.memory_space<vmem>>, vector<2048x128xf32>,
    %c0_5 = arith.constant 0 : index
    %c0_6 = arith.constant 0 : index
    %4 = vector.load %arg2[%c0_5, %c0_6] : memref<2048x384xbf16, #tpu.memory_space<vmem>>, vector<2048x384xbf16>
    %cst_7 = arith.constant dense<0.000000e+00> : vector<2048x128xf32>
    %5 = tpu.matmul %4, %0, %cst_7 {dimension_numbers = #tpu.dot_dimension_numbers<[1], [0], [0], [1], [0, 0, 1, 1], [], []>} : vector<2048x384xbf16>, vector<384x128xbf16>, vector<2048x128xf32> -> vector<2048x128xf32>
    %c0_8 = arith.constant 0 : index
    %c0_9 = arith.constant 0 : index
    %6 = vector.load %arg5[%c0_8, %c0_9] : memref<2048x128xf32, #tpu.memory_space<vmem>>, vector<2048x128xf32>
    tpu.vector_store %arg5[%c0_8, %c0_9], %5 {strides = array<i32>} : memref<2048x128xf32, #tpu.memory_space<vmem>>, vector<2048x128xf32>,
    return
  }
  func.func @transform_0(%arg0: i32) -> (i32, i32) {
    %c0_i32 = arith.constant 0 : i32
    %c0_i32_0 = arith.constant 0 : i32
    return %arg0, %c0_i32 : i32, i32
  }
  func.func @transform_1(%arg0: i32) -> (i32, i32) {
    %c0_i32 = arith.constant 0 : i32
    %c0_i32_0 = arith.constant 0 : i32
    return %arg0, %c0_i32 : i32, i32
  }
  func.func @transform_2(%arg0: i32) -> (i32, i32) {
    %c0_i32 = arith.constant 0 : i32
    %c0_i32_0 = arith.constant 0 : i32
    %c0_i32_1 = arith.constant 0 : i32
    return %c0_i32, %c0_i32_0 : i32, i32
  }
  func.func @transform_3(%arg0: i32) -> (i32, i32) {
    %c0_i32 = arith.constant 0 : i32
    %c0_i32_0 = arith.constant 0 : i32
    return %arg0, %c0_i32 : i32, i32
  }
  func.func @transform_4(%arg0: i32) -> (i32, i32) {
    %c0_i32 = arith.constant 0 : i32
    %c0_i32_0 = arith.constant 0 : i32
    return %arg0, %c0_i32 : i32, i32
  }
}

module attributes {stable_mosaic.version = 11 : i64} {
  func.func @_swd_kernel(%arg0: i32, %arg1: i32, %arg2: i32, %arg3: memref<1x512x128xf32, #tpu.memory_space<vmem>>, %arg4: memref<1x512x128xf32, #tpu.memory_space<vmem>>, %arg5: memref<1x1x8x128xf32, #tpu.memory_space<vmem>>, %arg6: memref<8x128xf32, #tpu.memory_space<vmem>>) attributes {dimension_semantics = [#tpu.dimension_semantics<parallel>, #tpu.dimension_semantics<parallel>, #tpu.dimension_semantics<arbitrary>], iteration_bounds = array<i64: 2, 2, 1>, scalar_prefetch = 0 : i64, scratch_operands = 1 : i64, tpu.core_type = #tpu.core_type<tc>, window_params = [{transform_indices = @transform_0, window_bounds = array<i64: 1, 512, 128>}, {transform_indices = @transform_1, window_bounds = array<i64: 1, 512, 128>}, {transform_indices = @transform_2, window_bounds = array<i64: 1, 1, 8, 128>}]} {
    %c0_i32 = arith.constant 0 : i32
    %0 = arith.cmpi eq, %arg2, %c0_i32 : i32
    %1 = arith.extui %0 : i1 to i32
    %c0_i32_0 = arith.constant 0 : i32
    %2 = arith.cmpi ne, %1, %c0_i32_0 : i32
    scf.if %2 {
      %cst_12 = arith.constant 0.000000e+00 : f32
      %17 = vector.broadcast %cst_12 : f32 to vector<8x128xf32>
      %c0_13 = arith.constant 0 : index
      %c0_14 = arith.constant 0 : index
      %18 = vector.load %arg6[%c0_13, %c0_14] : memref<8x128xf32, #tpu.memory_space<vmem>>, vector<8x128xf32>
      tpu.vector_store %arg6[%c0_13, %c0_14], %17 {strides = array<i32>} : memref<8x128xf32, #tpu.memory_space<vmem>>, vector<8x128xf32>,
    } else {
    }
    %c0 = arith.constant 0 : index
    %c0_1 = arith.constant 0 : index
    %c0_2 = arith.constant 0 : index
    %3 = vector.load %arg3[%c0, %c0_1, %c0_2] : memref<1x512x128xf32, #tpu.memory_space<vmem>>, vector<1x512x128xf32>
    %4 = vector.shape_cast %3 : vector<1x512x128xf32> to vector<512x128xf32>
    %c0_3 = arith.constant 0 : index
    %c0_4 = arith.constant 0 : index
    %c0_5 = arith.constant 0 : index
    %5 = vector.load %arg4[%c0_3, %c0_4, %c0_5] : memref<1x512x128xf32, #tpu.memory_space<vmem>>, vector<1x512x128xf32>
    %6 = vector.shape_cast %5 : vector<1x512x128xf32> to vector<512x128xf32>
    %7 = arith.subf %4, %6 : vector<512x128xf32>
    %8 = math.absf %7 : vector<512x128xf32>
    %c0_6 = arith.constant 0 : index
    %c0_7 = arith.constant 0 : index
    %9 = vector.load %arg6[%c0_6, %c0_7] : memref<8x128xf32, #tpu.memory_space<vmem>>, vector<8x128xf32>
    %10 = vector.shape_cast %8 : vector<512x128xf32> to vector<64x8x128xf32>
    %cst = arith.constant dense<0.000000e+00> : vector<8x128xf32>
    %11 = vector.multi_reduction <add>, %10, %cst [0] : vector<64x8x128xf32> to vector<8x128xf32>
    %12 = arith.addf %9, %11 : vector<8x128xf32>
    %c0_8 = arith.constant 0 : index
    %c0_9 = arith.constant 0 : index
    %13 = vector.load %arg6[%c0_8, %c0_9] : memref<8x128xf32, #tpu.memory_space<vmem>>, vector<8x128xf32>
    tpu.vector_store %arg6[%c0_8, %c0_9], %12 {strides = array<i32>} : memref<8x128xf32, #tpu.memory_space<vmem>>, vector<8x128xf32>,
    %c0_i32_10 = arith.constant 0 : i32
    %14 = arith.cmpi eq, %arg2, %c0_i32_10 : i32
    %15 = arith.extui %14 : i1 to i32
    %c0_i32_11 = arith.constant 0 : i32
    %16 = arith.cmpi ne, %15, %c0_i32_11 : i32
    scf.if %16 {
      %c0_12 = arith.constant 0 : index
      %c0_13 = arith.constant 0 : index
      %17 = vector.load %arg6[%c0_12, %c0_13] : memref<8x128xf32, #tpu.memory_space<vmem>>, vector<8x128xf32>
      %c0_14 = arith.constant 0 : index
      %c0_15 = arith.constant 0 : index
      %c0_16 = arith.constant 0 : index
      %c0_17 = arith.constant 0 : index
      %18 = vector.load %arg5[%c0_14, %c0_15, %c0_16, %c0_17] : memref<1x1x8x128xf32, #tpu.memory_space<vmem>>, vector<1x1x8x128xf32>
      %19 = vector.shape_cast %18 : vector<1x1x8x128xf32> to vector<8x128xf32>
      %20 = vector.shape_cast %17 : vector<8x128xf32> to vector<1x1x8x128xf32>
      tpu.vector_store %arg5[%c0_14, %c0_15, %c0_16, %c0_17], %20 {strides = array<i32>} : memref<1x1x8x128xf32, #tpu.memory_space<vmem>>, vector<1x1x8x128xf32>,
    } else {
    }
    return
  }
  func.func @transform_0(%arg0: i32, %arg1: i32, %arg2: i32) -> (i32, i32, i32) {
    %c1_i32 = arith.constant 1 : i32
    %0 = arith.muli %arg1, %c1_i32 : i32
    %1 = arith.addi %0, %arg2 : i32
    %c0_i32 = arith.constant 0 : i32
    %c0_i32_0 = arith.constant 0 : i32
    return %arg0, %1, %c0_i32 : i32, i32, i32
  }
  func.func @transform_1(%arg0: i32, %arg1: i32, %arg2: i32) -> (i32, i32, i32) {
    %c1_i32 = arith.constant 1 : i32
    %0 = arith.muli %arg1, %c1_i32 : i32
    %1 = arith.addi %0, %arg2 : i32
    %c0_i32 = arith.constant 0 : i32
    %c0_i32_0 = arith.constant 0 : i32
    return %arg0, %1, %c0_i32 : i32, i32, i32
  }
  func.func @transform_2(%arg0: i32, %arg1: i32, %arg2: i32) -> (i32, i32, i32, i32) {
    %c0_i32 = arith.constant 0 : i32
    %c0_i32_0 = arith.constant 0 : i32
    %c0_i32_1 = arith.constant 0 : i32
    return %arg0, %arg1, %c0_i32, %c0_i32_0 : i32, i32, i32, i32
  }
}

module attributes {stable_mosaic.version = 11 : i64} {
  func.func @_swd_kernel(%arg0: i32, %arg1: i32, %arg2: i32, %arg3: memref<1x256x128xf32, #tpu.memory_space<vmem>>, %arg4: memref<1x256x128xf32, #tpu.memory_space<vmem>>, %arg5: memref<1x1x8x128xf32, #tpu.memory_space<vmem>>, %arg6: memref<8x128xf32, #tpu.memory_space<vmem>>) attributes {dimension_semantics = [#tpu.dimension_semantics<parallel>, #tpu.dimension_semantics<parallel>, #tpu.dimension_semantics<arbitrary>], iteration_bounds = array<i64: 2, 1, 1>, scalar_prefetch = 0 : i64, scratch_operands = 1 : i64, tpu.core_type = #tpu.core_type<tc>, window_params = [{transform_indices = @transform_0, window_bounds = array<i64: 1, 256, 128>}, {transform_indices = @transform_1, window_bounds = array<i64: 1, 256, 128>}, {transform_indices = @transform_2, window_bounds = array<i64: 1, 1, 8, 128>}]} {
    %c0_i32 = arith.constant 0 : i32
    %0 = arith.cmpi eq, %arg2, %c0_i32 : i32
    %1 = arith.extui %0 : i1 to i32
    %c0_i32_0 = arith.constant 0 : i32
    %2 = arith.cmpi ne, %1, %c0_i32_0 : i32
    scf.if %2 {
      %cst_12 = arith.constant 0.000000e+00 : f32
      %17 = vector.broadcast %cst_12 : f32 to vector<8x128xf32>
      %c0_13 = arith.constant 0 : index
      %c0_14 = arith.constant 0 : index
      %18 = vector.load %arg6[%c0_13, %c0_14] : memref<8x128xf32, #tpu.memory_space<vmem>>, vector<8x128xf32>
      tpu.vector_store %arg6[%c0_13, %c0_14], %17 {strides = array<i32>} : memref<8x128xf32, #tpu.memory_space<vmem>>, vector<8x128xf32>,
    } else {
    }
    %c0 = arith.constant 0 : index
    %c0_1 = arith.constant 0 : index
    %c0_2 = arith.constant 0 : index
    %3 = vector.load %arg3[%c0, %c0_1, %c0_2] : memref<1x256x128xf32, #tpu.memory_space<vmem>>, vector<1x256x128xf32>
    %4 = vector.shape_cast %3 : vector<1x256x128xf32> to vector<256x128xf32>
    %c0_3 = arith.constant 0 : index
    %c0_4 = arith.constant 0 : index
    %c0_5 = arith.constant 0 : index
    %5 = vector.load %arg4[%c0_3, %c0_4, %c0_5] : memref<1x256x128xf32, #tpu.memory_space<vmem>>, vector<1x256x128xf32>
    %6 = vector.shape_cast %5 : vector<1x256x128xf32> to vector<256x128xf32>
    %7 = arith.subf %4, %6 : vector<256x128xf32>
    %8 = math.absf %7 : vector<256x128xf32>
    %c0_6 = arith.constant 0 : index
    %c0_7 = arith.constant 0 : index
    %9 = vector.load %arg6[%c0_6, %c0_7] : memref<8x128xf32, #tpu.memory_space<vmem>>, vector<8x128xf32>
    %10 = vector.shape_cast %8 : vector<256x128xf32> to vector<32x8x128xf32>
    %cst = arith.constant dense<0.000000e+00> : vector<8x128xf32>
    %11 = vector.multi_reduction <add>, %10, %cst [0] : vector<32x8x128xf32> to vector<8x128xf32>
    %12 = arith.addf %9, %11 : vector<8x128xf32>
    %c0_8 = arith.constant 0 : index
    %c0_9 = arith.constant 0 : index
    %13 = vector.load %arg6[%c0_8, %c0_9] : memref<8x128xf32, #tpu.memory_space<vmem>>, vector<8x128xf32>
    tpu.vector_store %arg6[%c0_8, %c0_9], %12 {strides = array<i32>} : memref<8x128xf32, #tpu.memory_space<vmem>>, vector<8x128xf32>,
    %c0_i32_10 = arith.constant 0 : i32
    %14 = arith.cmpi eq, %arg2, %c0_i32_10 : i32
    %15 = arith.extui %14 : i1 to i32
    %c0_i32_11 = arith.constant 0 : i32
    %16 = arith.cmpi ne, %15, %c0_i32_11 : i32
    scf.if %16 {
      %c0_12 = arith.constant 0 : index
      %c0_13 = arith.constant 0 : index
      %17 = vector.load %arg6[%c0_12, %c0_13] : memref<8x128xf32, #tpu.memory_space<vmem>>, vector<8x128xf32>
      %c0_14 = arith.constant 0 : index
      %c0_15 = arith.constant 0 : index
      %c0_16 = arith.constant 0 : index
      %c0_17 = arith.constant 0 : index
      %18 = vector.load %arg5[%c0_14, %c0_15, %c0_16, %c0_17] : memref<1x1x8x128xf32, #tpu.memory_space<vmem>>, vector<1x1x8x128xf32>
      %19 = vector.shape_cast %18 : vector<1x1x8x128xf32> to vector<8x128xf32>
      %20 = vector.shape_cast %17 : vector<8x128xf32> to vector<1x1x8x128xf32>
      tpu.vector_store %arg5[%c0_14, %c0_15, %c0_16, %c0_17], %20 {strides = array<i32>} : memref<1x1x8x128xf32, #tpu.memory_space<vmem>>, vector<1x1x8x128xf32>,
    } else {
    }
    return
  }
  func.func @transform_0(%arg0: i32, %arg1: i32, %arg2: i32) -> (i32, i32, i32) {
    %c1_i32 = arith.constant 1 : i32
    %0 = arith.muli %arg1, %c1_i32 : i32
    %1 = arith.addi %0, %arg2 : i32
    %c0_i32 = arith.constant 0 : i32
    %c0_i32_0 = arith.constant 0 : i32
    return %arg0, %1, %c0_i32 : i32, i32, i32
  }
  func.func @transform_1(%arg0: i32, %arg1: i32, %arg2: i32) -> (i32, i32, i32) {
    %c1_i32 = arith.constant 1 : i32
    %0 = arith.muli %arg1, %c1_i32 : i32
    %1 = arith.addi %0, %arg2 : i32
    %c0_i32 = arith.constant 0 : i32
    %c0_i32_0 = arith.constant 0 : i32
    return %arg0, %1, %c0_i32 : i32, i32, i32
  }
  func.func @transform_2(%arg0: i32, %arg1: i32, %arg2: i32) -> (i32, i32, i32, i32) {
    %c0_i32 = arith.constant 0 : i32
    %c0_i32_0 = arith.constant 0 : i32
    %c0_i32_1 = arith.constant 0 : i32
    return %arg0, %arg1, %c0_i32, %c0_i32_0 : i32, i32, i32, i32
  }
}

module attributes {stable_mosaic.version = 11 : i64} {
  func.func @_swd_kernel(%arg0: i32, %arg1: i32, %arg2: i32, %arg3: memref<1x64x128xf32, #tpu.memory_space<vmem>>, %arg4: memref<1x64x128xf32, #tpu.memory_space<vmem>>, %arg5: memref<1x1x8x128xf32, #tpu.memory_space<vmem>>, %arg6: memref<8x128xf32, #tpu.memory_space<vmem>>) attributes {dimension_semantics = [#tpu.dimension_semantics<parallel>, #tpu.dimension_semantics<parallel>, #tpu.dimension_semantics<arbitrary>], iteration_bounds = array<i64: 2, 1, 1>, scalar_prefetch = 0 : i64, scratch_operands = 1 : i64, tpu.core_type = #tpu.core_type<tc>, window_params = [{transform_indices = @transform_0, window_bounds = array<i64: 1, 64, 128>}, {transform_indices = @transform_1, window_bounds = array<i64: 1, 64, 128>}, {transform_indices = @transform_2, window_bounds = array<i64: 1, 1, 8, 128>}]} {
    %c0_i32 = arith.constant 0 : i32
    %0 = arith.cmpi eq, %arg2, %c0_i32 : i32
    %1 = arith.extui %0 : i1 to i32
    %c0_i32_0 = arith.constant 0 : i32
    %2 = arith.cmpi ne, %1, %c0_i32_0 : i32
    scf.if %2 {
      %cst_12 = arith.constant 0.000000e+00 : f32
      %17 = vector.broadcast %cst_12 : f32 to vector<8x128xf32>
      %c0_13 = arith.constant 0 : index
      %c0_14 = arith.constant 0 : index
      %18 = vector.load %arg6[%c0_13, %c0_14] : memref<8x128xf32, #tpu.memory_space<vmem>>, vector<8x128xf32>
      tpu.vector_store %arg6[%c0_13, %c0_14], %17 {strides = array<i32>} : memref<8x128xf32, #tpu.memory_space<vmem>>, vector<8x128xf32>,
    } else {
    }
    %c0 = arith.constant 0 : index
    %c0_1 = arith.constant 0 : index
    %c0_2 = arith.constant 0 : index
    %3 = vector.load %arg3[%c0, %c0_1, %c0_2] : memref<1x64x128xf32, #tpu.memory_space<vmem>>, vector<1x64x128xf32>
    %4 = vector.shape_cast %3 : vector<1x64x128xf32> to vector<64x128xf32>
    %c0_3 = arith.constant 0 : index
    %c0_4 = arith.constant 0 : index
    %c0_5 = arith.constant 0 : index
    %5 = vector.load %arg4[%c0_3, %c0_4, %c0_5] : memref<1x64x128xf32, #tpu.memory_space<vmem>>, vector<1x64x128xf32>
    %6 = vector.shape_cast %5 : vector<1x64x128xf32> to vector<64x128xf32>
    %7 = arith.subf %4, %6 : vector<64x128xf32>
    %8 = math.absf %7 : vector<64x128xf32>
    %c0_6 = arith.constant 0 : index
    %c0_7 = arith.constant 0 : index
    %9 = vector.load %arg6[%c0_6, %c0_7] : memref<8x128xf32, #tpu.memory_space<vmem>>, vector<8x128xf32>
    %10 = vector.shape_cast %8 : vector<64x128xf32> to vector<8x8x128xf32>
    %cst = arith.constant dense<0.000000e+00> : vector<8x128xf32>
    %11 = vector.multi_reduction <add>, %10, %cst [0] : vector<8x8x128xf32> to vector<8x128xf32>
    %12 = arith.addf %9, %11 : vector<8x128xf32>
    %c0_8 = arith.constant 0 : index
    %c0_9 = arith.constant 0 : index
    %13 = vector.load %arg6[%c0_8, %c0_9] : memref<8x128xf32, #tpu.memory_space<vmem>>, vector<8x128xf32>
    tpu.vector_store %arg6[%c0_8, %c0_9], %12 {strides = array<i32>} : memref<8x128xf32, #tpu.memory_space<vmem>>, vector<8x128xf32>,
    %c0_i32_10 = arith.constant 0 : i32
    %14 = arith.cmpi eq, %arg2, %c0_i32_10 : i32
    %15 = arith.extui %14 : i1 to i32
    %c0_i32_11 = arith.constant 0 : i32
    %16 = arith.cmpi ne, %15, %c0_i32_11 : i32
    scf.if %16 {
      %c0_12 = arith.constant 0 : index
      %c0_13 = arith.constant 0 : index
      %17 = vector.load %arg6[%c0_12, %c0_13] : memref<8x128xf32, #tpu.memory_space<vmem>>, vector<8x128xf32>
      %c0_14 = arith.constant 0 : index
      %c0_15 = arith.constant 0 : index
      %c0_16 = arith.constant 0 : index
      %c0_17 = arith.constant 0 : index
      %18 = vector.load %arg5[%c0_14, %c0_15, %c0_16, %c0_17] : memref<1x1x8x128xf32, #tpu.memory_space<vmem>>, vector<1x1x8x128xf32>
      %19 = vector.shape_cast %18 : vector<1x1x8x128xf32> to vector<8x128xf32>
      %20 = vector.shape_cast %17 : vector<8x128xf32> to vector<1x1x8x128xf32>
      tpu.vector_store %arg5[%c0_14, %c0_15, %c0_16, %c0_17], %20 {strides = array<i32>} : memref<1x1x8x128xf32, #tpu.memory_space<vmem>>, vector<1x1x8x128xf32>,
    } else {
    }
    return
  }
  func.func @transform_0(%arg0: i32, %arg1: i32, %arg2: i32) -> (i32, i32, i32) {
    %c1_i32 = arith.constant 1 : i32
    %0 = arith.muli %arg1, %c1_i32 : i32
    %1 = arith.addi %0, %arg2 : i32
    %c0_i32 = arith.constant 0 : i32
    %c0_i32_0 = arith.constant 0 : i32
    return %arg0, %1, %c0_i32 : i32, i32, i32
  }
  func.func @transform_1(%arg0: i32, %arg1: i32, %arg2: i32) -> (i32, i32, i32) {
    %c1_i32 = arith.constant 1 : i32
    %0 = arith.muli %arg1, %c1_i32 : i32
    %1 = arith.addi %0, %arg2 : i32
    %c0_i32 = arith.constant 0 : i32
    %c0_i32_0 = arith.constant 0 : i32
    return %arg0, %1, %c0_i32 : i32, i32, i32
  }
  func.func @transform_2(%arg0: i32, %arg1: i32, %arg2: i32) -> (i32, i32, i32, i32) {
    %c0_i32 = arith.constant 0 : i32
    %c0_i32_0 = arith.constant 0 : i32
    %c0_i32_1 = arith.constant 0 : i32
    return %arg0, %arg1, %c0_i32, %c0_i32_0 : i32, i32, i32, i32
  }
}

</mosaic_0001>

<bundles_post_ra>
// kernel: ms_swd_forward.4
= control target key start
LH: loop header
LB: loop body
LE: loop exit
PB: predicated region body
PF: predicated region fallthrough
CT: control target
= control target key end

     0   :  { %s13137_s15 = smov 0   ;;  %s16219_s0 = inlined_call_operand.vmem [shape: bf16[4096,384], index: 0, kind: input, shape index: {}]   ;;  %s16220_s1 = inlined_call_operand.vmem [shape: bf16[4096,384], index: 1, kind: input, shape index: {}]   ;;  %s16221_s2 = inlined_call_operand.vmem [shape: bf16[384,128], index: 2, kind: input, shape index: {}]   ;;  %s16222_s3 = inlined_call_operand.vmem [shape: f32[4096,128], index: 3, kind: output, shape index: {0}]   ;;  %s16223_s4 = inlined_call_operand.vmem [shape: f32[4096,128], index: 4, kind: output, shape index: {1}]  }
   0x1 LB: > { %s10398_s16 = sadd.s32 4294967295, %s13109_s15   ;;  %p10402_p0 = scmp.ge.s32.totalorder %s13109_s15, 1  ;;  %s13109_s15 = sphi %s13137_s15, %s15_s15  }
   0x2   : > { %p179_p1 = scmp.lt.s32.totalorder %s13109_s15, 3 }
   0x4   : > { %p180_p2 = pnand %p10402_p0, %p179_p1 }
   0x6   : > { %183 = sbr.rel (%p180_p2) target bundleno = 1810 (0x712), region = 32 }
   0xd   : > { %v13148_v0 = vld [vmem:[%s16221_s2] sm:$0xff]   ;;  %v13111_v1 = vmov 0   ;;  %s10403_s21 = sshll.u32 %s10398_s16, 8  ;;  %v13160_v3 = vld [vmem:[%s16221_s2 + $0x8] sm:$0xff]   ;;  %v13174_v5 = vld [vmem:[%s16221_s2 + $0x90] sm:$0xff]  }
   0xe   : > { %2996 = vmatprep.subr.bf16.mxu0 %v13111_v1  ;;  %v13154_v2 = vld [vmem:[%s16221_s2 + $0x80] sm:$0xff]   ;;  %p218_p3 = scmp.lt.s32.totalorder %s10403_s21, 511  ;;  %v13167_v4 = vld [vmem:[%s16221_s2 + $0x88] sm:$0xff]   ;;  %v13182_v6 = vld [vmem:[%s16221_s2 + $0x10] sm:$0xff]  }
   0xf   : > { %2997 = vmatpush1.bf16.msra.mxu0 %v13148_v0  ;;  %11477 = vmatprep.subr.bf16.mxu1 %v13154_v2  ;;  %v13190_v7 = vld [vmem:[%s16221_s2 + $0x98] sm:$0xff]   ;;  %v13205_v9 = vld [vmem:[%s16221_s2 + $0xa0] sm:$0xff]   ;;  %v13227_v12 = vld [vmem:[%s16221_s2 + $0xa8] sm:$0xff]  }
  0x10   : > { %2998 = vmatprep.subr.bf16.mxu0 %v13111_v1  ;;  %11478 = vmatpush3.bf16.msra.mxu1 %v13154_v2  ;;  %s16645_s21 = smov (!%p218_p3, %s10403_s21), 511  ;;  %v13197_v8 = vld [vmem:[%s16221_s2 + $0x18] sm:$0xff]   ;;  %v13218_v10 = vld [vmem:[%s16221_s2 + $0x20] sm:$0xff]   ;;  %v13233_v13 = vld [vmem:[%s16221_s2 + $0x28] sm:$0xff]  }
  0x11   : > { %11479 = vmatprep.subr.bf16.mxu1 %v13167_v4  ;;  %s12037_s6 = smul.u32 12, %s16645_s21  ;;  %v13241_v14 = vld [vmem:[%s16221_s2 + $0xb0] sm:$0xff]   ;;  %v13255_v16 = vld [vmem:[%s16221_s2 + $0xb8] sm:$0xff]   ;;  %v13270_v18 = vld [vmem:[%s16221_s2 + $0x40] sm:$0xff]   ;;  %s10408_s24 = sshll.u32 %s16645_s21, 3 }
  0x12   : > { %v13247_v15 = vld [vmem:[%s16221_s2 + $0x30] sm:$0xff]   ;;  %v13261_v17 = vld [vmem:[%s16221_s2 + $0x38] sm:$0xff]   ;;  %v13282_v22 = vld [vmem:[%s16221_s2 + $0x48] sm:$0xff]   ;;  %s13524_s27 = scalar_lea.vmem %s16222_s3, %s10408_s24  ;;  %s15336_s26 = scalar_lea.vmem %s16223_s4, %s10408_s24 }
  0x13   : > { %2999 = vmatpush1.bf16.msra.mxu0 %v13160_v3  ;;  %s13212_s13 = scalar_lea.vmem %s16219_s0, %s12037_s6  ;;  %v13291_v23 = vld [vmem:[%s16221_s2 + $0x50] sm:$0xff]   ;;  %v13302_v26 = vld [vmem:[%s16221_s2 + $0x58] sm:$0xff]   ;;  %v13311_v27 = vld [vmem:[%s16221_s2 + $0x60] sm:$0xff]   ;;  %s13811_s30 = scalar_lea.vmem %s16220_s1, %s12037_s6 }
  0x14   : > { %3000 = vmatprep.subr.bf16.mxu0 %v13111_v1  ;;  %11480 = vmatpush3.bf16.msra.mxu1 %v13167_v4  ;;  %v12063_v11 = vld [vmem:[%s13212_s13 + $0x8] ss:$12 sps:$4 sm:$0xff]   ;;  %v12065_v19 = vld [vmem:[%s13212_s13 + $0x20] ss:$12 sps:$4 sm:$0xff]   ;;  %v12067_v20 = vld [vmem:[%s13212_s13 + $0x38] ss:$12 sps:$4 sm:$0xff]  }
  0x15   : > { %11481 = vmatprep.subr.bf16.mxu1 %v13174_v5  ;;  %11493 = vmatprep.mubr.bf16.mxu1 %v12063_v11  ;;  %v12081_v21 = vld [vmem:[%s13212_s13 + $0x4] ss:$12 sps:$4 sm:$0xff]   ;;  %v12071_v25 = vld [vmem:[%s13212_s13 + $0x68] ss:$12 sps:$4 sm:$0xff]   ;;  %v12073_v28 = vld [vmem:[%s13212_s13 + $0x80] ss:$12 sps:$4 sm:$0xff]  }
  0x16   : > { %3028 = vmatprep.mubr.bf16.mxu0 %v12081_v21  ;;  %v12069_v24 = vld [vmem:[%s13212_s13 + $0x50] ss:$12 sps:$4 sm:$0xff]   ;;  %v12075_v29 = vld [vmem:[%s13212_s13 + $0x98] ss:$12 sps:$4 sm:$0xff]   ;;  %v13322_v30 = vld [vmem:[%s16221_s2 + $0x68] sm:$0xff]  }
  0x17   : > { %3001 = vmatpush1.bf16.msra.mxu0 %v13182_v6  ;;  %v13331_v31 = vld [vmem:[%s16221_s2 + $0x70] sm:$0xff]   ;;  %v13342_v34 = vld [vmem:[%s16221_s2 + $0x78] sm:$0xff]   ;;  %v12079_v35 = vld [vmem:[%s13212_s13] ss:$12 sps:$4 sm:$0xff]  }
  0x18   : > { %3002 = vmatprep.subr.bf16.mxu0 %v13111_v1  ;;  %11482 = vmatpush3.bf16.msra.mxu1 %v13174_v5  ;;  %v12077_v32 = vld [vmem:[%s13212_s13 + $0xb0] ss:$12 sps:$4 sm:$0xff]   ;;  %v12082_v33 = vld [vmem:[%s13212_s13 + $0xc8] ss:$12 sps:$4 sm:$0xff]   ;;  %v12083_v37 = vld [vmem:[%s13212_s13 + $0xe0] ss:$12 sps:$4 sm:$0xff]  }
  0x19   : > { %11483 = vmatprep.subr.bf16.mxu1 %v13190_v7  ;;  %v12084_v36 = vld [vmem:[%s13212_s13 + $0x1c] ss:$12 sps:$4 sm:$0xff]   ;;  %v12087_v38 = vld [vmem:[%s13212_s13 + $0xf8] ss:$12 sps:$4 sm:$0xff]   ;;  %v12089_v40 = vld [vmem:[%s13212_s13 + $0x34] ss:$12 sps:$4 sm:$0xff]  }
  0x1a   : > { %v12086_v39 = vld [vmem:[%s13212_s13 + $0x18] ss:$12 sps:$4 sm:$0xff]   ;;  %v12088_v41 = vld [vmem:[%s13212_s13 + $0x110] ss:$12 sps:$4 sm:$0xff]   ;;  %v12092_v42 = vld [vmem:[%s13212_s13 + $0x128] ss:$12 sps:$4 sm:$0xff]  }
  0x1b   : > { %3003 = vmatpush1.bf16.msra.mxu0 %v13197_v8  ;;  %v12091_v43 = vld [vmem:[%s13212_s13 + $0x30] ss:$12 sps:$4 sm:$0xff]   ;;  %v12094_v44 = vld [vmem:[%s13212_s13 + $0x4c] ss:$12 sps:$4 sm:$0xff]   ;;  %v12096_v47 = vld [vmem:[%s13212_s13 + $0x48] ss:$12 sps:$4 sm:$0xff]  }
  0x1c   : > { %3004 = vmatprep.subr.bf16.mxu0 %v13111_v1  ;;  %11484 = vmatpush3.bf16.msra.mxu1 %v13190_v7  ;;  %v12093_v45 = vld [vmem:[%s13212_s13 + $0x140] ss:$12 sps:$4 sm:$0xff]   ;;  %v12097_v46 = vld [vmem:[%s13212_s13 + $0x158] ss:$12 sps:$4 sm:$0xff]   ;;  %v12098_v49 = vld [vmem:[%s13212_s13 + $0x170] ss:$12 sps:$4 sm:$0xff]  }
  0x1d   : > { %11485 = vmatprep.subr.bf16.mxu1 %v13205_v9  ;;  %v12099_v48 = vld [vmem:[%s13212_s13 + $0x64] ss:$12 sps:$4 sm:$0xff]   ;;  %v12102_v50 = vld [vmem:[%s13212_s13 + $0x188] ss:$12 sps:$4 sm:$0xff]   ;;  %v12101_v51 = vld [vmem:[%s13212_s13 + $0x60] ss:$12 sps:$4 sm:$0xff]  }
  0x1e   : > { %v12104_v52 = vld [vmem:[%s13212_s13 + $0x7c] ss:$12 sps:$4 sm:$0xff]   ;;  %v12103_v53 = vld [vmem:[%s13212_s13 + $0x1a0] ss:$12 sps:$4 sm:$0xff]   ;;  %v12107_v54 = vld [vmem:[%s13212_s13 + $0x1b8] ss:$12 sps:$4 sm:$0xff]  }
  0x1f   : > { %3005 = vmatpush1.bf16.msra.mxu0 %v13218_v10  ;;  %v12106_v55 = vld [vmem:[%s13212_s13 + $0x78] ss:$12 sps:$4 sm:$0xff]   ;;  %v12109_v56 = vld [vmem:[%s13212_s13 + $0x94] ss:$12 sps:$4 sm:$0xff]   ;;  %v12108_v57 = vld [vmem:[%s13212_s13 + $0x1d0] ss:$12 sps:$4 sm:$0xff]  }
  0x20   : > { %3006 = vmatprep.subr.bf16.mxu0 %v13111_v1  ;;  %11486 = vmatpush3.bf16.msra.mxu1 %v13205_v9  ;;  %v12112_v58 = vld [vmem:[%s13212_s13 + $0x1e8] ss:$12 sps:$4 sm:$0xff]   ;;  %v12111_v59 = vld [vmem:[%s13212_s13 + $0x90] ss:$12 sps:$4 sm:$0xff]   ;;  %v12114_v60 = vld [vmem:[%s13212_s13 + $0xac] ss:$12 sps:$4 sm:$0xff]  }
  0x21   : > { %11487 = vmatprep.subr.bf16.mxu1 %v13227_v12  ;;  %v12113_v61 = vld [vmem:[%s13212_s13 + $0x200] ss:$12 sps:$4 sm:$0xff]   ;;  %v12117_v62 = vld [vmem:[%s13212_s13 + $0x218] ss:$12 sps:$4 sm:$0xff]   ;;  %v12116_v63 = vld [vmem:[%s13212_s13 + $0xa8] ss:$12 sps:$4 sm:$0xff]  }
  0x22   : > { %v12131_v11 = vld [vmem:[%s13212_s13 + $0xf0] ss:$12 sps:$4 sm:$0xff]   ;;  %v12143_v21 = vld [vmem:[%s13212_s13 + $0x320] ss:$12 sps:$4 sm:$0xff]  }
  0x23   : > { %3007 = vmatpush1.bf16.msra.mxu0 %v13233_v13 }
  0x24   : > { %3008 = vmatprep.subr.bf16.mxu0 %v13111_v1  ;;  %11488 = vmatpush3.bf16.msra.mxu1 %v13227_v12 }
  0x25   : > { %11489 = vmatprep.subr.bf16.mxu1 %v13241_v14 }
  0x27   : > { %3009 = vmatpush1.bf16.msra.mxu0 %v13247_v15 }
  0x28   : > { %3010 = vmatprep.subr.bf16.mxu0 %v13111_v1  ;;  %11490 = vmatpush3.bf16.msra.mxu1 %v13241_v14 }
  0x29   : > { %11491 = vmatprep.subr.bf16.mxu1 %v13255_v16 }
  0x2b   : > { %3011 = vmatpush1.bf16.msra.mxu0 %v13261_v17 }
  0x2c   : > { %3012 = vmatprep.subr.bf16.mxu0 %v13111_v1  ;;  %11492 = vmatpush3.bf16.msra.mxu1 %v13255_v16 }
  0x2d   : > { %7926 = vmatprep.subr.bf16.mxu1 %v13111_v1 }
  0x2f   : > { %3013 = vmatpush1.bf16.msra.mxu0 %v13270_v18  ;;  %11494 = vmatmul.mubr.bf16.vlgmr.msra.gmra.mrb[0].mxu1 %v12065_v19  ;;  %v12141_v19 = vld [vmem:[%s13212_s13 + $0x120] ss:$12 sps:$4 sm:$0xff]  }
  0x30   : > { %3014 = vmatprep.subr.bf16.mxu0 %v13111_v1  ;;  %7927 = vmatpush1.bf16.msra.mxu1 %v13148_v0  ;;  %v12119_v0 = vld [vmem:[%s13212_s13 + $0xc4] ss:$12 sps:$4 sm:$0xff]  }
  0x31   : > { %11497 = vmatprep.mubr.bf16.mxu1 %v12067_v20  ;;  %7928 = vmatprep.subr.bf16.mxu1 %v13111_v1  ;;  %v12144_v20 = vld [vmem:[%s13212_s13 + $0x13c] ss:$12 sps:$4 sm:$0xff]  }
  0x33   : > { %3015 = vmatpush1.bf16.msra.mxu0 %v13282_v22 }
  0x34   : > { %3016 = vmatprep.subr.bf16.mxu0 %v13111_v1  ;;  %7929 = vmatpush1.bf16.msra.mxu1 %v13160_v3  ;;  %v12121_v3 = vld [vmem:[%s13212_s13 + $0xc0] ss:$12 sps:$4 sm:$0xff]  }
  0x35   : > { %7930 = vmatprep.subr.bf16.mxu1 %v13111_v1 }
  0x37   : > { %3017 = vmatpush1.bf16.msra.mxu0 %v13291_v23  ;;  %11498 = vmatmul.mubr.bf16.gmra.mrb[4].mxu1 %v12069_v24  ;;  %v12149_v24 = vld [vmem:[%s13212_s13 + $0x154] ss:$12 sps:$4 sm:$0xff]  }
  0x38   : > { %3018 = vmatprep.subr.bf16.mxu0 %v13111_v1  ;;  %11501 = vmatprep.mubr.bf16.mxu1 %v12071_v25  ;;  %v12148_v25 = vld [vmem:[%s13212_s13 + $0x350] ss:$12 sps:$4 sm:$0xff]  }
  0x39   : > { %7931 = vmatpush1.bf16.msra.mxu1 %v13182_v6  ;;  %v12127_v6 = vld [vmem:[%s13212_s13 + $0x278] ss:$12 sps:$4 sm:$0xff]  }
  0x3a   : > { %7932 = vmatprep.subr.bf16.mxu1 %v13111_v1 }
  0x3b   : > { %3019 = vmatpush1.bf16.msra.mxu0 %v13302_v26 }
  0x3c   : > { %3020 = vmatprep.subr.bf16.mxu0 %v13111_v1 }
  0x3d   : > { %7933 = vmatpush1.bf16.msra.mxu1 %v13197_v8  ;;  %v12129_v8 = vld [vmem:[%s13212_s13 + $0xf4] ss:$12 sps:$4 sm:$0xff]  }
  0x3e   : > { %7934 = vmatprep.subr.bf16.mxu1 %v13111_v1 }
  0x3f   : > { %3021 = vmatpush1.bf16.msra.mxu0 %v13311_v27  ;;  %11502 = vmatmul.mubr.bf16.gmra.mrb[8].mxu1 %v12073_v28  ;;  %v12154_v28 = vld [vmem:[%s13212_s13 + $0x16c] ss:$12 sps:$4 sm:$0xff]  }
  0x40   : > { %3022 = vmatprep.subr.bf16.mxu0 %v13111_v1  ;;  %11505 = vmatprep.mubr.bf16.mxu1 %v12075_v29  ;;  %v12153_v29 = vld [vmem:[%s13212_s13 + $0x380] ss:$12 sps:$4 sm:$0xff]  }
  0x41   : > { %7935 = vmatpush1.bf16.msra.mxu1 %v13218_v10  ;;  %v12132_v10 = vld [vmem:[%s13212_s13 + $0x2a8] ss:$12 sps:$4 sm:$0xff]  }
  0x42   : > { %7936 = vmatprep.subr.bf16.mxu1 %v13111_v1 }
  0x43   : > { %3023 = vmatpush1.bf16.msra.mxu0 %v13322_v30 }
  0x44   : > { %3024 = vmatprep.subr.bf16.mxu0 %v13111_v1 }
  0x45   : > { %7937 = vmatpush1.bf16.msra.mxu1 %v13233_v13  ;;  %v12133_v13 = vld [vmem:[%s13212_s13 + $0x2c0] ss:$12 sps:$4 sm:$0xff]  }
  0x46   : > { %7938 = vmatprep.subr.bf16.mxu1 %v13111_v1 }
  0x47   : > { %3025 = vmatpush1.bf16.msra.mxu0 %v13331_v31  ;;  %11506 = vmatmul.mubr.bf16.gmra.mrb[12].mxu1 %v12077_v32  ;;  %v12159_v32 = vld [vmem:[%s13212_s13 + $0x184] ss:$12 sps:$4 sm:$0xff]  }
  0x48   : > { %3026 = vmatprep.subr.bf16.mxu0 %v13111_v1  ;;  %11509 = vmatprep.mubr.bf16.mxu1 %v12082_v33  ;;  %v12158_v33 = vld [vmem:[%s13212_s13 + $0x3b0] ss:$12 sps:$4 sm:$0xff]  }
  0x49   : > { %7939 = vmatpush1.bf16.msra.mxu1 %v13247_v15  ;;  %v12136_v15 = vld [vmem:[%s13212_s13 + $0x108] ss:$12 sps:$4 sm:$0xff]  }
  0x4a   : > { %7940 = vmatprep.subr.bf16.mxu1 %v13111_v1 }
  0x4b   : > { %3027 = vmatpush1.bf16.msra.mxu0 %v13342_v34 }
  0x4c   : > { %11749 = vmatprep.subr.bf16.mxu0 %v13154_v2 }
  0x4d   : > { %7941 = vmatpush1.bf16.msra.mxu1 %v13261_v17  ;;  %v12138_v17 = vld [vmem:[%s13212_s13 + $0x2f0] ss:$12 sps:$4 sm:$0xff]  }
  0x4e   : > { %3029 = vmatmul.mubr.bf16.vlgmr.msra.gmra.mrb[0].mxu0 %v12079_v35  ;;  %7942 = vmatprep.subr.bf16.mxu1 %v13111_v1  ;;  %v12161_v35 = vld [vmem:[%s13212_s13 + $0x180] ss:$12 sps:$4 sm:$0xff]  }
  0x4f   : > { %11750 = vmatpush3.bf16.msra.mxu0 %v13154_v2  ;;  %3036 = vmatprep.mubr.bf16.mxu0 %v12084_v36  ;;  %v12164_v36 = vld [vmem:[%s13212_s13 + $0x19c] ss:$12 sps:$4 sm:$0xff]  }
  0x50   : > { %11510 = vmatmul.mubr.bf16.gmra.mrb[16].mxu1 %v12083_v37  ;;  %11751 = vmatprep.subr.bf16.mxu0 %v13167_v4  ;;  %v12163_v37 = vld [vmem:[%s13212_s13 + $0x3e0] ss:$12 sps:$4 sm:$0xff]  }
  0x51   : > { %11513 = vmatprep.mubr.bf16.mxu1 %v12087_v38  ;;  %7943 = vmatpush1.bf16.msra.mxu1 %v13270_v18  ;;  %v12142_v18 = vld [vmem:[%s13212_s13 + $0x308] ss:$12 sps:$4 sm:$0xff]   ;;  %v12167_v38 = vld [vmem:[%s13212_s13 + $0x3f8] ss:$12 sps:$4 sm:$0xff]  }
  0x52   : > { %7944 = vmatprep.subr.bf16.mxu1 %v13111_v1 }
  0x53   : > { %11752 = vmatpush3.bf16.msra.mxu0 %v13167_v4  ;;  %v12124_v4 = vld [vmem:[%s13212_s13 + $0xdc] ss:$12 sps:$4 sm:$0xff]  }
  0x54   : > { %11753 = vmatprep.subr.bf16.mxu0 %v13174_v5 }
  0x55   : > { %7945 = vmatpush1.bf16.msra.mxu1 %v13282_v22  ;;  %v12147_v22 = vld [vmem:[%s13212_s13 + $0x338] ss:$12 sps:$4 sm:$0xff]  }
  0x56   : > { %3037 = vmatmul.mubr.bf16.gmra.mrb[4].mxu0 %v12086_v39  ;;  %7946 = vmatprep.subr.bf16.mxu1 %v13111_v1  ;;  %v12166_v39 = vld [vmem:[%s13212_s13 + $0x198] ss:$12 sps:$4 sm:$0xff]  }
  0x57   : > { %3044 = vmatprep.mubr.bf16.mxu0 %v12089_v40  ;;  %11754 = vmatpush3.bf16.msra.mxu0 %v13174_v5  ;;  %v12123_v5 = vld [vmem:[%s13212_s13 + $0x260] ss:$12 sps:$4 sm:$0xff]  }
  0x58   : > { %11514 = vmatmul.mubr.bf16.gmra.mrb[20].mxu1 %v12088_v41  ;;  %11755 = vmatprep.subr.bf16.mxu0 %v13190_v7  ;;  %v12169_v40 = vld [vmem:[%s13212_s13 + $0x1b4] ss:$12 sps:$4 sm:$0xff]   ;;  %v12168_v41 = vld [vmem:[%s13212_s13 + $0x410] ss:$12 sps:$4 sm:$0xff]  }
  0x59   : > { %11517 = vmatprep.mubr.bf16.mxu1 %v12092_v42  ;;  %7947 = vmatpush1.bf16.msra.mxu1 %v13291_v23  ;;  %v12146_v23 = vld [vmem:[%s13212_s13 + $0x138] ss:$12 sps:$4 sm:$0xff]   ;;  %v12172_v42 = vld [vmem:[%s13212_s13 + $0x428] ss:$12 sps:$4 sm:$0xff]  }
  0x5a   : > { %7948 = vmatprep.subr.bf16.mxu1 %v13111_v1 }
  0x5b   : > { %11756 = vmatpush3.bf16.msra.mxu0 %v13190_v7  ;;  %v12126_v7 = vld [vmem:[%s13212_s13 + $0xd8] ss:$12 sps:$4 sm:$0xff]  }
  0x5c   : > { %11757 = vmatprep.subr.bf16.mxu0 %v13205_v9 }
  0x5d   : > { %7949 = vmatpush1.bf16.msra.mxu1 %v13302_v26  ;;  %v12152_v26 = vld [vmem:[%s13212_s13 + $0x368] ss:$12 sps:$4 sm:$0xff]  }
  0x5e   : > { %3045 = vmatmul.mubr.bf16.gmra.mrb[8].mxu0 %v12091_v43  ;;  %7950 = vmatprep.subr.bf16.mxu1 %v13111_v1  ;;  %v12171_v43 = vld [vmem:[%s13212_s13 + $0x1b0] ss:$12 sps:$4 sm:$0xff]  }
  0x5f   : > { %3052 = vmatprep.mubr.bf16.mxu0 %v12094_v44  ;;  %11758 = vmatpush3.bf16.msra.mxu0 %v13205_v9  ;;  %v12128_v9 = vld [vmem:[%s13212_s13 + $0x290] ss:$12 sps:$4 sm:$0xff]   ;;  %v12174_v44 = vld [vmem:[%s13212_s13 + $0x1cc] ss:$12 sps:$4 sm:$0xff]  }
  0x60   : > { %11518 = vmatmul.mubr.bf16.gmra.mrb[24].mxu1 %v12093_v45  ;;  %11759 = vmatprep.subr.bf16.mxu0 %v13227_v12  ;;  %v12173_v45 = vld [vmem:[%s13212_s13 + $0x440] ss:$12 sps:$4 sm:$0xff]  }
  0x61   : > { %11521 = vmatprep.mubr.bf16.mxu1 %v12097_v46  ;;  %7951 = vmatpush1.bf16.msra.mxu1 %v13311_v27  ;;  %v12151_v27 = vld [vmem:[%s13212_s13 + $0x150] ss:$12 sps:$4 sm:$0xff]   ;;  %v12177_v46 = vld [vmem:[%s13212_s13 + $0x458] ss:$12 sps:$4 sm:$0xff]  }
  0x62   : > { %7952 = vmatprep.subr.bf16.mxu1 %v13111_v1 }
  0x63   : > { %11760 = vmatpush3.bf16.msra.mxu0 %v13227_v12  ;;  %v12134_v12 = vld [vmem:[%s13212_s13 + $0x10c] ss:$12 sps:$4 sm:$0xff]  }
  0x64   : > { %11761 = vmatprep.subr.bf16.mxu0 %v13241_v14 }
  0x65   : > { %7953 = vmatpush1.bf16.msra.mxu1 %v13322_v30  ;;  %v12157_v30 = vld [vmem:[%s13212_s13 + $0x398] ss:$12 sps:$4 sm:$0xff]  }
  0x66   : > { %3053 = vmatmul.mubr.bf16.gmra.mrb[12].mxu0 %v12096_v47  ;;  %7954 = vmatprep.subr.bf16.mxu1 %v13111_v1  ;;  %v12176_v47 = vld [vmem:[%s13212_s13 + $0x1c8] ss:$12 sps:$4 sm:$0xff]  }
  0x67   : > { %3060 = vmatprep.mubr.bf16.mxu0 %v12099_v48  ;;  %11762 = vmatpush3.bf16.msra.mxu0 %v13241_v14  ;;  %v12137_v14 = vld [vmem:[%s13212_s13 + $0x2d8] ss:$12 sps:$4 sm:$0xff]  }
  0x68   : > { %11522 = vmatmul.mubr.bf16.gmra.mrb[28].mxu1 %v12098_v49  ;;  %11763 = vmatprep.subr.bf16.mxu0 %v13255_v16  ;;  %v12179_v48 = vld [vmem:[%s13212_s13 + $0x1e4] ss:$12 sps:$4 sm:$0xff]  }
  0x69   : > { %11525 = vmatprep.mubr.bf16.mxu1 %v12102_v50  ;;  %7955 = vmatpush1.bf16.msra.mxu1 %v13331_v31  ;;  %v12156_v31 = vld [vmem:[%s13212_s13 + $0x168] ss:$12 sps:$4 sm:$0xff]   ;;  %v12178_v49 = vld [vmem:[%s13212_s13 + $0x470] ss:$12 sps:$4 sm:$0xff]  }
  0x6a   : > { %7956 = vmatprep.subr.bf16.mxu1 %v13111_v1  ;;  %v12118_v1 = vld [vmem:[%s13212_s13 + $0x230] ss:$12 sps:$4 sm:$0xff]   ;;  %v12182_v50 = vld [vmem:[%s13212_s13 + $0x488] ss:$12 sps:$4 sm:$0xff]  }
  0x6b   : > { %11764 = vmatpush3.bf16.msra.mxu0 %v13255_v16  ;;  %v12139_v16 = vld [vmem:[%s13212_s13 + $0x124] ss:$12 sps:$4 sm:$0xff]  }
  0x6d   : > { %7957 = vmatpush1.bf16.msra.mxu1 %v13342_v34  ;;  %v12162_v34 = vld [vmem:[%s13212_s13 + $0x3c8] ss:$12 sps:$4 sm:$0xff]  }
  0x6e   : > { %3061 = vmatmul.mubr.bf16.gmra.mrb[16].mxu0 %v12101_v51  ;;  %12021 = vmatprep.subr.bf16.mxu1 %v13154_v2  ;;  %v12122_v2 = vld [vmem:[%s13212_s13 + $0x248] ss:$12 sps:$4 sm:$0xff]   ;;  %v12181_v51 = vld [vmem:[%s13212_s13 + $0x1e0] ss:$12 sps:$4 sm:$0xff]  }
  0x6f   : > { %3068 = vmatprep.mubr.bf16.mxu0 %v12104_v52  ;;  %v12184_v52 = vld [vmem:[%s13212_s13 + $0x1fc] ss:$12 sps:$4 sm:$0xff]  }
  0x70   : > { %11526 = vmatmul.mubr.bf16.gmra.mrb[32].mxu1 %v12103_v53  ;;  %v12183_v53 = vld [vmem:[%s13212_s13 + $0x4a0] ss:$12 sps:$4 sm:$0xff]  }
  0x71   : > { %11529 = vmatprep.mubr.bf16.mxu1 %v12107_v54  ;;  %v12187_v54 = vld [vmem:[%s13212_s13 + $0x4b8] ss:$12 sps:$4 sm:$0xff]  }
  0x76   : > { %3069 = vmatmul.mubr.bf16.gmra.mrb[20].mxu0 %v12106_v55  ;;  %v12186_v55 = vld [vmem:[%s13212_s13 + $0x1f8] ss:$12 sps:$4 sm:$0xff]  }
  0x77   : > { %3076 = vmatprep.mubr.bf16.mxu0 %v12109_v56  ;;  %v12189_v56 = vld [vmem:[%s13212_s13 + $0x214] ss:$12 sps:$4 sm:$0xff]  }
  0x78   : > { %11530 = vmatmul.mubr.bf16.gmra.mrb[36].mxu1 %v12108_v57  ;;  %v12188_v57 = vld [vmem:[%s13212_s13 + $0x4d0] ss:$12 sps:$4 sm:$0xff]  }
  0x79   : > { %11533 = vmatprep.mubr.bf16.mxu1 %v12112_v58  ;;  %v12192_v58 = vld [vmem:[%s13212_s13 + $0x4e8] ss:$12 sps:$4 sm:$0xff]  }
  0x7e   : > { %3077 = vmatmul.mubr.bf16.gmra.mrb[24].mxu0 %v12111_v59  ;;  %v12191_v59 = vld [vmem:[%s13212_s13 + $0x210] ss:$12 sps:$4 sm:$0xff]  }
  0x7f   : > { %3084 = vmatprep.mubr.bf16.mxu0 %v12114_v60  ;;  %v12194_v60 = vld [vmem:[%s13212_s13 + $0x22c] ss:$12 sps:$4 sm:$0xff]  }
  0x80   : > { %11534 = vmatmul.mubr.bf16.gmra.mrb[40].mxu1 %v12113_v61  ;;  %v12193_v61 = vld [vmem:[%s13212_s13 + $0x500] ss:$12 sps:$4 sm:$0xff]  }
  0x81   : > { %11537 = vmatprep.mubr.bf16.mxu1 %v12117_v62  ;;  %v12197_v62 = vld [vmem:[%s13212_s13 + $0x518] ss:$12 sps:$4 sm:$0xff]  }
  0x86   : > { %3085 = vmatmul.mubr.bf16.gmra.mrb[28].mxu0 %v12116_v63  ;;  %v12196_v63 = vld [vmem:[%s13212_s13 + $0x228] ss:$12 sps:$4 sm:$0xff]  }
  0x87   : > { %3092 = vmatprep.mubr.bf16.mxu0 %v12119_v0  ;;  %v12199_v0 = vld [vmem:[%s13212_s13 + $0x244] ss:$12 sps:$4 sm:$0xff]  }
  0x88   : > { %11538 = vmatmul.mubr.bf16.gmra.mrb[44].mxu1 %v12118_v1 }
  0x89   : > { %11541 = vmatprep.mubr.bf16.mxu1 %v12122_v2 }
  0x8e   : > { %3093 = vmatmul.mubr.bf16.gmra.mrb[32].mxu0 %v12121_v3  ;;  %v12198_v3 = vld [vmem:[%s13212_s13 + $0x530] ss:$12 sps:$4 sm:$0xff]  }
  0x8f   : > { %3100 = vmatprep.mubr.bf16.mxu0 %v12124_v4 }
  0x90   : > { %11542 = vmatmul.mubr.bf16.gmra.mrb[48].mxu1 %v12123_v5  ;;  %v12202_v5 = vld [vmem:[%s13212_s13 + $0x548] ss:$12 sps:$4 sm:$0xff]  }
  0x91   : > { %11545 = vmatprep.mubr.bf16.mxu1 %v12127_v6 }
  0x96   : > { %3101 = vmatmul.mubr.bf16.gmra.mrb[36].mxu0 %v12126_v7  ;;  %v12201_v7 = vld [vmem:[%s13212_s13 + $0x240] ss:$12 sps:$4 sm:$0xff]  }
  0x97   : > { %3108 = vmatprep.mubr.bf16.mxu0 %v12129_v8 }
  0x98   : > { %11546 = vmatmul.mubr.bf16.gmra.mrb[52].mxu1 %v12128_v9  ;;  %v12204_v9 = vld [vmem:[%s13212_s13 + $0x25c] ss:$12 sps:$4 sm:$0xff]  }
  0x99   : > { %11549 = vmatprep.mubr.bf16.mxu1 %v12132_v10 }
  0x9e   : > { %3109 = vmatmul.mubr.bf16.gmra.mrb[40].mxu0 %v12131_v11  ;;  %v12203_v11 = vld [vmem:[%s13212_s13 + $0x560] ss:$12 sps:$4 sm:$0xff]  }
  0x9f   : > { %3116 = vmatprep.mubr.bf16.mxu0 %v12134_v12 }
  0xa0   : > { %11550 = vmatmul.mubr.bf16.gmra.mrb[56].mxu1 %v12133_v13  ;;  %v12207_v13 = vld [vmem:[%s13212_s13 + $0x578] ss:$12 sps:$4 sm:$0xff]  }
  0xa1   : > { %11553 = vmatprep.mubr.bf16.mxu1 %v12137_v14 }
  0xa6   : > { %3117 = vmatmul.mubr.bf16.gmra.mrb[44].mxu0 %v12136_v15  ;;  %v12206_v15 = vld [vmem:[%s13212_s13 + $0x258] ss:$12 sps:$4 sm:$0xff]  }
  0xa7   : > { %3124 = vmatprep.mubr.bf16.mxu0 %v12139_v16 }
  0xa8   : > { %11554 = vmatmul.mubr.bf16.gmra.mrb[60].mxu1 %v12138_v17  ;;  %v12209_v17 = vld [vmem:[%s13212_s13 + $0x274] ss:$12 sps:$4 sm:$0xff]  }
  0xa9   : > { %11557 = vmatprep.mubr.bf16.mxu1 %v12142_v18 }
  0xae   : > { %3125 = vmatmul.mubr.bf16.gmra.mrb[48].mxu0 %v12141_v19  ;;  %v12208_v19 = vld [vmem:[%s13212_s13 + $0x590] ss:$12 sps:$4 sm:$0xff]  }
  0xaf   : > { %3132 = vmatprep.mubr.bf16.mxu0 %v12144_v20 }
  0xb0   : > { %11558 = vmatmul.mubr.bf16.gmra.mrb[64].mxu1 %v12143_v21  ;;  %v12212_v21 = vld [vmem:[%s13212_s13 + $0x5a8] ss:$12 sps:$4 sm:$0xff]  }
  0xb1   : > { %11561 = vmatprep.mubr.bf16.mxu1 %v12147_v22 }
  0xb6   : > { %3133 = vmatmul.mubr.bf16.gmra.mrb[52].mxu0 %v12146_v23  ;;  %v12211_v23 = vld [vmem:[%s13212_s13 + $0x270] ss:$12 sps:$4 sm:$0xff]  }
  0xb7   : > { %3140 = vmatprep.mubr.bf16.mxu0 %v12149_v24 }
  0xb8   : > { %11562 = vmatmul.mubr.bf16.gmra.mrb[68].mxu1 %v12148_v25  ;;  %v12214_v25 = vld [vmem:[%s13212_s13 + $0x28c] ss:$12 sps:$4 sm:$0xff]  }
  0xb9   : > { %11565 = vmatprep.mubr.bf16.mxu1 %v12152_v26 }
  0xbe   : > { %3141 = vmatmul.mubr.bf16.gmra.mrb[56].mxu0 %v12151_v27  ;;  %v12213_v27 = vld [vmem:[%s13212_s13 + $0x5c0] ss:$12 sps:$4 sm:$0xff]  }
  0xbf   : > { %3148 = vmatprep.mubr.bf16.mxu0 %v12154_v28 }
  0xc0   : > { %11566 = vmatmul.mubr.bf16.gmra.mrb[72].mxu1 %v12153_v29  ;;  %v12217_v29 = vld [vmem:[%s13212_s13 + $0x5d8] ss:$12 sps:$4 sm:$0xff]  }
  0xc1   : > { %11569 = vmatprep.mubr.bf16.mxu1 %v12157_v30 }
  0xc6   : > { %3149 = vmatmul.mubr.bf16.gmra.mrb[60].mxu0 %v12156_v31 }
  0xc7   : > { %3156 = vmatprep.mubr.bf16.mxu0 %v12159_v32 }
  0xc8   : > { %11570 = vmatmul.mubr.bf16.gmra.mrb[76].mxu1 %v12158_v33 }
  0xc9   : > { %11573 = vmatprep.mubr.bf16.mxu1 %v12162_v34  ;;  %v12216_v34 = vld [vmem:[%s13212_s13 + $0x288] ss:$12 sps:$4 sm:$0xff]  }
  0xce   : > { %3157 = vmatmul.mubr.bf16.gmra.mrb[64].mxu0 %v12161_v35 }
  0xcf   : > { %3164 = vmatprep.mubr.bf16.mxu0 %v12164_v36 }
  0xd0   : > { %11574 = vmatmul.mubr.bf16.gmra.mrb[80].mxu1 %v12163_v37  ;;  %v12219_v37 = vld [vmem:[%s13212_s13 + $0x2a4] ss:$12 sps:$4 sm:$0xff]  }
  0xd1   : > { %11577 = vmatprep.mubr.bf16.mxu1 %v12167_v38 }
  0xd6   : > { %3165 = vmatmul.mubr.bf16.gmra.mrb[68].mxu0 %v12166_v39 }
  0xd7   : > { %3172 = vmatprep.mubr.bf16.mxu0 %v12169_v40 }
  0xd8   : > { %11578 = vmatmul.mubr.bf16.gmra.mrb[84].mxu1 %v12168_v41  ;;  %v12218_v41 = vld [vmem:[%s13212_s13 + $0x5f0] ss:$12 sps:$4 sm:$0xff]  }
  0xd9   : > { %11581 = vmatprep.mubr.bf16.mxu1 %v12172_v42 }
  0xde   : > { %3173 = vmatmul.mubr.bf16.gmra.mrb[72].mxu0 %v12171_v43  ;;  %v12222_v43 = vld [vmem:[%s13212_s13 + $0x608] ss:$12 sps:$4 sm:$0xff]  }
  0xdf   : > { %3180 = vmatprep.mubr.bf16.mxu0 %v12174_v44 }
  0xe0   : > { %11582 = vmatmul.mubr.bf16.gmra.mrb[88].mxu1 %v12173_v45 }
  0xe1   : > { %11585 = vmatprep.mubr.bf16.mxu1 %v12177_v46 }
  0xe6   : > { %3181 = vmatmul.mubr.bf16.gmra.mrb[76].mxu0 %v12176_v47 }
  0xe7   : > { %3188 = vmatprep.mubr.bf16.mxu0 %v12179_v48  ;;  %v12221_v48 = vld [vmem:[%s13212_s13 + $0x2a0] ss:$12 sps:$4 sm:$0xff]  }
  0xe8   : > { %11586 = vmatmul.mubr.bf16.gmra.mrb[92].mxu1 %v12178_v49 }
  0xe9   : > { %11589 = vmatprep.mubr.bf16.mxu1 %v12182_v50 }
  0xee   : > { %3189 = vmatmul.mubr.bf16.gmra.mrb[80].mxu0 %v12181_v51  ;;  %v12224_v51 = vld [vmem:[%s13212_s13 + $0x2bc] ss:$12 sps:$4 sm:$0xff]  }
  0xef   : > { %3196 = vmatprep.mubr.bf16.mxu0 %v12184_v52 }
  0xf0   : > { %11590 = vmatmul.mubr.bf16.gmra.mrb[96].mxu1 %v12183_v53 }
  0xf1   : > { %11593 = vmatprep.mubr.bf16.mxu1 %v12187_v54 }
  0xf6   : > { %3197 = vmatmul.mubr.bf16.gmra.mrb[84].mxu0 %v12186_v55  ;;  %v12223_v55 = vld [vmem:[%s13212_s13 + $0x620] ss:$12 sps:$4 sm:$0xff]  }
  0xf7   : > { %3204 = vmatprep.mubr.bf16.mxu0 %v12189_v56 }
  0xf8   : > { %11594 = vmatmul.mubr.bf16.gmra.mrb[100].mxu1 %v12188_v57  ;;  %v12227_v57 = vld [vmem:[%s13212_s13 + $0x638] ss:$12 sps:$4 sm:$0xff]  }
  0xf9   : > { %11597 = vmatprep.mubr.bf16.mxu1 %v12192_v58 }
  0xfe   : > { %3205 = vmatmul.mubr.bf16.gmra.mrb[88].mxu0 %v12191_v59 }
  0xff   : > { %3212 = vmatprep.mubr.bf16.mxu0 %v12194_v60 }
 0x100   : > { %11598 = vmatmul.mubr.bf16.gmra.mrb[104].mxu1 %v12193_v61 }
 0x101   : > { %11601 = vmatprep.mubr.bf16.mxu1 %v12197_v62  ;;  %v12226_v62 = vld [vmem:[%s13212_s13 + $0x2b8] ss:$12 sps:$4 sm:$0xff]  }
 0x102   : > { %v13476_v1 = vpop.f32.mrb[0].mxu1 }
 0x103   : > { %v4087_v2 = vpop.f32.mrb[1].mxu1 }
 0x104   : > { %v13479_v4 = vpop.f32.mrb[2].mxu1 }
 0x105   : > { %v4090_v6 = vpop.f32.mrb[3].mxu1 }
 0x106   : > { %3213 = vmatmul.mubr.bf16.gmra.mrb[92].mxu0 %v12196_v63 }
 0x107   : > { %3220 = vmatprep.mubr.bf16.mxu0 %v12199_v0 }
 0x108   : > { %11602 = vmatmul.mubr.bf16.gmra.mrb[108].mxu1 %v12198_v3 }
 0x109   : > { %11605 = vmatprep.mubr.bf16.mxu1 %v12202_v5  ;;  %v12228_v5 = vld [vmem:[%s13212_s13 + $0x650] ss:$12 sps:$4 sm:$0xff]  }
 0x10a   : > { %v13483_v8 = vpop.f32.mrb[4].mxu1 }
 0x10b   : > { %v13486_v10 = vpop.f32.mrb[5].mxu1 }
 0x10c   : > { %v13489_v12 = vpop.f32.mrb[6].mxu1 }
 0x10d   : > { %v13492_v14 = vpop.f32.mrb[7].mxu1 }
 0x10e   : > { %3221 = vmatmul.mubr.bf16.gmra.mrb[96].mxu0 %v12201_v7  ;;  %v12232_v7 = vld [vmem:[%s13212_s13 + $0x668] ss:$12 sps:$4 sm:$0xff]  }
 0x10f   : > { %3228 = vmatprep.mubr.bf16.mxu0 %v12204_v9 }
 0x110   : > { %11606 = vmatmul.mubr.bf16.gmra.mrb[112].mxu1 %v12203_v11 }
 0x111   : > { %11609 = vmatprep.mubr.bf16.mxu1 %v12207_v13 }
 0x112   : > { %v13495_v16 = vpop.f32.mrb[8].mxu1 }
 0x113   : > { %v13498_v18 = vpop.f32.mrb[9].mxu1 }
 0x114   : > { %v13501_v20 = vpop.f32.mrb[10].mxu1 }
 0x115   : > { %v13504_v22 = vpop.f32.mrb[11].mxu1 }
 0x116   : > { %3229 = vmatmul.mubr.bf16.gmra.mrb[100].mxu0 %v12206_v15 }
 0x117   : > { %3236 = vmatprep.mubr.bf16.mxu0 %v12209_v17 }
 0x118   : > { %11610 = vmatmul.mubr.bf16.gmra.mrb[116].mxu1 %v12208_v19  ;;  %v12234_v19 = vld [vmem:[%s13212_s13 + $0x2ec] ss:$12 sps:$4 sm:$0xff]  }
 0x119   : > { %11613 = vmatprep.mubr.bf16.mxu1 %v12212_v21 }
 0x11a   : > { %v13507_v24 = vpop.f32.mrb[12].mxu1 }
 0x11b   : > { %v13510_v26 = vpop.f32.mrb[13].mxu1 }
 0x11c   : > { %v13513_v28 = vpop.f32.mrb[14].mxu1 }
 0x11d   : > { %v13516_v30 = vpop.f32.mrb[15].mxu1 }
 0x11e   : > { %3237 = vmatmul.mubr.bf16.gmra.mrb[104].mxu0 %v12211_v23 }
 0x11f   : > { %3244 = vmatprep.mubr.bf16.mxu0 %v12214_v25 }
 0x120   : > { %11614 = vmatmul.mubr.bf16.gmra.mrb[120].mxu1 %v12213_v27  ;;  %v12233_v27 = vld [vmem:[%s13212_s13 + $0x680] ss:$12 sps:$4 sm:$0xff]  }
 0x121   : > { %v3030_v31 = vpop.f32.mrb[0].mxu0  ;;  %11617 = vmatprep.mubr.bf16.mxu1 %v12217_v29 }
 0x122   : > { %v4088_v32 = vadd.f32 %v4087_v2, %v3030_v31  ;;  %v3032_v33 = vpop.f32.mrb[1].mxu0  ;;  %v12237_v31 = vld [vmem:[%s13212_s13 + $0x698] ss:$12 sps:$4 sm:$0xff]  }
 0x123   : > { %v13527_v35 = vpop.f32.mrb[16].mxu1  ;;  %v3033_v36 = vpop.f32.mrb[2].mxu0 }
 0x124   : > { %5110 = vst [vmem:[%s13524_s27] sm:$0xff] %v4088_v32  ;;  %v4091_v38 = vadd.f32 %v4090_v6, %v3033_v36  ;;  %v13531_v39 = vpop.f32.mrb[17].mxu1  ;;  %v3035_v40 = vpop.f32.mrb[3].mxu0 }
 0x125   : > { %v13534_v42 = vpop.f32.mrb[18].mxu1 }
 0x126   : > { %5111 = vst [vmem:[%s13524_s27 + $0x8] sm:$0xff] %v4091_v38  ;;  %v13538_v44 = vpop.f32.mrb[19].mxu1  ;;  %3245 = vmatmul.mubr.bf16.gmra.mrb[108].mxu0 %v12216_v34  ;;  %v12236_v34 = vld [vmem:[%s13212_s13 + $0x2e8] ss:$12 sps:$4 sm:$0xff]   ;;  %v12239_v38 = vld [vmem:[%s13212_s13 + $0x304] ss:$12 sps:$4 sm:$0xff]  }
 0x127   : > { %3252 = vmatprep.mubr.bf16.mxu0 %v12219_v37 }
 0x128   : > { %11618 = vmatmul.mubr.bf16.gmra.mrb[124].mxu1 %v12218_v41 }
 0x129   : > { %v3038_v45 = vpop.f32.mrb[4].mxu0  ;;  %11621 = vmatprep.mubr.bf16.mxu1 %v12222_v43 }
 0x12a   : > { %v4096_v46 = vadd.f32 %v13476_v1, %v3038_v45  ;;  %v3040_v47 = vpop.f32.mrb[5].mxu0  ;;  %v12229_v1 = vld [vmem:[%s13212_s13 + $0x2d4] ss:$12 sps:$4 sm:$0xff]   ;;  %v12238_v45 = vld [vmem:[%s13212_s13 + $0x6b0] ss:$12 sps:$4 sm:$0xff]  }
 0x12b   : > { %v13542_v49 = vpop.f32.mrb[20].mxu1  ;;  %v3041_v50 = vpop.f32.mrb[6].mxu0  ;;  %v12242_v47 = vld [vmem:[%s13212_s13 + $0x6c8] ss:$12 sps:$4 sm:$0xff]  }
 0x12c   : > { %5112 = vst [vmem:[%s13524_s27 + $0x10] sm:$0xff] %v4096_v46  ;;  %v4099_v52 = vadd.f32 %v13479_v4, %v3041_v50  ;;  %v13547_v53 = vpop.f32.mrb[21].mxu1  ;;  %v3043_v54 = vpop.f32.mrb[7].mxu0 }
 0x12d   : > { %v13550_v56 = vpop.f32.mrb[22].mxu1 }
 0x12e   : > { %5113 = vst [vmem:[%s13524_s27 + $0x18] sm:$0xff] %v4099_v52  ;;  %v13554_v58 = vpop.f32.mrb[23].mxu1  ;;  %3253 = vmatmul.mubr.bf16.gmra.mrb[112].mxu0 %v12221_v48 }
 0x12f   : > { %3260 = vmatprep.mubr.bf16.mxu0 %v12224_v51  ;;  %v12241_v51 = vld [vmem:[%s13212_s13 + $0x300] ss:$12 sps:$4 sm:$0xff]  }
 0x130   : > { %11622 = vmatmul.mubr.bf16.gmra.mrb[128].mxu1 %v12223_v55  ;;  %v12244_v55 = vld [vmem:[%s13212_s13 + $0x31c] ss:$12 sps:$4 sm:$0xff]  }
 0x131   : > { %v3046_v59 = vpop.f32.mrb[8].mxu0  ;;  %11625 = vmatprep.mubr.bf16.mxu1 %v12227_v57 }
 0x132   : > { %v4104_v60 = vadd.f32 %v13486_v10, %v3046_v59  ;;  %v3048_v61 = vpop.f32.mrb[9].mxu0 }
 0x133   : > { %v13558_v63 = vpop.f32.mrb[24].mxu1  ;;  %v3049_v0 = vpop.f32.mrb[10].mxu0  ;;  %v12243_v61 = vld [vmem:[%s13212_s13 + $0x6e0] ss:$12 sps:$4 sm:$0xff]  }
 0x134   : > { %5114 = vst [vmem:[%s13524_s27 + $0x20] sm:$0xff] %v4104_v60  ;;  %v4107_v2 = vadd.f32 %v13492_v14, %v3049_v0  ;;  %v13563_v3 = vpop.f32.mrb[25].mxu1  ;;  %v3051_v4 = vpop.f32.mrb[11].mxu0  ;;  %v12231_v14 = vld [vmem:[%s13212_s13 + $0x2d0] ss:$12 sps:$4 sm:$0xff]  }
 0x135   : > { %v13566_v6 = vpop.f32.mrb[26].mxu1  ;;  %v12247_v0 = vld [vmem:[%s13212_s13 + $0x6f8] ss:$12 sps:$4 sm:$0xff]  }
 0x136   : > { %5115 = vst [vmem:[%s13524_s27 + $0x28] sm:$0xff] %v4107_v2  ;;  %v13570_v9 = vpop.f32.mrb[27].mxu1  ;;  %3261 = vmatmul.mubr.bf16.gmra.mrb[116].mxu0 %v12226_v62  ;;  %v12246_v4 = vld [vmem:[%s13212_s13 + $0x318] ss:$12 sps:$4 sm:$0xff]  }
 0x137   : > { %3268 = vmatprep.mubr.bf16.mxu0 %v12229_v1 }
 0x138   : > { %11626 = vmatmul.mubr.bf16.gmra.mrb[132].mxu1 %v12228_v5 }
 0x139   : > { %v3054_v10 = vpop.f32.mrb[12].mxu0  ;;  %11629 = vmatprep.mubr.bf16.mxu1 %v12232_v7 }
 0x13a   : > { %v4112_v11 = vadd.f32 %v13483_v8, %v3054_v10  ;;  %v3056_v13 = vpop.f32.mrb[13].mxu0  ;;  %v12249_v10 = vld [vmem:[%s13212_s13 + $0x334] ss:$12 sps:$4 sm:$0xff]  }
 0x13b   : > { %v13574_v15 = vpop.f32.mrb[28].mxu1  ;;  %v3057_v17 = vpop.f32.mrb[14].mxu0 }
 0x13c   : > { %5116 = vst [vmem:[%s13524_s27 + $0x30] sm:$0xff] %v4112_v11  ;;  %v4115_v21 = vadd.f32 %v13489_v12, %v3057_v17  ;;  %v13579_v23 = vpop.f32.mrb[29].mxu1  ;;  %v3059_v25 = vpop.f32.mrb[15].mxu0  ;;  %v12248_v17 = vld [vmem:[%s13212_s13 + $0x710] ss:$12 sps:$4 sm:$0xff]  }
 0x13d   : > { %v13582_v29 = vpop.f32.mrb[30].mxu1 }
 0x13e   : > { %5117 = vst [vmem:[%s13524_s27 + $0x38] sm:$0xff] %v4115_v21  ;;  %v13586_v8 = vpop.f32.mrb[31].mxu1  ;;  %3269 = vmatmul.mubr.bf16.gmra.mrb[120].mxu0 %v12231_v14  ;;  %v12252_v21 = vld [vmem:[%s13212_s13 + $0x728] ss:$12 sps:$4 sm:$0xff]  }
 0x13f   : > { %3276 = vmatprep.mubr.bf16.mxu0 %v12234_v19 }
 0x140   : > { %11630 = vmatmul.mubr.bf16.gmra.mrb[136].mxu1 %v12233_v27 }
 0x141   : > { %v3062_v32 = vpop.f32.mrb[16].mxu0  ;;  %11633 = vmatprep.mubr.bf16.mxu1 %v12237_v31  ;;  %v12251_v31 = vld [vmem:[%s13212_s13 + $0x330] ss:$12 sps:$4 sm:$0xff]  }
 0x142   : > { %v4120_v12 = vadd.f32 %v13498_v18, %v3062_v32  ;;  %v3064_v33 = vpop.f32.mrb[17].mxu0 }
 0x143   : > { %v13590_v36 = vpop.f32.mrb[32].mxu1  ;;  %v3065_v37 = vpop.f32.mrb[18].mxu0  ;;  %v12254_v33 = vld [vmem:[%s13212_s13 + $0x34c] ss:$12 sps:$4 sm:$0xff]  }
 0x144   : > { %5118 = vst [vmem:[%s13524_s27 + $0x40] sm:$0xff] %v4120_v12  ;;  %v4123_v40 = vadd.f32 %v13504_v22, %v3065_v37  ;;  %v13595_v41 = vpop.f32.mrb[33].mxu1  ;;  %v3067_v43 = vpop.f32.mrb[19].mxu0 }
 0x145   : > { %v13598_v46 = vpop.f32.mrb[34].mxu1 }
 0x146   : > { %5119 = vst [vmem:[%s13524_s27 + $0x48] sm:$0xff] %v4123_v40  ;;  %v13602_v18 = vpop.f32.mrb[35].mxu1  ;;  %3277 = vmatmul.mubr.bf16.gmra.mrb[124].mxu0 %v12236_v34  ;;  %v12253_v40 = vld [vmem:[%s13212_s13 + $0x740] ss:$12 sps:$4 sm:$0xff]  }
 0x147   : > { %3284 = vmatprep.mubr.bf16.mxu0 %v12239_v38 }
 0x148   : > { %11634 = vmatmul.mubr.bf16.gmra.mrb[140].mxu1 %v12238_v45  ;;  %v12257_v45 = vld [vmem:[%s13212_s13 + $0x758] ss:$12 sps:$4 sm:$0xff]  }
 0x149   : > { %v3070_v48 = vpop.f32.mrb[20].mxu0  ;;  %11637 = vmatprep.mubr.bf16.mxu1 %v12242_v47 }
 0x14a   : > { %v4128_v22 = vadd.f32 %v13495_v16, %v3070_v48  ;;  %v3072_v50 = vpop.f32.mrb[21].mxu0 }
 0x14b   : > { %v13606_v52 = vpop.f32.mrb[36].mxu1  ;;  %v3073_v54 = vpop.f32.mrb[22].mxu0 }
 0x14c   : > { %5120 = vst [vmem:[%s13524_s27 + $0x50] sm:$0xff] %v4128_v22  ;;  %v4131_v57 = vadd.f32 %v13501_v20, %v3073_v54  ;;  %v13611_v59 = vpop.f32.mrb[37].mxu1  ;;  %v3075_v60 = vpop.f32.mrb[23].mxu0  ;;  %v12256_v22 = vld [vmem:[%s13212_s13 + $0x348] ss:$12 sps:$4 sm:$0xff]  }
 0x14d   : > { %v13614_v62 = vpop.f32.mrb[38].mxu1  ;;  %v12259_v54 = vld [vmem:[%s13212_s13 + $0x364] ss:$12 sps:$4 sm:$0xff]  }
 0x14e   : > { %5121 = vst [vmem:[%s13524_s27 + $0x58] sm:$0xff] %v4131_v57  ;;  %v13618_v16 = vpop.f32.mrb[39].mxu1  ;;  %3285 = vmatmul.mubr.bf16.gmra.mrb[128].mxu0 %v12241_v51 }
 0x14f   : > { %3292 = vmatprep.mubr.bf16.mxu0 %v12244_v55 }
 0x150   : > { %11638 = vmatmul.mubr.bf16.gmra.mrb[144].mxu1 %v12243_v61  ;;  %v12258_v61 = vld [vmem:[%s13212_s13 + $0x770] ss:$12 sps:$4 sm:$0xff]  }
 0x151   : > { %v3078_v1 = vpop.f32.mrb[24].mxu0  ;;  %11641 = vmatprep.mubr.bf16.mxu1 %v12247_v0 }
 0x152   : > { %v4136_v20 = vadd.f32 %v13510_v26, %v3078_v1  ;;  %v3080_v2 = vpop.f32.mrb[25].mxu0  ;;  %v12262_v1 = vld [vmem:[%s13212_s13 + $0x788] ss:$12 sps:$4 sm:$0xff]  }
 0x153   : > { %v13622_v5 = vpop.f32.mrb[40].mxu1  ;;  %v3081_v7 = vpop.f32.mrb[26].mxu0 }
 0x154   : > { %5122 = vst [vmem:[%s13524_s27 + $0x60] sm:$0xff] %v4136_v20  ;;  %v4139_v11 = vadd.f32 %v13516_v30, %v3081_v7  ;;  %v13627_v13 = vpop.f32.mrb[41].mxu1  ;;  %v3083_v14 = vpop.f32.mrb[27].mxu0 }
 0x155   : > { %v13630_v19 = vpop.f32.mrb[42].mxu1 }
 0x156   : > { %5123 = vst [vmem:[%s13524_s27 + $0x68] sm:$0xff] %v4139_v11  ;;  %v13634_v26 = vpop.f32.mrb[43].mxu1  ;;  %3293 = vmatmul.mubr.bf16.gmra.mrb[132].mxu0 %v12246_v4  ;;  %v12261_v4 = vld [vmem:[%s13212_s13 + $0x360] ss:$12 sps:$4 sm:$0xff]   ;;  %v12264_v11 = vld [vmem:[%s13212_s13 + $0x37c] ss:$12 sps:$4 sm:$0xff]  }
 0x157   : > { %3300 = vmatprep.mubr.bf16.mxu0 %v12249_v10 }
 0x158   : > { %11642 = vmatmul.mubr.bf16.gmra.mrb[148].mxu1 %v12248_v17 }
 0x159   : > { %v3086_v25 = vpop.f32.mrb[28].mxu0  ;;  %11645 = vmatprep.mubr.bf16.mxu1 %v12252_v21 }
 0x15a   : > { %v4144_v30 = vadd.f32 %v13507_v24, %v3086_v25  ;;  %v3088_v27 = vpop.f32.mrb[29].mxu0  ;;  %v12263_v25 = vld [vmem:[%s13212_s13 + $0x7a0] ss:$12 sps:$4 sm:$0xff]  }
 0x15b   : > { %v13638_v32 = vpop.f32.mrb[44].mxu1  ;;  %v3089_v12 = vpop.f32.mrb[30].mxu0  ;;  %v12267_v27 = vld [vmem:[%s13212_s13 + $0x7b8] ss:$12 sps:$4 sm:$0xff]  }
 0x15c   : > { %5124 = vst [vmem:[%s13524_s27 + $0x70] sm:$0xff] %v4144_v30  ;;  %v4147_v34 = vadd.f32 %v13513_v28, %v3089_v12  ;;  %v13643_v37 = vpop.f32.mrb[45].mxu1  ;;  %v3091_v38 = vpop.f32.mrb[31].mxu0 }
 0x15d   : > { %v13646_v43 = vpop.f32.mrb[46].mxu1 }
 0x15e   : > { %5125 = vst [vmem:[%s13524_s27 + $0x78] sm:$0xff] %v4147_v34  ;;  %v13650_v24 = vpop.f32.mrb[47].mxu1  ;;  %3301 = vmatmul.mubr.bf16.gmra.mrb[136].mxu0 %v12251_v31 }
 0x15f   : > { %3308 = vmatprep.mubr.bf16.mxu0 %v12254_v33  ;;  %v12266_v33 = vld [vmem:[%s13212_s13 + $0x378] ss:$12 sps:$4 sm:$0xff]  }
 0x160   : > { %11646 = vmatmul.mubr.bf16.gmra.mrb[152].mxu1 %v12253_v40  ;;  %v12269_v40 = vld [vmem:[%s13212_s13 + $0x394] ss:$12 sps:$4 sm:$0xff]  }
 0x161   : > { %v3094_v47 = vpop.f32.mrb[32].mxu0  ;;  %11649 = vmatprep.mubr.bf16.mxu1 %v12257_v45 }
 0x162   : > { %v4152_v28 = vadd.f32 %v13531_v39, %v3094_v47  ;;  %v3096_v48 = vpop.f32.mrb[33].mxu0 }
 0x163   : > { %v13654_v50 = vpop.f32.mrb[48].mxu1  ;;  %v3097_v51 = vpop.f32.mrb[34].mxu0  ;;  %v12268_v48 = vld [vmem:[%s13212_s13 + $0x7d0] ss:$12 sps:$4 sm:$0xff]  }
 0x164   : > { %5126 = vst [vmem:[%s13524_s27 + $0x80] sm:$0xff] %v4152_v28  ;;  %v4155_v55 = vadd.f32 %v13538_v44, %v3097_v51  ;;  %v13659_v57 = vpop.f32.mrb[49].mxu1  ;;  %v3099_v60 = vpop.f32.mrb[35].mxu0  ;;  %v12272_v51 = vld [vmem:[%s13212_s13 + $0x7e8] ss:$12 sps:$4 sm:$0xff]  }
 0x165   : > { %v13662_v0 = vpop.f32.mrb[50].mxu1  ;;  %v12271_v60 = vld [vmem:[%s13212_s13 + $0x390] ss:$12 sps:$4 sm:$0xff]  }
 0x166   : > { %5127 = vst [vmem:[%s13524_s27 + $0x88] sm:$0xff] %v4155_v55  ;;  %v13666_v39 = vpop.f32.mrb[51].mxu1  ;;  %3309 = vmatmul.mubr.bf16.gmra.mrb[140].mxu0 %v12256_v22 }
 0x167   : > { %3316 = vmatprep.mubr.bf16.mxu0 %v12259_v54 }
 0x168   : > { %11650 = vmatmul.mubr.bf16.gmra.mrb[156].mxu1 %v12258_v61 }
 0x169   : > { %v3102_v20 = vpop.f32.mrb[36].mxu0  ;;  %11653 = vmatprep.mubr.bf16.mxu1 %v12262_v1 }
 0x16a   : > { %v4160_v44 = vadd.f32 %v13527_v35, %v3102_v20  ;;  %v3104_v2 = vpop.f32.mrb[37].mxu0  ;;  %v12274_v20 = vld [vmem:[%s13212_s13 + $0x3ac] ss:$12 sps:$4 sm:$0xff]  }
 0x16b   : > { %v13670_v7 = vpop.f32.mrb[52].mxu1  ;;  %v3105_v10 = vpop.f32.mrb[38].mxu0 }
 0x16c   : > { %5128 = vst [vmem:[%s13524_s27 + $0x90] sm:$0xff] %v4160_v44  ;;  %v4163_v14 = vadd.f32 %v13534_v42, %v3105_v10  ;;  %v13675_v17 = vpop.f32.mrb[53].mxu1  ;;  %v3107_v21 = vpop.f32.mrb[39].mxu0  ;;  %v12273_v10 = vld [vmem:[%s13212_s13 + $0x800] ss:$12 sps:$4 sm:$0xff]  }
 0x16d   : > { %v13678_v30 = vpop.f32.mrb[54].mxu1 }
 0x16e   : > { %5129 = vst [vmem:[%s13524_s27 + $0x98] sm:$0xff] %v4163_v14  ;;  %v13682_v35 = vpop.f32.mrb[55].mxu1  ;;  %3317 = vmatmul.mubr.bf16.gmra.mrb[144].mxu0 %v12261_v4  ;;  %v12277_v14 = vld [vmem:[%s13212_s13 + $0x818] ss:$12 sps:$4 sm:$0xff]  }
 0x16f   : > { %3324 = vmatprep.mubr.bf16.mxu0 %v12264_v11 }
 0x170   : > { %11654 = vmatmul.mubr.bf16.gmra.mrb[160].mxu1 %v12263_v25 }
 0x171   : > { %v3110_v31 = vpop.f32.mrb[40].mxu0  ;;  %11657 = vmatprep.mubr.bf16.mxu1 %v12267_v27  ;;  %v12276_v27 = vld [vmem:[%s13212_s13 + $0x3a8] ss:$12 sps:$4 sm:$0xff]  }
 0x172   : > { %v4168_v42 = vadd.f32 %v13547_v53, %v3110_v31  ;;  %v3112_v12 = vpop.f32.mrb[41].mxu0 }
 0x173   : > { %v13686_v34 = vpop.f32.mrb[56].mxu1  ;;  %v3113_v38 = vpop.f32.mrb[42].mxu0  ;;  %v12279_v12 = vld [vmem:[%s13212_s13 + $0x3c4] ss:$12 sps:$4 sm:$0xff]  }
 0x174   : > { %5130 = vst [vmem:[%s13524_s27 + $0xa0] sm:$0xff] %v4168_v42  ;;  %v4171_v45 = vadd.f32 %v13554_v58, %v3113_v38  ;;  %v13691_v47 = vpop.f32.mrb[57].mxu1  ;;  %v3115_v28 = vpop.f32.mrb[43].mxu0 }
 0x175   : > { %v13694_v22 = vpop.f32.mrb[58].mxu1 }
 0x176   : > { %5131 = vst [vmem:[%s13524_s27 + $0xa8] sm:$0xff] %v4171_v45  ;;  %v13698_v53 = vpop.f32.mrb[59].mxu1  ;;  %3325 = vmatmul.mubr.bf16.gmra.mrb[148].mxu0 %v12266_v33  ;;  %v12278_v45 = vld [vmem:[%s13212_s13 + $0x830] ss:$12 sps:$4 sm:$0xff]  }
 0x177   : > { %3332 = vmatprep.mubr.bf16.mxu0 %v12269_v40 }
 0x178   : > { %11658 = vmatmul.mubr.bf16.gmra.mrb[164].mxu1 %v12268_v48  ;;  %v12282_v48 = vld [vmem:[%s13212_s13 + $0x848] ss:$12 sps:$4 sm:$0xff]  }
 0x179   : > { %v3118_v54 = vpop.f32.mrb[44].mxu0  ;;  %11661 = vmatprep.mubr.bf16.mxu1 %v12272_v51 }
 0x17a   : > { %v4176_v58 = vadd.f32 %v13542_v49, %v3118_v54  ;;  %v3120_v55 = vpop.f32.mrb[45].mxu0 }
 0x17b   : > { %v13702_v61 = vpop.f32.mrb[60].mxu1  ;;  %v3121_v1 = vpop.f32.mrb[46].mxu0 }
 0x17c   : > { %5132 = vst [vmem:[%s13524_s27 + $0xb0] sm:$0xff] %v4176_v58  ;;  %v4179_v44 = vadd.f32 %v13550_v56, %v3121_v1  ;;  %v13707_v2 = vpop.f32.mrb[61].mxu1  ;;  %v3123_v4 = vpop.f32.mrb[47].mxu0  ;;  %v12281_v58 = vld [vmem:[%s13212_s13 + $0x3c0] ss:$12 sps:$4 sm:$0xff]  }
 0x17d   : > { %v13710_v11 = vpop.f32.mrb[62].mxu1  ;;  %v12284_v1 = vld [vmem:[%s13212_s13 + $0x3dc] ss:$12 sps:$4 sm:$0xff]  }
 0x17e   : > { %5133 = vst [vmem:[%s13524_s27 + $0xb8] sm:$0xff] %v4179_v44  ;;  %v13714_v49 = vpop.f32.mrb[63].mxu1  ;;  %3333 = vmatmul.mubr.bf16.gmra.mrb[152].mxu0 %v12271_v60 }
 0x17f   : > { %3340 = vmatprep.mubr.bf16.mxu0 %v12274_v20 }
 0x180   : > { %11662 = vmatmul.mubr.bf16.gmra.mrb[168].mxu1 %v12273_v10  ;;  %v12283_v10 = vld [vmem:[%s13212_s13 + $0x860] ss:$12 sps:$4 sm:$0xff]  }
 0x181   : > { %v3126_v21 = vpop.f32.mrb[48].mxu0  ;;  %11665 = vmatprep.mubr.bf16.mxu1 %v12277_v14 }
 0x182   : > { %v4184_v56 = vadd.f32 %v13563_v3, %v3126_v21  ;;  %v3128_v25 = vpop.f32.mrb[49].mxu0  ;;  %v12287_v21 = vld [vmem:[%s13212_s13 + $0x878] ss:$12 sps:$4 sm:$0xff]  }
 0x183   : > { %v13718_v31 = vpop.f32.mrb[64].mxu1  ;;  %v3129_v42 = vpop.f32.mrb[50].mxu0 }
 0x184   : > { %5134 = vst [vmem:[%s13524_s27 + $0xc0] sm:$0xff] %v4184_v56  ;;  %v4187_v33 = vadd.f32 %v13570_v9, %v3129_v42  ;;  %v13723_v38 = vpop.f32.mrb[65].mxu1  ;;  %v3131_v40 = vpop.f32.mrb[51].mxu0 }
 0x185   : > { %v13726_v28 = vpop.f32.mrb[66].mxu1 }
 0x186   : > { %5135 = vst [vmem:[%s13524_s27 + $0xc8] sm:$0xff] %v4187_v33  ;;  %v13730_v3 = vpop.f32.mrb[67].mxu1  ;;  %3341 = vmatmul.mubr.bf16.gmra.mrb[156].mxu0 %v12276_v27  ;;  %v12286_v27 = vld [vmem:[%s13212_s13 + $0x3d8] ss:$12 sps:$4 sm:$0xff]   ;;  %v12289_v33 = vld [vmem:[%s13212_s13 + $0x3f4] ss:$12 sps:$4 sm:$0xff]  }
 0x187   : > { %3348 = vmatprep.mubr.bf16.mxu0 %v12279_v12 }
 0x188   : > { %11666 = vmatmul.mubr.bf16.gmra.mrb[172].mxu1 %v12278_v45 }
 0x189   : > { %v3134_v51 = vpop.f32.mrb[52].mxu0  ;;  %11669 = vmatprep.mubr.bf16.mxu1 %v12282_v48 }
 0x18a   : > { %v4192_v9 = vadd.f32 %v13558_v63, %v3134_v51  ;;  %v3136_v54 = vpop.f32.mrb[53].mxu0  ;;  %v12288_v51 = vld [vmem:[%s13212_s13 + $0x890] ss:$12 sps:$4 sm:$0xff]  }
 0x18b   : > { %v13734_v55 = vpop.f32.mrb[68].mxu1  ;;  %v3137_v60 = vpop.f32.mrb[54].mxu0  ;;  %v12292_v54 = vld [vmem:[%s13212_s13 + $0x8a8] ss:$12 sps:$4 sm:$0xff]  }
 0x18c   : > { %5136 = vst [vmem:[%s13524_s27 + $0xd0] sm:$0xff] %v4192_v9  ;;  %v4195_v20 = vadd.f32 %v13566_v6, %v3137_v60  ;;  %v13739_v44 = vpop.f32.mrb[69].mxu1  ;;  %v3139_v4 = vpop.f32.mrb[55].mxu0 }
 0x18d   : > { %v13742_v14 = vpop.f32.mrb[70].mxu1 }
 0x18e   : > { %5137 = vst [vmem:[%s13524_s27 + $0xd8] sm:$0xff] %v4195_v20  ;;  %v13746_v63 = vpop.f32.mrb[71].mxu1  ;;  %3349 = vmatmul.mubr.bf16.gmra.mrb[160].mxu0 %v12281_v58 }
 0x18f   : > { %3356 = vmatprep.mubr.bf16.mxu0 %v12284_v1  ;;  %v12291_v1 = vld [vmem:[%s13212_s13 + $0x3f0] ss:$12 sps:$4 sm:$0xff]  }
 0x190   : > { %11670 = vmatmul.mubr.bf16.gmra.mrb[176].mxu1 %v12283_v10  ;;  %v12294_v10 = vld [vmem:[%s13212_s13 + $0x40c] ss:$12 sps:$4 sm:$0xff]  }
 0x191   : > { %v3142_v56 = vpop.f32.mrb[56].mxu0  ;;  %11673 = vmatprep.mubr.bf16.mxu1 %v12287_v21 }
 0x192   : > { %v4200_v6 = vadd.f32 %v13579_v23, %v3142_v56  ;;  %v3144_v25 = vpop.f32.mrb[57].mxu0 }
 0x193   : > { %v13750_v42 = vpop.f32.mrb[72].mxu1  ;;  %v3145_v12 = vpop.f32.mrb[58].mxu0  ;;  %v12293_v25 = vld [vmem:[%s13212_s13 + $0x8c0] ss:$12 sps:$4 sm:$0xff]  }
 0x194   : > { %5138 = vst [vmem:[%s13524_s27 + $0xe0] sm:$0xff] %v4200_v6  ;;  %v4203_v40 = vadd.f32 %v13586_v8, %v3145_v12  ;;  %v13755_v45 = vpop.f32.mrb[73].mxu1  ;;  %v3147_v48 = vpop.f32.mrb[59].mxu0  ;;  %v12297_v12 = vld [vmem:[%s13212_s13 + $0x8d8] ss:$12 sps:$4 sm:$0xff]  }
 0x195   : > { %v13758_v9 = vpop.f32.mrb[74].mxu1  ;;  %v12296_v48 = vld [vmem:[%s13212_s13 + $0x408] ss:$12 sps:$4 sm:$0xff]  }
 0x196   : > { %5139 = vst [vmem:[%s13524_s27 + $0xe8] sm:$0xff] %v4203_v40  ;;  %v13762_v23 = vpop.f32.mrb[75].mxu1  ;;  %3357 = vmatmul.mubr.bf16.gmra.mrb[164].mxu0 %v12286_v27 }
 0x197   : > { %3364 = vmatprep.mubr.bf16.mxu0 %v12289_v33 }
 0x198   : > { %11674 = vmatmul.mubr.bf16.gmra.mrb[180].mxu1 %v12288_v51 }
 0x199   : > { %v3150_v58 = vpop.f32.mrb[60].mxu0  ;;  %11677 = vmatprep.mubr.bf16.mxu1 %v12292_v54 }
 0x19a   : > { %v4208_v8 = vadd.f32 %v13574_v15, %v3150_v58  ;;  %v3152_v60 = vpop.f32.mrb[61].mxu0  ;;  %v12299_v58 = vld [vmem:[%s13212_s13 + $0x424] ss:$12 sps:$4 sm:$0xff]  }
 0x19b   : > { %v13766_v20 = vpop.f32.mrb[76].mxu1  ;;  %v3153_v4 = vpop.f32.mrb[62].mxu0 }
 0x19c   : > { %5140 = vst [vmem:[%s13524_s27 + $0xf0] sm:$0xff] %v4208_v8  ;;  %v4211_v21 = vadd.f32 %v13582_v29, %v3153_v4  ;;  %v13771_v56 = vpop.f32.mrb[77].mxu1  ;;  %v3155_v6 = vpop.f32.mrb[63].mxu0  ;;  %v12298_v4 = vld [vmem:[%s13212_s13 + $0x8f0] ss:$12 sps:$4 sm:$0xff]  }
 0x19d   : > { %v13774_v27 = vpop.f32.mrb[78].mxu1 }
 0x19e   : > { %5141 = vst [vmem:[%s13524_s27 + $0xf8] sm:$0xff] %v4211_v21  ;;  %v13778_v15 = vpop.f32.mrb[79].mxu1  ;;  %3365 = vmatmul.mubr.bf16.gmra.mrb[168].mxu0 %v12291_v1  ;;  %v12302_v21 = vld [vmem:[%s13212_s13 + $0x908] ss:$12 sps:$4 sm:$0xff]  }
 0x19f   : > { %3372 = vmatprep.mubr.bf16.mxu0 %v12294_v10 }
 0x1a0   : > { %11678 = vmatmul.mubr.bf16.gmra.mrb[184].mxu1 %v12293_v25 }
 0x1a1   : > { %v3158_v33 = vpop.f32.mrb[64].mxu0  ;;  %11681 = vmatprep.mubr.bf16.mxu1 %v12297_v12  ;;  %v12301_v12 = vld [vmem:[%s13212_s13 + $0x420] ss:$12 sps:$4 sm:$0xff]  }
 0x1a2   : > { %v4216_v29 = vadd.f32 %v13595_v41, %v3158_v33  ;;  %v3160_v40 = vpop.f32.mrb[65].mxu0 }
 0x1a3   : > { %v13782_v51 = vpop.f32.mrb[80].mxu1  ;;  %v3161_v54 = vpop.f32.mrb[66].mxu0  ;;  %v12304_v40 = vld [vmem:[%s13212_s13 + $0x43c] ss:$12 sps:$4 sm:$0xff]  }
 0x1a4   : > { %5142 = vst [vmem:[%s13524_s27 + $0x100] sm:$0xff] %v4216_v29  ;;  %v4219_v8 = vadd.f32 %v13602_v18, %v3161_v54  ;;  %v13787_v60 = vpop.f32.mrb[81].mxu1  ;;  %v3163_v1 = vpop.f32.mrb[67].mxu0 }
 0x1a5   : > { %v13790_v10 = vpop.f32.mrb[82].mxu1  ;;  %v12307_v1 = vld [vmem:[%s13212_s13 + $0x938] ss:$12 sps:$4 sm:$0xff]  }
 0x1a6   : > { %5143 = vst [vmem:[%s13524_s27 + $0x108] sm:$0xff] %v4219_v8  ;;  %v13794_v41 = vpop.f32.mrb[83].mxu1  ;;  %3373 = vmatmul.mubr.bf16.gmra.mrb[172].mxu0 %v12296_v48  ;;  %v12303_v8 = vld [vmem:[%s13212_s13 + $0x920] ss:$12 sps:$4 sm:$0xff]  }
 0x1a7   : > { %3380 = vmatprep.mubr.bf16.mxu0 %v12299_v58 }
 0x1a8   : > { %11682 = vmatmul.mubr.bf16.gmra.mrb[188].mxu1 %v12298_v4 }
 0x1a9   : > { %v3166_v6 = vpop.f32.mrb[68].mxu0  ;;  %11685 = vmatprep.mubr.bf16.mxu1 %v12302_v21 }
 0x1aa   : > { %v4224_v18 = vadd.f32 %v13590_v36, %v3166_v6  ;;  %v3168_v25 = vpop.f32.mrb[69].mxu0  ;;  %v12309_v6 = vld [vmem:[%s13212_s13 + $0x454] ss:$12 sps:$4 sm:$0xff]  }
 0x1ab   : > { %v13798_v33 = vpop.f32.mrb[84].mxu1  ;;  %v3169_v29 = vpop.f32.mrb[70].mxu0 }
 0x1ac   : > { %16224 = vst [vmem:[#allocation2_spill] sm:$0xff] %v13798_v33  ;;  %5144 = vst [vmem:[%s13524_s27 + $0x110] sm:$0xff] %v4224_v18  ;;  %v4227_v48 = vadd.f32 %v13598_v46, %v3169_v29  ;;  %v13803_v54 = vpop.f32.mrb[85].mxu1  ;;  %v3171_v58 = vpop.f32.mrb[71].mxu0  ;;  %v12306_v46 = vld [vmem:[%s13212_s13 + $0x438] ss:$12 sps:$4 sm:$0xff]  }
 0x1ad   : > { %v13813_v36 = vpop.f32.mrb[86].mxu1 }
 0x1ae   : > { %16225 = vst [vmem:[#allocation3_spill] sm:$0xff] %v13813_v36  ;;  %5145 = vst [vmem:[%s13524_s27 + $0x118] sm:$0xff] %v4227_v48  ;;  %v13817_v4 = vpop.f32.mrb[87].mxu1  ;;  %3381 = vmatmul.mubr.bf16.gmra.mrb[176].mxu0 %v12301_v12 }
 0x1af   : > { %3388 = vmatprep.mubr.bf16.mxu0 %v12304_v40 }
 0x1b0   : > { %11686 = vmatmul.mubr.bf16.gmra.mrb[192].mxu1 %v12303_v8  ;;  %v12308_v8 = vld [vmem:[%s13212_s13 + $0x950] ss:$12 sps:$4 sm:$0xff]  }
 0x1b1   : > { %v3174_v21 = vpop.f32.mrb[72].mxu0  ;;  %11689 = vmatprep.mubr.bf16.mxu1 %v12307_v1  ;;  %v12312_v1 = vld [vmem:[%s13212_s13 + $0x968] ss:$12 sps:$4 sm:$0xff]  }
 0x1b2   : > { %v4232_v18 = vadd.f32 %v13611_v59, %v3174_v21  ;;  %v3176_v25 = vpop.f32.mrb[73].mxu0  ;;  %v12311_v59 = vld [vmem:[%s13212_s13 + $0x450] ss:$12 sps:$4 sm:$0xff]  }
 0x1b3   : > { %v13822_v29 = vpop.f32.mrb[88].mxu1  ;;  %v3177_v58 = vpop.f32.mrb[74].mxu0 }
 0x1b4   : > { %16226 = vst [vmem:[#allocation4_spill] sm:$0xff] %v13822_v29  ;;  %5146 = vst [vmem:[%s13524_s27 + $0x120] sm:$0xff] %v4232_v18  ;;  %v4235_v48 = vadd.f32 %v13618_v16, %v3177_v58  ;;  %v13826_v12 = vpop.f32.mrb[89].mxu1  ;;  %v3179_v40 = vpop.f32.mrb[75].mxu0  ;;  %v12314_v16 = vld [vmem:[%s13212_s13 + $0x46c] ss:$12 sps:$4 sm:$0xff]  }
 0x1b5   : > { %v13829_v36 = vpop.f32.mrb[90].mxu1 }
 0x1b6   : > { %16227 = vst [vmem:[#allocation5_spill] sm:$0xff] %v13829_v36  ;;  %5147 = vst [vmem:[%s13524_s27 + $0x128] sm:$0xff] %v4235_v48  ;;  %v13833_v33 = vpop.f32.mrb[91].mxu1  ;;  %3389 = vmatmul.mubr.bf16.gmra.mrb[180].mxu0 %v12306_v46 }
 0x1b7   : > { %3396 = vmatprep.mubr.bf16.mxu0 %v12309_v6 }
 0x1b8   : > { %11690 = vmatmul.mubr.bf16.gmra.mrb[196].mxu1 %v12308_v8  ;;  %v12313_v8 = vld [vmem:[%s13212_s13 + $0x980] ss:$12 sps:$4 sm:$0xff]  }
 0x1b9   : > { %v3182_v21 = vpop.f32.mrb[76].mxu0  ;;  %11693 = vmatprep.mubr.bf16.mxu1 %v12312_v1  ;;  %v12317_v1 = vld [vmem:[%s13212_s13 + $0x998] ss:$12 sps:$4 sm:$0xff]  }
 0x1ba   : > { %v4240_v18 = vadd.f32 %v13606_v52, %v3182_v21  ;;  %v3184_v25 = vpop.f32.mrb[77].mxu0  ;;  %v12316_v52 = vld [vmem:[%s13212_s13 + $0x468] ss:$12 sps:$4 sm:$0xff]  }
 0x1bb   : > { %v13838_v58 = vpop.f32.mrb[92].mxu1  ;;  %v3185_v40 = vpop.f32.mrb[78].mxu0 }
 0x1bc   : > { %16228 = vst [vmem:[#allocation6_spill] sm:$0xff] %v13838_v58  ;;  %5148 = vst [vmem:[%s13524_s27 + $0x130] sm:$0xff] %v4240_v18  ;;  %v4243_v48 = vadd.f32 %v13614_v62, %v3185_v40  ;;  %v13842_v46 = vpop.f32.mrb[93].mxu1  ;;  %v3187_v6 = vpop.f32.mrb[79].mxu0  ;;  %v12319_v62 = vld [vmem:[%s13212_s13 + $0x484] ss:$12 sps:$4 sm:$0xff]  }
 0x1bd   : > { %v13845_v36 = vpop.f32.mrb[94].mxu1 }
 0x1be   : > { %16229 = vst [vmem:[#allocation7_spill] sm:$0xff] %v13845_v36  ;;  %5149 = vst [vmem:[%s13524_s27 + $0x138] sm:$0xff] %v4243_v48  ;;  %v13849_v29 = vpop.f32.mrb[95].mxu1  ;;  %3397 = vmatmul.mubr.bf16.gmra.mrb[184].mxu0 %v12311_v59 }
 0x1bf   : > { %3404 = vmatprep.mubr.bf16.mxu0 %v12314_v16 }
 0x1c0   : > { %11694 = vmatmul.mubr.bf16.gmra.mrb[200].mxu1 %v12313_v8  ;;  %v12318_v8 = vld [vmem:[%s13212_s13 + $0x9b0] ss:$12 sps:$4 sm:$0xff]  }
 0x1c1   : > { %v3190_v21 = vpop.f32.mrb[80].mxu0  ;;  %11697 = vmatprep.mubr.bf16.mxu1 %v12317_v1  ;;  %v12322_v1 = vld [vmem:[%s13212_s13 + $0x9c8] ss:$12 sps:$4 sm:$0xff]  }
 0x1c2   : > { %v4248_v18 = vadd.f32 %v13627_v13, %v3190_v21  ;;  %v3192_v25 = vpop.f32.mrb[81].mxu0  ;;  %v12321_v13 = vld [vmem:[%s13212_s13 + $0x480] ss:$12 sps:$4 sm:$0xff]  }
 0x1c3   : > { %v13854_v40 = vpop.f32.mrb[96].mxu1  ;;  %v3193_v6 = vpop.f32.mrb[82].mxu0 }
 0x1c4   : > { %16230 = vst [vmem:[#allocation8_spill] sm:$0xff] %v13854_v40  ;;  %5150 = vst [vmem:[%s13524_s27 + $0x140] sm:$0xff] %v4248_v18  ;;  %v4251_v48 = vadd.f32 %v13634_v26, %v3193_v6  ;;  %v13858_v59 = vpop.f32.mrb[97].mxu1  ;;  %v3195_v16 = vpop.f32.mrb[83].mxu0  ;;  %v12324_v26 = vld [vmem:[%s13212_s13 + $0x49c] ss:$12 sps:$4 sm:$0xff]  }
 0x1c5   : > { %v13861_v36 = vpop.f32.mrb[98].mxu1 }
 0x1c6   : > { %16231 = vst [vmem:[#allocation9_spill] sm:$0xff] %v13861_v36  ;;  %5151 = vst [vmem:[%s13524_s27 + $0x148] sm:$0xff] %v4251_v48  ;;  %v13865_v58 = vpop.f32.mrb[99].mxu1  ;;  %3405 = vmatmul.mubr.bf16.gmra.mrb[188].mxu0 %v12316_v52 }
 0x1c7   : > { %3412 = vmatprep.mubr.bf16.mxu0 %v12319_v62 }
 0x1c8   : > { %11698 = vmatmul.mubr.bf16.gmra.mrb[204].mxu1 %v12318_v8  ;;  %v12323_v8 = vld [vmem:[%s13212_s13 + $0x9e0] ss:$12 sps:$4 sm:$0xff]  }
 0x1c9   : > { %v3198_v21 = vpop.f32.mrb[84].mxu0  ;;  %11701 = vmatprep.mubr.bf16.mxu1 %v12322_v1  ;;  %v12327_v1 = vld [vmem:[%s13212_s13 + $0x9f8] ss:$12 sps:$4 sm:$0xff]  }
 0x1ca   : > { %v4256_v18 = vadd.f32 %v13622_v5, %v3198_v21  ;;  %v3200_v25 = vpop.f32.mrb[85].mxu0  ;;  %v12326_v5 = vld [vmem:[%s13212_s13 + $0x498] ss:$12 sps:$4 sm:$0xff]  }
 0x1cb   : > { %v13870_v6 = vpop.f32.mrb[100].mxu1  ;;  %v3201_v16 = vpop.f32.mrb[86].mxu0 }
 0x1cc   : > { %16232 = vst [vmem:[#allocation10_spill] sm:$0xff] %v13870_v6  ;;  %5152 = vst [vmem:[%s13524_s27 + $0x150] sm:$0xff] %v4256_v18  ;;  %v4259_v48 = vadd.f32 %v13630_v19, %v3201_v16  ;;  %v13874_v52 = vpop.f32.mrb[101].mxu1  ;;  %v3203_v62 = vpop.f32.mrb[87].mxu0  ;;  %v12329_v19 = vld [vmem:[%s13212_s13 + $0x4b4] ss:$12 sps:$4 sm:$0xff]  }
 0x1cd   : > { %v13877_v36 = vpop.f32.mrb[102].mxu1 }
 0x1ce   : > { %16233 = vst [vmem:[#allocation11_spill] sm:$0xff] %v13877_v36  ;;  %5153 = vst [vmem:[%s13524_s27 + $0x158] sm:$0xff] %v4259_v48  ;;  %v13881_v40 = vpop.f32.mrb[103].mxu1  ;;  %3413 = vmatmul.mubr.bf16.gmra.mrb[192].mxu0 %v12321_v13 }
 0x1cf   : > { %3420 = vmatprep.mubr.bf16.mxu0 %v12324_v26 }
 0x1d0   : > { %11702 = vmatmul.mubr.bf16.gmra.mrb[208].mxu1 %v12323_v8  ;;  %v12328_v8 = vld [vmem:[%s13212_s13 + $0xa10] ss:$12 sps:$4 sm:$0xff]  }
 0x1d1   : > { %v3206_v21 = vpop.f32.mrb[88].mxu0  ;;  %11705 = vmatprep.mubr.bf16.mxu1 %v12327_v1  ;;  %v12332_v1 = vld [vmem:[%s13212_s13 + $0xa28] ss:$12 sps:$4 sm:$0xff]  }
 0x1d2   : > { %v4264_v18 = vadd.f32 %v13643_v37, %v3206_v21  ;;  %v3208_v25 = vpop.f32.mrb[89].mxu0  ;;  %v12331_v37 = vld [vmem:[%s13212_s13 + $0x4b0] ss:$12 sps:$4 sm:$0xff]  }
 0x1d3   : > { %v13886_v16 = vpop.f32.mrb[104].mxu1  ;;  %v3209_v62 = vpop.f32.mrb[90].mxu0 }
 0x1d4   : > { %16234 = vst [vmem:[#allocation12_spill] sm:$0xff] %v13886_v16  ;;  %5154 = vst [vmem:[%s13524_s27 + $0x160] sm:$0xff] %v4264_v18  ;;  %v4267_v48 = vadd.f32 %v13650_v24, %v3209_v62  ;;  %v13890_v13 = vpop.f32.mrb[105].mxu1  ;;  %v3211_v26 = vpop.f32.mrb[91].mxu0  ;;  %v12334_v24 = vld [vmem:[%s13212_s13 + $0x4cc] ss:$12 sps:$4 sm:$0xff]  }
 0x1d5   : > { %v13893_v36 = vpop.f32.mrb[106].mxu1 }
 0x1d6   : > { %16235 = vst [vmem:[#allocation13_spill] sm:$0xff] %v13893_v36  ;;  %5155 = vst [vmem:[%s13524_s27 + $0x168] sm:$0xff] %v4267_v48  ;;  %v13897_v6 = vpop.f32.mrb[107].mxu1  ;;  %3421 = vmatmul.mubr.bf16.gmra.mrb[196].mxu0 %v12326_v5 }
 0x1d7   : > { %3428 = vmatprep.mubr.bf16.mxu0 %v12329_v19 }
 0x1d8   : > { %11706 = vmatmul.mubr.bf16.gmra.mrb[212].mxu1 %v12328_v8  ;;  %v12333_v8 = vld [vmem:[%s13212_s13 + $0xa40] ss:$12 sps:$4 sm:$0xff]  }
 0x1d9   : > { %v3214_v21 = vpop.f32.mrb[92].mxu0  ;;  %11709 = vmatprep.mubr.bf16.mxu1 %v12332_v1  ;;  %v12337_v1 = vld [vmem:[%s13212_s13 + $0xa58] ss:$12 sps:$4 sm:$0xff]  }
 0x1da   : > { %v4272_v18 = vadd.f32 %v13638_v32, %v3214_v21  ;;  %v3216_v25 = vpop.f32.mrb[93].mxu0  ;;  %v12336_v32 = vld [vmem:[%s13212_s13 + $0x4c8] ss:$12 sps:$4 sm:$0xff]  }
 0x1db   : > { %v13902_v62 = vpop.f32.mrb[108].mxu1  ;;  %v3217_v26 = vpop.f32.mrb[94].mxu0 }
 0x1dc   : > { %16236 = vst [vmem:[#allocation14_spill] sm:$0xff] %v13902_v62  ;;  %5156 = vst [vmem:[%s13524_s27 + $0x170] sm:$0xff] %v4272_v18  ;;  %v4275_v48 = vadd.f32 %v13646_v43, %v3217_v26  ;;  %v13906_v5 = vpop.f32.mrb[109].mxu1  ;;  %v3219_v19 = vpop.f32.mrb[95].mxu0  ;;  %v12339_v43 = vld [vmem:[%s13212_s13 + $0x4e4] ss:$12 sps:$4 sm:$0xff]  }
 0x1dd   : > { %v13909_v36 = vpop.f32.mrb[110].mxu1 }
 0x1de   : > { %16237 = vst [vmem:[#allocation15_spill] sm:$0xff] %v13909_v36  ;;  %5157 = vst [vmem:[%s13524_s27 + $0x178] sm:$0xff] %v4275_v48  ;;  %v13913_v16 = vpop.f32.mrb[111].mxu1  ;;  %3429 = vmatmul.mubr.bf16.gmra.mrb[200].mxu0 %v12331_v37 }
 0x1df   : > { %3436 = vmatprep.mubr.bf16.mxu0 %v12334_v24 }
 0x1e0   : > { %11710 = vmatmul.mubr.bf16.gmra.mrb[216].mxu1 %v12333_v8  ;;  %v12338_v8 = vld [vmem:[%s13212_s13 + $0xa70] ss:$12 sps:$4 sm:$0xff]  }
 0x1e1   : > { %v3222_v21 = vpop.f32.mrb[96].mxu0  ;;  %11713 = vmatprep.mubr.bf16.mxu1 %v12337_v1  ;;  %v12342_v1 = vld [vmem:[%s13212_s13 + $0xa88] ss:$12 sps:$4 sm:$0xff]  }
 0x1e2   : > { %v4280_v18 = vadd.f32 %v13659_v57, %v3222_v21  ;;  %v3224_v25 = vpop.f32.mrb[97].mxu0  ;;  %v12341_v57 = vld [vmem:[%s13212_s13 + $0x4e0] ss:$12 sps:$4 sm:$0xff]  }
 0x1e3   : > { %v13918_v26 = vpop.f32.mrb[112].mxu1  ;;  %v3225_v19 = vpop.f32.mrb[98].mxu0 }
 0x1e4   : > { %16238 = vst [vmem:[#allocation16_spill] sm:$0xff] %v13918_v26  ;;  %5158 = vst [vmem:[%s13524_s27 + $0x180] sm:$0xff] %v4280_v18  ;;  %v4283_v48 = vadd.f32 %v13666_v39, %v3225_v19  ;;  %v13922_v37 = vpop.f32.mrb[113].mxu1  ;;  %v3227_v24 = vpop.f32.mrb[99].mxu0  ;;  %v12344_v39 = vld [vmem:[%s13212_s13 + $0x4fc] ss:$12 sps:$4 sm:$0xff]  }
 0x1e5   : > { %v13925_v36 = vpop.f32.mrb[114].mxu1 }
 0x1e6   : > { %16239 = vst [vmem:[#allocation17_spill] sm:$0xff] %v13925_v36  ;;  %5159 = vst [vmem:[%s13524_s27 + $0x188] sm:$0xff] %v4283_v48  ;;  %v13929_v62 = vpop.f32.mrb[115].mxu1  ;;  %3437 = vmatmul.mubr.bf16.gmra.mrb[204].mxu0 %v12336_v32 }
 0x1e7   : > { %3444 = vmatprep.mubr.bf16.mxu0 %v12339_v43 }
 0x1e8   : > { %11714 = vmatmul.mubr.bf16.gmra.mrb[220].mxu1 %v12338_v8  ;;  %v12343_v8 = vld [vmem:[%s13212_s13 + $0xaa0] ss:$12 sps:$4 sm:$0xff]  }
 0x1e9   : > { %v3230_v21 = vpop.f32.mrb[100].mxu0  ;;  %11717 = vmatprep.mubr.bf16.mxu1 %v12342_v1  ;;  %v12347_v1 = vld [vmem:[%s13212_s13 + $0xab8] ss:$12 sps:$4 sm:$0xff]  }
 0x1ea   : > { %v4288_v18 = vadd.f32 %v13654_v50, %v3230_v21  ;;  %v3232_v25 = vpop.f32.mrb[101].mxu0  ;;  %v12346_v50 = vld [vmem:[%s13212_s13 + $0x4f8] ss:$12 sps:$4 sm:$0xff]  }
 0x1eb   : > { %v13934_v19 = vpop.f32.mrb[116].mxu1  ;;  %v3233_v24 = vpop.f32.mrb[102].mxu0 }
 0x1ec   : > { %16240 = vst [vmem:[#allocation18_spill] sm:$0xff] %v13934_v19  ;;  %5160 = vst [vmem:[%s13524_s27 + $0x190] sm:$0xff] %v4288_v18  ;;  %v4291_v48 = vadd.f32 %v13662_v0, %v3233_v24  ;;  %v13938_v32 = vpop.f32.mrb[117].mxu1  ;;  %v3235_v43 = vpop.f32.mrb[103].mxu0  ;;  %v12349_v0 = vld [vmem:[%s13212_s13 + $0x514] ss:$12 sps:$4 sm:$0xff]  }
 0x1ed   : > { %v13941_v36 = vpop.f32.mrb[118].mxu1 }
 0x1ee   : > { %16241 = vst [vmem:[#allocation19_spill] sm:$0xff] %v13941_v36  ;;  %5161 = vst [vmem:[%s13524_s27 + $0x198] sm:$0xff] %v4291_v48  ;;  %v13945_v26 = vpop.f32.mrb[119].mxu1  ;;  %3445 = vmatmul.mubr.bf16.gmra.mrb[208].mxu0 %v12341_v57 }
 0x1ef   : > { %3452 = vmatprep.mubr.bf16.mxu0 %v12344_v39 }
 0x1f0   : > { %11718 = vmatmul.mubr.bf16.gmra.mrb[224].mxu1 %v12343_v8  ;;  %v12348_v8 = vld [vmem:[%s13212_s13 + $0xad0] ss:$12 sps:$4 sm:$0xff]  }
 0x1f1   : > { %v3238_v21 = vpop.f32.mrb[104].mxu0  ;;  %11721 = vmatprep.mubr.bf16.mxu1 %v12347_v1  ;;  %v12352_v1 = vld [vmem:[%s13212_s13 + $0xae8] ss:$12 sps:$4 sm:$0xff]  }
 0x1f2   : > { %v4296_v18 = vadd.f32 %v13675_v17, %v3238_v21  ;;  %v3240_v25 = vpop.f32.mrb[105].mxu0  ;;  %v12351_v17 = vld [vmem:[%s13212_s13 + $0x510] ss:$12 sps:$4 sm:$0xff]  }
 0x1f3   : > { %v13950_v24 = vpop.f32.mrb[120].mxu1  ;;  %v3241_v43 = vpop.f32.mrb[106].mxu0 }
 0x1f4   : > { %16242 = vst [vmem:[#allocation20_spill] sm:$0xff] %v13950_v24  ;;  %5162 = vst [vmem:[%s13524_s27 + $0x1a0] sm:$0xff] %v4296_v18  ;;  %v4299_v48 = vadd.f32 %v13682_v35, %v3241_v43  ;;  %v13954_v57 = vpop.f32.mrb[121].mxu1  ;;  %v3243_v39 = vpop.f32.mrb[107].mxu0  ;;  %v12354_v35 = vld [vmem:[%s13212_s13 + $0x52c] ss:$12 sps:$4 sm:$0xff]  }
 0x1f5   : > { %v13957_v36 = vpop.f32.mrb[122].mxu1 }
 0x1f6   : > { %16243 = vst [vmem:[#allocation21_spill] sm:$0xff] %v13957_v36  ;;  %5163 = vst [vmem:[%s13524_s27 + $0x1a8] sm:$0xff] %v4299_v48  ;;  %v13961_v19 = vpop.f32.mrb[123].mxu1  ;;  %3453 = vmatmul.mubr.bf16.gmra.mrb[212].mxu0 %v12346_v50 }
 0x1f7   : > { %3460 = vmatprep.mubr.bf16.mxu0 %v12349_v0 }
 0x1f8   : > { %11722 = vmatmul.mubr.bf16.gmra.mrb[228].mxu1 %v12348_v8  ;;  %v12353_v8 = vld [vmem:[%s13212_s13 + $0xb00] ss:$12 sps:$4 sm:$0xff]  }
 0x1f9   : > { %v3246_v21 = vpop.f32.mrb[108].mxu0  ;;  %11725 = vmatprep.mubr.bf16.mxu1 %v12352_v1  ;;  %v12357_v1 = vld [vmem:[%s13212_s13 + $0xb18] ss:$12 sps:$4 sm:$0xff]  }
 0x1fa   : > { %v4304_v18 = vadd.f32 %v13670_v7, %v3246_v21  ;;  %v3248_v25 = vpop.f32.mrb[109].mxu0  ;;  %v12356_v7 = vld [vmem:[%s13212_s13 + $0x528] ss:$12 sps:$4 sm:$0xff]  }
 0x1fb   : > { %v13966_v43 = vpop.f32.mrb[124].mxu1  ;;  %v3249_v39 = vpop.f32.mrb[110].mxu0 }
 0x1fc   : > { %16244 = vst [vmem:[#allocation22_spill] sm:$0xff] %v13966_v43  ;;  %5164 = vst [vmem:[%s13524_s27 + $0x1b0] sm:$0xff] %v4304_v18  ;;  %v4307_v48 = vadd.f32 %v13678_v30, %v3249_v39  ;;  %v13970_v50 = vpop.f32.mrb[125].mxu1  ;;  %v3251_v0 = vpop.f32.mrb[111].mxu0  ;;  %v12359_v30 = vld [vmem:[%s13212_s13 + $0x544] ss:$12 sps:$4 sm:$0xff]  }
 0x1fd   : > { %v13973_v36 = vpop.f32.mrb[126].mxu1 }
 0x1fe   : > { %16245 = vst [vmem:[#allocation23_spill] sm:$0xff] %v13973_v36  ;;  %5165 = vst [vmem:[%s13524_s27 + $0x1b8] sm:$0xff] %v4307_v48  ;;  %v13977_v24 = vpop.f32.mrb[127].mxu1  ;;  %3461 = vmatmul.mubr.bf16.gmra.mrb[216].mxu0 %v12351_v17 }
 0x1ff   : > { %3468 = vmatprep.mubr.bf16.mxu0 %v12354_v35 }
 0x200   : > { %11726 = vmatmul.mubr.bf16.gmra.mrb[232].mxu1 %v12353_v8  ;;  %v12358_v8 = vld [vmem:[%s13212_s13 + $0xb30] ss:$12 sps:$4 sm:$0xff]  }
 0x201   : > { %v3254_v21 = vpop.f32.mrb[112].mxu0  ;;  %11729 = vmatprep.mubr.bf16.mxu1 %v12357_v1  ;;  %v12362_v1 = vld [vmem:[%s13212_s13 + $0xb48] ss:$12 sps:$4 sm:$0xff]  }
 0x202   : > { %v4312_v18 = vadd.f32 %v13691_v47, %v3254_v21  ;;  %v3256_v25 = vpop.f32.mrb[113].mxu0  ;;  %v12361_v47 = vld [vmem:[%s13212_s13 + $0x540] ss:$12 sps:$4 sm:$0xff]  }
 0x203   : > { %v13982_v39 = vpop.f32.mrb[128].mxu1  ;;  %v3257_v0 = vpop.f32.mrb[114].mxu0 }
 0x204   : > { %16246 = vst [vmem:[#allocation24_spill] sm:$0xff] %v13982_v39  ;;  %5166 = vst [vmem:[%s13524_s27 + $0x1c0] sm:$0xff] %v4312_v18  ;;  %v4315_v48 = vadd.f32 %v13698_v53, %v3257_v0  ;;  %v13986_v17 = vpop.f32.mrb[129].mxu1  ;;  %v3259_v35 = vpop.f32.mrb[115].mxu0  ;;  %v12364_v53 = vld [vmem:[%s13212_s13 + $0x55c] ss:$12 sps:$4 sm:$0xff]  }
 0x205   : > { %v13989_v36 = vpop.f32.mrb[130].mxu1 }
 0x206   : > { %16247 = vst [vmem:[#allocation25_spill] sm:$0xff] %v13989_v36  ;;  %5167 = vst [vmem:[%s13524_s27 + $0x1c8] sm:$0xff] %v4315_v48  ;;  %v13993_v43 = vpop.f32.mrb[131].mxu1  ;;  %3469 = vmatmul.mubr.bf16.gmra.mrb[220].mxu0 %v12356_v7 }
 0x207   : > { %3476 = vmatprep.mubr.bf16.mxu0 %v12359_v30 }
 0x208   : > { %11730 = vmatmul.mubr.bf16.gmra.mrb[236].mxu1 %v12358_v8  ;;  %v12363_v8 = vld [vmem:[%s13212_s13 + $0xb60] ss:$12 sps:$4 sm:$0xff]  }
 0x209   : > { %v3262_v21 = vpop.f32.mrb[116].mxu0  ;;  %11733 = vmatprep.mubr.bf16.mxu1 %v12362_v1  ;;  %v12367_v1 = vld [vmem:[%s13212_s13 + $0xb78] ss:$12 sps:$4 sm:$0xff]  }
 0x20a   : > { %v4320_v18 = vadd.f32 %v13686_v34, %v3262_v21  ;;  %v3264_v25 = vpop.f32.mrb[117].mxu0  ;;  %v12366_v34 = vld [vmem:[%s13212_s13 + $0x558] ss:$12 sps:$4 sm:$0xff]  }
 0x20b   : > { %v13998_v0 = vpop.f32.mrb[132].mxu1  ;;  %v3265_v35 = vpop.f32.mrb[118].mxu0 }
 0x20c   : > { %16248 = vst [vmem:[#allocation26_spill] sm:$0xff] %v13998_v0  ;;  %5168 = vst [vmem:[%s13524_s27 + $0x1d0] sm:$0xff] %v4320_v18  ;;  %v4323_v48 = vadd.f32 %v13694_v22, %v3265_v35  ;;  %v14002_v7 = vpop.f32.mrb[133].mxu1  ;;  %v3267_v30 = vpop.f32.mrb[119].mxu0  ;;  %v12369_v22 = vld [vmem:[%s13212_s13 + $0x574] ss:$12 sps:$4 sm:$0xff]  }
 0x20d   : > { %v14005_v36 = vpop.f32.mrb[134].mxu1 }
 0x20e   : > { %16249 = vst [vmem:[#allocation27_spill] sm:$0xff] %v14005_v36  ;;  %5169 = vst [vmem:[%s13524_s27 + $0x1d8] sm:$0xff] %v4323_v48  ;;  %v14009_v39 = vpop.f32.mrb[135].mxu1  ;;  %3477 = vmatmul.mubr.bf16.gmra.mrb[224].mxu0 %v12361_v47 }
 0x20f   : > { %3484 = vmatprep.mubr.bf16.mxu0 %v12364_v53 }
 0x210   : > { %11734 = vmatmul.mubr.bf16.gmra.mrb[240].mxu1 %v12363_v8  ;;  %v12368_v8 = vld [vmem:[%s13212_s13 + $0xb90] ss:$12 sps:$4 sm:$0xff]  }
 0x211   : > { %v3270_v21 = vpop.f32.mrb[120].mxu0  ;;  %11737 = vmatprep.mubr.bf16.mxu1 %v12367_v1  ;;  %v12372_v1 = vld [vmem:[%s13212_s13 + $0xba8] ss:$12 sps:$4 sm:$0xff]  }
 0x212   : > { %v4328_v18 = vadd.f32 %v13707_v2, %v3270_v21  ;;  %v3272_v25 = vpop.f32.mrb[121].mxu0  ;;  %v12371_v2 = vld [vmem:[%s13212_s13 + $0x570] ss:$12 sps:$4 sm:$0xff]  }
 0x213   : > { %v14014_v35 = vpop.f32.mrb[136].mxu1  ;;  %v3273_v30 = vpop.f32.mrb[122].mxu0 }
 0x214   : > { %16250 = vst [vmem:[#allocation28_spill] sm:$0xff] %v14014_v35  ;;  %5170 = vst [vmem:[%s13524_s27 + $0x1e0] sm:$0xff] %v4328_v18  ;;  %v4331_v48 = vadd.f32 %v13714_v49, %v3273_v30  ;;  %v14018_v47 = vpop.f32.mrb[137].mxu1  ;;  %v3275_v53 = vpop.f32.mrb[123].mxu0  ;;  %v12374_v49 = vld [vmem:[%s13212_s13 + $0x58c] ss:$12 sps:$4 sm:$0xff]  }
 0x215   : > { %v14021_v36 = vpop.f32.mrb[138].mxu1 }
 0x216   : > { %16251 = vst [vmem:[#allocation29_spill] sm:$0xff] %v14021_v36  ;;  %5171 = vst [vmem:[%s13524_s27 + $0x1e8] sm:$0xff] %v4331_v48  ;;  %v14025_v0 = vpop.f32.mrb[139].mxu1  ;;  %3485 = vmatmul.mubr.bf16.gmra.mrb[228].mxu0 %v12366_v34 }
 0x217   : > { %3492 = vmatprep.mubr.bf16.mxu0 %v12369_v22 }
 0x218   : > { %11738 = vmatmul.mubr.bf16.gmra.mrb[244].mxu1 %v12368_v8  ;;  %v12373_v8 = vld [vmem:[%s13212_s13 + $0xbc0] ss:$12 sps:$4 sm:$0xff]  }
 0x219   : > { %v3278_v21 = vpop.f32.mrb[124].mxu0  ;;  %11741 = vmatprep.mubr.bf16.mxu1 %v12372_v1  ;;  %v12377_v1 = vld [vmem:[%s13212_s13 + $0xbd8] ss:$12 sps:$4 sm:$0xff]  }
 0x21a   : > { %v4336_v18 = vadd.f32 %v13702_v61, %v3278_v21  ;;  %v3280_v25 = vpop.f32.mrb[125].mxu0  ;;  %v12376_v61 = vld [vmem:[%s13212_s13 + $0x588] ss:$12 sps:$4 sm:$0xff]  }
 0x21b   : > { %v14030_v30 = vpop.f32.mrb[140].mxu1  ;;  %v3281_v53 = vpop.f32.mrb[126].mxu0 }
 0x21c   : > { %16252 = vst [vmem:[#allocation30_spill] sm:$0xff] %v14030_v30  ;;  %5172 = vst [vmem:[%s13524_s27 + $0x1f0] sm:$0xff] %v4336_v18  ;;  %v4339_v48 = vadd.f32 %v13710_v11, %v3281_v53  ;;  %v14034_v34 = vpop.f32.mrb[141].mxu1  ;;  %v3283_v22 = vpop.f32.mrb[127].mxu0  ;;  %v12379_v11 = vld [vmem:[%s13212_s13 + $0x5a4] ss:$12 sps:$4 sm:$0xff]  }
 0x21d   : > { %v14037_v36 = vpop.f32.mrb[142].mxu1 }
 0x21e   : > { %16253 = vst [vmem:[#allocation31_spill] sm:$0xff] %v14037_v36  ;;  %5173 = vst [vmem:[%s13524_s27 + $0x1f8] sm:$0xff] %v4339_v48  ;;  %v14041_v35 = vpop.f32.mrb[143].mxu1  ;;  %3493 = vmatmul.mubr.bf16.gmra.mrb[232].mxu0 %v12371_v2 }
 0x21f   : > { %3500 = vmatprep.mubr.bf16.mxu0 %v12374_v49 }
 0x220   : > { %11742 = vmatmul.mubr.bf16.gmra.mrb[248].mxu1 %v12373_v8  ;;  %v12378_v8 = vld [vmem:[%s13212_s13 + $0xbf0] ss:$12 sps:$4 sm:$0xff]  }
 0x221   : > { %v3286_v21 = vpop.f32.mrb[128].mxu0  ;;  %11745 = vmatprep.mubr.bf16.mxu1 %v12377_v1  ;;  %v12384_v1 = vld [vmem:[%s13811_s30 + $0x4] ss:$12 sps:$4 sm:$0xff]  }
 0x222   : > { %v4344_v18 = vadd.f32 %v13723_v38, %v3286_v21  ;;  %v3288_v25 = vpop.f32.mrb[129].mxu0  ;;  %v12381_v38 = vld [vmem:[%s13212_s13 + $0x5a0] ss:$12 sps:$4 sm:$0xff]  }
 0x223   : > { %v14046_v53 = vpop.f32.mrb[144].mxu1  ;;  %v3289_v22 = vpop.f32.mrb[130].mxu0 }
 0x224   : > { %16254 = vst [vmem:[#allocation32_spill] sm:$0xff] %v14046_v53  ;;  %5174 = vst [vmem:[%s13524_s27 + $0x200] sm:$0xff] %v4344_v18  ;;  %v4347_v48 = vadd.f32 %v13730_v3, %v3289_v22  ;;  %v14050_v2 = vpop.f32.mrb[145].mxu1  ;;  %v3291_v49 = vpop.f32.mrb[131].mxu0  ;;  %v12385_v3 = vld [vmem:[%s13212_s13 + $0x5bc] ss:$12 sps:$4 sm:$0xff]  }
 0x225   : > { %v14053_v36 = vpop.f32.mrb[146].mxu1  ;;  %v12390_v53 = vld [vmem:[%s13811_s30 + $0x1c] ss:$12 sps:$4 sm:$0xff]  }
 0x226   : > { %16255 = vst [vmem:[#allocation33_spill] sm:$0xff] %v14053_v36  ;;  %5175 = vst [vmem:[%s13524_s27 + $0x208] sm:$0xff] %v4347_v48  ;;  %v14057_v30 = vpop.f32.mrb[147].mxu1  ;;  %3501 = vmatmul.mubr.bf16.gmra.mrb[236].mxu0 %v12376_v61 }
 0x227   : > { %3508 = vmatprep.mubr.bf16.mxu0 %v12379_v11 }
 0x228   : > { %11746 = vmatmul.mubr.bf16.gmra.mrb[252].mxu1 %v12378_v8  ;;  %v12382_v8 = vld [vmem:[%s13811_s30] ss:$12 sps:$4 sm:$0xff]  }
 0x229   : > { %v3294_v21 = vpop.f32.mrb[132].mxu0  ;;  %7958 = vmatprep.mubr.bf16.mxu1 %v12384_v1 }
 0x22a   : > { %v4352_v18 = vadd.f32 %v13718_v31, %v3294_v21  ;;  %v3296_v25 = vpop.f32.mrb[133].mxu0  ;;  %v12387_v31 = vld [vmem:[%s13212_s13 + $0x5b8] ss:$12 sps:$4 sm:$0xff]  }
 0x22b   : > { %v14062_v22 = vpop.f32.mrb[148].mxu1  ;;  %v3297_v49 = vpop.f32.mrb[134].mxu0 }
 0x22c   : > { %5176 = vst [vmem:[%s13524_s27 + $0x210] sm:$0xff] %v4352_v18  ;;  %v4355_v48 = vadd.f32 %v13726_v28, %v3297_v49  ;;  %v14066_v61 = vpop.f32.mrb[149].mxu1  ;;  %v3299_v11 = vpop.f32.mrb[135].mxu0  ;;  %v13095_v28 = vld [vmem:[%s16221_s2 + $0x80] sm:$0xff]  }
 0x22d   : > { %v14069_v36 = vpop.f32.mrb[150].mxu1  ;;  %v12391_v18 = vld [vmem:[%s13212_s13 + $0x5d4] ss:$12 sps:$4 sm:$0xff]  }
 0x22e   : > { %16256 = vst [vmem:[#allocation34_spill] sm:$0xff] %v14069_v36  ;;  %5177 = vst [vmem:[%s13524_s27 + $0x218] sm:$0xff] %v4355_v48  ;;  %v14073_v1 = vpop.f32.mrb[151].mxu1  ;;  %3509 = vmatmul.mubr.bf16.gmra.mrb[240].mxu0 %v12381_v38  ;;  %v13096_v38 = vld [vmem:[%s16221_s2 + $0x88] sm:$0xff]  }
 0x22f   : > { %3516 = vmatprep.mubr.bf16.mxu0 %v12385_v3 }
 0x230   : > { %7959 = vmatmul.mubr.bf16.vlgmr.msra.gmra.mrb[0].mxu1 %v12382_v8 }
 0x231   : > { %12029 = vmatpush3.bf16.msra.mxu1 %v13095_v28  ;;  %v3302_v21 = vpop.f32.mrb[136].mxu0  ;;  %7966 = vmatprep.mubr.bf16.mxu1 %v12390_v53  ;;  %v12388_v28 = vld [vmem:[%s13811_s30 + $0x18] ss:$12 sps:$4 sm:$0xff]  }
 0x232   : > { %v4360_v25 = vadd.f32 %v13739_v44, %v3302_v21  ;;  %v3304_v49 = vpop.f32.mrb[137].mxu0  ;;  %12022 = vmatprep.subr.bf16.mxu1 %v13096_v38  ;;  %v12396_v44 = vld [vmem:[%s13811_s30 + $0x34] ss:$12 sps:$4 sm:$0xff]  }
 0x233   : > { %v14084_v3 = vpop.f32.mrb[152].mxu1  ;;  %v3305_v48 = vpop.f32.mrb[138].mxu0 }
 0x234   : > { %16257 = vst [vmem:[#allocation35_spill] sm:$0xff] %v14084_v3  ;;  %5178 = vst [vmem:[%s13524_s27 + $0x220] sm:$0xff] %v4360_v25  ;;  %v4363_v11 = vadd.f32 %v13746_v63, %v3305_v48  ;;  %v14088_v8 = vpop.f32.mrb[153].mxu1  ;;  %v3307_v53 = vpop.f32.mrb[139].mxu0  ;;  %v13097_v25 = vld [vmem:[%s16221_s2 + $0x90] sm:$0xff]  }
 0x235   : > { %v14091_v36 = vpop.f32.mrb[154].mxu1  ;;  %12030 = vmatpush3.bf16.msra.mxu1 %v13096_v38  ;;  %v12393_v63 = vld [vmem:[%s13212_s13 + $0x5d0] ss:$12 sps:$4 sm:$0xff]   ;;  %v12397_v48 = vld [vmem:[%s13212_s13 + $0x5ec] ss:$12 sps:$4 sm:$0xff]  }
 0x236   : > { %16258 = vst [vmem:[#allocation36_spill] sm:$0xff] %v14091_v36  ;;  %5179 = vst [vmem:[%s13524_s27 + $0x228] sm:$0xff] %v4363_v11  ;;  %v14095_v21 = vpop.f32.mrb[155].mxu1  ;;  %3517 = vmatmul.mubr.bf16.gmra.mrb[244].mxu0 %v12387_v31  ;;  %12023 = vmatprep.subr.bf16.mxu1 %v13097_v25  ;;  %v13098_v31 = vld [vmem:[%s16221_s2 + $0x98] sm:$0xff]  }
 0x237   : > { %3524 = vmatprep.mubr.bf16.mxu0 %v12391_v18 }
 0x238   : > { %7967 = vmatmul.mubr.bf16.gmra.mrb[4].mxu1 %v12388_v28 }
 0x239   : > { %v3310_v49 = vpop.f32.mrb[140].mxu0  ;;  %7974 = vmatprep.mubr.bf16.mxu1 %v12396_v44  ;;  %12031 = vmatpush3.bf16.msra.mxu1 %v13097_v25  ;;  %v12394_v25 = vld [vmem:[%s13811_s30 + $0x30] ss:$12 sps:$4 sm:$0xff]  }
 0x23a   : > { %v4368_v38 = vadd.f32 %v13734_v55, %v3310_v49  ;;  %v3312_v11 = vpop.f32.mrb[141].mxu0  ;;  %12024 = vmatprep.subr.bf16.mxu1 %v13098_v31  ;;  %v12402_v55 = vld [vmem:[%s13811_s30 + $0x4c] ss:$12 sps:$4 sm:$0xff]  }
 0x23b   : > { %v14106_v53 = vpop.f32.mrb[156].mxu1  ;;  %v3313_v18 = vpop.f32.mrb[142].mxu0 }
 0x23c   : > { %16259 = vst [vmem:[#allocation37_spill] sm:$0xff] %v14106_v53  ;;  %5180 = vst [vmem:[%s13524_s27 + $0x230] sm:$0xff] %v4368_v38  ;;  %v4371_v28 = vadd.f32 %v13742_v14, %v3313_v18  ;;  %v14110_v36 = vpop.f32.mrb[157].mxu1  ;;  %v3315_v44 = vpop.f32.mrb[143].mxu0  ;;  %v13099_v38 = vld [vmem:[%s16221_s2 + $0xa0] sm:$0xff]  }
 0x23d   : > { %v14113_v3 = vpop.f32.mrb[158].mxu1  ;;  %12032 = vmatpush3.bf16.msra.mxu1 %v13098_v31  ;;  %v12399_v14 = vld [vmem:[%s13212_s13 + $0x5e8] ss:$12 sps:$4 sm:$0xff]   ;;  %v12405_v18 = vld [vmem:[%s13212_s13 + $0x604] ss:$12 sps:$4 sm:$0xff]  }
 0x23e   : > { %16260 = vst [vmem:[#allocation38_spill] sm:$0xff] %v14113_v3  ;;  %5181 = vst [vmem:[%s13524_s27 + $0x238] sm:$0xff] %v4371_v28  ;;  %v14117_v49 = vpop.f32.mrb[159].mxu1  ;;  %3525 = vmatmul.mubr.bf16.gmra.mrb[248].mxu0 %v12393_v63  ;;  %12025 = vmatprep.subr.bf16.mxu1 %v13099_v38  ;;  %v13100_v63 = vld [vmem:[%s16221_s2 + $0xa8] sm:$0xff]  }
 0x23f   : > { %3532 = vmatprep.mubr.bf16.mxu0 %v12397_v48 }
 0x240   : > { %7975 = vmatmul.mubr.bf16.gmra.mrb[8].mxu1 %v12394_v25 }
 0x241   : > { %v3318_v11 = vpop.f32.mrb[144].mxu0  ;;  %7982 = vmatprep.mubr.bf16.mxu1 %v12402_v55  ;;  %12033 = vmatpush3.bf16.msra.mxu1 %v13099_v38  ;;  %v12400_v38 = vld [vmem:[%s13811_s30 + $0x48] ss:$12 sps:$4 sm:$0xff]  }
 0x242   : > { %v4376_v31 = vadd.f32 %v13755_v45, %v3318_v11  ;;  %v3320_v28 = vpop.f32.mrb[145].mxu0  ;;  %12026 = vmatprep.subr.bf16.mxu1 %v13100_v63  ;;  %v12408_v45 = vld [vmem:[%s13811_s30 + $0x64] ss:$12 sps:$4 sm:$0xff]  }
 0x243   : > { %v14128_v44 = vpop.f32.mrb[160].mxu1  ;;  %v3321_v48 = vpop.f32.mrb[146].mxu0 }
 0x244   : > { %16261 = vst [vmem:[#allocation39_spill] sm:$0xff] %v14128_v44  ;;  %5182 = vst [vmem:[%s13524_s27 + $0x240] sm:$0xff] %v4376_v31  ;;  %v4379_v25 = vadd.f32 %v13762_v23, %v3321_v48  ;;  %v14132_v3 = vpop.f32.mrb[161].mxu1  ;;  %v3323_v55 = vpop.f32.mrb[147].mxu0  ;;  %v13101_v31 = vld [vmem:[%s16221_s2 + $0xb0] sm:$0xff]  }
 0x245   : > { %v14135_v53 = vpop.f32.mrb[162].mxu1  ;;  %12034 = vmatpush3.bf16.msra.mxu1 %v13100_v63  ;;  %v12403_v23 = vld [vmem:[%s13212_s13 + $0x600] ss:$12 sps:$4 sm:$0xff]   ;;  %v12411_v48 = vld [vmem:[%s13212_s13 + $0x61c] ss:$12 sps:$4 sm:$0xff]  }
 0x246   : > { %16262 = vst [vmem:[#allocation40_spill] sm:$0xff] %v14135_v53  ;;  %5183 = vst [vmem:[%s13524_s27 + $0x248] sm:$0xff] %v4379_v25  ;;  %v14139_v11 = vpop.f32.mrb[163].mxu1  ;;  %3533 = vmatmul.mubr.bf16.gmra.mrb[252].mxu0 %v12399_v14  ;;  %12027 = vmatprep.subr.bf16.mxu1 %v13101_v31  ;;  %v13102_v14 = vld [vmem:[%s16221_s2 + $0xb8] sm:$0xff]  }
 0x247   : > { %3540 = vmatprep.mubr.bf16.mxu0 %v12405_v18 }
 0x248   : > { %7983 = vmatmul.mubr.bf16.gmra.mrb[12].mxu1 %v12400_v38 }
 0x249   : > { %v3326_v28 = vpop.f32.mrb[148].mxu0  ;;  %7990 = vmatprep.mubr.bf16.mxu1 %v12408_v45  ;;  %12035 = vmatpush3.bf16.msra.mxu1 %v13101_v31  ;;  %v12406_v31 = vld [vmem:[%s13811_s30 + $0x60] ss:$12 sps:$4 sm:$0xff]  }
 0x24a   : > { %v4384_v63 = vadd.f32 %v13750_v42, %v3326_v28  ;;  %v3328_v25 = vpop.f32.mrb[149].mxu0  ;;  %12028 = vmatprep.subr.bf16.mxu1 %v13102_v14  ;;  %v12414_v42 = vld [vmem:[%s13811_s30 + $0x7c] ss:$12 sps:$4 sm:$0xff]  }
 0x24b   : > { %v14150_v55 = vpop.f32.mrb[164].mxu1  ;;  %v3329_v18 = vpop.f32.mrb[150].mxu0  ;;  %v12417_v25 = vld [vmem:[%s13212_s13 + $0x634] ss:$12 sps:$4 sm:$0xff]  }
 0x24c   : > { %16263 = vst [vmem:[#allocation41_spill] sm:$0xff] %v14150_v55  ;;  %5184 = vst [vmem:[%s13524_s27 + $0x250] sm:$0xff] %v4384_v63  ;;  %v4387_v38 = vadd.f32 %v13758_v9, %v3329_v18  ;;  %v14154_v45 = vpop.f32.mrb[165].mxu1  ;;  %v3331_v53 = vpop.f32.mrb[151].mxu0  ;;  %v12409_v63 = vld [vmem:[%s13212_s13 + $0x618] ss:$12 sps:$4 sm:$0xff]  }
 0x24d   : > { %v14157_v44 = vpop.f32.mrb[166].mxu1  ;;  %12036 = vmatpush3.bf16.msra.mxu1 %v13102_v14 }
 0x24e   : > { %16264 = vst [vmem:[#allocation42_spill] sm:$0xff] %v14157_v44  ;;  %5185 = vst [vmem:[%s13524_s27 + $0x258] sm:$0xff] %v4387_v38  ;;  %v14161_v28 = vpop.f32.mrb[167].mxu1  ;;  %3541 = vmatmul.mubr.bf16.gmra.mrb[0].mxu0 %v12403_v23 }
 0x24f   : > { %16265 = vst [vmem:[#allocation43_spill] sm:$0xff] %v14161_v28  ;;  %3548 = vmatprep.mubr.bf16.mxu0 %v12411_v48 }
 0x250   : > { %7991 = vmatmul.mubr.bf16.gmra.mrb[16].mxu1 %v12406_v31  ;;  %v12412_v31 = vld [vmem:[%s13811_s30 + $0x78] ss:$12 sps:$4 sm:$0xff]  }
 0x251   : > { %v3334_v9 = vpop.f32.mrb[152].mxu0  ;;  %7998 = vmatprep.mubr.bf16.mxu1 %v12414_v42  ;;  %v12420_v42 = vld [vmem:[%s13811_s30 + $0x94] ss:$12 sps:$4 sm:$0xff]  }
 0x252   : > { %v4392_v53 = vadd.f32 %v13771_v56, %v3334_v9  ;;  %v3336_v18 = vpop.f32.mrb[153].mxu0  ;;  %v12415_v56 = vld [vmem:[%s13212_s13 + $0x630] ss:$12 sps:$4 sm:$0xff]  }
 0x253   : > { %v14166_v44 = vpop.f32.mrb[168].mxu1  ;;  %v3337_v14 = vpop.f32.mrb[154].mxu0 }
 0x254   : > { %16266 = vst [vmem:[#allocation44_spill] sm:$0xff] %v14166_v44  ;;  %5186 = vst [vmem:[%s13524_s27 + $0x260] sm:$0xff] %v4392_v53  ;;  %v4395_v38 = vadd.f32 %v13778_v15, %v3337_v14  ;;  %v14170_v23 = vpop.f32.mrb[169].mxu1  ;;  %v3339_v48 = vpop.f32.mrb[155].mxu0  ;;  %v12423_v15 = vld [vmem:[%s13212_s13 + $0x64c] ss:$12 sps:$4 sm:$0xff]  }
 0x255   : > { %v14173_v55 = vpop.f32.mrb[170].mxu1 }
 0x256   : > { %16267 = vst [vmem:[#allocation45_spill] sm:$0xff] %v14173_v55  ;;  %5187 = vst [vmem:[%s13524_s27 + $0x268] sm:$0xff] %v4395_v38  ;;  %v14177_v28 = vpop.f32.mrb[171].mxu1  ;;  %3549 = vmatmul.mubr.bf16.gmra.mrb[4].mxu0 %v12409_v63 }
 0x257   : > { %3556 = vmatprep.mubr.bf16.mxu0 %v12417_v25 }
 0x258   : > { %7999 = vmatmul.mubr.bf16.gmra.mrb[20].mxu1 %v12412_v31  ;;  %v12418_v31 = vld [vmem:[%s13811_s30 + $0x90] ss:$12 sps:$4 sm:$0xff]  }
 0x259   : > { %v3342_v9 = vpop.f32.mrb[156].mxu0  ;;  %8006 = vmatprep.mubr.bf16.mxu1 %v12420_v42  ;;  %v12426_v42 = vld [vmem:[%s13811_s30 + $0xac] ss:$12 sps:$4 sm:$0xff]  }
 0x25a   : > { %v4400_v53 = vadd.f32 %v13766_v20, %v3342_v9  ;;  %v3344_v18 = vpop.f32.mrb[157].mxu0  ;;  %v12421_v20 = vld [vmem:[%s13212_s13 + $0x648] ss:$12 sps:$4 sm:$0xff]  }
 0x25b   : > { %v14182_v14 = vpop.f32.mrb[172].mxu1  ;;  %v3345_v48 = vpop.f32.mrb[158].mxu0 }
 0x25c   : > { %16268 = vst [vmem:[#allocation46_spill] sm:$0xff] %v14182_v14  ;;  %5188 = vst [vmem:[%s13524_s27 + $0x270] sm:$0xff] %v4400_v53  ;;  %v4403_v38 = vadd.f32 %v13774_v27, %v3345_v48  ;;  %v14186_v63 = vpop.f32.mrb[173].mxu1  ;;  %v3347_v25 = vpop.f32.mrb[159].mxu0  ;;  %v12429_v27 = vld [vmem:[%s13212_s13 + $0x664] ss:$12 sps:$4 sm:$0xff]  }
 0x25d   : > { %v14189_v55 = vpop.f32.mrb[174].mxu1 }
 0x25e   : > { %16269 = vst [vmem:[#allocation47_spill] sm:$0xff] %v14189_v55  ;;  %5189 = vst [vmem:[%s13524_s27 + $0x278] sm:$0xff] %v4403_v38  ;;  %v14193_v44 = vpop.f32.mrb[175].mxu1  ;;  %3557 = vmatmul.mubr.bf16.gmra.mrb[8].mxu0 %v12415_v56 }
 0x25f   : > { %3564 = vmatprep.mubr.bf16.mxu0 %v12423_v15 }
 0x260   : > { %8007 = vmatmul.mubr.bf16.gmra.mrb[24].mxu1 %v12418_v31  ;;  %v12424_v31 = vld [vmem:[%s13811_s30 + $0xa8] ss:$12 sps:$4 sm:$0xff]  }
 0x261   : > { %v3350_v9 = vpop.f32.mrb[160].mxu0  ;;  %8014 = vmatprep.mubr.bf16.mxu1 %v12426_v42  ;;  %v12432_v42 = vld [vmem:[%s13811_s30 + $0xc4] ss:$12 sps:$4 sm:$0xff]  }
 0x262   : > { %v4408_v53 = vadd.f32 %v13787_v60, %v3350_v9  ;;  %v3352_v18 = vpop.f32.mrb[161].mxu0  ;;  %v12427_v60 = vld [vmem:[%s13212_s13 + $0x660] ss:$12 sps:$4 sm:$0xff]  }
 0x263   : > { %v14198_v48 = vpop.f32.mrb[176].mxu1  ;;  %v3353_v25 = vpop.f32.mrb[162].mxu0 }
 0x264   : > { %16270 = vst [vmem:[#allocation48_spill] sm:$0xff] %v14198_v48  ;;  %5190 = vst [vmem:[%s13524_s27 + $0x280] sm:$0xff] %v4408_v53  ;;  %v4411_v38 = vadd.f32 %v13794_v41, %v3353_v25  ;;  %v14202_v56 = vpop.f32.mrb[177].mxu1  ;;  %v3355_v15 = vpop.f32.mrb[163].mxu0  ;;  %v12435_v41 = vld [vmem:[%s13212_s13 + $0x67c] ss:$12 sps:$4 sm:$0xff]  }
 0x265   : > { %v14205_v55 = vpop.f32.mrb[178].mxu1 }
 0x266   : > { %16271 = vst [vmem:[#allocation49_spill] sm:$0xff] %v14205_v55  ;;  %5191 = vst [vmem:[%s13524_s27 + $0x288] sm:$0xff] %v4411_v38  ;;  %v14209_v14 = vpop.f32.mrb[179].mxu1  ;;  %3565 = vmatmul.mubr.bf16.gmra.mrb[12].mxu0 %v12421_v20 }
 0x267   : > { %3572 = vmatprep.mubr.bf16.mxu0 %v12429_v27 }
 0x268   : > { %8015 = vmatmul.mubr.bf16.gmra.mrb[28].mxu1 %v12424_v31  ;;  %v12430_v31 = vld [vmem:[%s13811_s30 + $0xc0] ss:$12 sps:$4 sm:$0xff]  }
 0x269   : > { %v3358_v9 = vpop.f32.mrb[164].mxu0  ;;  %8022 = vmatprep.mubr.bf16.mxu1 %v12432_v42  ;;  %v12438_v42 = vld [vmem:[%s13811_s30 + $0xdc] ss:$12 sps:$4 sm:$0xff]  }
 0x26a   : > { %v4416_v53 = vadd.f32 %v13782_v51, %v3358_v9  ;;  %v3360_v18 = vpop.f32.mrb[165].mxu0  ;;  %v12433_v51 = vld [vmem:[%s13212_s13 + $0x678] ss:$12 sps:$4 sm:$0xff]  }
 0x26b   : > { %v14214_v25 = vpop.f32.mrb[180].mxu1  ;;  %v3361_v15 = vpop.f32.mrb[166].mxu0 }
 0x26c   : > { %16272 = vst [vmem:[#allocation50_spill] sm:$0xff] %v14214_v25  ;;  %5192 = vst [vmem:[%s13524_s27 + $0x290] sm:$0xff] %v4416_v53  ;;  %v4419_v38 = vadd.f32 %v13790_v10, %v3361_v15  ;;  %v14218_v20 = vpop.f32.mrb[181].mxu1  ;;  %v3363_v27 = vpop.f32.mrb[167].mxu0  ;;  %v12441_v10 = vld [vmem:[%s13212_s13 + $0x694] ss:$12 sps:$4 sm:$0xff]  }
 0x26d   : > { %v14221_v55 = vpop.f32.mrb[182].mxu1 }
 0x26e   : > { %16273 = vst [vmem:[#allocation51_spill] sm:$0xff] %v14221_v55  ;;  %5193 = vst [vmem:[%s13524_s27 + $0x298] sm:$0xff] %v4419_v38  ;;  %v14225_v48 = vpop.f32.mrb[183].mxu1  ;;  %3573 = vmatmul.mubr.bf16.gmra.mrb[16].mxu0 %v12427_v60 }
 0x26f   : > { %3580 = vmatprep.mubr.bf16.mxu0 %v12435_v41 }
 0x270   : > { %8023 = vmatmul.mubr.bf16.gmra.mrb[32].mxu1 %v12430_v31  ;;  %v12436_v31 = vld [vmem:[%s13811_s30 + $0xd8] ss:$12 sps:$4 sm:$0xff]  }
 0x271   : > { %v3366_v9 = vpop.f32.mrb[168].mxu0  ;;  %8030 = vmatprep.mubr.bf16.mxu1 %v12438_v42  ;;  %v12444_v42 = vld [vmem:[%s13811_s30 + $0xf4] ss:$12 sps:$4 sm:$0xff]  }
 0x272   : > { %v4424_v53 = vadd.f32 %v13803_v54, %v3366_v9  ;;  %v3368_v18 = vpop.f32.mrb[169].mxu0  ;;  %v12439_v54 = vld [vmem:[%s13212_s13 + $0x690] ss:$12 sps:$4 sm:$0xff]  }
 0x273   : > { %v14230_v15 = vpop.f32.mrb[184].mxu1  ;;  %v3369_v27 = vpop.f32.mrb[170].mxu0 }
 0x274   : > { %16274 = vst [vmem:[#allocation52_spill] sm:$0xff] %v14230_v15  ;;  %5194 = vst [vmem:[%s13524_s27 + $0x2a0] sm:$0xff] %v4424_v53  ;;  %v4427_v38 = vadd.f32 %v13817_v4, %v3369_v27  ;;  %v14234_v60 = vpop.f32.mrb[185].mxu1  ;;  %v3371_v41 = vpop.f32.mrb[171].mxu0  ;;  %v12447_v4 = vld [vmem:[%s13212_s13 + $0x6ac] ss:$12 sps:$4 sm:$0xff]  }
 0x275   : > { %16275 = vst [vmem:[#allocation53_spill] sm:$0xff] %v14234_v60  ;;  %v14237_v55 = vpop.f32.mrb[186].mxu1  ;;  %v16278_v53 = vld [vmem:[#allocation2_spill] sm:$0xff] }
 0x276   : > { %16276 = vst [vmem:[#allocation54_spill] sm:$0xff] %v14237_v55  ;;  %5195 = vst [vmem:[%s13524_s27 + $0x2a8] sm:$0xff] %v4427_v38  ;;  %v14241_v25 = vpop.f32.mrb[187].mxu1  ;;  %3581 = vmatmul.mubr.bf16.gmra.mrb[20].mxu0 %v12433_v51  ;;  %v16280_v38 = vld [vmem:[#allocation3_spill] sm:$0xff] }
 0x277   : > { %16277 = vst [vmem:[#allocation55_spill] sm:$0xff] %v14241_v25  ;;  %3588 = vmatprep.mubr.bf16.mxu0 %v12441_v10 }
 0x278   : > { %8031 = vmatmul.mubr.bf16.gmra.mrb[36].mxu1 %v12436_v31  ;;  %v12442_v31 = vld [vmem:[%s13811_s30 + $0xf0] ss:$12 sps:$4 sm:$0xff]  }
 0x279   : > { %v3374_v9 = vpop.f32.mrb[172].mxu0  ;;  %8038 = vmatprep.mubr.bf16.mxu1 %v12444_v42  ;;  %v12450_v42 = vld [vmem:[%s13811_s30 + $0x10c] ss:$12 sps:$4 sm:$0xff]  }
 0x27a   : > { %v4432_v18 = vadd.f32 %v16278_v53, %v3374_v9  ;;  %v3376_v27 = vpop.f32.mrb[173].mxu0  ;;  %v12445_v9 = vld [vmem:[%s13212_s13 + $0x6a8] ss:$12 sps:$4 sm:$0xff]  }
 0x27b   : > { %v14246_v41 = vpop.f32.mrb[188].mxu1  ;;  %v3377_v55 = vpop.f32.mrb[174].mxu0 }
 0x27c   : > { %16279 = vst [vmem:[#allocation2_spill] sm:$0xff] %v14246_v41  ;;  %5196 = vst [vmem:[%s13524_s27 + $0x2b0] sm:$0xff] %v4432_v18  ;;  %v4435_v15 = vadd.f32 %v16280_v38, %v3377_v55  ;;  %v14250_v51 = vpop.f32.mrb[189].mxu1  ;;  %v3379_v10 = vpop.f32.mrb[175].mxu0  ;;  %v12453_v55 = vld [vmem:[%s13212_s13 + $0x6c4] ss:$12 sps:$4 sm:$0xff]  }
 0x27d   : > { %v14253_v25 = vpop.f32.mrb[190].mxu1 }
 0x27e   : > { %16281 = vst [vmem:[#allocation3_spill] sm:$0xff] %v14253_v25  ;;  %5197 = vst [vmem:[%s13524_s27 + $0x2b8] sm:$0xff] %v4435_v15  ;;  %v14257_v60 = vpop.f32.mrb[191].mxu1  ;;  %3589 = vmatmul.mubr.bf16.gmra.mrb[24].mxu0 %v12439_v54 }
 0x27f   : > { %3596 = vmatprep.mubr.bf16.mxu0 %v12447_v4  ;;  %v12448_v4 = vld [vmem:[%s13811_s30 + $0x108] ss:$12 sps:$4 sm:$0xff]  }
 0x280   : > { %8039 = vmatmul.mubr.bf16.gmra.mrb[40].mxu1 %v12442_v31 }
 0x281   : > { %v3382_v53 = vpop.f32.mrb[176].mxu0  ;;  %8046 = vmatprep.mubr.bf16.mxu1 %v12450_v42  ;;  %v12456_v42 = vld [vmem:[%s13811_s30 + $0x124] ss:$12 sps:$4 sm:$0xff]  }
 0x282   : > { %v4440_v18 = vadd.f32 %v13826_v12, %v3382_v53  ;;  %v3384_v27 = vpop.f32.mrb[177].mxu0  ;;  %v12451_v12 = vld [vmem:[%s13212_s13 + $0x6c0] ss:$12 sps:$4 sm:$0xff]   ;;  %v16285_v53 = vld [vmem:[#allocation4_spill] sm:$0xff] }
 0x283   : > { %v14262_v38 = vpop.f32.mrb[192].mxu1  ;;  %v3385_v10 = vpop.f32.mrb[178].mxu0 }
 0x284   : > { %16282 = vst [vmem:[#allocation56_spill] sm:$0xff] %v14262_v38  ;;  %5198 = vst [vmem:[%s13524_s27 + $0x2c0] sm:$0xff] %v4440_v18  ;;  %v4443_v15 = vadd.f32 %v13833_v33, %v3385_v10  ;;  %v14266_v25 = vpop.f32.mrb[193].mxu1  ;;  %v3387_v54 = vpop.f32.mrb[179].mxu0 }
 0x285   : > { %v14269_v31 = vpop.f32.mrb[194].mxu1 }
 0x286   : > { %16283 = vst [vmem:[#allocation57_spill] sm:$0xff] %v14269_v31  ;;  %5199 = vst [vmem:[%s13524_s27 + $0x2c8] sm:$0xff] %v4443_v15  ;;  %v14273_v41 = vpop.f32.mrb[195].mxu1  ;;  %3597 = vmatmul.mubr.bf16.gmra.mrb[28].mxu0 %v12445_v9  ;;  %v12459_v31 = vld [vmem:[%s13212_s13 + $0x6dc] ss:$12 sps:$4 sm:$0xff]  }
 0x287   : > { %16284 = vst [vmem:[#allocation58_spill] sm:$0xff] %v14273_v41  ;;  %3604 = vmatprep.mubr.bf16.mxu0 %v12453_v55  ;;  %v16287_v15 = vld [vmem:[#allocation5_spill] sm:$0xff]  ;;  %v12454_v55 = vld [vmem:[%s13811_s30 + $0x120] ss:$12 sps:$4 sm:$0xff]  }
 0x288   : > { %8047 = vmatmul.mubr.bf16.gmra.mrb[44].mxu1 %v12448_v4 }
 0x289   : > { %v3390_v33 = vpop.f32.mrb[180].mxu0  ;;  %8054 = vmatprep.mubr.bf16.mxu1 %v12456_v42  ;;  %v12462_v42 = vld [vmem:[%s13811_s30 + $0x13c] ss:$12 sps:$4 sm:$0xff]  }
 0x28a   : > { %v4448_v18 = vadd.f32 %v16285_v53, %v3390_v33  ;;  %v3392_v27 = vpop.f32.mrb[181].mxu0 }
 0x28b   : > { %v14277_v10 = vpop.f32.mrb[196].mxu1  ;;  %v3393_v54 = vpop.f32.mrb[182].mxu0 }
 0x28c   : > { %16286 = vst [vmem:[#allocation4_spill] sm:$0xff] %v14277_v10  ;;  %5200 = vst [vmem:[%s13524_s27 + $0x2d0] sm:$0xff] %v4448_v18  ;;  %v4451_v38 = vadd.f32 %v16287_v15, %v3393_v54  ;;  %v14282_v41 = vpop.f32.mrb[197].mxu1  ;;  %v3395_v9 = vpop.f32.mrb[183].mxu0  ;;  %v12457_v54 = vld [vmem:[%s13212_s13 + $0x6d8] ss:$12 sps:$4 sm:$0xff]  }
 0x28d   : > { %v14285_v4 = vpop.f32.mrb[198].mxu1 }
 0x28e   : > { %16288 = vst [vmem:[#allocation5_spill] sm:$0xff] %v14285_v4  ;;  %5201 = vst [vmem:[%s13524_s27 + $0x2d8] sm:$0xff] %v4451_v38  ;;  %v14289_v33 = vpop.f32.mrb[199].mxu1  ;;  %3605 = vmatmul.mubr.bf16.gmra.mrb[32].mxu0 %v12451_v12  ;;  %v12465_v4 = vld [vmem:[%s13212_s13 + $0x6f4] ss:$12 sps:$4 sm:$0xff]  }
 0x28f   : > { %3612 = vmatprep.mubr.bf16.mxu0 %v12459_v31  ;;  %v12460_v12 = vld [vmem:[%s13811_s30 + $0x138] ss:$12 sps:$4 sm:$0xff]  }
 0x290   : > { %8055 = vmatmul.mubr.bf16.gmra.mrb[48].mxu1 %v12454_v55 }
 0x291   : > { %v3398_v53 = vpop.f32.mrb[184].mxu0  ;;  %8062 = vmatprep.mubr.bf16.mxu1 %v12462_v42  ;;  %v12468_v42 = vld [vmem:[%s13811_s30 + $0x154] ss:$12 sps:$4 sm:$0xff]  }
 0x292   : > { %v4456_v18 = vadd.f32 %v13842_v46, %v3398_v53  ;;  %v3400_v27 = vpop.f32.mrb[185].mxu0 }
 0x293   : > { %v14293_v15 = vpop.f32.mrb[200].mxu1  ;;  %v3401_v9 = vpop.f32.mrb[186].mxu0 }
 0x294   : > { %16289 = vst [vmem:[#allocation59_spill] sm:$0xff] %v14293_v15  ;;  %5202 = vst [vmem:[%s13524_s27 + $0x2e0] sm:$0xff] %v4456_v18  ;;  %v4459_v38 = vadd.f32 %v13849_v29, %v3401_v9  ;;  %v14298_v10 = vpop.f32.mrb[201].mxu1  ;;  %v3403_v31 = vpop.f32.mrb[187].mxu0  ;;  %v16293_v29 = vld [vmem:[#allocation6_spill] sm:$0xff] }
 0x295   : > { %16290 = vst [vmem:[#allocation60_spill] sm:$0xff] %v14298_v10  ;;  %v14301_v55 = vpop.f32.mrb[202].mxu1  ;;  %v12463_v9 = vld [vmem:[%s13212_s13 + $0x6f0] ss:$12 sps:$4 sm:$0xff]  }
 0x296   : > { %16291 = vst [vmem:[#allocation61_spill] sm:$0xff] %v14301_v55  ;;  %5203 = vst [vmem:[%s13524_s27 + $0x2e8] sm:$0xff] %v4459_v38  ;;  %v14305_v46 = vpop.f32.mrb[203].mxu1  ;;  %3613 = vmatmul.mubr.bf16.gmra.mrb[36].mxu0 %v12457_v54  ;;  %v12471_v55 = vld [vmem:[%s13212_s13 + $0x70c] ss:$12 sps:$4 sm:$0xff]  }
 0x297   : > { %16292 = vst [vmem:[#allocation62_spill] sm:$0xff] %v14305_v46  ;;  %3620 = vmatprep.mubr.bf16.mxu0 %v12465_v4  ;;  %v16295_v38 = vld [vmem:[#allocation7_spill] sm:$0xff]  ;;  %v12466_v54 = vld [vmem:[%s13811_s30 + $0x150] ss:$12 sps:$4 sm:$0xff]  }
 0x298   : > { %8063 = vmatmul.mubr.bf16.gmra.mrb[52].mxu1 %v12460_v12 }
 0x299   : > { %v3406_v53 = vpop.f32.mrb[188].mxu0  ;;  %8070 = vmatprep.mubr.bf16.mxu1 %v12468_v42  ;;  %v12474_v42 = vld [vmem:[%s13811_s30 + $0x16c] ss:$12 sps:$4 sm:$0xff]  }
 0x29a   : > { %v4464_v18 = vadd.f32 %v16293_v29, %v3406_v53  ;;  %v3408_v27 = vpop.f32.mrb[189].mxu0 }
 0x29b   : > { %v14309_v31 = vpop.f32.mrb[204].mxu1  ;;  %v3409_v15 = vpop.f32.mrb[190].mxu0  ;;  %v12469_v27 = vld [vmem:[%s13212_s13 + $0x708] ss:$12 sps:$4 sm:$0xff]  }
 0x29c   : > { %16294 = vst [vmem:[#allocation6_spill] sm:$0xff] %v14309_v31  ;;  %5204 = vst [vmem:[%s13524_s27 + $0x2f0] sm:$0xff] %v4464_v18  ;;  %v4467_v46 = vadd.f32 %v16295_v38, %v3409_v15  ;;  %v14314_v10 = vpop.f32.mrb[205].mxu1  ;;  %v3411_v4 = vpop.f32.mrb[191].mxu0 }
 0x29d   : > { %v14317_v12 = vpop.f32.mrb[206].mxu1 }
 0x29e   : > { %16296 = vst [vmem:[#allocation7_spill] sm:$0xff] %v14317_v12  ;;  %5205 = vst [vmem:[%s13524_s27 + $0x2f8] sm:$0xff] %v4467_v46  ;;  %v14321_v53 = vpop.f32.mrb[207].mxu1  ;;  %3621 = vmatmul.mubr.bf16.gmra.mrb[40].mxu0 %v12463_v9  ;;  %v12477_v12 = vld [vmem:[%s13212_s13 + $0x724] ss:$12 sps:$4 sm:$0xff]  }
 0x29f   : > { %3628 = vmatprep.mubr.bf16.mxu0 %v12471_v55  ;;  %v12472_v9 = vld [vmem:[%s13811_s30 + $0x168] ss:$12 sps:$4 sm:$0xff]  }
 0x2a0   : > { %8071 = vmatmul.mubr.bf16.gmra.mrb[56].mxu1 %v12466_v54 }
 0x2a1   : > { %v3414_v29 = vpop.f32.mrb[192].mxu0  ;;  %8078 = vmatprep.mubr.bf16.mxu1 %v12474_v42  ;;  %v12480_v42 = vld [vmem:[%s13811_s30 + $0x184] ss:$12 sps:$4 sm:$0xff]  }
 0x2a2   : > { %v4472_v15 = vadd.f32 %v13858_v59, %v3414_v29  ;;  %v3416_v18 = vpop.f32.mrb[193].mxu0 }
 0x2a3   : > { %v14325_v38 = vpop.f32.mrb[208].mxu1  ;;  %v3417_v4 = vpop.f32.mrb[194].mxu0 }
 0x2a4   : > { %16297 = vst [vmem:[#allocation63_spill] sm:$0xff] %v14325_v38  ;;  %5206 = vst [vmem:[%s13524_s27 + $0x300] sm:$0xff] %v4472_v15  ;;  %v4475_v46 = vadd.f32 %v13865_v58, %v3417_v4  ;;  %v14330_v31 = vpop.f32.mrb[209].mxu1  ;;  %v3419_v55 = vpop.f32.mrb[195].mxu0  ;;  %v16301_v58 = vld [vmem:[#allocation8_spill] sm:$0xff] }
 0x2a5   : > { %16298 = vst [vmem:[#allocation64_spill] sm:$0xff] %v14330_v31  ;;  %v14333_v54 = vpop.f32.mrb[210].mxu1  ;;  %v12475_v4 = vld [vmem:[%s13212_s13 + $0x720] ss:$12 sps:$4 sm:$0xff]  }
 0x2a6   : > { %16299 = vst [vmem:[#allocation65_spill] sm:$0xff] %v14333_v54  ;;  %5207 = vst [vmem:[%s13524_s27 + $0x308] sm:$0xff] %v4475_v46  ;;  %v14337_v59 = vpop.f32.mrb[211].mxu1  ;;  %3629 = vmatmul.mubr.bf16.gmra.mrb[44].mxu0 %v12469_v27  ;;  %v12483_v54 = vld [vmem:[%s13212_s13 + $0x73c] ss:$12 sps:$4 sm:$0xff]  }
 0x2a7   : > { %16300 = vst [vmem:[#allocation66_spill] sm:$0xff] %v14337_v59  ;;  %3636 = vmatprep.mubr.bf16.mxu0 %v12477_v12  ;;  %v16303_v46 = vld [vmem:[#allocation9_spill] sm:$0xff]  ;;  %v12478_v27 = vld [vmem:[%s13811_s30 + $0x180] ss:$12 sps:$4 sm:$0xff]  }
 0x2a8   : > { %8079 = vmatmul.mubr.bf16.gmra.mrb[60].mxu1 %v12472_v9 }
 0x2a9   : > { %v3422_v29 = vpop.f32.mrb[196].mxu0  ;;  %8086 = vmatprep.mubr.bf16.mxu1 %v12480_v42  ;;  %v12486_v42 = vld [vmem:[%s13811_s30 + $0x19c] ss:$12 sps:$4 sm:$0xff]  }
 0x2aa   : > { %v4480_v15 = vadd.f32 %v16301_v58, %v3422_v29  ;;  %v3424_v18 = vpop.f32.mrb[197].mxu0 }
 0x2ab   : > { %v14341_v55 = vpop.f32.mrb[212].mxu1  ;;  %v3425_v38 = vpop.f32.mrb[198].mxu0  ;;  %v12481_v18 = vld [vmem:[%s13212_s13 + $0x738] ss:$12 sps:$4 sm:$0xff]  }
 0x2ac   : > { %16302 = vst [vmem:[#allocation8_spill] sm:$0xff] %v14341_v55  ;;  %5208 = vst [vmem:[%s13524_s27 + $0x310] sm:$0xff] %v4480_v15  ;;  %v4483_v59 = vadd.f32 %v16303_v46, %v3425_v38  ;;  %v14346_v31 = vpop.f32.mrb[213].mxu1  ;;  %v3427_v12 = vpop.f32.mrb[199].mxu0 }
 0x2ad   : > { %v14349_v9 = vpop.f32.mrb[214].mxu1 }
 0x2ae   : > { %16304 = vst [vmem:[#allocation9_spill] sm:$0xff] %v14349_v9  ;;  %5209 = vst [vmem:[%s13524_s27 + $0x318] sm:$0xff] %v4483_v59  ;;  %v14353_v29 = vpop.f32.mrb[215].mxu1  ;;  %3637 = vmatmul.mubr.bf16.gmra.mrb[48].mxu0 %v12475_v4  ;;  %v12489_v9 = vld [vmem:[%s13212_s13 + $0x754] ss:$12 sps:$4 sm:$0xff]  }
 0x2af   : > { %3644 = vmatprep.mubr.bf16.mxu0 %v12483_v54  ;;  %v12484_v4 = vld [vmem:[%s13811_s30 + $0x198] ss:$12 sps:$4 sm:$0xff]  }
 0x2b0   : > { %8087 = vmatmul.mubr.bf16.gmra.mrb[64].mxu1 %v12478_v27 }
 0x2b1   : > { %v3430_v58 = vpop.f32.mrb[200].mxu0  ;;  %8094 = vmatprep.mubr.bf16.mxu1 %v12486_v42  ;;  %v12492_v42 = vld [vmem:[%s13811_s30 + $0x1b4] ss:$12 sps:$4 sm:$0xff]  }
 0x2b2   : > { %v4488_v38 = vadd.f32 %v13874_v52, %v3430_v58  ;;  %v3432_v15 = vpop.f32.mrb[201].mxu0 }
 0x2b3   : > { %v14357_v46 = vpop.f32.mrb[216].mxu1  ;;  %v3433_v12 = vpop.f32.mrb[202].mxu0 }
 0x2b4   : > { %16305 = vst [vmem:[#allocation67_spill] sm:$0xff] %v14357_v46  ;;  %5210 = vst [vmem:[%s13524_s27 + $0x320] sm:$0xff] %v4488_v38  ;;  %v4491_v59 = vadd.f32 %v13881_v40, %v3433_v12  ;;  %v14362_v55 = vpop.f32.mrb[217].mxu1  ;;  %v3435_v54 = vpop.f32.mrb[203].mxu0  ;;  %v16309_v40 = vld [vmem:[#allocation10_spill] sm:$0xff] }
 0x2b5   : > { %16306 = vst [vmem:[#allocation68_spill] sm:$0xff] %v14362_v55  ;;  %v14365_v27 = vpop.f32.mrb[218].mxu1  ;;  %v12487_v12 = vld [vmem:[%s13212_s13 + $0x750] ss:$12 sps:$4 sm:$0xff]  }
 0x2b6   : > { %16307 = vst [vmem:[#allocation69_spill] sm:$0xff] %v14365_v27  ;;  %5211 = vst [vmem:[%s13524_s27 + $0x328] sm:$0xff] %v4491_v59  ;;  %v14369_v52 = vpop.f32.mrb[219].mxu1  ;;  %3645 = vmatmul.mubr.bf16.gmra.mrb[52].mxu0 %v12481_v18  ;;  %v12495_v27 = vld [vmem:[%s13212_s13 + $0x76c] ss:$12 sps:$4 sm:$0xff]  }
 0x2b7   : > { %16308 = vst [vmem:[#allocation70_spill] sm:$0xff] %v14369_v52  ;;  %3652 = vmatprep.mubr.bf16.mxu0 %v12489_v9  ;;  %v16311_v59 = vld [vmem:[#allocation11_spill] sm:$0xff]  ;;  %v12490_v18 = vld [vmem:[%s13811_s30 + $0x1b0] ss:$12 sps:$4 sm:$0xff]  }
 0x2b8   : > { %8095 = vmatmul.mubr.bf16.gmra.mrb[68].mxu1 %v12484_v4 }
 0x2b9   : > { %v3438_v58 = vpop.f32.mrb[204].mxu0  ;;  %8102 = vmatprep.mubr.bf16.mxu1 %v12492_v42  ;;  %v12498_v42 = vld [vmem:[%s13811_s30 + $0x1cc] ss:$12 sps:$4 sm:$0xff]  }
 0x2ba   : > { %v4496_v38 = vadd.f32 %v16309_v40, %v3438_v58  ;;  %v3440_v15 = vpop.f32.mrb[205].mxu0 }
 0x2bb   : > { %v14373_v54 = vpop.f32.mrb[220].mxu1  ;;  %v3441_v46 = vpop.f32.mrb[206].mxu0  ;;  %v12493_v15 = vld [vmem:[%s13212_s13 + $0x768] ss:$12 sps:$4 sm:$0xff]  }
 0x2bc   : > { %16310 = vst [vmem:[#allocation10_spill] sm:$0xff] %v14373_v54  ;;  %5212 = vst [vmem:[%s13524_s27 + $0x330] sm:$0xff] %v4496_v38  ;;  %v4499_v52 = vadd.f32 %v16311_v59, %v3441_v46  ;;  %v14378_v55 = vpop.f32.mrb[221].mxu1  ;;  %v3443_v9 = vpop.f32.mrb[207].mxu0 }
 0x2bd   : > { %v14381_v4 = vpop.f32.mrb[222].mxu1 }
 0x2be   : > { %16312 = vst [vmem:[#allocation11_spill] sm:$0xff] %v14381_v4  ;;  %5213 = vst [vmem:[%s13524_s27 + $0x338] sm:$0xff] %v4499_v52  ;;  %v14385_v58 = vpop.f32.mrb[223].mxu1  ;;  %3653 = vmatmul.mubr.bf16.gmra.mrb[56].mxu0 %v12487_v12  ;;  %v12501_v4 = vld [vmem:[%s13212_s13 + $0x784] ss:$12 sps:$4 sm:$0xff]  }
 0x2bf   : > { %3660 = vmatprep.mubr.bf16.mxu0 %v12495_v27  ;;  %v12496_v12 = vld [vmem:[%s13811_s30 + $0x1c8] ss:$12 sps:$4 sm:$0xff]  }
 0x2c0   : > { %8103 = vmatmul.mubr.bf16.gmra.mrb[72].mxu1 %v12490_v18 }
 0x2c1   : > { %v3446_v40 = vpop.f32.mrb[208].mxu0  ;;  %8110 = vmatprep.mubr.bf16.mxu1 %v12498_v42  ;;  %v12504_v42 = vld [vmem:[%s13811_s30 + $0x1e4] ss:$12 sps:$4 sm:$0xff]  }
 0x2c2   : > { %v4504_v46 = vadd.f32 %v13890_v13, %v3446_v40  ;;  %v3448_v38 = vpop.f32.mrb[209].mxu0 }
 0x2c3   : > { %v14389_v59 = vpop.f32.mrb[224].mxu1  ;;  %v3449_v9 = vpop.f32.mrb[210].mxu0 }
 0x2c4   : > { %16313 = vst [vmem:[#allocation71_spill] sm:$0xff] %v14389_v59  ;;  %5214 = vst [vmem:[%s13524_s27 + $0x340] sm:$0xff] %v4504_v46  ;;  %v4507_v52 = vadd.f32 %v13897_v6, %v3449_v9  ;;  %v14394_v54 = vpop.f32.mrb[225].mxu1  ;;  %v3451_v27 = vpop.f32.mrb[211].mxu0  ;;  %v16317_v6 = vld [vmem:[#allocation12_spill] sm:$0xff] }
 0x2c5   : > { %16314 = vst [vmem:[#allocation72_spill] sm:$0xff] %v14394_v54  ;;  %v14397_v18 = vpop.f32.mrb[226].mxu1  ;;  %v12499_v9 = vld [vmem:[%s13212_s13 + $0x780] ss:$12 sps:$4 sm:$0xff]  }
 0x2c6   : > { %16315 = vst [vmem:[#allocation73_spill] sm:$0xff] %v14397_v18  ;;  %5215 = vst [vmem:[%s13524_s27 + $0x348] sm:$0xff] %v4507_v52  ;;  %v14401_v13 = vpop.f32.mrb[227].mxu1  ;;  %3661 = vmatmul.mubr.bf16.gmra.mrb[60].mxu0 %v12493_v15  ;;  %v12507_v18 = vld [vmem:[%s13212_s13 + $0x79c] ss:$12 sps:$4 sm:$0xff]  }
 0x2c7   : > { %16316 = vst [vmem:[#allocation74_spill] sm:$0xff] %v14401_v13  ;;  %3668 = vmatprep.mubr.bf16.mxu0 %v12501_v4  ;;  %v16319_v52 = vld [vmem:[#allocation13_spill] sm:$0xff]  ;;  %v12502_v15 = vld [vmem:[%s13811_s30 + $0x1e0] ss:$12 sps:$4 sm:$0xff]  }
 0x2c8   : > { %8111 = vmatmul.mubr.bf16.gmra.mrb[76].mxu1 %v12496_v12 }
 0x2c9   : > { %v3454_v40 = vpop.f32.mrb[212].mxu0  ;;  %8118 = vmatprep.mubr.bf16.mxu1 %v12504_v42  ;;  %v12510_v42 = vld [vmem:[%s13811_s30 + $0x1fc] ss:$12 sps:$4 sm:$0xff]  }
 0x2ca   : > { %v4512_v46 = vadd.f32 %v16317_v6, %v3454_v40  ;;  %v3456_v38 = vpop.f32.mrb[213].mxu0 }
 0x2cb   : > { %v14405_v27 = vpop.f32.mrb[228].mxu1  ;;  %v3457_v59 = vpop.f32.mrb[214].mxu0  ;;  %v12505_v38 = vld [vmem:[%s13212_s13 + $0x798] ss:$12 sps:$4 sm:$0xff]  }
 0x2cc   : > { %16318 = vst [vmem:[#allocation12_spill] sm:$0xff] %v14405_v27  ;;  %5216 = vst [vmem:[%s13524_s27 + $0x350] sm:$0xff] %v4512_v46  ;;  %v4515_v13 = vadd.f32 %v16319_v52, %v3457_v59  ;;  %v14410_v54 = vpop.f32.mrb[229].mxu1  ;;  %v3459_v4 = vpop.f32.mrb[215].mxu0 }
 0x2cd   : > { %v14413_v12 = vpop.f32.mrb[230].mxu1 }
 0x2ce   : > { %16320 = vst [vmem:[#allocation13_spill] sm:$0xff] %v14413_v12  ;;  %5217 = vst [vmem:[%s13524_s27 + $0x358] sm:$0xff] %v4515_v13  ;;  %v14417_v40 = vpop.f32.mrb[231].mxu1  ;;  %3669 = vmatmul.mubr.bf16.gmra.mrb[64].mxu0 %v12499_v9  ;;  %v12513_v12 = vld [vmem:[%s13212_s13 + $0x7b4] ss:$12 sps:$4 sm:$0xff]  }
 0x2cf   : > { %3676 = vmatprep.mubr.bf16.mxu0 %v12507_v18  ;;  %v12508_v9 = vld [vmem:[%s13811_s30 + $0x1f8] ss:$12 sps:$4 sm:$0xff]  }
 0x2d0   : > { %8119 = vmatmul.mubr.bf16.gmra.mrb[80].mxu1 %v12502_v15 }
 0x2d1   : > { %v3462_v6 = vpop.f32.mrb[216].mxu0  ;;  %8126 = vmatprep.mubr.bf16.mxu1 %v12510_v42  ;;  %v12516_v42 = vld [vmem:[%s13811_s30 + $0x214] ss:$12 sps:$4 sm:$0xff]  }
 0x2d2   : > { %v4520_v59 = vadd.f32 %v13906_v5, %v3462_v6  ;;  %v3464_v46 = vpop.f32.mrb[217].mxu0 }
 0x2d3   : > { %v14421_v52 = vpop.f32.mrb[232].mxu1  ;;  %v3465_v4 = vpop.f32.mrb[218].mxu0 }
 0x2d4   : > { %16321 = vst [vmem:[#allocation75_spill] sm:$0xff] %v14421_v52  ;;  %5218 = vst [vmem:[%s13524_s27 + $0x360] sm:$0xff] %v4520_v59  ;;  %v4523_v13 = vadd.f32 %v13913_v16, %v3465_v4  ;;  %v14426_v27 = vpop.f32.mrb[233].mxu1  ;;  %v3467_v18 = vpop.f32.mrb[219].mxu0  ;;  %v16325_v16 = vld [vmem:[#allocation14_spill] sm:$0xff] }
 0x2d5   : > { %16322 = vst [vmem:[#allocation76_spill] sm:$0xff] %v14426_v27  ;;  %v14429_v15 = vpop.f32.mrb[234].mxu1  ;;  %v12511_v4 = vld [vmem:[%s13212_s13 + $0x7b0] ss:$12 sps:$4 sm:$0xff]  }
 0x2d6   : > { %16323 = vst [vmem:[#allocation77_spill] sm:$0xff] %v14429_v15  ;;  %5219 = vst [vmem:[%s13524_s27 + $0x368] sm:$0xff] %v4523_v13  ;;  %v14433_v5 = vpop.f32.mrb[235].mxu1  ;;  %3677 = vmatmul.mubr.bf16.gmra.mrb[68].mxu0 %v12505_v38  ;;  %v12519_v15 = vld [vmem:[%s13212_s13 + $0x7cc] ss:$12 sps:$4 sm:$0xff]  }
 0x2d7   : > { %16324 = vst [vmem:[#allocation78_spill] sm:$0xff] %v14433_v5  ;;  %3684 = vmatprep.mubr.bf16.mxu0 %v12513_v12  ;;  %v16327_v13 = vld [vmem:[#allocation15_spill] sm:$0xff]  ;;  %v12514_v38 = vld [vmem:[%s13811_s30 + $0x210] ss:$12 sps:$4 sm:$0xff]  }
 0x2d8   : > { %8127 = vmatmul.mubr.bf16.gmra.mrb[84].mxu1 %v12508_v9 }
 0x2d9   : > { %v3470_v6 = vpop.f32.mrb[220].mxu0  ;;  %8134 = vmatprep.mubr.bf16.mxu1 %v12516_v42  ;;  %v12522_v42 = vld [vmem:[%s13811_s30 + $0x22c] ss:$12 sps:$4 sm:$0xff]  }
 0x2da   : > { %v4528_v59 = vadd.f32 %v16325_v16, %v3470_v6  ;;  %v3472_v46 = vpop.f32.mrb[221].mxu0 }
 0x2db   : > { %v14437_v18 = vpop.f32.mrb[236].mxu1  ;;  %v3473_v52 = vpop.f32.mrb[222].mxu0  ;;  %v12517_v46 = vld [vmem:[%s13212_s13 + $0x7c8] ss:$12 sps:$4 sm:$0xff]  }
 0x2dc   : > { %16326 = vst [vmem:[#allocation14_spill] sm:$0xff] %v14437_v18  ;;  %5220 = vst [vmem:[%s13524_s27 + $0x370] sm:$0xff] %v4528_v59  ;;  %v4531_v5 = vadd.f32 %v16327_v13, %v3473_v52  ;;  %v14442_v27 = vpop.f32.mrb[237].mxu1  ;;  %v3475_v12 = vpop.f32.mrb[223].mxu0 }
 0x2dd   : > { %v14445_v9 = vpop.f32.mrb[238].mxu1 }
 0x2de   : > { %16328 = vst [vmem:[#allocation15_spill] sm:$0xff] %v14445_v9  ;;  %5221 = vst [vmem:[%s13524_s27 + $0x378] sm:$0xff] %v4531_v5  ;;  %v14449_v6 = vpop.f32.mrb[239].mxu1  ;;  %3685 = vmatmul.mubr.bf16.gmra.mrb[72].mxu0 %v12511_v4  ;;  %v12525_v9 = vld [vmem:[%s13212_s13 + $0x7e4] ss:$12 sps:$4 sm:$0xff]  }
 0x2df   : > { %3692 = vmatprep.mubr.bf16.mxu0 %v12519_v15  ;;  %v12520_v4 = vld [vmem:[%s13811_s30 + $0x228] ss:$12 sps:$4 sm:$0xff]  }
 0x2e0   : > { %8135 = vmatmul.mubr.bf16.gmra.mrb[88].mxu1 %v12514_v38 }
 0x2e1   : > { %v3478_v16 = vpop.f32.mrb[224].mxu0  ;;  %8142 = vmatprep.mubr.bf16.mxu1 %v12522_v42  ;;  %v12528_v42 = vld [vmem:[%s13811_s30 + $0x244] ss:$12 sps:$4 sm:$0xff]  }
 0x2e2   : > { %v4536_v52 = vadd.f32 %v13922_v37, %v3478_v16  ;;  %v3480_v59 = vpop.f32.mrb[225].mxu0 }
 0x2e3   : > { %v14453_v13 = vpop.f32.mrb[240].mxu1  ;;  %v3481_v12 = vpop.f32.mrb[226].mxu0 }
 0x2e4   : > { %16329 = vst [vmem:[#allocation79_spill] sm:$0xff] %v14453_v13  ;;  %5222 = vst [vmem:[%s13524_s27 + $0x380] sm:$0xff] %v4536_v52  ;;  %v4539_v5 = vadd.f32 %v13929_v62, %v3481_v12  ;;  %v14458_v18 = vpop.f32.mrb[241].mxu1  ;;  %v3483_v15 = vpop.f32.mrb[227].mxu0  ;;  %v16333_v62 = vld [vmem:[#allocation16_spill] sm:$0xff] }
 0x2e5   : > { %16330 = vst [vmem:[#allocation80_spill] sm:$0xff] %v14458_v18  ;;  %v14461_v38 = vpop.f32.mrb[242].mxu1  ;;  %v12523_v12 = vld [vmem:[%s13212_s13 + $0x7e0] ss:$12 sps:$4 sm:$0xff]  }
 0x2e6   : > { %16331 = vst [vmem:[#allocation81_spill] sm:$0xff] %v14461_v38  ;;  %5223 = vst [vmem:[%s13524_s27 + $0x388] sm:$0xff] %v4539_v5  ;;  %v14465_v37 = vpop.f32.mrb[243].mxu1  ;;  %3693 = vmatmul.mubr.bf16.gmra.mrb[76].mxu0 %v12517_v46  ;;  %v12531_v38 = vld [vmem:[%s13212_s13 + $0x7fc] ss:$12 sps:$4 sm:$0xff]  }
 0x2e7   : > { %16332 = vst [vmem:[#allocation82_spill] sm:$0xff] %v14465_v37  ;;  %3700 = vmatprep.mubr.bf16.mxu0 %v12525_v9  ;;  %v16335_v5 = vld [vmem:[#allocation17_spill] sm:$0xff]  ;;  %v12526_v46 = vld [vmem:[%s13811_s30 + $0x240] ss:$12 sps:$4 sm:$0xff]  }
 0x2e8   : > { %8143 = vmatmul.mubr.bf16.gmra.mrb[92].mxu1 %v12520_v4 }
 0x2e9   : > { %v3486_v16 = vpop.f32.mrb[228].mxu0  ;;  %8150 = vmatprep.mubr.bf16.mxu1 %v12528_v42  ;;  %v12534_v42 = vld [vmem:[%s13811_s30 + $0x25c] ss:$12 sps:$4 sm:$0xff]  }
 0x2ea   : > { %v4544_v52 = vadd.f32 %v16333_v62, %v3486_v16  ;;  %v3488_v59 = vpop.f32.mrb[229].mxu0 }
 0x2eb   : > { %v14469_v15 = vpop.f32.mrb[244].mxu1  ;;  %v3489_v13 = vpop.f32.mrb[230].mxu0  ;;  %v12529_v59 = vld [vmem:[%s13212_s13 + $0x7f8] ss:$12 sps:$4 sm:$0xff]  }
 0x2ec   : > { %16334 = vst [vmem:[#allocation16_spill] sm:$0xff] %v14469_v15  ;;  %5224 = vst [vmem:[%s13524_s27 + $0x390] sm:$0xff] %v4544_v52  ;;  %v4547_v37 = vadd.f32 %v16335_v5, %v3489_v13  ;;  %v14474_v18 = vpop.f32.mrb[245].mxu1  ;;  %v3491_v9 = vpop.f32.mrb[231].mxu0 }
 0x2ed   : > { %v14477_v4 = vpop.f32.mrb[246].mxu1 }
 0x2ee   : > { %16336 = vst [vmem:[#allocation17_spill] sm:$0xff] %v14477_v4  ;;  %5225 = vst [vmem:[%s13524_s27 + $0x398] sm:$0xff] %v4547_v37  ;;  %v14481_v16 = vpop.f32.mrb[247].mxu1  ;;  %3701 = vmatmul.mubr.bf16.gmra.mrb[80].mxu0 %v12523_v12  ;;  %v12537_v4 = vld [vmem:[%s13212_s13 + $0x814] ss:$12 sps:$4 sm:$0xff]  }
 0x2ef   : > { %3708 = vmatprep.mubr.bf16.mxu0 %v12531_v38  ;;  %v12532_v12 = vld [vmem:[%s13811_s30 + $0x258] ss:$12 sps:$4 sm:$0xff]  }
 0x2f0   : > { %8151 = vmatmul.mubr.bf16.gmra.mrb[96].mxu1 %v12526_v46 }
 0x2f1   : > { %v3494_v62 = vpop.f32.mrb[232].mxu0  ;;  %8158 = vmatprep.mubr.bf16.mxu1 %v12534_v42  ;;  %v12540_v42 = vld [vmem:[%s13811_s30 + $0x274] ss:$12 sps:$4 sm:$0xff]  }
 0x2f2   : > { %v4552_v13 = vadd.f32 %v13938_v32, %v3494_v62  ;;  %v3496_v52 = vpop.f32.mrb[233].mxu0 }
 0x2f3   : > { %v14485_v5 = vpop.f32.mrb[248].mxu1  ;;  %v3497_v9 = vpop.f32.mrb[234].mxu0 }
 0x2f4   : > { %16337 = vst [vmem:[#allocation83_spill] sm:$0xff] %v14485_v5  ;;  %5226 = vst [vmem:[%s13524_s27 + $0x3a0] sm:$0xff] %v4552_v13  ;;  %v4555_v37 = vadd.f32 %v13945_v26, %v3497_v9  ;;  %v14490_v15 = vpop.f32.mrb[249].mxu1  ;;  %v3499_v38 = vpop.f32.mrb[235].mxu0  ;;  %v16341_v26 = vld [vmem:[#allocation18_spill] sm:$0xff] }
 0x2f5   : > { %16338 = vst [vmem:[#allocation84_spill] sm:$0xff] %v14490_v15  ;;  %v14493_v46 = vpop.f32.mrb[250].mxu1  ;;  %v12535_v9 = vld [vmem:[%s13212_s13 + $0x810] ss:$12 sps:$4 sm:$0xff]  }
 0x2f6   : > { %16339 = vst [vmem:[#allocation85_spill] sm:$0xff] %v14493_v46  ;;  %5227 = vst [vmem:[%s13524_s27 + $0x3a8] sm:$0xff] %v4555_v37  ;;  %v14497_v32 = vpop.f32.mrb[251].mxu1  ;;  %3709 = vmatmul.mubr.bf16.gmra.mrb[84].mxu0 %v12529_v59  ;;  %v12543_v46 = vld [vmem:[%s13212_s13 + $0x82c] ss:$12 sps:$4 sm:$0xff]  }
 0x2f7   : > { %16340 = vst [vmem:[#allocation86_spill] sm:$0xff] %v14497_v32  ;;  %3716 = vmatprep.mubr.bf16.mxu0 %v12537_v4  ;;  %v16343_v37 = vld [vmem:[#allocation19_spill] sm:$0xff]  ;;  %v12538_v59 = vld [vmem:[%s13811_s30 + $0x270] ss:$12 sps:$4 sm:$0xff]  }
 0x2f8   : > { %8159 = vmatmul.mubr.bf16.gmra.mrb[100].mxu1 %v12532_v12 }
 0x2f9   : > { %v3502_v62 = vpop.f32.mrb[236].mxu0  ;;  %8166 = vmatprep.mubr.bf16.mxu1 %v12540_v42  ;;  %v12546_v42 = vld [vmem:[%s13811_s30 + $0x28c] ss:$12 sps:$4 sm:$0xff]  }
 0x2fa   : > { %v4560_v13 = vadd.f32 %v16341_v26, %v3502_v62  ;;  %v3504_v52 = vpop.f32.mrb[237].mxu0 }
 0x2fb   : > { %v14501_v38 = vpop.f32.mrb[252].mxu1  ;;  %v3505_v5 = vpop.f32.mrb[238].mxu0  ;;  %v12541_v52 = vld [vmem:[%s13212_s13 + $0x828] ss:$12 sps:$4 sm:$0xff]  }
 0x2fc   : > { %16342 = vst [vmem:[#allocation18_spill] sm:$0xff] %v14501_v38  ;;  %5228 = vst [vmem:[%s13524_s27 + $0x3b0] sm:$0xff] %v4560_v13  ;;  %v4563_v32 = vadd.f32 %v16343_v37, %v3505_v5  ;;  %v14506_v15 = vpop.f32.mrb[253].mxu1  ;;  %v3507_v4 = vpop.f32.mrb[239].mxu0 }
 0x2fd   : > { %v14509_v12 = vpop.f32.mrb[254].mxu1 }
 0x2fe   : > { %16344 = vst [vmem:[#allocation19_spill] sm:$0xff] %v14509_v12  ;;  %5229 = vst [vmem:[%s13524_s27 + $0x3b8] sm:$0xff] %v4563_v32  ;;  %v14513_v62 = vpop.f32.mrb[255].mxu1  ;;  %3717 = vmatmul.mubr.bf16.gmra.mrb[88].mxu0 %v12535_v9  ;;  %v12549_v12 = vld [vmem:[%s13212_s13 + $0x844] ss:$12 sps:$4 sm:$0xff]  }
 0x2ff   : > { %3724 = vmatprep.mubr.bf16.mxu0 %v12543_v46  ;;  %v12544_v46 = vld [vmem:[%s13811_s30 + $0x288] ss:$12 sps:$4 sm:$0xff]  }
 0x300   : > { %8167 = vmatmul.mubr.bf16.gmra.mrb[104].mxu1 %v12538_v59 }
 0x301   : > { %v3510_v26 = vpop.f32.mrb[240].mxu0  ;;  %8174 = vmatprep.mubr.bf16.mxu1 %v12546_v42  ;;  %v12552_v42 = vld [vmem:[%s13811_s30 + $0x2a4] ss:$12 sps:$4 sm:$0xff]  }
 0x302   : > { %v4568_v5 = vadd.f32 %v13954_v57, %v3510_v26  ;;  %v3512_v13 = vpop.f32.mrb[241].mxu0 }
 0x303   : > { %v14517_v37 = vpop.f32.mrb[0].mxu1  ;;  %v3513_v4 = vpop.f32.mrb[242].mxu0  ;;  %v12547_v13 = vld [vmem:[%s13212_s13 + $0x840] ss:$12 sps:$4 sm:$0xff]  }
 0x304   : > { %16345 = vst [vmem:[#allocation87_spill] sm:$0xff] %v14517_v37  ;;  %5230 = vst [vmem:[%s13524_s27 + $0x3c0] sm:$0xff] %v4568_v5  ;;  %v4571_v32 = vadd.f32 %v13961_v19, %v3513_v4  ;;  %v7962_v38 = vpop.f32.mrb[1].mxu1  ;;  %v3515_v9 = vpop.f32.mrb[243].mxu0  ;;  %v16347_v5 = vld [vmem:[#allocation20_spill] sm:$0xff] }
 0x305   : > { %v14523_v59 = vpop.f32.mrb[2].mxu1  ;;  %v12555_v37 = vld [vmem:[%s13212_s13 + $0x85c] ss:$12 sps:$4 sm:$0xff]  }
 0x306   : > { %16346 = vst [vmem:[#allocation88_spill] sm:$0xff] %v14523_v59  ;;  %5231 = vst [vmem:[%s13524_s27 + $0x3c8] sm:$0xff] %v4571_v32  ;;  %v7965_v57 = vpop.f32.mrb[3].mxu1  ;;  %3725 = vmatmul.mubr.bf16.gmra.mrb[92].mxu0 %v12541_v52  ;;  %v16348_v59 = vld [vmem:[#allocation21_spill] sm:$0xff] }
 0x307   : > { %3732 = vmatprep.mubr.bf16.mxu0 %v12549_v12  ;;  %v12550_v12 = vld [vmem:[%s13811_s30 + $0x2a0] ss:$12 sps:$4 sm:$0xff]  }
 0x308   : > { %8175 = vmatmul.mubr.bf16.gmra.mrb[108].mxu1 %v12544_v46 }
 0x309   : > { %v3518_v26 = vpop.f32.mrb[244].mxu0  ;;  %8182 = vmatprep.mubr.bf16.mxu1 %v12552_v42  ;;  %v12558_v42 = vld [vmem:[%s13811_s30 + $0x2bc] ss:$12 sps:$4 sm:$0xff]  }
 0x30a   : > { %v4576_v19 = vadd.f32 %v16347_v5, %v3518_v26  ;;  %v3520_v38 = vpop.f32.mrb[245].mxu0 }
 0x30b   : > { %v14529_v4 = vpop.f32.mrb[4].mxu1  ;;  %v3521_v9 = vpop.f32.mrb[246].mxu0  ;;  %v12553_v38 = vld [vmem:[%s13212_s13 + $0x858] ss:$12 sps:$4 sm:$0xff]  }
 0x30c   : > { %5232 = vst [vmem:[%s13524_s27 + $0x3d0] sm:$0xff] %v4576_v19  ;;  %v4579_v32 = vadd.f32 %v16348_v59, %v3521_v9  ;;  %v7970_v57 = vpop.f32.mrb[5].mxu1  ;;  %v3523_v52 = vpop.f32.mrb[247].mxu0 }
 0x30d   : > { %v14535_v46 = vpop.f32.mrb[6].mxu1  ;;  %v12561_v52 = vld [vmem:[%s13212_s13 + $0x874] ss:$12 sps:$4 sm:$0xff]  }
 0x30e   : > { %5233 = vst [vmem:[%s13524_s27 + $0x3d8] sm:$0xff] %v4579_v32  ;;  %v7973_v26 = vpop.f32.mrb[7].mxu1  ;;  %3733 = vmatmul.mubr.bf16.gmra.mrb[96].mxu0 %v12547_v13 }
 0x30f   : > { %3740 = vmatprep.mubr.bf16.mxu0 %v12555_v37  ;;  %v12556_v37 = vld [vmem:[%s13811_s30 + $0x2b8] ss:$12 sps:$4 sm:$0xff]  }
 0x310   : > { %8183 = vmatmul.mubr.bf16.gmra.mrb[112].mxu1 %v12550_v12 }
 0x311   : > { %v3526_v5 = vpop.f32.mrb[248].mxu0  ;;  %8190 = vmatprep.mubr.bf16.mxu1 %v12558_v42  ;;  %v12564_v42 = vld [vmem:[%s13811_s30 + $0x2d4] ss:$12 sps:$4 sm:$0xff]  }
 0x312   : > { %v4584_v59 = vadd.f32 %v13970_v50, %v3526_v5  ;;  %v3528_v19 = vpop.f32.mrb[249].mxu0 }
 0x313   : > { %v14541_v9 = vpop.f32.mrb[8].mxu1  ;;  %v3529_v57 = vpop.f32.mrb[250].mxu0 }
 0x314   : > { %16349 = vst [vmem:[#allocation20_spill] sm:$0xff] %v14541_v9  ;;  %5234 = vst [vmem:[%s13524_s27 + $0x3e0] sm:$0xff] %v4584_v59  ;;  %v4587_v32 = vadd.f32 %v13977_v24, %v3529_v57  ;;  %v7978_v26 = vpop.f32.mrb[9].mxu1  ;;  %v3531_v13 = vpop.f32.mrb[251].mxu0  ;;  %v16351_v59 = vld [vmem:[#allocation22_spill] sm:$0xff] }
 0x315   : > { %v14547_v12 = vpop.f32.mrb[10].mxu1  ;;  %v12559_v57 = vld [vmem:[%s13212_s13 + $0x870] ss:$12 sps:$4 sm:$0xff]   ;;  %v12567_v9 = vld [vmem:[%s13212_s13 + $0x88c] ss:$12 sps:$4 sm:$0xff]  }
 0x316   : > { %16350 = vst [vmem:[#allocation21_spill] sm:$0xff] %v14547_v12  ;;  %5235 = vst [vmem:[%s13524_s27 + $0x3e8] sm:$0xff] %v4587_v32  ;;  %v7981_v50 = vpop.f32.mrb[11].mxu1  ;;  %3741 = vmatmul.mubr.bf16.gmra.mrb[100].mxu0 %v12553_v38  ;;  %v16352_v12 = vld [vmem:[#allocation23_spill] sm:$0xff] }
 0x317   : > { %3748 = vmatprep.mubr.bf16.mxu0 %v12561_v52  ;;  %v12562_v52 = vld [vmem:[%s13811_s30 + $0x2d0] ss:$12 sps:$4 sm:$0xff]  }
 0x318   : > { %8191 = vmatmul.mubr.bf16.gmra.mrb[116].mxu1 %v12556_v37 }
 0x319   : > { %v3534_v5 = vpop.f32.mrb[252].mxu0  ;;  %8198 = vmatprep.mubr.bf16.mxu1 %v12564_v42  ;;  %v12570_v42 = vld [vmem:[%s13811_s30 + $0x2ec] ss:$12 sps:$4 sm:$0xff]  }
 0x31a   : > { %v4592_v24 = vadd.f32 %v16351_v59, %v3534_v5  ;;  %v3536_v19 = vpop.f32.mrb[253].mxu0 }
 0x31b   : > { %v14553_v26 = vpop.f32.mrb[12].mxu1  ;;  %v3537_v13 = vpop.f32.mrb[254].mxu0  ;;  %v12565_v19 = vld [vmem:[%s13212_s13 + $0x888] ss:$12 sps:$4 sm:$0xff]  }
 0x31c   : > { %5236 = vst [vmem:[%s13524_s27 + $0x3f0] sm:$0xff] %v4592_v24  ;;  %v4595_v32 = vadd.f32 %v16352_v12, %v3537_v13  ;;  %v7986_v50 = vpop.f32.mrb[13].mxu1  ;;  %v3539_v38 = vpop.f32.mrb[255].mxu0 }
 0x31d   : > { %v14559_v37 = vpop.f32.mrb[14].mxu1  ;;  %v12573_v38 = vld [vmem:[%s13212_s13 + $0x8a4] ss:$12 sps:$4 sm:$0xff]  }
 0x31e   : > { %5237 = vst [vmem:[%s13524_s27 + $0x3f8] sm:$0xff] %v4595_v32  ;;  %v7989_v5 = vpop.f32.mrb[15].mxu1  ;;  %3749 = vmatmul.mubr.bf16.gmra.mrb[104].mxu0 %v12559_v57 }
 0x31f   : > { %3756 = vmatprep.mubr.bf16.mxu0 %v12567_v9  ;;  %v12568_v9 = vld [vmem:[%s13811_s30 + $0x2e8] ss:$12 sps:$4 sm:$0xff]  }
 0x320   : > { %8199 = vmatmul.mubr.bf16.gmra.mrb[120].mxu1 %v12562_v52 }
 0x321   : > { %v3542_v59 = vpop.f32.mrb[0].mxu0  ;;  %8206 = vmatprep.mubr.bf16.mxu1 %v12570_v42  ;;  %v12576_v42 = vld [vmem:[%s13811_s30 + $0x304] ss:$12 sps:$4 sm:$0xff]  }
 0x322   : > { %v4600_v12 = vadd.f32 %v13986_v17, %v3542_v59  ;;  %v3544_v24 = vpop.f32.mrb[1].mxu0 }
 0x323   : > { %v14565_v13 = vpop.f32.mrb[16].mxu1  ;;  %v3545_v50 = vpop.f32.mrb[2].mxu0 }
 0x324   : > { %16353 = vst [vmem:[#allocation22_spill] sm:$0xff] %v14565_v13  ;;  %5238 = vst [vmem:[%s13524_s27 + $0x400] sm:$0xff] %v4600_v12  ;;  %v4603_v32 = vadd.f32 %v13993_v43, %v3545_v50  ;;  %v7994_v5 = vpop.f32.mrb[17].mxu1  ;;  %v3547_v57 = vpop.f32.mrb[3].mxu0  ;;  %v16355_v12 = vld [vmem:[#allocation24_spill] sm:$0xff] }
 0x325   : > { %v14571_v52 = vpop.f32.mrb[18].mxu1  ;;  %v12571_v50 = vld [vmem:[%s13212_s13 + $0x8a0] ss:$12 sps:$4 sm:$0xff]   ;;  %v12579_v13 = vld [vmem:[%s13212_s13 + $0x8bc] ss:$12 sps:$4 sm:$0xff]  }
 0x326   : > { %16354 = vst [vmem:[#allocation23_spill] sm:$0xff] %v14571_v52  ;;  %5239 = vst [vmem:[%s13524_s27 + $0x408] sm:$0xff] %v4603_v32  ;;  %v7997_v17 = vpop.f32.mrb[19].mxu1  ;;  %3757 = vmatmul.mubr.bf16.gmra.mrb[108].mxu0 %v12565_v19  ;;  %v16356_v52 = vld [vmem:[#allocation25_spill] sm:$0xff] }
 0x327   : > { %3764 = vmatprep.mubr.bf16.mxu0 %v12573_v38  ;;  %v12574_v38 = vld [vmem:[%s13811_s30 + $0x300] ss:$12 sps:$4 sm:$0xff]  }
 0x328   : > { %8207 = vmatmul.mubr.bf16.gmra.mrb[124].mxu1 %v12568_v9 }
 0x329   : > { %v3550_v59 = vpop.f32.mrb[4].mxu0  ;;  %8214 = vmatprep.mubr.bf16.mxu1 %v12576_v42  ;;  %v12582_v42 = vld [vmem:[%s13811_s30 + $0x31c] ss:$12 sps:$4 sm:$0xff]  }
 0x32a   : > { %v4608_v43 = vadd.f32 %v16355_v12, %v3550_v59  ;;  %v3552_v24 = vpop.f32.mrb[5].mxu0 }
 0x32b   : > { %v14577_v5 = vpop.f32.mrb[20].mxu1  ;;  %v3553_v57 = vpop.f32.mrb[6].mxu0  ;;  %v12577_v24 = vld [vmem:[%s13212_s13 + $0x8b8] ss:$12 sps:$4 sm:$0xff]  }
 0x32c   : > { %5240 = vst [vmem:[%s13524_s27 + $0x410] sm:$0xff] %v4608_v43  ;;  %v4611_v32 = vadd.f32 %v16356_v52, %v3553_v57  ;;  %v8002_v17 = vpop.f32.mrb[21].mxu1  ;;  %v3555_v19 = vpop.f32.mrb[7].mxu0 }
 0x32d   : > { %v14583_v9 = vpop.f32.mrb[22].mxu1  ;;  %v12585_v19 = vld [vmem:[%s13212_s13 + $0x8d4] ss:$12 sps:$4 sm:$0xff]  }
 0x32e   : > { %5241 = vst [vmem:[%s13524_s27 + $0x418] sm:$0xff] %v4611_v32  ;;  %v8005_v59 = vpop.f32.mrb[23].mxu1  ;;  %3765 = vmatmul.mubr.bf16.gmra.mrb[112].mxu0 %v12571_v50 }
 0x32f   : > { %3772 = vmatprep.mubr.bf16.mxu0 %v12579_v13  ;;  %v12580_v13 = vld [vmem:[%s13811_s30 + $0x318] ss:$12 sps:$4 sm:$0xff]  }
 0x330   : > { %8215 = vmatmul.mubr.bf16.gmra.mrb[128].mxu1 %v12574_v38 }
 0x331   : > { %v3558_v12 = vpop.f32.mrb[8].mxu0  ;;  %8222 = vmatprep.mubr.bf16.mxu1 %v12582_v42  ;;  %v12588_v42 = vld [vmem:[%s13811_s30 + $0x334] ss:$12 sps:$4 sm:$0xff]  }
 0x332   : > { %v4616_v52 = vadd.f32 %v14002_v7, %v3558_v12  ;;  %v3560_v43 = vpop.f32.mrb[9].mxu0 }
 0x333   : > { %v14589_v57 = vpop.f32.mrb[24].mxu1  ;;  %v3561_v17 = vpop.f32.mrb[10].mxu0 }
 0x334   : > { %16357 = vst [vmem:[#allocation24_spill] sm:$0xff] %v14589_v57  ;;  %5242 = vst [vmem:[%s13524_s27 + $0x420] sm:$0xff] %v4616_v52  ;;  %v4619_v32 = vadd.f32 %v14009_v39, %v3561_v17  ;;  %v8010_v59 = vpop.f32.mrb[25].mxu1  ;;  %v3563_v50 = vpop.f32.mrb[11].mxu0  ;;  %v16359_v52 = vld [vmem:[#allocation26_spill] sm:$0xff] }
 0x335   : > { %v14595_v38 = vpop.f32.mrb[26].mxu1  ;;  %v12583_v17 = vld [vmem:[%s13212_s13 + $0x8d0] ss:$12 sps:$4 sm:$0xff]   ;;  %v12591_v57 = vld [vmem:[%s13212_s13 + $0x8ec] ss:$12 sps:$4 sm:$0xff]  }
 0x336   : > { %16358 = vst [vmem:[#allocation25_spill] sm:$0xff] %v14595_v38  ;;  %5243 = vst [vmem:[%s13524_s27 + $0x428] sm:$0xff] %v4619_v32  ;;  %v8013_v7 = vpop.f32.mrb[27].mxu1  ;;  %3773 = vmatmul.mubr.bf16.gmra.mrb[116].mxu0 %v12577_v24  ;;  %v16360_v38 = vld [vmem:[#allocation27_spill] sm:$0xff] }
 0x337   : > { %3780 = vmatprep.mubr.bf16.mxu0 %v12585_v19  ;;  %v12586_v19 = vld [vmem:[%s13811_s30 + $0x330] ss:$12 sps:$4 sm:$0xff]  }
 0x338   : > { %8223 = vmatmul.mubr.bf16.gmra.mrb[132].mxu1 %v12580_v13 }
 0x339   : > { %v3566_v12 = vpop.f32.mrb[12].mxu0  ;;  %8230 = vmatprep.mubr.bf16.mxu1 %v12588_v42  ;;  %v12594_v42 = vld [vmem:[%s13811_s30 + $0x34c] ss:$12 sps:$4 sm:$0xff]  }
 0x33a   : > { %v4624_v39 = vadd.f32 %v16359_v52, %v3566_v12  ;;  %v3568_v43 = vpop.f32.mrb[13].mxu0 }
 0x33b   : > { %v14601_v59 = vpop.f32.mrb[28].mxu1  ;;  %v3569_v50 = vpop.f32.mrb[14].mxu0  ;;  %v12589_v43 = vld [vmem:[%s13212_s13 + $0x8e8] ss:$12 sps:$4 sm:$0xff]  }
 0x33c   : > { %5244 = vst [vmem:[%s13524_s27 + $0x430] sm:$0xff] %v4624_v39  ;;  %v4627_v32 = vadd.f32 %v16360_v38, %v3569_v50  ;;  %v8018_v7 = vpop.f32.mrb[29].mxu1  ;;  %v3571_v24 = vpop.f32.mrb[15].mxu0 }
 0x33d   : > { %v14607_v13 = vpop.f32.mrb[30].mxu1  ;;  %v12597_v24 = vld [vmem:[%s13212_s13 + $0x904] ss:$12 sps:$4 sm:$0xff]  }
 0x33e   : > { %5245 = vst [vmem:[%s13524_s27 + $0x438] sm:$0xff] %v4627_v32  ;;  %v8021_v12 = vpop.f32.mrb[31].mxu1  ;;  %3781 = vmatmul.mubr.bf16.gmra.mrb[120].mxu0 %v12583_v17 }
 0x33f   : > { %3788 = vmatprep.mubr.bf16.mxu0 %v12591_v57  ;;  %v12592_v57 = vld [vmem:[%s13811_s30 + $0x348] ss:$12 sps:$4 sm:$0xff]  }
 0x340   : > { %8231 = vmatmul.mubr.bf16.gmra.mrb[136].mxu1 %v12586_v19 }
 0x341   : > { %v3574_v52 = vpop.f32.mrb[16].mxu0  ;;  %8238 = vmatprep.mubr.bf16.mxu1 %v12594_v42  ;;  %v12600_v42 = vld [vmem:[%s13811_s30 + $0x364] ss:$12 sps:$4 sm:$0xff]  }
 0x342   : > { %v4632_v38 = vadd.f32 %v14018_v47, %v3574_v52  ;;  %v3576_v39 = vpop.f32.mrb[17].mxu0 }
 0x343   : > { %v14613_v50 = vpop.f32.mrb[32].mxu1  ;;  %v3577_v7 = vpop.f32.mrb[18].mxu0 }
 0x344   : > { %16361 = vst [vmem:[#allocation26_spill] sm:$0xff] %v14613_v50  ;;  %5246 = vst [vmem:[%s13524_s27 + $0x440] sm:$0xff] %v4632_v38  ;;  %v4635_v32 = vadd.f32 %v14025_v0, %v3577_v7  ;;  %v8026_v12 = vpop.f32.mrb[33].mxu1  ;;  %v3579_v17 = vpop.f32.mrb[19].mxu0  ;;  %v16363_v38 = vld [vmem:[#allocation28_spill] sm:$0xff] }
 0x345   : > { %v14619_v19 = vpop.f32.mrb[34].mxu1  ;;  %v12595_v7 = vld [vmem:[%s13212_s13 + $0x900] ss:$12 sps:$4 sm:$0xff]   ;;  %v12603_v50 = vld [vmem:[%s13212_s13 + $0x91c] ss:$12 sps:$4 sm:$0xff]  }
 0x346   : > { %16362 = vst [vmem:[#allocation27_spill] sm:$0xff] %v14619_v19  ;;  %5247 = vst [vmem:[%s13524_s27 + $0x448] sm:$0xff] %v4635_v32  ;;  %v8029_v47 = vpop.f32.mrb[35].mxu1  ;;  %3789 = vmatmul.mubr.bf16.gmra.mrb[124].mxu0 %v12589_v43  ;;  %v16364_v19 = vld [vmem:[#allocation29_spill] sm:$0xff] }
 0x347   : > { %3796 = vmatprep.mubr.bf16.mxu0 %v12597_v24  ;;  %v12598_v24 = vld [vmem:[%s13811_s30 + $0x360] ss:$12 sps:$4 sm:$0xff]  }
 0x348   : > { %8239 = vmatmul.mubr.bf16.gmra.mrb[140].mxu1 %v12592_v57 }
 0x349   : > { %v3582_v52 = vpop.f32.mrb[20].mxu0  ;;  %8246 = vmatprep.mubr.bf16.mxu1 %v12600_v42  ;;  %v12606_v42 = vld [vmem:[%s13811_s30 + $0x37c] ss:$12 sps:$4 sm:$0xff]  }
 0x34a   : > { %v4640_v0 = vadd.f32 %v16363_v38, %v3582_v52  ;;  %v3584_v39 = vpop.f32.mrb[21].mxu0 }
 0x34b   : > { %v14625_v12 = vpop.f32.mrb[36].mxu1  ;;  %v3585_v17 = vpop.f32.mrb[22].mxu0  ;;  %v12601_v39 = vld [vmem:[%s13212_s13 + $0x918] ss:$12 sps:$4 sm:$0xff]  }
 0x34c   : > { %5248 = vst [vmem:[%s13524_s27 + $0x450] sm:$0xff] %v4640_v0  ;;  %v4643_v32 = vadd.f32 %v16364_v19, %v3585_v17  ;;  %v8034_v47 = vpop.f32.mrb[37].mxu1  ;;  %v3587_v43 = vpop.f32.mrb[23].mxu0 }
 0x34d   : > { %v14631_v57 = vpop.f32.mrb[38].mxu1  ;;  %v12609_v43 = vld [vmem:[%s13212_s13 + $0x934] ss:$12 sps:$4 sm:$0xff]  }
 0x34e   : > { %5249 = vst [vmem:[%s13524_s27 + $0x458] sm:$0xff] %v4643_v32  ;;  %v8037_v52 = vpop.f32.mrb[39].mxu1  ;;  %3797 = vmatmul.mubr.bf16.gmra.mrb[128].mxu0 %v12595_v7 }
 0x34f   : > { %3804 = vmatprep.mubr.bf16.mxu0 %v12603_v50  ;;  %v12604_v50 = vld [vmem:[%s13811_s30 + $0x378] ss:$12 sps:$4 sm:$0xff]  }
 0x350   : > { %8247 = vmatmul.mubr.bf16.gmra.mrb[144].mxu1 %v12598_v24 }
 0x351   : > { %v3590_v38 = vpop.f32.mrb[24].mxu0  ;;  %8254 = vmatprep.mubr.bf16.mxu1 %v12606_v42  ;;  %v12612_v42 = vld [vmem:[%s13811_s30 + $0x394] ss:$12 sps:$4 sm:$0xff]  }
 0x352   : > { %v4648_v19 = vadd.f32 %v14034_v34, %v3590_v38  ;;  %v3592_v0 = vpop.f32.mrb[25].mxu0 }
 0x353   : > { %v14637_v17 = vpop.f32.mrb[40].mxu1  ;;  %v3593_v47 = vpop.f32.mrb[26].mxu0 }
 0x354   : > { %16365 = vst [vmem:[#allocation28_spill] sm:$0xff] %v14637_v17  ;;  %5250 = vst [vmem:[%s13524_s27 + $0x460] sm:$0xff] %v4648_v19  ;;  %v4651_v32 = vadd.f32 %v14041_v35, %v3593_v47  ;;  %v8042_v52 = vpop.f32.mrb[41].mxu1  ;;  %v3595_v7 = vpop.f32.mrb[27].mxu0  ;;  %v16367_v19 = vld [vmem:[#allocation30_spill] sm:$0xff] }
 0x355   : > { %v14643_v24 = vpop.f32.mrb[42].mxu1  ;;  %v12607_v47 = vld [vmem:[%s13212_s13 + $0x930] ss:$12 sps:$4 sm:$0xff]   ;;  %v12615_v17 = vld [vmem:[%s13212_s13 + $0x94c] ss:$12 sps:$4 sm:$0xff]  }
 0x356   : > { %16366 = vst [vmem:[#allocation29_spill] sm:$0xff] %v14643_v24  ;;  %5251 = vst [vmem:[%s13524_s27 + $0x468] sm:$0xff] %v4651_v32  ;;  %v8045_v34 = vpop.f32.mrb[43].mxu1  ;;  %3805 = vmatmul.mubr.bf16.gmra.mrb[132].mxu0 %v12601_v39  ;;  %v16368_v24 = vld [vmem:[#allocation31_spill] sm:$0xff] }
 0x357   : > { %3812 = vmatprep.mubr.bf16.mxu0 %v12609_v43  ;;  %v12610_v43 = vld [vmem:[%s13811_s30 + $0x390] ss:$12 sps:$4 sm:$0xff]  }
 0x358   : > { %8255 = vmatmul.mubr.bf16.gmra.mrb[148].mxu1 %v12604_v50 }
 0x359   : > { %v3598_v38 = vpop.f32.mrb[28].mxu0  ;;  %8262 = vmatprep.mubr.bf16.mxu1 %v12612_v42  ;;  %v12618_v42 = vld [vmem:[%s13811_s30 + $0x3ac] ss:$12 sps:$4 sm:$0xff]  }
 0x35a   : > { %v4656_v35 = vadd.f32 %v16367_v19, %v3598_v38  ;;  %v3600_v0 = vpop.f32.mrb[29].mxu0 }
 0x35b   : > { %v14649_v52 = vpop.f32.mrb[44].mxu1  ;;  %v3601_v7 = vpop.f32.mrb[30].mxu0  ;;  %v12613_v0 = vld [vmem:[%s13212_s13 + $0x948] ss:$12 sps:$4 sm:$0xff]  }
 0x35c   : > { %5252 = vst [vmem:[%s13524_s27 + $0x470] sm:$0xff] %v4656_v35  ;;  %v4659_v32 = vadd.f32 %v16368_v24, %v3601_v7  ;;  %v8050_v34 = vpop.f32.mrb[45].mxu1  ;;  %v3603_v39 = vpop.f32.mrb[31].mxu0 }
 0x35d   : > { %v14655_v50 = vpop.f32.mrb[46].mxu1  ;;  %v12621_v39 = vld [vmem:[%s13212_s13 + $0x964] ss:$12 sps:$4 sm:$0xff]  }
 0x35e   : > { %5253 = vst [vmem:[%s13524_s27 + $0x478] sm:$0xff] %v4659_v32  ;;  %v8053_v38 = vpop.f32.mrb[47].mxu1  ;;  %3813 = vmatmul.mubr.bf16.gmra.mrb[136].mxu0 %v12607_v47 }
 0x35f   : > { %3820 = vmatprep.mubr.bf16.mxu0 %v12615_v17  ;;  %v12616_v17 = vld [vmem:[%s13811_s30 + $0x3a8] ss:$12 sps:$4 sm:$0xff]  }
 0x360   : > { %8263 = vmatmul.mubr.bf16.gmra.mrb[152].mxu1 %v12610_v43 }
 0x361   : > { %v3606_v19 = vpop.f32.mrb[32].mxu0  ;;  %8270 = vmatprep.mubr.bf16.mxu1 %v12618_v42  ;;  %v12624_v42 = vld [vmem:[%s13811_s30 + $0x3c4] ss:$12 sps:$4 sm:$0xff]  }
 0x362   : > { %v4664_v24 = vadd.f32 %v14050_v2, %v3606_v19  ;;  %v3608_v35 = vpop.f32.mrb[33].mxu0 }
 0x363   : > { %v14661_v7 = vpop.f32.mrb[48].mxu1  ;;  %v3609_v34 = vpop.f32.mrb[34].mxu0 }
 0x364   : > { %16369 = vst [vmem:[#allocation30_spill] sm:$0xff] %v14661_v7  ;;  %5254 = vst [vmem:[%s13524_s27 + $0x480] sm:$0xff] %v4664_v24  ;;  %v4667_v32 = vadd.f32 %v14057_v30, %v3609_v34  ;;  %v8058_v38 = vpop.f32.mrb[49].mxu1  ;;  %v3611_v47 = vpop.f32.mrb[35].mxu0  ;;  %v16371_v24 = vld [vmem:[#allocation32_spill] sm:$0xff] }
 0x365   : > { %v14667_v43 = vpop.f32.mrb[50].mxu1  ;;  %v12619_v34 = vld [vmem:[%s13212_s13 + $0x960] ss:$12 sps:$4 sm:$0xff]   ;;  %v12627_v7 = vld [vmem:[%s13212_s13 + $0x97c] ss:$12 sps:$4 sm:$0xff]  }
 0x366   : > { %16370 = vst [vmem:[#allocation31_spill] sm:$0xff] %v14667_v43  ;;  %5255 = vst [vmem:[%s13524_s27 + $0x488] sm:$0xff] %v4667_v32  ;;  %v8061_v2 = vpop.f32.mrb[51].mxu1  ;;  %3821 = vmatmul.mubr.bf16.gmra.mrb[140].mxu0 %v12613_v0  ;;  %v16372_v43 = vld [vmem:[#allocation33_spill] sm:$0xff] }
 0x367   : > { %3828 = vmatprep.mubr.bf16.mxu0 %v12621_v39  ;;  %v12622_v39 = vld [vmem:[%s13811_s30 + $0x3c0] ss:$12 sps:$4 sm:$0xff]  }
 0x368   : > { %8271 = vmatmul.mubr.bf16.gmra.mrb[156].mxu1 %v12616_v17 }
 0x369   : > { %v3614_v19 = vpop.f32.mrb[36].mxu0  ;;  %8278 = vmatprep.mubr.bf16.mxu1 %v12624_v42  ;;  %v12630_v42 = vld [vmem:[%s13811_s30 + $0x3dc] ss:$12 sps:$4 sm:$0xff]  }
 0x36a   : > { %v4672_v30 = vadd.f32 %v16371_v24, %v3614_v19  ;;  %v3616_v35 = vpop.f32.mrb[37].mxu0 }
 0x36b   : > { %v14673_v38 = vpop.f32.mrb[52].mxu1  ;;  %v3617_v47 = vpop.f32.mrb[38].mxu0  ;;  %v12625_v35 = vld [vmem:[%s13212_s13 + $0x978] ss:$12 sps:$4 sm:$0xff]  }
 0x36c   : > { %5256 = vst [vmem:[%s13524_s27 + $0x490] sm:$0xff] %v4672_v30  ;;  %v4675_v32 = vadd.f32 %v16372_v43, %v3617_v47  ;;  %v8066_v2 = vpop.f32.mrb[53].mxu1  ;;  %v3619_v0 = vpop.f32.mrb[39].mxu0 }
 0x36d   : > { %v14679_v17 = vpop.f32.mrb[54].mxu1  ;;  %v12633_v0 = vld [vmem:[%s13212_s13 + $0x994] ss:$12 sps:$4 sm:$0xff]  }
 0x36e   : > { %5257 = vst [vmem:[%s13524_s27 + $0x498] sm:$0xff] %v4675_v32  ;;  %v8069_v19 = vpop.f32.mrb[55].mxu1  ;;  %3829 = vmatmul.mubr.bf16.gmra.mrb[144].mxu0 %v12619_v34 }
 0x36f   : > { %3836 = vmatprep.mubr.bf16.mxu0 %v12627_v7  ;;  %v12628_v7 = vld [vmem:[%s13811_s30 + $0x3d8] ss:$12 sps:$4 sm:$0xff]  }
 0x370   : > { %8279 = vmatmul.mubr.bf16.gmra.mrb[160].mxu1 %v12622_v39 }
 0x371   : > { %v3622_v24 = vpop.f32.mrb[40].mxu0  ;;  %8286 = vmatprep.mubr.bf16.mxu1 %v12630_v42  ;;  %v12636_v42 = vld [vmem:[%s13811_s30 + $0x3f4] ss:$12 sps:$4 sm:$0xff]  }
 0x372   : > { %v4680_v43 = vadd.f32 %v14066_v61, %v3622_v24  ;;  %v3624_v30 = vpop.f32.mrb[41].mxu0 }
 0x373   : > { %v14685_v47 = vpop.f32.mrb[56].mxu1  ;;  %v3625_v2 = vpop.f32.mrb[42].mxu0  ;;  %v12631_v30 = vld [vmem:[%s13212_s13 + $0x990] ss:$12 sps:$4 sm:$0xff]  }
 0x374   : > { %5258 = vst [vmem:[%s13524_s27 + $0x4a0] sm:$0xff] %v4680_v43  ;;  %v4683_v32 = vadd.f32 %v14073_v1, %v3625_v2  ;;  %v8074_v19 = vpop.f32.mrb[57].mxu1  ;;  %v3627_v34 = vpop.f32.mrb[43].mxu0 }
 0x375   : > { %v14691_v39 = vpop.f32.mrb[58].mxu1  ;;  %v12639_v34 = vld [vmem:[%s13212_s13 + $0x9ac] ss:$12 sps:$4 sm:$0xff]  }
 0x376   : > { %16373 = vst [vmem:[#allocation32_spill] sm:$0xff] %v14691_v39  ;;  %5259 = vst [vmem:[%s13524_s27 + $0x4a8] sm:$0xff] %v4683_v32  ;;  %v8077_v61 = vpop.f32.mrb[59].mxu1  ;;  %3837 = vmatmul.mubr.bf16.gmra.mrb[148].mxu0 %v12625_v35  ;;  %v16374_v39 = vld [vmem:[#allocation34_spill] sm:$0xff] }
 0x377   : > { %3844 = vmatprep.mubr.bf16.mxu0 %v12633_v0  ;;  %v12634_v0 = vld [vmem:[%s13811_s30 + $0x3f0] ss:$12 sps:$4 sm:$0xff]  }
 0x378   : > { %8287 = vmatmul.mubr.bf16.gmra.mrb[164].mxu1 %v12628_v7 }
 0x379   : > { %v3630_v24 = vpop.f32.mrb[44].mxu0  ;;  %8294 = vmatprep.mubr.bf16.mxu1 %v12636_v42  ;;  %v12642_v42 = vld [vmem:[%s13811_s30 + $0x40c] ss:$12 sps:$4 sm:$0xff]  }
 0x37a   : > { %v4688_v1 = vadd.f32 %v14062_v22, %v3630_v24  ;;  %v3632_v43 = vpop.f32.mrb[45].mxu0 }
 0x37b   : > { %v14697_v2 = vpop.f32.mrb[60].mxu1  ;;  %v3633_v19 = vpop.f32.mrb[46].mxu0  ;;  %v12637_v43 = vld [vmem:[%s13212_s13 + $0x9a8] ss:$12 sps:$4 sm:$0xff]  }
 0x37c   : > { %5260 = vst [vmem:[%s13524_s27 + $0x4b0] sm:$0xff] %v4688_v1  ;;  %v4691_v32 = vadd.f32 %v16374_v39, %v3633_v19  ;;  %v8082_v61 = vpop.f32.mrb[61].mxu1  ;;  %v3635_v35 = vpop.f32.mrb[47].mxu0 }
 0x37d   : > { %v14703_v7 = vpop.f32.mrb[62].mxu1  ;;  %v12645_v35 = vld [vmem:[%s13212_s13 + $0x9c4] ss:$12 sps:$4 sm:$0xff]  }
 0x37e   : > { %5261 = vst [vmem:[%s13524_s27 + $0x4b8] sm:$0xff] %v4691_v32  ;;  %v8085_v22 = vpop.f32.mrb[63].mxu1  ;;  %3845 = vmatmul.mubr.bf16.gmra.mrb[152].mxu0 %v12631_v30 }
 0x37f   : > { %3852 = vmatprep.mubr.bf16.mxu0 %v12639_v34  ;;  %v12640_v34 = vld [vmem:[%s13811_s30 + $0x408] ss:$12 sps:$4 sm:$0xff]  }
 0x380   : > { %8295 = vmatmul.mubr.bf16.gmra.mrb[168].mxu1 %v12634_v0 }
 0x381   : > { %v3638_v24 = vpop.f32.mrb[48].mxu0  ;;  %8302 = vmatprep.mubr.bf16.mxu1 %v12642_v42  ;;  %v12648_v42 = vld [vmem:[%s13811_s30 + $0x424] ss:$12 sps:$4 sm:$0xff]  }
 0x382   : > { %v4696_v39 = vadd.f32 %v14088_v8, %v3638_v24  ;;  %v3640_v1 = vpop.f32.mrb[49].mxu0 }
 0x383   : > { %v14709_v19 = vpop.f32.mrb[64].mxu1  ;;  %v3641_v61 = vpop.f32.mrb[50].mxu0 }
 0x384   : > { %16375 = vst [vmem:[#allocation33_spill] sm:$0xff] %v14709_v19  ;;  %5262 = vst [vmem:[%s13524_s27 + $0x4c0] sm:$0xff] %v4696_v39  ;;  %v4699_v32 = vadd.f32 %v14095_v21, %v3641_v61  ;;  %v8090_v22 = vpop.f32.mrb[65].mxu1  ;;  %v3643_v30 = vpop.f32.mrb[51].mxu0  ;;  %v16377_v39 = vld [vmem:[#allocation35_spill] sm:$0xff] }
 0x385   : > { %v14715_v0 = vpop.f32.mrb[66].mxu1  ;;  %v12643_v61 = vld [vmem:[%s13212_s13 + $0x9c0] ss:$12 sps:$4 sm:$0xff]   ;;  %v12651_v19 = vld [vmem:[%s13212_s13 + $0x9dc] ss:$12 sps:$4 sm:$0xff]  }
 0x386   : > { %16376 = vst [vmem:[#allocation34_spill] sm:$0xff] %v14715_v0  ;;  %5263 = vst [vmem:[%s13524_s27 + $0x4c8] sm:$0xff] %v4699_v32  ;;  %v8093_v8 = vpop.f32.mrb[67].mxu1  ;;  %3853 = vmatmul.mubr.bf16.gmra.mrb[156].mxu0 %v12637_v43  ;;  %v16378_v0 = vld [vmem:[#allocation36_spill] sm:$0xff] }
 0x387   : > { %3860 = vmatprep.mubr.bf16.mxu0 %v12645_v35  ;;  %v12646_v35 = vld [vmem:[%s13811_s30 + $0x420] ss:$12 sps:$4 sm:$0xff]  }
 0x388   : > { %8303 = vmatmul.mubr.bf16.gmra.mrb[172].mxu1 %v12640_v34 }
 0x389   : > { %v3646_v24 = vpop.f32.mrb[52].mxu0  ;;  %8310 = vmatprep.mubr.bf16.mxu1 %v12648_v42  ;;  %v12654_v42 = vld [vmem:[%s13811_s30 + $0x43c] ss:$12 sps:$4 sm:$0xff]  }
 0x38a   : > { %v4704_v21 = vadd.f32 %v16377_v39, %v3646_v24  ;;  %v3648_v1 = vpop.f32.mrb[53].mxu0 }
 0x38b   : > { %v14721_v22 = vpop.f32.mrb[68].mxu1  ;;  %v3649_v30 = vpop.f32.mrb[54].mxu0  ;;  %v12649_v1 = vld [vmem:[%s13212_s13 + $0x9d8] ss:$12 sps:$4 sm:$0xff]  }
 0x38c   : > { %5264 = vst [vmem:[%s13524_s27 + $0x4d0] sm:$0xff] %v4704_v21  ;;  %v4707_v32 = vadd.f32 %v16378_v0, %v3649_v30  ;;  %v8098_v8 = vpop.f32.mrb[69].mxu1  ;;  %v3651_v43 = vpop.f32.mrb[55].mxu0 }
 0x38d   : > { %v14727_v34 = vpop.f32.mrb[70].mxu1  ;;  %v12657_v43 = vld [vmem:[%s13212_s13 + $0x9f4] ss:$12 sps:$4 sm:$0xff]  }
 0x38e   : > { %5265 = vst [vmem:[%s13524_s27 + $0x4d8] sm:$0xff] %v4707_v32  ;;  %v8101_v24 = vpop.f32.mrb[71].mxu1  ;;  %3861 = vmatmul.mubr.bf16.gmra.mrb[160].mxu0 %v12643_v61 }
 0x38f   : > { %3868 = vmatprep.mubr.bf16.mxu0 %v12651_v19  ;;  %v12652_v19 = vld [vmem:[%s13811_s30 + $0x438] ss:$12 sps:$4 sm:$0xff]  }
 0x390   : > { %8311 = vmatmul.mubr.bf16.gmra.mrb[176].mxu1 %v12646_v35 }
 0x391   : > { %v3654_v39 = vpop.f32.mrb[56].mxu0  ;;  %8318 = vmatprep.mubr.bf16.mxu1 %v12654_v42  ;;  %v12660_v42 = vld [vmem:[%s13811_s30 + $0x454] ss:$12 sps:$4 sm:$0xff]  }
 0x392   : > { %v4712_v0 = vadd.f32 %v14110_v36, %v3654_v39  ;;  %v3656_v21 = vpop.f32.mrb[57].mxu0 }
 0x393   : > { %v14733_v30 = vpop.f32.mrb[72].mxu1  ;;  %v3657_v8 = vpop.f32.mrb[58].mxu0 }
 0x394   : > { %16379 = vst [vmem:[#allocation35_spill] sm:$0xff] %v14733_v30  ;;  %5266 = vst [vmem:[%s13524_s27 + $0x4e0] sm:$0xff] %v4712_v0  ;;  %v4715_v32 = vadd.f32 %v14117_v49, %v3657_v8  ;;  %v8106_v24 = vpop.f32.mrb[73].mxu1  ;;  %v3659_v61 = vpop.f32.mrb[59].mxu0  ;;  %v16381_v0 = vld [vmem:[#allocation37_spill] sm:$0xff] }
 0x395   : > { %v14739_v35 = vpop.f32.mrb[74].mxu1  ;;  %v12655_v8 = vld [vmem:[%s13212_s13 + $0x9f0] ss:$12 sps:$4 sm:$0xff]   ;;  %v12663_v30 = vld [vmem:[%s13212_s13 + $0xa0c] ss:$12 sps:$4 sm:$0xff]  }
 0x396   : > { %16380 = vst [vmem:[#allocation36_spill] sm:$0xff] %v14739_v35  ;;  %5267 = vst [vmem:[%s13524_s27 + $0x4e8] sm:$0xff] %v4715_v32  ;;  %v8109_v36 = vpop.f32.mrb[75].mxu1  ;;  %3869 = vmatmul.mubr.bf16.gmra.mrb[164].mxu0 %v12649_v1  ;;  %v16382_v35 = vld [vmem:[#allocation38_spill] sm:$0xff] }
 0x397   : > { %3876 = vmatprep.mubr.bf16.mxu0 %v12657_v43  ;;  %v12658_v43 = vld [vmem:[%s13811_s30 + $0x450] ss:$12 sps:$4 sm:$0xff]  }
 0x398   : > { %8319 = vmatmul.mubr.bf16.gmra.mrb[180].mxu1 %v12652_v19 }
 0x399   : > { %v3662_v39 = vpop.f32.mrb[60].mxu0  ;;  %8326 = vmatprep.mubr.bf16.mxu1 %v12660_v42  ;;  %v12666_v42 = vld [vmem:[%s13811_s30 + $0x46c] ss:$12 sps:$4 sm:$0xff]  }
 0x39a   : > { %v4720_v49 = vadd.f32 %v16381_v0, %v3662_v39  ;;  %v3664_v21 = vpop.f32.mrb[61].mxu0 }
 0x39b   : > { %v14745_v24 = vpop.f32.mrb[76].mxu1  ;;  %v3665_v61 = vpop.f32.mrb[62].mxu0  ;;  %v12661_v21 = vld [vmem:[%s13212_s13 + $0xa08] ss:$12 sps:$4 sm:$0xff]  }
 0x39c   : > { %5268 = vst [vmem:[%s13524_s27 + $0x4f0] sm:$0xff] %v4720_v49  ;;  %v4723_v32 = vadd.f32 %v16382_v35, %v3665_v61  ;;  %v8114_v36 = vpop.f32.mrb[77].mxu1  ;;  %v3667_v1 = vpop.f32.mrb[63].mxu0 }
 0x39d   : > { %v14751_v19 = vpop.f32.mrb[78].mxu1  ;;  %v12669_v1 = vld [vmem:[%s13212_s13 + $0xa24] ss:$12 sps:$4 sm:$0xff]  }
 0x39e   : > { %5269 = vst [vmem:[%s13524_s27 + $0x4f8] sm:$0xff] %v4723_v32  ;;  %v8117_v39 = vpop.f32.mrb[79].mxu1  ;;  %3877 = vmatmul.mubr.bf16.gmra.mrb[168].mxu0 %v12655_v8 }
 0x39f   : > { %3884 = vmatprep.mubr.bf16.mxu0 %v12663_v30  ;;  %v12664_v30 = vld [vmem:[%s13811_s30 + $0x468] ss:$12 sps:$4 sm:$0xff]  }
 0x3a0   : > { %8327 = vmatmul.mubr.bf16.gmra.mrb[184].mxu1 %v12658_v43 }
 0x3a1   : > { %v3670_v0 = vpop.f32.mrb[64].mxu0  ;;  %8334 = vmatprep.mubr.bf16.mxu1 %v12666_v42  ;;  %v12672_v42 = vld [vmem:[%s13811_s30 + $0x484] ss:$12 sps:$4 sm:$0xff]  }
 0x3a2   : > { %v4728_v35 = vadd.f32 %v14132_v3, %v3670_v0  ;;  %v3672_v49 = vpop.f32.mrb[65].mxu0 }
 0x3a3   : > { %v14757_v61 = vpop.f32.mrb[80].mxu1  ;;  %v3673_v36 = vpop.f32.mrb[66].mxu0 }
 0x3a4   : > { %16383 = vst [vmem:[#allocation37_spill] sm:$0xff] %v14757_v61  ;;  %5270 = vst [vmem:[%s13524_s27 + $0x500] sm:$0xff] %v4728_v35  ;;  %v4731_v32 = vadd.f32 %v14139_v11, %v3673_v36  ;;  %v8122_v39 = vpop.f32.mrb[81].mxu1  ;;  %v3675_v8 = vpop.f32.mrb[67].mxu0  ;;  %v16385_v35 = vld [vmem:[#allocation39_spill] sm:$0xff] }
 0x3a5   : > { %v14763_v43 = vpop.f32.mrb[82].mxu1  ;;  %v12667_v36 = vld [vmem:[%s13212_s13 + $0xa20] ss:$12 sps:$4 sm:$0xff]   ;;  %v12675_v61 = vld [vmem:[%s13212_s13 + $0xa3c] ss:$12 sps:$4 sm:$0xff]  }
 0x3a6   : > { %16384 = vst [vmem:[#allocation38_spill] sm:$0xff] %v14763_v43  ;;  %5271 = vst [vmem:[%s13524_s27 + $0x508] sm:$0xff] %v4731_v32  ;;  %v8125_v3 = vpop.f32.mrb[83].mxu1  ;;  %3885 = vmatmul.mubr.bf16.gmra.mrb[172].mxu0 %v12661_v21  ;;  %v16386_v43 = vld [vmem:[#allocation40_spill] sm:$0xff] }
 0x3a7   : > { %3892 = vmatprep.mubr.bf16.mxu0 %v12669_v1  ;;  %v12670_v1 = vld [vmem:[%s13811_s30 + $0x480] ss:$12 sps:$4 sm:$0xff]  }
 0x3a8   : > { %8335 = vmatmul.mubr.bf16.gmra.mrb[188].mxu1 %v12664_v30 }
 0x3a9   : > { %v3678_v0 = vpop.f32.mrb[68].mxu0  ;;  %8342 = vmatprep.mubr.bf16.mxu1 %v12672_v42  ;;  %v12678_v42 = vld [vmem:[%s13811_s30 + $0x49c] ss:$12 sps:$4 sm:$0xff]  }
 0x3aa   : > { %v4736_v11 = vadd.f32 %v16385_v35, %v3678_v0  ;;  %v3680_v49 = vpop.f32.mrb[69].mxu0 }
 0x3ab   : > { %v14769_v39 = vpop.f32.mrb[84].mxu1  ;;  %v3681_v8 = vpop.f32.mrb[70].mxu0  ;;  %v12673_v49 = vld [vmem:[%s13212_s13 + $0xa38] ss:$12 sps:$4 sm:$0xff]  }
 0x3ac   : > { %5272 = vst [vmem:[%s13524_s27 + $0x510] sm:$0xff] %v4736_v11  ;;  %v4739_v32 = vadd.f32 %v16386_v43, %v3681_v8  ;;  %v8130_v3 = vpop.f32.mrb[85].mxu1  ;;  %v3683_v21 = vpop.f32.mrb[71].mxu0 }
 0x3ad   : > { %v14775_v30 = vpop.f32.mrb[86].mxu1  ;;  %v12681_v21 = vld [vmem:[%s13212_s13 + $0xa54] ss:$12 sps:$4 sm:$0xff]  }
 0x3ae   : > { %16387 = vst [vmem:[#allocation39_spill] sm:$0xff] %v14775_v30  ;;  %5273 = vst [vmem:[%s13524_s27 + $0x518] sm:$0xff] %v4739_v32  ;;  %v8133_v0 = vpop.f32.mrb[87].mxu1  ;;  %3893 = vmatmul.mubr.bf16.gmra.mrb[176].mxu0 %v12667_v36  ;;  %v16389_v30 = vld [vmem:[#allocation43_spill] sm:$0xff] }
 0x3af   : > { %3900 = vmatprep.mubr.bf16.mxu0 %v12675_v61  ;;  %v12676_v61 = vld [vmem:[%s13811_s30 + $0x498] ss:$12 sps:$4 sm:$0xff]  }
 0x3b0   : > { %8343 = vmatmul.mubr.bf16.gmra.mrb[192].mxu1 %v12670_v1 }
 0x3b1   : > { %v3686_v35 = vpop.f32.mrb[72].mxu0  ;;  %8350 = vmatprep.mubr.bf16.mxu1 %v12678_v42  ;;  %v12684_v42 = vld [vmem:[%s13811_s30 + $0x4b4] ss:$12 sps:$4 sm:$0xff]  }
 0x3b2   : > { %v4744_v43 = vadd.f32 %v14154_v45, %v3686_v35  ;;  %v3688_v11 = vpop.f32.mrb[73].mxu0 }
 0x3b3   : > { %v14781_v8 = vpop.f32.mrb[88].mxu1  ;;  %v3689_v3 = vpop.f32.mrb[74].mxu0 }
 0x3b4   : > { %16388 = vst [vmem:[#allocation40_spill] sm:$0xff] %v14781_v8  ;;  %5274 = vst [vmem:[%s13524_s27 + $0x520] sm:$0xff] %v4744_v43  ;;  %v4747_v32 = vadd.f32 %v16389_v30, %v3689_v3  ;;  %v8138_v0 = vpop.f32.mrb[89].mxu1  ;;  %v3691_v36 = vpop.f32.mrb[75].mxu0  ;;  %v16391_v43 = vld [vmem:[#allocation41_spill] sm:$0xff] }
 0x3b5   : > { %v14787_v1 = vpop.f32.mrb[90].mxu1  ;;  %v12679_v3 = vld [vmem:[%s13212_s13 + $0xa50] ss:$12 sps:$4 sm:$0xff]   ;;  %v12687_v8 = vld [vmem:[%s13212_s13 + $0xa6c] ss:$12 sps:$4 sm:$0xff]  }
 0x3b6   : > { %16390 = vst [vmem:[#allocation43_spill] sm:$0xff] %v14787_v1  ;;  %5275 = vst [vmem:[%s13524_s27 + $0x528] sm:$0xff] %v4747_v32  ;;  %v8141_v45 = vpop.f32.mrb[91].mxu1  ;;  %3901 = vmatmul.mubr.bf16.gmra.mrb[180].mxu0 %v12673_v49  ;;  %v16392_v1 = vld [vmem:[#allocation42_spill] sm:$0xff] }
 0x3b7   : > { %3908 = vmatprep.mubr.bf16.mxu0 %v12681_v21  ;;  %v12682_v21 = vld [vmem:[%s13811_s30 + $0x4b0] ss:$12 sps:$4 sm:$0xff]  }
 0x3b8   : > { %8351 = vmatmul.mubr.bf16.gmra.mrb[196].mxu1 %v12676_v61 }
 0x3b9   : > { %v3694_v35 = vpop.f32.mrb[76].mxu0  ;;  %8358 = vmatprep.mubr.bf16.mxu1 %v12684_v42  ;;  %v12690_v42 = vld [vmem:[%s13811_s30 + $0x4cc] ss:$12 sps:$4 sm:$0xff]  }
 0x3ba   : > { %v4752_v30 = vadd.f32 %v16391_v43, %v3694_v35  ;;  %v3696_v11 = vpop.f32.mrb[77].mxu0 }
 0x3bb   : > { %v14793_v0 = vpop.f32.mrb[92].mxu1  ;;  %v3697_v36 = vpop.f32.mrb[78].mxu0  ;;  %v12685_v11 = vld [vmem:[%s13212_s13 + $0xa68] ss:$12 sps:$4 sm:$0xff]  }
 0x3bc   : > { %5276 = vst [vmem:[%s13524_s27 + $0x530] sm:$0xff] %v4752_v30  ;;  %v4755_v32 = vadd.f32 %v16392_v1, %v3697_v36  ;;  %v8146_v45 = vpop.f32.mrb[93].mxu1  ;;  %v3699_v49 = vpop.f32.mrb[79].mxu0 }
 0x3bd   : > { %v14799_v61 = vpop.f32.mrb[94].mxu1  ;;  %v12693_v49 = vld [vmem:[%s13212_s13 + $0xa84] ss:$12 sps:$4 sm:$0xff]  }
 0x3be   : > { %5277 = vst [vmem:[%s13524_s27 + $0x538] sm:$0xff] %v4755_v32  ;;  %v8149_v35 = vpop.f32.mrb[95].mxu1  ;;  %3909 = vmatmul.mubr.bf16.gmra.mrb[184].mxu0 %v12679_v3 }
 0x3bf   : > { %3916 = vmatprep.mubr.bf16.mxu0 %v12687_v8  ;;  %v12688_v8 = vld [vmem:[%s13811_s30 + $0x4c8] ss:$12 sps:$4 sm:$0xff]  }
 0x3c0   : > { %8359 = vmatmul.mubr.bf16.gmra.mrb[200].mxu1 %v12682_v21 }
 0x3c1   : > { %v3702_v43 = vpop.f32.mrb[80].mxu0  ;;  %8366 = vmatprep.mubr.bf16.mxu1 %v12690_v42  ;;  %v12696_v42 = vld [vmem:[%s13811_s30 + $0x4e4] ss:$12 sps:$4 sm:$0xff]  }
 0x3c2   : > { %v4760_v1 = vadd.f32 %v14170_v23, %v3702_v43  ;;  %v3704_v30 = vpop.f32.mrb[81].mxu0 }
 0x3c3   : > { %v14805_v36 = vpop.f32.mrb[96].mxu1  ;;  %v3705_v45 = vpop.f32.mrb[82].mxu0 }
 0x3c4   : > { %16393 = vst [vmem:[#allocation41_spill] sm:$0xff] %v14805_v36  ;;  %5278 = vst [vmem:[%s13524_s27 + $0x540] sm:$0xff] %v4760_v1  ;;  %v4763_v32 = vadd.f32 %v14177_v28, %v3705_v45  ;;  %v8154_v35 = vpop.f32.mrb[97].mxu1  ;;  %v3707_v3 = vpop.f32.mrb[83].mxu0  ;;  %v16395_v1 = vld [vmem:[#allocation44_spill] sm:$0xff] }
 0x3c5   : > { %v14811_v21 = vpop.f32.mrb[98].mxu1  ;;  %v12691_v45 = vld [vmem:[%s13212_s13 + $0xa80] ss:$12 sps:$4 sm:$0xff]   ;;  %v12699_v36 = vld [vmem:[%s13212_s13 + $0xa9c] ss:$12 sps:$4 sm:$0xff]  }
 0x3c6   : > { %16394 = vst [vmem:[#allocation42_spill] sm:$0xff] %v14811_v21  ;;  %5279 = vst [vmem:[%s13524_s27 + $0x548] sm:$0xff] %v4763_v32  ;;  %v8157_v23 = vpop.f32.mrb[99].mxu1  ;;  %3917 = vmatmul.mubr.bf16.gmra.mrb[188].mxu0 %v12685_v11  ;;  %v16396_v21 = vld [vmem:[#allocation45_spill] sm:$0xff] }
 0x3c7   : > { %3924 = vmatprep.mubr.bf16.mxu0 %v12693_v49  ;;  %v12694_v49 = vld [vmem:[%s13811_s30 + $0x4e0] ss:$12 sps:$4 sm:$0xff]  }
 0x3c8   : > { %8367 = vmatmul.mubr.bf16.gmra.mrb[204].mxu1 %v12688_v8 }
 0x3c9   : > { %v3710_v43 = vpop.f32.mrb[84].mxu0  ;;  %8374 = vmatprep.mubr.bf16.mxu1 %v12696_v42  ;;  %v12702_v42 = vld [vmem:[%s13811_s30 + $0x4fc] ss:$12 sps:$4 sm:$0xff]  }
 0x3ca   : > { %v4768_v28 = vadd.f32 %v16395_v1, %v3710_v43  ;;  %v3712_v30 = vpop.f32.mrb[85].mxu0 }
 0x3cb   : > { %v14817_v35 = vpop.f32.mrb[100].mxu1  ;;  %v3713_v3 = vpop.f32.mrb[86].mxu0  ;;  %v12697_v30 = vld [vmem:[%s13212_s13 + $0xa98] ss:$12 sps:$4 sm:$0xff]  }
 0x3cc   : > { %5280 = vst [vmem:[%s13524_s27 + $0x550] sm:$0xff] %v4768_v28  ;;  %v4771_v32 = vadd.f32 %v16396_v21, %v3713_v3  ;;  %v8162_v23 = vpop.f32.mrb[101].mxu1  ;;  %v3715_v11 = vpop.f32.mrb[87].mxu0 }
 0x3cd   : > { %v14823_v8 = vpop.f32.mrb[102].mxu1  ;;  %v12705_v11 = vld [vmem:[%s13212_s13 + $0xab4] ss:$12 sps:$4 sm:$0xff]  }
 0x3ce   : > { %5281 = vst [vmem:[%s13524_s27 + $0x558] sm:$0xff] %v4771_v32  ;;  %v8165_v43 = vpop.f32.mrb[103].mxu1  ;;  %3925 = vmatmul.mubr.bf16.gmra.mrb[192].mxu0 %v12691_v45 }
 0x3cf   : > { %3932 = vmatprep.mubr.bf16.mxu0 %v12699_v36  ;;  %v12700_v36 = vld [vmem:[%s13811_s30 + $0x4f8] ss:$12 sps:$4 sm:$0xff]  }
 0x3d0   : > { %8375 = vmatmul.mubr.bf16.gmra.mrb[208].mxu1 %v12694_v49 }
 0x3d1   : > { %v3718_v1 = vpop.f32.mrb[88].mxu0  ;;  %8382 = vmatprep.mubr.bf16.mxu1 %v12702_v42  ;;  %v12708_v42 = vld [vmem:[%s13811_s30 + $0x514] ss:$12 sps:$4 sm:$0xff]  }
 0x3d2   : > { %v4776_v21 = vadd.f32 %v14186_v63, %v3718_v1  ;;  %v3720_v28 = vpop.f32.mrb[89].mxu0 }
 0x3d3   : > { %v14829_v3 = vpop.f32.mrb[104].mxu1  ;;  %v3721_v23 = vpop.f32.mrb[90].mxu0 }
 0x3d4   : > { %16397 = vst [vmem:[#allocation44_spill] sm:$0xff] %v14829_v3  ;;  %5282 = vst [vmem:[%s13524_s27 + $0x560] sm:$0xff] %v4776_v21  ;;  %v4779_v32 = vadd.f32 %v14193_v44, %v3721_v23  ;;  %v8170_v43 = vpop.f32.mrb[105].mxu1  ;;  %v3723_v45 = vpop.f32.mrb[91].mxu0  ;;  %v16399_v21 = vld [vmem:[#allocation46_spill] sm:$0xff] }
 0x3d5   : > { %v14835_v49 = vpop.f32.mrb[106].mxu1  ;;  %v12703_v23 = vld [vmem:[%s13212_s13 + $0xab0] ss:$12 sps:$4 sm:$0xff]   ;;  %v12711_v3 = vld [vmem:[%s13212_s13 + $0xacc] ss:$12 sps:$4 sm:$0xff]  }
 0x3d6   : > { %16398 = vst [vmem:[#allocation45_spill] sm:$0xff] %v14835_v49  ;;  %5283 = vst [vmem:[%s13524_s27 + $0x568] sm:$0xff] %v4779_v32  ;;  %v8173_v63 = vpop.f32.mrb[107].mxu1  ;;  %3933 = vmatmul.mubr.bf16.gmra.mrb[196].mxu0 %v12697_v30  ;;  %v16400_v49 = vld [vmem:[#allocation47_spill] sm:$0xff] }
 0x3d7   : > { %3940 = vmatprep.mubr.bf16.mxu0 %v12705_v11  ;;  %v12706_v11 = vld [vmem:[%s13811_s30 + $0x510] ss:$12 sps:$4 sm:$0xff]  }
 0x3d8   : > { %8383 = vmatmul.mubr.bf16.gmra.mrb[212].mxu1 %v12700_v36 }
 0x3d9   : > { %v3726_v1 = vpop.f32.mrb[92].mxu0  ;;  %8390 = vmatprep.mubr.bf16.mxu1 %v12708_v42  ;;  %v12714_v42 = vld [vmem:[%s13811_s30 + $0x52c] ss:$12 sps:$4 sm:$0xff]  }
 0x3da   : > { %v4784_v44 = vadd.f32 %v16399_v21, %v3726_v1  ;;  %v3728_v28 = vpop.f32.mrb[93].mxu0 }
 0x3db   : > { %v14841_v43 = vpop.f32.mrb[108].mxu1  ;;  %v3729_v45 = vpop.f32.mrb[94].mxu0  ;;  %v12709_v28 = vld [vmem:[%s13212_s13 + $0xac8] ss:$12 sps:$4 sm:$0xff]  }
 0x3dc   : > { %5284 = vst [vmem:[%s13524_s27 + $0x570] sm:$0xff] %v4784_v44  ;;  %v4787_v32 = vadd.f32 %v16400_v49, %v3729_v45  ;;  %v8178_v63 = vpop.f32.mrb[109].mxu1  ;;  %v3731_v30 = vpop.f32.mrb[95].mxu0 }
 0x3dd   : > { %v14847_v36 = vpop.f32.mrb[110].mxu1  ;;  %v12717_v30 = vld [vmem:[%s13212_s13 + $0xae4] ss:$12 sps:$4 sm:$0xff]  }
 0x3de   : > { %5285 = vst [vmem:[%s13524_s27 + $0x578] sm:$0xff] %v4787_v32  ;;  %v8181_v1 = vpop.f32.mrb[111].mxu1  ;;  %3941 = vmatmul.mubr.bf16.gmra.mrb[200].mxu0 %v12703_v23 }
 0x3df   : > { %3948 = vmatprep.mubr.bf16.mxu0 %v12711_v3  ;;  %v12712_v3 = vld [vmem:[%s13811_s30 + $0x528] ss:$12 sps:$4 sm:$0xff]  }
 0x3e0   : > { %8391 = vmatmul.mubr.bf16.gmra.mrb[216].mxu1 %v12706_v11 }
 0x3e1   : > { %v3734_v21 = vpop.f32.mrb[96].mxu0  ;;  %8398 = vmatprep.mubr.bf16.mxu1 %v12714_v42  ;;  %v12720_v42 = vld [vmem:[%s13811_s30 + $0x544] ss:$12 sps:$4 sm:$0xff]  }
 0x3e2   : > { %v4792_v49 = vadd.f32 %v14202_v56, %v3734_v21  ;;  %v3736_v44 = vpop.f32.mrb[97].mxu0 }
 0x3e3   : > { %v14853_v45 = vpop.f32.mrb[112].mxu1  ;;  %v3737_v63 = vpop.f32.mrb[98].mxu0 }
 0x3e4   : > { %16401 = vst [vmem:[#allocation46_spill] sm:$0xff] %v14853_v45  ;;  %5286 = vst [vmem:[%s13524_s27 + $0x580] sm:$0xff] %v4792_v49  ;;  %v4795_v32 = vadd.f32 %v14209_v14, %v3737_v63  ;;  %v8186_v1 = vpop.f32.mrb[113].mxu1  ;;  %v3739_v23 = vpop.f32.mrb[99].mxu0  ;;  %v16403_v49 = vld [vmem:[#allocation48_spill] sm:$0xff] }
 0x3e5   : > { %v14859_v11 = vpop.f32.mrb[114].mxu1  ;;  %v12715_v63 = vld [vmem:[%s13212_s13 + $0xae0] ss:$12 sps:$4 sm:$0xff]   ;;  %v12723_v45 = vld [vmem:[%s13212_s13 + $0xafc] ss:$12 sps:$4 sm:$0xff]  }
 0x3e6   : > { %16402 = vst [vmem:[#allocation47_spill] sm:$0xff] %v14859_v11  ;;  %5287 = vst [vmem:[%s13524_s27 + $0x588] sm:$0xff] %v4795_v32  ;;  %v8189_v56 = vpop.f32.mrb[115].mxu1  ;;  %3949 = vmatmul.mubr.bf16.gmra.mrb[204].mxu0 %v12709_v28  ;;  %v16404_v11 = vld [vmem:[#allocation49_spill] sm:$0xff] }
 0x3e7   : > { %3956 = vmatprep.mubr.bf16.mxu0 %v12717_v30  ;;  %v12718_v30 = vld [vmem:[%s13811_s30 + $0x540] ss:$12 sps:$4 sm:$0xff]  }
 0x3e8   : > { %8399 = vmatmul.mubr.bf16.gmra.mrb[220].mxu1 %v12712_v3 }
 0x3e9   : > { %v3742_v21 = vpop.f32.mrb[100].mxu0  ;;  %8406 = vmatprep.mubr.bf16.mxu1 %v12720_v42  ;;  %v12726_v42 = vld [vmem:[%s13811_s30 + $0x55c] ss:$12 sps:$4 sm:$0xff]  }
 0x3ea   : > { %v4800_v14 = vadd.f32 %v16403_v49, %v3742_v21  ;;  %v3744_v44 = vpop.f32.mrb[101].mxu0 }
 0x3eb   : > { %v14865_v1 = vpop.f32.mrb[116].mxu1  ;;  %v3745_v23 = vpop.f32.mrb[102].mxu0  ;;  %v12721_v44 = vld [vmem:[%s13212_s13 + $0xaf8] ss:$12 sps:$4 sm:$0xff]  }
 0x3ec   : > { %5288 = vst [vmem:[%s13524_s27 + $0x590] sm:$0xff] %v4800_v14  ;;  %v4803_v32 = vadd.f32 %v16404_v11, %v3745_v23  ;;  %v8194_v56 = vpop.f32.mrb[117].mxu1  ;;  %v3747_v28 = vpop.f32.mrb[103].mxu0 }
 0x3ed   : > { %v14871_v3 = vpop.f32.mrb[118].mxu1  ;;  %v12729_v28 = vld [vmem:[%s13212_s13 + $0xb14] ss:$12 sps:$4 sm:$0xff]  }
 0x3ee   : > { %5289 = vst [vmem:[%s13524_s27 + $0x598] sm:$0xff] %v4803_v32  ;;  %v8197_v21 = vpop.f32.mrb[119].mxu1  ;;  %3957 = vmatmul.mubr.bf16.gmra.mrb[208].mxu0 %v12715_v63 }
 0x3ef   : > { %3964 = vmatprep.mubr.bf16.mxu0 %v12723_v45  ;;  %v12724_v45 = vld [vmem:[%s13811_s30 + $0x558] ss:$12 sps:$4 sm:$0xff]  }
 0x3f0   : > { %8407 = vmatmul.mubr.bf16.gmra.mrb[224].mxu1 %v12718_v30 }
 0x3f1   : > { %v3750_v49 = vpop.f32.mrb[104].mxu0  ;;  %8414 = vmatprep.mubr.bf16.mxu1 %v12726_v42  ;;  %v12732_v42 = vld [vmem:[%s13811_s30 + $0x574] ss:$12 sps:$4 sm:$0xff]  }
 0x3f2   : > { %v4808_v11 = vadd.f32 %v14218_v20, %v3750_v49  ;;  %v3752_v14 = vpop.f32.mrb[105].mxu0 }
 0x3f3   : > { %v14877_v23 = vpop.f32.mrb[120].mxu1  ;;  %v3753_v56 = vpop.f32.mrb[106].mxu0 }
 0x3f4   : > { %16405 = vst [vmem:[#allocation48_spill] sm:$0xff] %v14877_v23  ;;  %5290 = vst [vmem:[%s13524_s27 + $0x5a0] sm:$0xff] %v4808_v11  ;;  %v4811_v32 = vadd.f32 %v14225_v48, %v3753_v56  ;;  %v8202_v21 = vpop.f32.mrb[121].mxu1  ;;  %v3755_v63 = vpop.f32.mrb[107].mxu0  ;;  %v16407_v11 = vld [vmem:[#allocation50_spill] sm:$0xff] }
 0x3f5   : > { %v14883_v30 = vpop.f32.mrb[122].mxu1  ;;  %v12727_v56 = vld [vmem:[%s13212_s13 + $0xb10] ss:$12 sps:$4 sm:$0xff]   ;;  %v12735_v23 = vld [vmem:[%s13212_s13 + $0xb2c] ss:$12 sps:$4 sm:$0xff]  }
 0x3f6   : > { %16406 = vst [vmem:[#allocation49_spill] sm:$0xff] %v14883_v30  ;;  %5291 = vst [vmem:[%s13524_s27 + $0x5a8] sm:$0xff] %v4811_v32  ;;  %v8205_v20 = vpop.f32.mrb[123].mxu1  ;;  %3965 = vmatmul.mubr.bf16.gmra.mrb[212].mxu0 %v12721_v44  ;;  %v16409_v30 = vld [vmem:[#allocation51_spill] sm:$0xff] }
 0x3f7   : > { %3972 = vmatprep.mubr.bf16.mxu0 %v12729_v28  ;;  %v12730_v28 = vld [vmem:[%s13811_s30 + $0x570] ss:$12 sps:$4 sm:$0xff]  }
 0x3f8   : > { %8415 = vmatmul.mubr.bf16.gmra.mrb[228].mxu1 %v12724_v45 }
 0x3f9   : > { %v3758_v49 = vpop.f32.mrb[108].mxu0  ;;  %8422 = vmatprep.mubr.bf16.mxu1 %v12732_v42  ;;  %v12738_v42 = vld [vmem:[%s13811_s30 + $0x58c] ss:$12 sps:$4 sm:$0xff]  }
 0x3fa   : > { %v4816_v48 = vadd.f32 %v16407_v11, %v3758_v49  ;;  %v3760_v14 = vpop.f32.mrb[109].mxu0 }
 0x3fb   : > { %v14889_v21 = vpop.f32.mrb[124].mxu1  ;;  %v3761_v63 = vpop.f32.mrb[110].mxu0 }
 0x3fc   : > { %16408 = vst [vmem:[#allocation50_spill] sm:$0xff] %v14889_v21  ;;  %5292 = vst [vmem:[%s13524_s27 + $0x5b0] sm:$0xff] %v4816_v48  ;;  %v4819_v32 = vadd.f32 %v16409_v30, %v3761_v63  ;;  %v8210_v20 = vpop.f32.mrb[125].mxu1  ;;  %v3763_v44 = vpop.f32.mrb[111].mxu0  ;;  %v16411_v48 = vld [vmem:[#allocation53_spill] sm:$0xff] }
 0x3fd   : > { %v14895_v45 = vpop.f32.mrb[126].mxu1  ;;  %v12733_v63 = vld [vmem:[%s13212_s13 + $0xb28] ss:$12 sps:$4 sm:$0xff]   ;;  %v12741_v21 = vld [vmem:[%s13212_s13 + $0xb44] ss:$12 sps:$4 sm:$0xff]  }
 0x3fe   : > { %16410 = vst [vmem:[#allocation51_spill] sm:$0xff] %v14895_v45  ;;  %5293 = vst [vmem:[%s13524_s27 + $0x5b8] sm:$0xff] %v4819_v32  ;;  %v8213_v49 = vpop.f32.mrb[127].mxu1  ;;  %3973 = vmatmul.mubr.bf16.gmra.mrb[216].mxu0 %v12727_v56  ;;  %v16413_v45 = vld [vmem:[#allocation55_spill] sm:$0xff] }
 0x3ff   : > { %3980 = vmatprep.mubr.bf16.mxu0 %v12735_v23  ;;  %v12736_v23 = vld [vmem:[%s13811_s30 + $0x588] ss:$12 sps:$4 sm:$0xff]  }
 0x400   : > { %8423 = vmatmul.mubr.bf16.gmra.mrb[232].mxu1 %v12730_v28 }
 0x401   : > { %v3766_v11 = vpop.f32.mrb[112].mxu0  ;;  %8430 = vmatprep.mubr.bf16.mxu1 %v12738_v42  ;;  %v12744_v42 = vld [vmem:[%s13811_s30 + $0x5a4] ss:$12 sps:$4 sm:$0xff]  }
 0x402   : > { %v4824_v30 = vadd.f32 %v16411_v48, %v3766_v11  ;;  %v3768_v14 = vpop.f32.mrb[113].mxu0 }
 0x403   : > { %v14901_v20 = vpop.f32.mrb[128].mxu1  ;;  %v3769_v44 = vpop.f32.mrb[114].mxu0 }
 0x404   : > { %16412 = vst [vmem:[#allocation53_spill] sm:$0xff] %v14901_v20  ;;  %5294 = vst [vmem:[%s13524_s27 + $0x5c0] sm:$0xff] %v4824_v30  ;;  %v4827_v32 = vadd.f32 %v16413_v45, %v3769_v44  ;;  %v8218_v49 = vpop.f32.mrb[129].mxu1  ;;  %v3771_v56 = vpop.f32.mrb[115].mxu0  ;;  %v16415_v30 = vld [vmem:[#allocation52_spill] sm:$0xff] }
 0x405   : > { %v14907_v28 = vpop.f32.mrb[130].mxu1  ;;  %v12739_v44 = vld [vmem:[%s13212_s13 + $0xb40] ss:$12 sps:$4 sm:$0xff]   ;;  %v12747_v20 = vld [vmem:[%s13212_s13 + $0xb5c] ss:$12 sps:$4 sm:$0xff]  }
 0x406   : > { %16414 = vst [vmem:[#allocation55_spill] sm:$0xff] %v14907_v28  ;;  %5295 = vst [vmem:[%s13524_s27 + $0x5c8] sm:$0xff] %v4827_v32  ;;  %v8221_v11 = vpop.f32.mrb[131].mxu1  ;;  %3981 = vmatmul.mubr.bf16.gmra.mrb[220].mxu0 %v12733_v63  ;;  %v16416_v28 = vld [vmem:[#allocation54_spill] sm:$0xff] }
 0x407   : > { %3988 = vmatprep.mubr.bf16.mxu0 %v12741_v21  ;;  %v12742_v21 = vld [vmem:[%s13811_s30 + $0x5a0] ss:$12 sps:$4 sm:$0xff]  }
 0x408   : > { %8431 = vmatmul.mubr.bf16.gmra.mrb[236].mxu1 %v12736_v23 }
 0x409   : > { %v3774_v48 = vpop.f32.mrb[116].mxu0  ;;  %8438 = vmatprep.mubr.bf16.mxu1 %v12744_v42  ;;  %v12750_v42 = vld [vmem:[%s13811_s30 + $0x5bc] ss:$12 sps:$4 sm:$0xff]  }
 0x40a   : > { %v4832_v45 = vadd.f32 %v16415_v30, %v3774_v48  ;;  %v3776_v14 = vpop.f32.mrb[117].mxu0 }
 0x40b   : > { %v14913_v49 = vpop.f32.mrb[132].mxu1  ;;  %v3777_v56 = vpop.f32.mrb[118].mxu0  ;;  %v12745_v14 = vld [vmem:[%s13212_s13 + $0xb58] ss:$12 sps:$4 sm:$0xff]  }
 0x40c   : > { %5296 = vst [vmem:[%s13524_s27 + $0x5d0] sm:$0xff] %v4832_v45  ;;  %v4835_v32 = vadd.f32 %v16416_v28, %v3777_v56  ;;  %v8226_v11 = vpop.f32.mrb[133].mxu1  ;;  %v3779_v63 = vpop.f32.mrb[119].mxu0 }
 0x40d   : > { %v14919_v23 = vpop.f32.mrb[134].mxu1  ;;  %v12753_v63 = vld [vmem:[%s13212_s13 + $0xb74] ss:$12 sps:$4 sm:$0xff]  }
 0x40e   : > { %5297 = vst [vmem:[%s13524_s27 + $0x5d8] sm:$0xff] %v4835_v32  ;;  %v8229_v48 = vpop.f32.mrb[135].mxu1  ;;  %3989 = vmatmul.mubr.bf16.gmra.mrb[224].mxu0 %v12739_v44 }
 0x40f   : > { %3996 = vmatprep.mubr.bf16.mxu0 %v12747_v20  ;;  %v12748_v20 = vld [vmem:[%s13811_s30 + $0x5b8] ss:$12 sps:$4 sm:$0xff]  }
 0x410   : > { %8439 = vmatmul.mubr.bf16.gmra.mrb[240].mxu1 %v12742_v21 }
 0x411   : > { %v3782_v30 = vpop.f32.mrb[120].mxu0  ;;  %8446 = vmatprep.mubr.bf16.mxu1 %v12750_v42  ;;  %v12756_v42 = vld [vmem:[%s13811_s30 + $0x5d4] ss:$12 sps:$4 sm:$0xff]  }
 0x412   : > { %v4840_v28 = vadd.f32 %v14250_v51, %v3782_v30  ;;  %v3784_v45 = vpop.f32.mrb[121].mxu0 }
 0x413   : > { %v14925_v56 = vpop.f32.mrb[136].mxu1  ;;  %v3785_v11 = vpop.f32.mrb[122].mxu0 }
 0x414   : > { %16417 = vst [vmem:[#allocation52_spill] sm:$0xff] %v14925_v56  ;;  %5298 = vst [vmem:[%s13524_s27 + $0x5e0] sm:$0xff] %v4840_v28  ;;  %v4843_v32 = vadd.f32 %v14257_v60, %v3785_v11  ;;  %v8234_v48 = vpop.f32.mrb[137].mxu1  ;;  %v3787_v44 = vpop.f32.mrb[123].mxu0  ;;  %v16419_v28 = vld [vmem:[#allocation2_spill] sm:$0xff] }
 0x415   : > { %v14931_v21 = vpop.f32.mrb[138].mxu1  ;;  %v12751_v11 = vld [vmem:[%s13212_s13 + $0xb70] ss:$12 sps:$4 sm:$0xff]   ;;  %v12759_v56 = vld [vmem:[%s13212_s13 + $0xb8c] ss:$12 sps:$4 sm:$0xff]  }
 0x416   : > { %16418 = vst [vmem:[#allocation54_spill] sm:$0xff] %v14931_v21  ;;  %5299 = vst [vmem:[%s13524_s27 + $0x5e8] sm:$0xff] %v4843_v32  ;;  %v8237_v51 = vpop.f32.mrb[139].mxu1  ;;  %3997 = vmatmul.mubr.bf16.gmra.mrb[228].mxu0 %v12745_v14  ;;  %v16420_v21 = vld [vmem:[#allocation3_spill] sm:$0xff] }
 0x417   : > { %4004 = vmatprep.mubr.bf16.mxu0 %v12753_v63  ;;  %v12754_v63 = vld [vmem:[%s13811_s30 + $0x5d0] ss:$12 sps:$4 sm:$0xff]  }
 0x418   : > { %8447 = vmatmul.mubr.bf16.gmra.mrb[244].mxu1 %v12748_v20 }
 0x419   : > { %v3790_v30 = vpop.f32.mrb[124].mxu0  ;;  %8454 = vmatprep.mubr.bf16.mxu1 %v12756_v42  ;;  %v12762_v42 = vld [vmem:[%s13811_s30 + $0x5ec] ss:$12 sps:$4 sm:$0xff]  }
 0x41a   : > { %v4848_v60 = vadd.f32 %v16419_v28, %v3790_v30  ;;  %v3792_v45 = vpop.f32.mrb[125].mxu0 }
 0x41b   : > { %v14937_v48 = vpop.f32.mrb[140].mxu1  ;;  %v3793_v44 = vpop.f32.mrb[126].mxu0  ;;  %v12757_v45 = vld [vmem:[%s13212_s13 + $0xb88] ss:$12 sps:$4 sm:$0xff]  }
 0x41c   : > { %5300 = vst [vmem:[%s13524_s27 + $0x5f0] sm:$0xff] %v4848_v60  ;;  %v4851_v32 = vadd.f32 %v16420_v21, %v3793_v44  ;;  %v8242_v51 = vpop.f32.mrb[141].mxu1  ;;  %v3795_v14 = vpop.f32.mrb[127].mxu0 }
 0x41d   : > { %v14943_v20 = vpop.f32.mrb[142].mxu1  ;;  %v12765_v14 = vld [vmem:[%s13212_s13 + $0xba4] ss:$12 sps:$4 sm:$0xff]  }
 0x41e   : > { %16421 = vst [vmem:[#allocation2_spill] sm:$0xff] %v14943_v20  ;;  %5301 = vst [vmem:[%s13524_s27 + $0x5f8] sm:$0xff] %v4851_v32  ;;  %v8245_v30 = vpop.f32.mrb[143].mxu1  ;;  %4005 = vmatmul.mubr.bf16.gmra.mrb[232].mxu0 %v12751_v11  ;;  %v16423_v20 = vld [vmem:[#allocation58_spill] sm:$0xff] }
 0x41f   : > { %4012 = vmatprep.mubr.bf16.mxu0 %v12759_v56  ;;  %v12760_v56 = vld [vmem:[%s13811_s30 + $0x5e8] ss:$12 sps:$4 sm:$0xff]  }
 0x420   : > { %8455 = vmatmul.mubr.bf16.gmra.mrb[248].mxu1 %v12754_v63 }
 0x421   : > { %v3798_v28 = vpop.f32.mrb[128].mxu0  ;;  %8462 = vmatprep.mubr.bf16.mxu1 %v12762_v42  ;;  %v12768_v42 = vld [vmem:[%s13811_s30 + $0x604] ss:$12 sps:$4 sm:$0xff]  }
 0x422   : > { %v4856_v21 = vadd.f32 %v14266_v25, %v3798_v28  ;;  %v3800_v60 = vpop.f32.mrb[129].mxu0 }
 0x423   : > { %v14949_v44 = vpop.f32.mrb[144].mxu1  ;;  %v3801_v51 = vpop.f32.mrb[130].mxu0 }
 0x424   : > { %16422 = vst [vmem:[#allocation3_spill] sm:$0xff] %v14949_v44  ;;  %5302 = vst [vmem:[%s13524_s27 + $0x600] sm:$0xff] %v4856_v21  ;;  %v4859_v32 = vadd.f32 %v16423_v20, %v3801_v51  ;;  %v8250_v30 = vpop.f32.mrb[145].mxu1  ;;  %v3803_v11 = vpop.f32.mrb[131].mxu0  ;;  %v16425_v21 = vld [vmem:[#allocation56_spill] sm:$0xff] }
 0x425   : > { %v14955_v63 = vpop.f32.mrb[146].mxu1  ;;  %v12763_v51 = vld [vmem:[%s13212_s13 + $0xba0] ss:$12 sps:$4 sm:$0xff]   ;;  %v12771_v44 = vld [vmem:[%s13212_s13 + $0xbbc] ss:$12 sps:$4 sm:$0xff]  }
 0x426   : > { %16424 = vst [vmem:[#allocation58_spill] sm:$0xff] %v14955_v63  ;;  %5303 = vst [vmem:[%s13524_s27 + $0x608] sm:$0xff] %v4859_v32  ;;  %v8253_v25 = vpop.f32.mrb[147].mxu1  ;;  %4013 = vmatmul.mubr.bf16.gmra.mrb[236].mxu0 %v12757_v45  ;;  %v16426_v63 = vld [vmem:[#allocation57_spill] sm:$0xff] }
 0x427   : > { %4020 = vmatprep.mubr.bf16.mxu0 %v12765_v14  ;;  %v12766_v14 = vld [vmem:[%s13811_s30 + $0x600] ss:$12 sps:$4 sm:$0xff]  }
 0x428   : > { %8463 = vmatmul.mubr.bf16.gmra.mrb[252].mxu1 %v12760_v56 }
 0x429   : > { %v3806_v28 = vpop.f32.mrb[132].mxu0  ;;  %8470 = vmatprep.mubr.bf16.mxu1 %v12768_v42  ;;  %v12774_v42 = vld [vmem:[%s13811_s30 + $0x61c] ss:$12 sps:$4 sm:$0xff]  }
 0x42a   : > { %v4864_v20 = vadd.f32 %v16425_v21, %v3806_v28  ;;  %v3808_v60 = vpop.f32.mrb[133].mxu0 }
 0x42b   : > { %v14961_v30 = vpop.f32.mrb[148].mxu1  ;;  %v3809_v11 = vpop.f32.mrb[134].mxu0  ;;  %v12769_v60 = vld [vmem:[%s13212_s13 + $0xbb8] ss:$12 sps:$4 sm:$0xff]  }
 0x42c   : > { %5304 = vst [vmem:[%s13524_s27 + $0x610] sm:$0xff] %v4864_v20  ;;  %v4867_v32 = vadd.f32 %v16426_v63, %v3809_v11  ;;  %v8258_v25 = vpop.f32.mrb[149].mxu1  ;;  %v3811_v45 = vpop.f32.mrb[135].mxu0 }
 0x42d   : > { %v14967_v56 = vpop.f32.mrb[150].mxu1  ;;  %v12777_v45 = vld [vmem:[%s13212_s13 + $0xbd4] ss:$12 sps:$4 sm:$0xff]  }
 0x42e   : > { %5305 = vst [vmem:[%s13524_s27 + $0x618] sm:$0xff] %v4867_v32  ;;  %v8261_v28 = vpop.f32.mrb[151].mxu1  ;;  %4021 = vmatmul.mubr.bf16.gmra.mrb[240].mxu0 %v12763_v51 }
 0x42f   : > { %4028 = vmatprep.mubr.bf16.mxu0 %v12771_v44  ;;  %v12772_v44 = vld [vmem:[%s13811_s30 + $0x618] ss:$12 sps:$4 sm:$0xff]  }
 0x430   : > { %8471 = vmatmul.mubr.bf16.gmra.mrb[0].mxu1 %v12766_v14 }
 0x431   : > { %v3814_v21 = vpop.f32.mrb[136].mxu0  ;;  %8478 = vmatprep.mubr.bf16.mxu1 %v12774_v42  ;;  %v12780_v42 = vld [vmem:[%s13811_s30 + $0x634] ss:$12 sps:$4 sm:$0xff]  }
 0x432   : > { %v4872_v63 = vadd.f32 %v14282_v41, %v3814_v21  ;;  %v3816_v20 = vpop.f32.mrb[137].mxu0 }
 0x433   : > { %v14973_v11 = vpop.f32.mrb[152].mxu1  ;;  %v3817_v25 = vpop.f32.mrb[138].mxu0 }
 0x434   : > { %16427 = vst [vmem:[#allocation56_spill] sm:$0xff] %v14973_v11  ;;  %5306 = vst [vmem:[%s13524_s27 + $0x620] sm:$0xff] %v4872_v63  ;;  %v4875_v32 = vadd.f32 %v14289_v33, %v3817_v25  ;;  %v8266_v28 = vpop.f32.mrb[153].mxu1  ;;  %v3819_v51 = vpop.f32.mrb[139].mxu0  ;;  %v16429_v63 = vld [vmem:[#allocation4_spill] sm:$0xff] }
 0x435   : > { %v14979_v14 = vpop.f32.mrb[154].mxu1  ;;  %v12775_v25 = vld [vmem:[%s13212_s13 + $0xbd0] ss:$12 sps:$4 sm:$0xff]   ;;  %v12783_v11 = vld [vmem:[%s13212_s13 + $0xbec] ss:$12 sps:$4 sm:$0xff]  }
 0x436   : > { %16428 = vst [vmem:[#allocation57_spill] sm:$0xff] %v14979_v14  ;;  %5307 = vst [vmem:[%s13524_s27 + $0x628] sm:$0xff] %v4875_v32  ;;  %v8269_v41 = vpop.f32.mrb[155].mxu1  ;;  %4029 = vmatmul.mubr.bf16.gmra.mrb[244].mxu0 %v12769_v60  ;;  %v16431_v14 = vld [vmem:[#allocation5_spill] sm:$0xff] }
 0x437   : > { %4036 = vmatprep.mubr.bf16.mxu0 %v12777_v45  ;;  %v12778_v45 = vld [vmem:[%s13811_s30 + $0x630] ss:$12 sps:$4 sm:$0xff]  }
 0x438   : > { %8479 = vmatmul.mubr.bf16.gmra.mrb[4].mxu1 %v12772_v44 }
 0x439   : > { %v3822_v21 = vpop.f32.mrb[140].mxu0  ;;  %8486 = vmatprep.mubr.bf16.mxu1 %v12780_v42  ;;  %v12786_v42 = vld [vmem:[%s13811_s30 + $0x64c] ss:$12 sps:$4 sm:$0xff]  }
 0x43a   : > { %v4880_v33 = vadd.f32 %v16429_v63, %v3822_v21  ;;  %v3824_v20 = vpop.f32.mrb[141].mxu0 }
 0x43b   : > { %v14985_v28 = vpop.f32.mrb[156].mxu1  ;;  %v3825_v51 = vpop.f32.mrb[142].mxu0 }
 0x43c   : > { %16430 = vst [vmem:[#allocation4_spill] sm:$0xff] %v14985_v28  ;;  %5308 = vst [vmem:[%s13524_s27 + $0x630] sm:$0xff] %v4880_v33  ;;  %v4883_v32 = vadd.f32 %v16431_v14, %v3825_v51  ;;  %v8274_v41 = vpop.f32.mrb[157].mxu1  ;;  %v3827_v60 = vpop.f32.mrb[143].mxu0  ;;  %v16433_v33 = vld [vmem:[#allocation60_spill] sm:$0xff] }
 0x43d   : > { %v14991_v44 = vpop.f32.mrb[158].mxu1  ;;  %v12781_v51 = vld [vmem:[%s13212_s13 + $0xbe8] ss:$12 sps:$4 sm:$0xff]  }
 0x43e   : > { %16432 = vst [vmem:[#allocation5_spill] sm:$0xff] %v14991_v44  ;;  %5309 = vst [vmem:[%s13524_s27 + $0x638] sm:$0xff] %v4883_v32  ;;  %v8277_v21 = vpop.f32.mrb[159].mxu1  ;;  %4037 = vmatmul.mubr.bf16.gmra.mrb[248].mxu0 %v12775_v25  ;;  %v12787_v28 = vld [vmem:[%s13811_s30 + $0x8] ss:$12 sps:$4 sm:$0xff]   ;;  %v16435_v44 = vld [vmem:[#allocation62_spill] sm:$0xff] }
 0x43f   : > { %4044 = vmatprep.mubr.bf16.mxu0 %v12783_v11  ;;  %v12784_v11 = vld [vmem:[%s13811_s30 + $0x648] ss:$12 sps:$4 sm:$0xff]  }
 0x440   : > { %8487 = vmatmul.mubr.bf16.gmra.mrb[8].mxu1 %v12778_v45 }
 0x441   : > { %v3830_v63 = vpop.f32.mrb[144].mxu0  ;;  %8494 = vmatprep.mubr.bf16.mxu1 %v12786_v42  ;;  %v12790_v42 = vld [vmem:[%s13811_s30 + $0x664] ss:$12 sps:$4 sm:$0xff]  }
 0x442   : > { %v4888_v14 = vadd.f32 %v16433_v33, %v3830_v63  ;;  %v3832_v20 = vpop.f32.mrb[145].mxu0 }
 0x443   : > { %v14997_v41 = vpop.f32.mrb[160].mxu1  ;;  %v3833_v60 = vpop.f32.mrb[146].mxu0 }
 0x444   : > { %16434 = vst [vmem:[#allocation60_spill] sm:$0xff] %v14997_v41  ;;  %5310 = vst [vmem:[%s13524_s27 + $0x640] sm:$0xff] %v4888_v14  ;;  %v4891_v32 = vadd.f32 %v16435_v44, %v3833_v60  ;;  %v8282_v21 = vpop.f32.mrb[161].mxu1  ;;  %v3835_v25 = vpop.f32.mrb[147].mxu0  ;;  %v16437_v14 = vld [vmem:[#allocation59_spill] sm:$0xff] }
 0x445   : > { %v15003_v45 = vpop.f32.mrb[162].mxu1  ;;  %v12791_v60 = vld [vmem:[%s13811_s30 + $0x20] ss:$12 sps:$4 sm:$0xff]   ;;  %v12792_v41 = vld [vmem:[%s13811_s30 + $0x38] ss:$12 sps:$4 sm:$0xff]  }
 0x446   : > { %16436 = vst [vmem:[#allocation62_spill] sm:$0xff] %v15003_v45  ;;  %5311 = vst [vmem:[%s13524_s27 + $0x648] sm:$0xff] %v4891_v32  ;;  %v8285_v63 = vpop.f32.mrb[163].mxu1  ;;  %4045 = vmatmul.mubr.bf16.gmra.mrb[252].mxu0 %v12781_v51  ;;  %v16438_v45 = vld [vmem:[#allocation61_spill] sm:$0xff] }
 0x447   : > { %11765 = vmatprep.mubr.bf16.mxu0 %v12787_v28  ;;  %v12788_v28 = vld [vmem:[%s13811_s30 + $0x660] ss:$12 sps:$4 sm:$0xff]  }
 0x448   : > { %8495 = vmatmul.mubr.bf16.gmra.mrb[12].mxu1 %v12784_v11 }
 0x449   : > { %v3838_v33 = vpop.f32.mrb[148].mxu0  ;;  %8502 = vmatprep.mubr.bf16.mxu1 %v12790_v42  ;;  %v12795_v42 = vld [vmem:[%s13811_s30 + $0x67c] ss:$12 sps:$4 sm:$0xff]  }
 0x44a   : > { %v4896_v44 = vadd.f32 %v16437_v14, %v3838_v33  ;;  %v3840_v20 = vpop.f32.mrb[149].mxu0 }
 0x44b   : > { %v15009_v21 = vpop.f32.mrb[164].mxu1  ;;  %v3841_v25 = vpop.f32.mrb[150].mxu0  ;;  %v12796_v20 = vld [vmem:[%s13811_s30 + $0x50] ss:$12 sps:$4 sm:$0xff]  }
 0x44c   : > { %5312 = vst [vmem:[%s13524_s27 + $0x650] sm:$0xff] %v4896_v44  ;;  %v4899_v32 = vadd.f32 %v16438_v45, %v3841_v25  ;;  %v8290_v63 = vpop.f32.mrb[165].mxu1  ;;  %v3843_v51 = vpop.f32.mrb[151].mxu0 }
 0x44d   : > { %v15015_v11 = vpop.f32.mrb[166].mxu1  ;;  %v12797_v51 = vld [vmem:[%s13811_s30 + $0x68] ss:$12 sps:$4 sm:$0xff]  }
 0x44e   : > { %5313 = vst [vmem:[%s13524_s27 + $0x658] sm:$0xff] %v4899_v32  ;;  %v8293_v33 = vpop.f32.mrb[167].mxu1  ;;  %11766 = vmatmul.mubr.bf16.vlgmr.msra.gmra.mrb[0].mxu0 %v12791_v60 }
 0x44f   : > { %11769 = vmatprep.mubr.bf16.mxu0 %v12792_v41  ;;  %v12793_v41 = vld [vmem:[%s13811_s30 + $0x678] ss:$12 sps:$4 sm:$0xff]  }
 0x450   : > { %8503 = vmatmul.mubr.bf16.gmra.mrb[16].mxu1 %v12788_v28 }
 0x451   : > { %v3846_v14 = vpop.f32.mrb[152].mxu0  ;;  %8510 = vmatprep.mubr.bf16.mxu1 %v12795_v42  ;;  %v12800_v42 = vld [vmem:[%s13811_s30 + $0x694] ss:$12 sps:$4 sm:$0xff]  }
 0x452   : > { %v4904_v45 = vadd.f32 %v14314_v10, %v3846_v14  ;;  %v3848_v44 = vpop.f32.mrb[153].mxu0 }
 0x453   : > { %v15021_v25 = vpop.f32.mrb[168].mxu1  ;;  %v3849_v63 = vpop.f32.mrb[154].mxu0 }
 0x454   : > { %16439 = vst [vmem:[#allocation59_spill] sm:$0xff] %v15021_v25  ;;  %5314 = vst [vmem:[%s13524_s27 + $0x660] sm:$0xff] %v4904_v45  ;;  %v4907_v32 = vadd.f32 %v14321_v53, %v3849_v63  ;;  %v8298_v33 = vpop.f32.mrb[169].mxu1  ;;  %v3851_v60 = vpop.f32.mrb[155].mxu0  ;;  %v16441_v45 = vld [vmem:[#allocation6_spill] sm:$0xff] }
 0x455   : > { %v15027_v28 = vpop.f32.mrb[170].mxu1  ;;  %v12801_v63 = vld [vmem:[%s13811_s30 + $0x80] ss:$12 sps:$4 sm:$0xff]   ;;  %v12802_v25 = vld [vmem:[%s13811_s30 + $0x98] ss:$12 sps:$4 sm:$0xff]  }
 0x456   : > { %16440 = vst [vmem:[#allocation61_spill] sm:$0xff] %v15027_v28  ;;  %5315 = vst [vmem:[%s13524_s27 + $0x668] sm:$0xff] %v4907_v32  ;;  %v8301_v10 = vpop.f32.mrb[171].mxu1  ;;  %11770 = vmatmul.mubr.bf16.gmra.mrb[4].mxu0 %v12796_v20  ;;  %v16443_v28 = vld [vmem:[#allocation7_spill] sm:$0xff] }
 0x457   : > { %11773 = vmatprep.mubr.bf16.mxu0 %v12797_v51  ;;  %v12798_v51 = vld [vmem:[%s13811_s30 + $0x690] ss:$12 sps:$4 sm:$0xff]  }
 0x458   : > { %8511 = vmatmul.mubr.bf16.gmra.mrb[20].mxu1 %v12793_v41 }
 0x459   : > { %v3854_v14 = vpop.f32.mrb[156].mxu0  ;;  %8518 = vmatprep.mubr.bf16.mxu1 %v12800_v42  ;;  %v12805_v42 = vld [vmem:[%s13811_s30 + $0x6ac] ss:$12 sps:$4 sm:$0xff]  }
 0x45a   : > { %v4912_v53 = vadd.f32 %v16441_v45, %v3854_v14  ;;  %v3856_v44 = vpop.f32.mrb[157].mxu0 }
 0x45b   : > { %v15033_v33 = vpop.f32.mrb[172].mxu1  ;;  %v3857_v60 = vpop.f32.mrb[158].mxu0 }
 0x45c   : > { %16442 = vst [vmem:[#allocation6_spill] sm:$0xff] %v15033_v33  ;;  %5316 = vst [vmem:[%s13524_s27 + $0x670] sm:$0xff] %v4912_v53  ;;  %v4915_v32 = vadd.f32 %v16443_v28, %v3857_v60  ;;  %v8306_v10 = vpop.f32.mrb[173].mxu1  ;;  %v3859_v20 = vpop.f32.mrb[159].mxu0  ;;  %v16445_v53 = vld [vmem:[#allocation64_spill] sm:$0xff] }
 0x45d   : > { %v15039_v41 = vpop.f32.mrb[174].mxu1  ;;  %v12806_v60 = vld [vmem:[%s13811_s30 + $0xb0] ss:$12 sps:$4 sm:$0xff]   ;;  %v12807_v33 = vld [vmem:[%s13811_s30 + $0xc8] ss:$12 sps:$4 sm:$0xff]  }
 0x45e   : > { %16444 = vst [vmem:[#allocation7_spill] sm:$0xff] %v15039_v41  ;;  %5317 = vst [vmem:[%s13524_s27 + $0x678] sm:$0xff] %v4915_v32  ;;  %v8309_v14 = vpop.f32.mrb[175].mxu1  ;;  %11774 = vmatmul.mubr.bf16.gmra.mrb[8].mxu0 %v12801_v63  ;;  %v16447_v41 = vld [vmem:[#allocation66_spill] sm:$0xff] }
 0x45f   : > { %11777 = vmatprep.mubr.bf16.mxu0 %v12802_v25  ;;  %v12803_v25 = vld [vmem:[%s13811_s30 + $0x6a8] ss:$12 sps:$4 sm:$0xff]  }
 0x460   : > { %8519 = vmatmul.mubr.bf16.gmra.mrb[24].mxu1 %v12798_v51 }
 0x461   : > { %v3862_v45 = vpop.f32.mrb[160].mxu0  ;;  %8526 = vmatprep.mubr.bf16.mxu1 %v12805_v42  ;;  %v12810_v42 = vld [vmem:[%s13811_s30 + $0x6c4] ss:$12 sps:$4 sm:$0xff]  }
 0x462   : > { %v4920_v28 = vadd.f32 %v16445_v53, %v3862_v45  ;;  %v3864_v44 = vpop.f32.mrb[161].mxu0 }
 0x463   : > { %v15045_v10 = vpop.f32.mrb[176].mxu1  ;;  %v3865_v20 = vpop.f32.mrb[162].mxu0 }
 0x464   : > { %16446 = vst [vmem:[#allocation64_spill] sm:$0xff] %v15045_v10  ;;  %5318 = vst [vmem:[%s13524_s27 + $0x680] sm:$0xff] %v4920_v28  ;;  %v4923_v32 = vadd.f32 %v16447_v41, %v3865_v20  ;;  %v8314_v14 = vpop.f32.mrb[177].mxu1  ;;  %v3867_v63 = vpop.f32.mrb[163].mxu0  ;;  %v16449_v28 = vld [vmem:[#allocation63_spill] sm:$0xff] }
 0x465   : > { %v15051_v51 = vpop.f32.mrb[178].mxu1  ;;  %v12811_v20 = vld [vmem:[%s13811_s30 + $0xe0] ss:$12 sps:$4 sm:$0xff]   ;;  %v12812_v10 = vld [vmem:[%s13811_s30 + $0xf8] ss:$12 sps:$4 sm:$0xff]  }
 0x466   : > { %16448 = vst [vmem:[#allocation66_spill] sm:$0xff] %v15051_v51  ;;  %5319 = vst [vmem:[%s13524_s27 + $0x688] sm:$0xff] %v4923_v32  ;;  %v8317_v45 = vpop.f32.mrb[179].mxu1  ;;  %11778 = vmatmul.mubr.bf16.gmra.mrb[12].mxu0 %v12806_v60  ;;  %v16450_v51 = vld [vmem:[#allocation65_spill] sm:$0xff] }
 0x467   : > { %11781 = vmatprep.mubr.bf16.mxu0 %v12807_v33  ;;  %v12808_v33 = vld [vmem:[%s13811_s30 + $0x6c0] ss:$12 sps:$4 sm:$0xff]  }
 0x468   : > { %8527 = vmatmul.mubr.bf16.gmra.mrb[28].mxu1 %v12803_v25 }
 0x469   : > { %v3870_v53 = vpop.f32.mrb[164].mxu0  ;;  %8534 = vmatprep.mubr.bf16.mxu1 %v12810_v42  ;;  %v12815_v42 = vld [vmem:[%s13811_s30 + $0x6dc] ss:$12 sps:$4 sm:$0xff]  }
 0x46a   : > { %v4928_v41 = vadd.f32 %v16449_v28, %v3870_v53  ;;  %v3872_v44 = vpop.f32.mrb[165].mxu0 }
 0x46b   : > { %v15057_v14 = vpop.f32.mrb[180].mxu1  ;;  %v3873_v63 = vpop.f32.mrb[166].mxu0  ;;  %v12816_v44 = vld [vmem:[%s13811_s30 + $0x110] ss:$12 sps:$4 sm:$0xff]  }
 0x46c   : > { %5320 = vst [vmem:[%s13524_s27 + $0x690] sm:$0xff] %v4928_v41  ;;  %v4931_v32 = vadd.f32 %v16450_v51, %v3873_v63  ;;  %v8322_v45 = vpop.f32.mrb[181].mxu1  ;;  %v3875_v60 = vpop.f32.mrb[167].mxu0 }
 0x46d   : > { %v15063_v25 = vpop.f32.mrb[182].mxu1  ;;  %v12817_v60 = vld [vmem:[%s13811_s30 + $0x128] ss:$12 sps:$4 sm:$0xff]  }
 0x46e   : > { %5321 = vst [vmem:[%s13524_s27 + $0x698] sm:$0xff] %v4931_v32  ;;  %v8325_v53 = vpop.f32.mrb[183].mxu1  ;;  %11782 = vmatmul.mubr.bf16.gmra.mrb[16].mxu0 %v12811_v20 }
 0x46f   : > { %11785 = vmatprep.mubr.bf16.mxu0 %v12812_v10  ;;  %v12813_v10 = vld [vmem:[%s13811_s30 + $0x6d8] ss:$12 sps:$4 sm:$0xff]  }
 0x470   : > { %8535 = vmatmul.mubr.bf16.gmra.mrb[32].mxu1 %v12808_v33 }
 0x471   : > { %v3878_v28 = vpop.f32.mrb[168].mxu0  ;;  %8542 = vmatprep.mubr.bf16.mxu1 %v12815_v42  ;;  %v12820_v42 = vld [vmem:[%s13811_s30 + $0x6f4] ss:$12 sps:$4 sm:$0xff]  }
 0x472   : > { %v4936_v51 = vadd.f32 %v14346_v31, %v3878_v28  ;;  %v3880_v41 = vpop.f32.mrb[169].mxu0 }
 0x473   : > { %v15069_v63 = vpop.f32.mrb[184].mxu1  ;;  %v3881_v45 = vpop.f32.mrb[170].mxu0 }
 0x474   : > { %16451 = vst [vmem:[#allocation63_spill] sm:$0xff] %v15069_v63  ;;  %5322 = vst [vmem:[%s13524_s27 + $0x6a0] sm:$0xff] %v4936_v51  ;;  %v4939_v32 = vadd.f32 %v14353_v29, %v3881_v45  ;;  %v8330_v53 = vpop.f32.mrb[185].mxu1  ;;  %v3883_v20 = vpop.f32.mrb[171].mxu0  ;;  %v16453_v51 = vld [vmem:[#allocation8_spill] sm:$0xff] }
 0x475   : > { %v15075_v33 = vpop.f32.mrb[186].mxu1  ;;  %v12821_v45 = vld [vmem:[%s13811_s30 + $0x140] ss:$12 sps:$4 sm:$0xff]   ;;  %v12822_v63 = vld [vmem:[%s13811_s30 + $0x158] ss:$12 sps:$4 sm:$0xff]  }
 0x476   : > { %16452 = vst [vmem:[#allocation65_spill] sm:$0xff] %v15075_v33  ;;  %5323 = vst [vmem:[%s13524_s27 + $0x6a8] sm:$0xff] %v4939_v32  ;;  %v8333_v31 = vpop.f32.mrb[187].mxu1  ;;  %11786 = vmatmul.mubr.bf16.gmra.mrb[20].mxu0 %v12816_v44  ;;  %v16455_v33 = vld [vmem:[#allocation9_spill] sm:$0xff] }
 0x477   : > { %11789 = vmatprep.mubr.bf16.mxu0 %v12817_v60  ;;  %v12818_v60 = vld [vmem:[%s13811_s30 + $0x6f0] ss:$12 sps:$4 sm:$0xff]  }
 0x478   : > { %8543 = vmatmul.mubr.bf16.gmra.mrb[36].mxu1 %v12813_v10 }
 0x479   : > { %v3886_v28 = vpop.f32.mrb[172].mxu0  ;;  %8550 = vmatprep.mubr.bf16.mxu1 %v12820_v42  ;;  %v12825_v42 = vld [vmem:[%s13811_s30 + $0x70c] ss:$12 sps:$4 sm:$0xff]  }
 0x47a   : > { %v4944_v29 = vadd.f32 %v16453_v51, %v3886_v28  ;;  %v3888_v41 = vpop.f32.mrb[173].mxu0 }
 0x47b   : > { %v15081_v53 = vpop.f32.mrb[188].mxu1  ;;  %v3889_v20 = vpop.f32.mrb[174].mxu0 }
 0x47c   : > { %16454 = vst [vmem:[#allocation8_spill] sm:$0xff] %v15081_v53  ;;  %5324 = vst [vmem:[%s13524_s27 + $0x6b0] sm:$0xff] %v4944_v29  ;;  %v4947_v32 = vadd.f32 %v16455_v33, %v3889_v20  ;;  %v8338_v31 = vpop.f32.mrb[189].mxu1  ;;  %v3891_v44 = vpop.f32.mrb[175].mxu0  ;;  %v16457_v29 = vld [vmem:[#allocation68_spill] sm:$0xff] }
 0x47d   : > { %v15087_v10 = vpop.f32.mrb[190].mxu1  ;;  %v12826_v20 = vld [vmem:[%s13811_s30 + $0x170] ss:$12 sps:$4 sm:$0xff]   ;;  %v12827_v53 = vld [vmem:[%s13811_s30 + $0x188] ss:$12 sps:$4 sm:$0xff]  }
 0x47e   : > { %16456 = vst [vmem:[#allocation9_spill] sm:$0xff] %v15087_v10  ;;  %5325 = vst [vmem:[%s13524_s27 + $0x6b8] sm:$0xff] %v4947_v32  ;;  %v8341_v28 = vpop.f32.mrb[191].mxu1  ;;  %11790 = vmatmul.mubr.bf16.gmra.mrb[24].mxu0 %v12821_v45  ;;  %v16459_v10 = vld [vmem:[#allocation70_spill] sm:$0xff] }
 0x47f   : > { %11793 = vmatprep.mubr.bf16.mxu0 %v12822_v63  ;;  %v12823_v63 = vld [vmem:[%s13811_s30 + $0x708] ss:$12 sps:$4 sm:$0xff]  }
 0x480   : > { %8551 = vmatmul.mubr.bf16.gmra.mrb[40].mxu1 %v12818_v60 }
 0x481   : > { %v3894_v51 = vpop.f32.mrb[176].mxu0  ;;  %8558 = vmatprep.mubr.bf16.mxu1 %v12825_v42  ;;  %v12830_v42 = vld [vmem:[%s13811_s30 + $0x724] ss:$12 sps:$4 sm:$0xff]  }
 0x482   : > { %v4952_v33 = vadd.f32 %v16457_v29, %v3894_v51  ;;  %v3896_v41 = vpop.f32.mrb[177].mxu0 }
 0x483   : > { %v15093_v31 = vpop.f32.mrb[192].mxu1  ;;  %v3897_v44 = vpop.f32.mrb[178].mxu0 }
 0x484   : > { %16458 = vst [vmem:[#allocation68_spill] sm:$0xff] %v15093_v31  ;;  %5326 = vst [vmem:[%s13524_s27 + $0x6c0] sm:$0xff] %v4952_v33  ;;  %v4955_v32 = vadd.f32 %v16459_v10, %v3897_v44  ;;  %v8346_v28 = vpop.f32.mrb[193].mxu1  ;;  %v3899_v45 = vpop.f32.mrb[179].mxu0  ;;  %v16461_v33 = vld [vmem:[#allocation67_spill] sm:$0xff] }
 0x485   : > { %v15099_v60 = vpop.f32.mrb[194].mxu1  ;;  %v12831_v44 = vld [vmem:[%s13811_s30 + $0x1a0] ss:$12 sps:$4 sm:$0xff]   ;;  %v12832_v31 = vld [vmem:[%s13811_s30 + $0x1b8] ss:$12 sps:$4 sm:$0xff]  }
 0x486   : > { %16460 = vst [vmem:[#allocation70_spill] sm:$0xff] %v15099_v60  ;;  %5327 = vst [vmem:[%s13524_s27 + $0x6c8] sm:$0xff] %v4955_v32  ;;  %v8349_v51 = vpop.f32.mrb[195].mxu1  ;;  %11794 = vmatmul.mubr.bf16.gmra.mrb[28].mxu0 %v12826_v20  ;;  %v16462_v60 = vld [vmem:[#allocation69_spill] sm:$0xff] }
 0x487   : > { %11797 = vmatprep.mubr.bf16.mxu0 %v12827_v53  ;;  %v12828_v53 = vld [vmem:[%s13811_s30 + $0x720] ss:$12 sps:$4 sm:$0xff]  }
 0x488   : > { %8559 = vmatmul.mubr.bf16.gmra.mrb[44].mxu1 %v12823_v63 }
 0x489   : > { %v3902_v29 = vpop.f32.mrb[180].mxu0  ;;  %8566 = vmatprep.mubr.bf16.mxu1 %v12830_v42  ;;  %v12835_v42 = vld [vmem:[%s13811_s30 + $0x73c] ss:$12 sps:$4 sm:$0xff]  }
 0x48a   : > { %v4960_v10 = vadd.f32 %v16461_v33, %v3902_v29  ;;  %v3904_v41 = vpop.f32.mrb[181].mxu0 }
 0x48b   : > { %v15105_v28 = vpop.f32.mrb[196].mxu1  ;;  %v3905_v45 = vpop.f32.mrb[182].mxu0  ;;  %v12836_v41 = vld [vmem:[%s13811_s30 + $0x1d0] ss:$12 sps:$4 sm:$0xff]  }
 0x48c   : > { %5328 = vst [vmem:[%s13524_s27 + $0x6d0] sm:$0xff] %v4960_v10  ;;  %v4963_v32 = vadd.f32 %v16462_v60, %v3905_v45  ;;  %v8354_v51 = vpop.f32.mrb[197].mxu1  ;;  %v3907_v20 = vpop.f32.mrb[183].mxu0 }
 0x48d   : > { %v15111_v63 = vpop.f32.mrb[198].mxu1  ;;  %v12837_v20 = vld [vmem:[%s13811_s30 + $0x1e8] ss:$12 sps:$4 sm:$0xff]  }
 0x48e   : > { %5329 = vst [vmem:[%s13524_s27 + $0x6d8] sm:$0xff] %v4963_v32  ;;  %v8357_v29 = vpop.f32.mrb[199].mxu1  ;;  %11798 = vmatmul.mubr.bf16.gmra.mrb[32].mxu0 %v12831_v44 }
 0x48f   : > { %11801 = vmatprep.mubr.bf16.mxu0 %v12832_v31  ;;  %v12833_v31 = vld [vmem:[%s13811_s30 + $0x738] ss:$12 sps:$4 sm:$0xff]  }
 0x490   : > { %8567 = vmatmul.mubr.bf16.gmra.mrb[48].mxu1 %v12828_v53 }
 0x491   : > { %v3910_v33 = vpop.f32.mrb[184].mxu0  ;;  %8574 = vmatprep.mubr.bf16.mxu1 %v12835_v42  ;;  %v12840_v42 = vld [vmem:[%s13811_s30 + $0x754] ss:$12 sps:$4 sm:$0xff]  }
 0x492   : > { %v4968_v60 = vadd.f32 %v14378_v55, %v3910_v33  ;;  %v3912_v10 = vpop.f32.mrb[185].mxu0 }
 0x493   : > { %v15117_v45 = vpop.f32.mrb[200].mxu1  ;;  %v3913_v51 = vpop.f32.mrb[186].mxu0 }
 0x494   : > { %16463 = vst [vmem:[#allocation67_spill] sm:$0xff] %v15117_v45  ;;  %5330 = vst [vmem:[%s13524_s27 + $0x6e0] sm:$0xff] %v4968_v60  ;;  %v4971_v32 = vadd.f32 %v14385_v58, %v3913_v51  ;;  %v8362_v29 = vpop.f32.mrb[201].mxu1  ;;  %v3915_v44 = vpop.f32.mrb[187].mxu0  ;;  %v16465_v60 = vld [vmem:[#allocation10_spill] sm:$0xff] }
 0x495   : > { %v15123_v53 = vpop.f32.mrb[202].mxu1  ;;  %v12841_v51 = vld [vmem:[%s13811_s30 + $0x200] ss:$12 sps:$4 sm:$0xff]   ;;  %v12842_v45 = vld [vmem:[%s13811_s30 + $0x218] ss:$12 sps:$4 sm:$0xff]  }
 0x496   : > { %16464 = vst [vmem:[#allocation69_spill] sm:$0xff] %v15123_v53  ;;  %5331 = vst [vmem:[%s13524_s27 + $0x6e8] sm:$0xff] %v4971_v32  ;;  %v8365_v55 = vpop.f32.mrb[203].mxu1  ;;  %11802 = vmatmul.mubr.bf16.gmra.mrb[36].mxu0 %v12836_v41  ;;  %v16467_v53 = vld [vmem:[#allocation11_spill] sm:$0xff] }
 0x497   : > { %11805 = vmatprep.mubr.bf16.mxu0 %v12837_v20  ;;  %v12838_v20 = vld [vmem:[%s13811_s30 + $0x750] ss:$12 sps:$4 sm:$0xff]  }
 0x498   : > { %8575 = vmatmul.mubr.bf16.gmra.mrb[52].mxu1 %v12833_v31 }
 0x499   : > { %v3918_v33 = vpop.f32.mrb[188].mxu0  ;;  %8582 = vmatprep.mubr.bf16.mxu1 %v12840_v42  ;;  %v12845_v42 = vld [vmem:[%s13811_s30 + $0x76c] ss:$12 sps:$4 sm:$0xff]  }
 0x49a   : > { %v4976_v58 = vadd.f32 %v16465_v60, %v3918_v33  ;;  %v3920_v10 = vpop.f32.mrb[189].mxu0 }
 0x49b   : > { %v15129_v29 = vpop.f32.mrb[204].mxu1  ;;  %v3921_v44 = vpop.f32.mrb[190].mxu0 }
 0x49c   : > { %16466 = vst [vmem:[#allocation10_spill] sm:$0xff] %v15129_v29  ;;  %5332 = vst [vmem:[%s13524_s27 + $0x6f0] sm:$0xff] %v4976_v58  ;;  %v4979_v32 = vadd.f32 %v16467_v53, %v3921_v44  ;;  %v8370_v55 = vpop.f32.mrb[205].mxu1  ;;  %v3923_v41 = vpop.f32.mrb[191].mxu0  ;;  %v16469_v58 = vld [vmem:[#allocation72_spill] sm:$0xff] }
 0x49d   : > { %v15135_v31 = vpop.f32.mrb[206].mxu1  ;;  %v12846_v44 = vld [vmem:[%s13811_s30 + $0x230] ss:$12 sps:$4 sm:$0xff]   ;;  %v12847_v29 = vld [vmem:[%s13811_s30 + $0x248] ss:$12 sps:$4 sm:$0xff]  }
 0x49e   : > { %16468 = vst [vmem:[#allocation11_spill] sm:$0xff] %v15135_v31  ;;  %5333 = vst [vmem:[%s13524_s27 + $0x6f8] sm:$0xff] %v4979_v32  ;;  %v8373_v33 = vpop.f32.mrb[207].mxu1  ;;  %11806 = vmatmul.mubr.bf16.gmra.mrb[40].mxu0 %v12841_v51  ;;  %v16471_v31 = vld [vmem:[#allocation74_spill] sm:$0xff] }
 0x49f   : > { %11809 = vmatprep.mubr.bf16.mxu0 %v12842_v45  ;;  %v12843_v45 = vld [vmem:[%s13811_s30 + $0x768] ss:$12 sps:$4 sm:$0xff]  }
 0x4a0   : > { %8583 = vmatmul.mubr.bf16.gmra.mrb[56].mxu1 %v12838_v20 }
 0x4a1   : > { %v3926_v60 = vpop.f32.mrb[192].mxu0  ;;  %8590 = vmatprep.mubr.bf16.mxu1 %v12845_v42  ;;  %v12850_v42 = vld [vmem:[%s13811_s30 + $0x784] ss:$12 sps:$4 sm:$0xff]  }
 0x4a2   : > { %v4984_v53 = vadd.f32 %v16469_v58, %v3926_v60  ;;  %v3928_v10 = vpop.f32.mrb[193].mxu0 }
 0x4a3   : > { %v15141_v55 = vpop.f32.mrb[208].mxu1  ;;  %v3929_v41 = vpop.f32.mrb[194].mxu0 }
 0x4a4   : > { %16470 = vst [vmem:[#allocation72_spill] sm:$0xff] %v15141_v55  ;;  %5334 = vst [vmem:[%s13524_s27 + $0x700] sm:$0xff] %v4984_v53  ;;  %v4987_v32 = vadd.f32 %v16471_v31, %v3929_v41  ;;  %v8378_v33 = vpop.f32.mrb[209].mxu1  ;;  %v3931_v51 = vpop.f32.mrb[195].mxu0  ;;  %v16473_v53 = vld [vmem:[#allocation71_spill] sm:$0xff] }
 0x4a5   : > { %v15147_v20 = vpop.f32.mrb[210].mxu1  ;;  %v12851_v41 = vld [vmem:[%s13811_s30 + $0x260] ss:$12 sps:$4 sm:$0xff]   ;;  %v12852_v55 = vld [vmem:[%s13811_s30 + $0x278] ss:$12 sps:$4 sm:$0xff]  }
 0x4a6   : > { %16472 = vst [vmem:[#allocation74_spill] sm:$0xff] %v15147_v20  ;;  %5335 = vst [vmem:[%s13524_s27 + $0x708] sm:$0xff] %v4987_v32  ;;  %v8381_v60 = vpop.f32.mrb[211].mxu1  ;;  %11810 = vmatmul.mubr.bf16.gmra.mrb[44].mxu0 %v12846_v44  ;;  %v16474_v20 = vld [vmem:[#allocation73_spill] sm:$0xff] }
 0x4a7   : > { %11813 = vmatprep.mubr.bf16.mxu0 %v12847_v29  ;;  %v12848_v29 = vld [vmem:[%s13811_s30 + $0x780] ss:$12 sps:$4 sm:$0xff]  }
 0x4a8   : > { %8591 = vmatmul.mubr.bf16.gmra.mrb[60].mxu1 %v12843_v45 }
 0x4a9   : > { %v3934_v58 = vpop.f32.mrb[196].mxu0  ;;  %8598 = vmatprep.mubr.bf16.mxu1 %v12850_v42  ;;  %v12855_v42 = vld [vmem:[%s13811_s30 + $0x79c] ss:$12 sps:$4 sm:$0xff]  }
 0x4aa   : > { %v4992_v31 = vadd.f32 %v16473_v53, %v3934_v58  ;;  %v3936_v10 = vpop.f32.mrb[197].mxu0 }
 0x4ab   : > { %v15153_v33 = vpop.f32.mrb[212].mxu1  ;;  %v3937_v51 = vpop.f32.mrb[198].mxu0  ;;  %v12856_v10 = vld [vmem:[%s13811_s30 + $0x290] ss:$12 sps:$4 sm:$0xff]  }
 0x4ac   : > { %5336 = vst [vmem:[%s13524_s27 + $0x710] sm:$0xff] %v4992_v31  ;;  %v4995_v32 = vadd.f32 %v16474_v20, %v3937_v51  ;;  %v8386_v60 = vpop.f32.mrb[213].mxu1  ;;  %v3939_v44 = vpop.f32.mrb[199].mxu0 }
 0x4ad   : > { %v15159_v45 = vpop.f32.mrb[214].mxu1  ;;  %v12857_v44 = vld [vmem:[%s13811_s30 + $0x2a8] ss:$12 sps:$4 sm:$0xff]  }
 0x4ae   : > { %5337 = vst [vmem:[%s13524_s27 + $0x718] sm:$0xff] %v4995_v32  ;;  %v8389_v58 = vpop.f32.mrb[215].mxu1  ;;  %11814 = vmatmul.mubr.bf16.gmra.mrb[48].mxu0 %v12851_v41 }
 0x4af   : > { %11817 = vmatprep.mubr.bf16.mxu0 %v12852_v55  ;;  %v12853_v55 = vld [vmem:[%s13811_s30 + $0x798] ss:$12 sps:$4 sm:$0xff]  }
 0x4b0   : > { %8599 = vmatmul.mubr.bf16.gmra.mrb[64].mxu1 %v12848_v29 }
 0x4b1   : > { %v3942_v53 = vpop.f32.mrb[200].mxu0  ;;  %8606 = vmatprep.mubr.bf16.mxu1 %v12855_v42  ;;  %v12860_v42 = vld [vmem:[%s13811_s30 + $0x7b4] ss:$12 sps:$4 sm:$0xff]  }
 0x4b2   : > { %v5000_v20 = vadd.f32 %v14410_v54, %v3942_v53  ;;  %v3944_v31 = vpop.f32.mrb[201].mxu0 }
 0x4b3   : > { %v15165_v51 = vpop.f32.mrb[216].mxu1  ;;  %v3945_v60 = vpop.f32.mrb[202].mxu0 }
 0x4b4   : > { %16475 = vst [vmem:[#allocation71_spill] sm:$0xff] %v15165_v51  ;;  %5338 = vst [vmem:[%s13524_s27 + $0x720] sm:$0xff] %v5000_v20  ;;  %v5003_v32 = vadd.f32 %v14417_v40, %v3945_v60  ;;  %v8394_v58 = vpop.f32.mrb[217].mxu1  ;;  %v3947_v41 = vpop.f32.mrb[203].mxu0  ;;  %v16477_v20 = vld [vmem:[#allocation12_spill] sm:$0xff] }
 0x4b5   : > { %v15171_v29 = vpop.f32.mrb[218].mxu1  ;;  %v12861_v60 = vld [vmem:[%s13811_s30 + $0x2c0] ss:$12 sps:$4 sm:$0xff]   ;;  %v12862_v51 = vld [vmem:[%s13811_s30 + $0x2d8] ss:$12 sps:$4 sm:$0xff]  }
 0x4b6   : > { %16476 = vst [vmem:[#allocation73_spill] sm:$0xff] %v15171_v29  ;;  %5339 = vst [vmem:[%s13524_s27 + $0x728] sm:$0xff] %v5003_v32  ;;  %v8397_v54 = vpop.f32.mrb[219].mxu1  ;;  %11818 = vmatmul.mubr.bf16.gmra.mrb[52].mxu0 %v12856_v10  ;;  %v16479_v29 = vld [vmem:[#allocation13_spill] sm:$0xff] }
 0x4b7   : > { %11821 = vmatprep.mubr.bf16.mxu0 %v12857_v44  ;;  %v12858_v44 = vld [vmem:[%s13811_s30 + $0x7b0] ss:$12 sps:$4 sm:$0xff]  }
 0x4b8   : > { %8607 = vmatmul.mubr.bf16.gmra.mrb[68].mxu1 %v12853_v55 }
 0x4b9   : > { %v3950_v53 = vpop.f32.mrb[204].mxu0  ;;  %8614 = vmatprep.mubr.bf16.mxu1 %v12860_v42  ;;  %v12865_v42 = vld [vmem:[%s13811_s30 + $0x7cc] ss:$12 sps:$4 sm:$0xff]  }
 0x4ba   : > { %v5008_v40 = vadd.f32 %v16477_v20, %v3950_v53  ;;  %v3952_v31 = vpop.f32.mrb[205].mxu0 }
 0x4bb   : > { %v15177_v58 = vpop.f32.mrb[220].mxu1  ;;  %v3953_v41 = vpop.f32.mrb[206].mxu0 }
 0x4bc   : > { %16478 = vst [vmem:[#allocation12_spill] sm:$0xff] %v15177_v58  ;;  %5340 = vst [vmem:[%s13524_s27 + $0x730] sm:$0xff] %v5008_v40  ;;  %v5011_v32 = vadd.f32 %v16479_v29, %v3953_v41  ;;  %v8402_v54 = vpop.f32.mrb[221].mxu1  ;;  %v3955_v10 = vpop.f32.mrb[207].mxu0  ;;  %v16481_v40 = vld [vmem:[#allocation76_spill] sm:$0xff] }
 0x4bd   : > { %v15183_v55 = vpop.f32.mrb[222].mxu1  ;;  %v12866_v41 = vld [vmem:[%s13811_s30 + $0x2f0] ss:$12 sps:$4 sm:$0xff]   ;;  %v12867_v58 = vld [vmem:[%s13811_s30 + $0x308] ss:$12 sps:$4 sm:$0xff]  }
 0x4be   : > { %16480 = vst [vmem:[#allocation13_spill] sm:$0xff] %v15183_v55  ;;  %5341 = vst [vmem:[%s13524_s27 + $0x738] sm:$0xff] %v5011_v32  ;;  %v8405_v53 = vpop.f32.mrb[223].mxu1  ;;  %11822 = vmatmul.mubr.bf16.gmra.mrb[56].mxu0 %v12861_v60  ;;  %v16483_v55 = vld [vmem:[#allocation78_spill] sm:$0xff] }
 0x4bf   : > { %11825 = vmatprep.mubr.bf16.mxu0 %v12862_v51  ;;  %v12863_v51 = vld [vmem:[%s13811_s30 + $0x7c8] ss:$12 sps:$4 sm:$0xff]  }
 0x4c0   : > { %8615 = vmatmul.mubr.bf16.gmra.mrb[72].mxu1 %v12858_v44 }
 0x4c1   : > { %v3958_v20 = vpop.f32.mrb[208].mxu0  ;;  %8622 = vmatprep.mubr.bf16.mxu1 %v12865_v42  ;;  %v12870_v42 = vld [vmem:[%s13811_s30 + $0x7e4] ss:$12 sps:$4 sm:$0xff]  }
 0x4c2   : > { %v5016_v29 = vadd.f32 %v16481_v40, %v3958_v20  ;;  %v3960_v31 = vpop.f32.mrb[209].mxu0 }
 0x4c3   : > { %v15189_v54 = vpop.f32.mrb[224].mxu1  ;;  %v3961_v10 = vpop.f32.mrb[210].mxu0 }
 0x4c4   : > { %16482 = vst [vmem:[#allocation76_spill] sm:$0xff] %v15189_v54  ;;  %5342 = vst [vmem:[%s13524_s27 + $0x740] sm:$0xff] %v5016_v29  ;;  %v5019_v32 = vadd.f32 %v16483_v55, %v3961_v10  ;;  %v8410_v53 = vpop.f32.mrb[225].mxu1  ;;  %v3963_v60 = vpop.f32.mrb[211].mxu0  ;;  %v16485_v29 = vld [vmem:[#allocation75_spill] sm:$0xff] }
 0x4c5   : > { %v15195_v44 = vpop.f32.mrb[226].mxu1  ;;  %v12871_v10 = vld [vmem:[%s13811_s30 + $0x320] ss:$12 sps:$4 sm:$0xff]   ;;  %v12872_v54 = vld [vmem:[%s13811_s30 + $0x338] ss:$12 sps:$4 sm:$0xff]  }
 0x4c6   : > { %16484 = vst [vmem:[#allocation78_spill] sm:$0xff] %v15195_v44  ;;  %5343 = vst [vmem:[%s13524_s27 + $0x748] sm:$0xff] %v5019_v32  ;;  %v8413_v20 = vpop.f32.mrb[227].mxu1  ;;  %11826 = vmatmul.mubr.bf16.gmra.mrb[60].mxu0 %v12866_v41  ;;  %v16486_v44 = vld [vmem:[#allocation77_spill] sm:$0xff] }
 0x4c7   : > { %11829 = vmatprep.mubr.bf16.mxu0 %v12867_v58  ;;  %v12868_v58 = vld [vmem:[%s13811_s30 + $0x7e0] ss:$12 sps:$4 sm:$0xff]  }
 0x4c8   : > { %8623 = vmatmul.mubr.bf16.gmra.mrb[76].mxu1 %v12863_v51 }
 0x4c9   : > { %v3966_v40 = vpop.f32.mrb[212].mxu0  ;;  %8630 = vmatprep.mubr.bf16.mxu1 %v12870_v42  ;;  %v12875_v42 = vld [vmem:[%s13811_s30 + $0x7fc] ss:$12 sps:$4 sm:$0xff]  }
 0x4ca   : > { %v5024_v55 = vadd.f32 %v16485_v29, %v3966_v40  ;;  %v3968_v31 = vpop.f32.mrb[213].mxu0 }
 0x4cb   : > { %v15201_v53 = vpop.f32.mrb[228].mxu1  ;;  %v3969_v60 = vpop.f32.mrb[214].mxu0  ;;  %v12876_v31 = vld [vmem:[%s13811_s30 + $0x350] ss:$12 sps:$4 sm:$0xff]  }
 0x4cc   : > { %5344 = vst [vmem:[%s13524_s27 + $0x750] sm:$0xff] %v5024_v55  ;;  %v5027_v32 = vadd.f32 %v16486_v44, %v3969_v60  ;;  %v8418_v20 = vpop.f32.mrb[229].mxu1  ;;  %v3971_v41 = vpop.f32.mrb[215].mxu0 }
 0x4cd   : > { %v15207_v51 = vpop.f32.mrb[230].mxu1  ;;  %v12877_v41 = vld [vmem:[%s13811_s30 + $0x368] ss:$12 sps:$4 sm:$0xff]  }
 0x4ce   : > { %5345 = vst [vmem:[%s13524_s27 + $0x758] sm:$0xff] %v5027_v32  ;;  %v8421_v40 = vpop.f32.mrb[231].mxu1  ;;  %11830 = vmatmul.mubr.bf16.gmra.mrb[64].mxu0 %v12871_v10 }
 0x4cf   : > { %11833 = vmatprep.mubr.bf16.mxu0 %v12872_v54  ;;  %v12873_v54 = vld [vmem:[%s13811_s30 + $0x7f8] ss:$12 sps:$4 sm:$0xff]  }
 0x4d0   : > { %8631 = vmatmul.mubr.bf16.gmra.mrb[80].mxu1 %v12868_v58 }
 0x4d1   : > { %v3974_v29 = vpop.f32.mrb[216].mxu0  ;;  %8638 = vmatprep.mubr.bf16.mxu1 %v12875_v42  ;;  %v12880_v42 = vld [vmem:[%s13811_s30 + $0x814] ss:$12 sps:$4 sm:$0xff]  }
 0x4d2   : > { %v5032_v44 = vadd.f32 %v14442_v27, %v3974_v29  ;;  %v3976_v55 = vpop.f32.mrb[217].mxu0 }
 0x4d3   : > { %v15213_v60 = vpop.f32.mrb[232].mxu1  ;;  %v3977_v20 = vpop.f32.mrb[218].mxu0 }
 0x4d4   : > { %16487 = vst [vmem:[#allocation75_spill] sm:$0xff] %v15213_v60  ;;  %5346 = vst [vmem:[%s13524_s27 + $0x760] sm:$0xff] %v5032_v44  ;;  %v5035_v32 = vadd.f32 %v14449_v6, %v3977_v20  ;;  %v8426_v40 = vpop.f32.mrb[233].mxu1  ;;  %v3979_v10 = vpop.f32.mrb[219].mxu0  ;;  %v16489_v44 = vld [vmem:[#allocation14_spill] sm:$0xff] }
 0x4d5   : > { %v15219_v58 = vpop.f32.mrb[234].mxu1  ;;  %v12881_v20 = vld [vmem:[%s13811_s30 + $0x380] ss:$12 sps:$4 sm:$0xff]   ;;  %v12882_v60 = vld [vmem:[%s13811_s30 + $0x398] ss:$12 sps:$4 sm:$0xff]  }
 0x4d6   : > { %16488 = vst [vmem:[#allocation77_spill] sm:$0xff] %v15219_v58  ;;  %5347 = vst [vmem:[%s13524_s27 + $0x768] sm:$0xff] %v5035_v32  ;;  %v8429_v27 = vpop.f32.mrb[235].mxu1  ;;  %11834 = vmatmul.mubr.bf16.gmra.mrb[68].mxu0 %v12876_v31  ;;  %v16491_v58 = vld [vmem:[#allocation15_spill] sm:$0xff] }
 0x4d7   : > { %11837 = vmatprep.mubr.bf16.mxu0 %v12877_v41  ;;  %v12878_v41 = vld [vmem:[%s13811_s30 + $0x810] ss:$12 sps:$4 sm:$0xff]  }
 0x4d8   : > { %8639 = vmatmul.mubr.bf16.gmra.mrb[84].mxu1 %v12873_v54 }
 0x4d9   : > { %v3982_v29 = vpop.f32.mrb[220].mxu0  ;;  %8646 = vmatprep.mubr.bf16.mxu1 %v12880_v42  ;;  %v12885_v42 = vld [vmem:[%s13811_s30 + $0x82c] ss:$12 sps:$4 sm:$0xff]  }
 0x4da   : > { %v5040_v6 = vadd.f32 %v16489_v44, %v3982_v29  ;;  %v3984_v55 = vpop.f32.mrb[221].mxu0 }
 0x4db   : > { %v15225_v40 = vpop.f32.mrb[236].mxu1  ;;  %v3985_v10 = vpop.f32.mrb[222].mxu0 }
 0x4dc   : > { %16490 = vst [vmem:[#allocation14_spill] sm:$0xff] %v15225_v40  ;;  %5348 = vst [vmem:[%s13524_s27 + $0x770] sm:$0xff] %v5040_v6  ;;  %v5043_v32 = vadd.f32 %v16491_v58, %v3985_v10  ;;  %v8434_v27 = vpop.f32.mrb[237].mxu1  ;;  %v3987_v31 = vpop.f32.mrb[223].mxu0  ;;  %v16493_v6 = vld [vmem:[#allocation80_spill] sm:$0xff] }
 0x4dd   : > { %v15231_v54 = vpop.f32.mrb[238].mxu1  ;;  %v12886_v10 = vld [vmem:[%s13811_s30 + $0x3b0] ss:$12 sps:$4 sm:$0xff]   ;;  %v12887_v40 = vld [vmem:[%s13811_s30 + $0x3c8] ss:$12 sps:$4 sm:$0xff]  }
 0x4de   : > { %16492 = vst [vmem:[#allocation15_spill] sm:$0xff] %v15231_v54  ;;  %5349 = vst [vmem:[%s13524_s27 + $0x778] sm:$0xff] %v5043_v32  ;;  %v8437_v29 = vpop.f32.mrb[239].mxu1  ;;  %11838 = vmatmul.mubr.bf16.gmra.mrb[72].mxu0 %v12881_v20  ;;  %v16495_v54 = vld [vmem:[#allocation82_spill] sm:$0xff] }
 0x4df   : > { %11841 = vmatprep.mubr.bf16.mxu0 %v12882_v60  ;;  %v12883_v60 = vld [vmem:[%s13811_s30 + $0x828] ss:$12 sps:$4 sm:$0xff]  }
 0x4e0   : > { %8647 = vmatmul.mubr.bf16.gmra.mrb[88].mxu1 %v12878_v41 }
 0x4e1   : > { %v3990_v44 = vpop.f32.mrb[224].mxu0  ;;  %8654 = vmatprep.mubr.bf16.mxu1 %v12885_v42  ;;  %v12890_v42 = vld [vmem:[%s13811_s30 + $0x844] ss:$12 sps:$4 sm:$0xff]  }
 0x4e2   : > { %v5048_v58 = vadd.f32 %v16493_v6, %v3990_v44  ;;  %v3992_v55 = vpop.f32.mrb[225].mxu0 }
 0x4e3   : > { %v15237_v27 = vpop.f32.mrb[240].mxu1  ;;  %v3993_v31 = vpop.f32.mrb[226].mxu0 }
 0x4e4   : > { %16494 = vst [vmem:[#allocation80_spill] sm:$0xff] %v15237_v27  ;;  %5350 = vst [vmem:[%s13524_s27 + $0x780] sm:$0xff] %v5048_v58  ;;  %v5051_v32 = vadd.f32 %v16495_v54, %v3993_v31  ;;  %v8442_v29 = vpop.f32.mrb[241].mxu1  ;;  %v3995_v20 = vpop.f32.mrb[227].mxu0  ;;  %v16497_v58 = vld [vmem:[#allocation79_spill] sm:$0xff] }
 0x4e5   : > { %v15243_v41 = vpop.f32.mrb[242].mxu1  ;;  %v12891_v31 = vld [vmem:[%s13811_s30 + $0x3e0] ss:$12 sps:$4 sm:$0xff]   ;;  %v12892_v27 = vld [vmem:[%s13811_s30 + $0x3f8] ss:$12 sps:$4 sm:$0xff]  }
 0x4e6   : > { %16496 = vst [vmem:[#allocation82_spill] sm:$0xff] %v15243_v41  ;;  %5351 = vst [vmem:[%s13524_s27 + $0x788] sm:$0xff] %v5051_v32  ;;  %v8445_v44 = vpop.f32.mrb[243].mxu1  ;;  %11842 = vmatmul.mubr.bf16.gmra.mrb[76].mxu0 %v12886_v10  ;;  %v16498_v41 = vld [vmem:[#allocation81_spill] sm:$0xff] }
 0x4e7   : > { %11845 = vmatprep.mubr.bf16.mxu0 %v12887_v40  ;;  %v12888_v40 = vld [vmem:[%s13811_s30 + $0x840] ss:$12 sps:$4 sm:$0xff]  }
 0x4e8   : > { %8655 = vmatmul.mubr.bf16.gmra.mrb[92].mxu1 %v12883_v60 }
 0x4e9   : > { %v3998_v6 = vpop.f32.mrb[228].mxu0  ;;  %8662 = vmatprep.mubr.bf16.mxu1 %v12890_v42  ;;  %v12895_v42 = vld [vmem:[%s13811_s30 + $0x85c] ss:$12 sps:$4 sm:$0xff]  }
 0x4ea   : > { %v5056_v54 = vadd.f32 %v16497_v58, %v3998_v6  ;;  %v4000_v55 = vpop.f32.mrb[229].mxu0 }
 0x4eb   : > { %v15249_v29 = vpop.f32.mrb[244].mxu1  ;;  %v4001_v20 = vpop.f32.mrb[230].mxu0  ;;  %v12896_v55 = vld [vmem:[%s13811_s30 + $0x410] ss:$12 sps:$4 sm:$0xff]  }
 0x4ec   : > { %5352 = vst [vmem:[%s13524_s27 + $0x790] sm:$0xff] %v5056_v54  ;;  %v5059_v32 = vadd.f32 %v16498_v41, %v4001_v20  ;;  %v8450_v44 = vpop.f32.mrb[245].mxu1  ;;  %v4003_v10 = vpop.f32.mrb[231].mxu0 }
 0x4ed   : > { %v15255_v60 = vpop.f32.mrb[246].mxu1  ;;  %v12897_v10 = vld [vmem:[%s13811_s30 + $0x428] ss:$12 sps:$4 sm:$0xff]  }
 0x4ee   : > { %5353 = vst [vmem:[%s13524_s27 + $0x798] sm:$0xff] %v5059_v32  ;;  %v8453_v6 = vpop.f32.mrb[247].mxu1  ;;  %11846 = vmatmul.mubr.bf16.gmra.mrb[80].mxu0 %v12891_v31 }
 0x4ef   : > { %11849 = vmatprep.mubr.bf16.mxu0 %v12892_v27  ;;  %v12893_v27 = vld [vmem:[%s13811_s30 + $0x858] ss:$12 sps:$4 sm:$0xff]  }
 0x4f0   : > { %8663 = vmatmul.mubr.bf16.gmra.mrb[96].mxu1 %v12888_v40 }
 0x4f1   : > { %v4006_v58 = vpop.f32.mrb[232].mxu0  ;;  %8670 = vmatprep.mubr.bf16.mxu1 %v12895_v42  ;;  %v12900_v42 = vld [vmem:[%s13811_s30 + $0x874] ss:$12 sps:$4 sm:$0xff]  }
 0x4f2   : > { %v5064_v41 = vadd.f32 %v14474_v18, %v4006_v58  ;;  %v4008_v54 = vpop.f32.mrb[233].mxu0 }
 0x4f3   : > { %v15261_v20 = vpop.f32.mrb[248].mxu1  ;;  %v4009_v44 = vpop.f32.mrb[234].mxu0 }
 0x4f4   : > { %16499 = vst [vmem:[#allocation79_spill] sm:$0xff] %v15261_v20  ;;  %5354 = vst [vmem:[%s13524_s27 + $0x7a0] sm:$0xff] %v5064_v41  ;;  %v5067_v32 = vadd.f32 %v14481_v16, %v4009_v44  ;;  %v8458_v6 = vpop.f32.mrb[249].mxu1  ;;  %v4011_v31 = vpop.f32.mrb[235].mxu0  ;;  %v16501_v41 = vld [vmem:[#allocation16_spill] sm:$0xff] }
 0x4f5   : > { %v15267_v40 = vpop.f32.mrb[250].mxu1  ;;  %v12901_v44 = vld [vmem:[%s13811_s30 + $0x440] ss:$12 sps:$4 sm:$0xff]   ;;  %v12902_v20 = vld [vmem:[%s13811_s30 + $0x458] ss:$12 sps:$4 sm:$0xff]  }
 0x4f6   : > { %16500 = vst [vmem:[#allocation81_spill] sm:$0xff] %v15267_v40  ;;  %5355 = vst [vmem:[%s13524_s27 + $0x7a8] sm:$0xff] %v5067_v32  ;;  %v8461_v18 = vpop.f32.mrb[251].mxu1  ;;  %11850 = vmatmul.mubr.bf16.gmra.mrb[84].mxu0 %v12896_v55  ;;  %v16503_v40 = vld [vmem:[#allocation17_spill] sm:$0xff] }
 0x4f7   : > { %11853 = vmatprep.mubr.bf16.mxu0 %v12897_v10  ;;  %v12898_v10 = vld [vmem:[%s13811_s30 + $0x870] ss:$12 sps:$4 sm:$0xff]  }
 0x4f8   : > { %8671 = vmatmul.mubr.bf16.gmra.mrb[100].mxu1 %v12893_v27 }
 0x4f9   : > { %v4014_v58 = vpop.f32.mrb[236].mxu0  ;;  %8678 = vmatprep.mubr.bf16.mxu1 %v12900_v42  ;;  %v12905_v42 = vld [vmem:[%s13811_s30 + $0x88c] ss:$12 sps:$4 sm:$0xff]  }
 0x4fa   : > { %v5072_v16 = vadd.f32 %v16501_v41, %v4014_v58  ;;  %v4016_v54 = vpop.f32.mrb[237].mxu0 }
 0x4fb   : > { %v15273_v6 = vpop.f32.mrb[252].mxu1  ;;  %v4017_v31 = vpop.f32.mrb[238].mxu0 }
 0x4fc   : > { %16502 = vst [vmem:[#allocation16_spill] sm:$0xff] %v15273_v6  ;;  %5356 = vst [vmem:[%s13524_s27 + $0x7b0] sm:$0xff] %v5072_v16  ;;  %v5075_v32 = vadd.f32 %v16503_v40, %v4017_v31  ;;  %v8466_v18 = vpop.f32.mrb[253].mxu1  ;;  %v4019_v55 = vpop.f32.mrb[239].mxu0  ;;  %v16505_v16 = vld [vmem:[#allocation84_spill] sm:$0xff] }
 0x4fd   : > { %v15279_v27 = vpop.f32.mrb[254].mxu1  ;;  %v12906_v31 = vld [vmem:[%s13811_s30 + $0x470] ss:$12 sps:$4 sm:$0xff]   ;;  %v12907_v6 = vld [vmem:[%s13811_s30 + $0x488] ss:$12 sps:$4 sm:$0xff]  }
 0x4fe   : > { %16504 = vst [vmem:[#allocation17_spill] sm:$0xff] %v15279_v27  ;;  %5357 = vst [vmem:[%s13524_s27 + $0x7b8] sm:$0xff] %v5075_v32  ;;  %v8469_v58 = vpop.f32.mrb[255].mxu1  ;;  %11854 = vmatmul.mubr.bf16.gmra.mrb[88].mxu0 %v12901_v44  ;;  %v16507_v27 = vld [vmem:[#allocation86_spill] sm:$0xff] }
 0x4ff   : > { %11857 = vmatprep.mubr.bf16.mxu0 %v12902_v20  ;;  %v12903_v20 = vld [vmem:[%s13811_s30 + $0x888] ss:$12 sps:$4 sm:$0xff]  }
 0x500   : > { %8679 = vmatmul.mubr.bf16.gmra.mrb[104].mxu1 %v12898_v10 }
 0x501   : > { %v4022_v41 = vpop.f32.mrb[240].mxu0  ;;  %8686 = vmatprep.mubr.bf16.mxu1 %v12905_v42  ;;  %v12910_v42 = vld [vmem:[%s13811_s30 + $0x8a4] ss:$12 sps:$4 sm:$0xff]  }
 0x502   : > { %v5080_v40 = vadd.f32 %v16505_v16, %v4022_v41  ;;  %v4024_v54 = vpop.f32.mrb[241].mxu0 }
 0x503   : > { %v15285_v18 = vpop.f32.mrb[0].mxu1  ;;  %v4025_v55 = vpop.f32.mrb[242].mxu0 }
 0x504   : > { %16506 = vst [vmem:[#allocation84_spill] sm:$0xff] %v15285_v18  ;;  %5358 = vst [vmem:[%s13524_s27 + $0x7c0] sm:$0xff] %v5080_v40  ;;  %v5083_v32 = vadd.f32 %v16507_v27, %v4025_v55  ;;  %v8474_v58 = vpop.f32.mrb[1].mxu1  ;;  %v4027_v44 = vpop.f32.mrb[243].mxu0  ;;  %v16509_v40 = vld [vmem:[#allocation83_spill] sm:$0xff] }
 0x505   : > { %v15291_v10 = vpop.f32.mrb[2].mxu1  ;;  %v12911_v55 = vld [vmem:[%s13811_s30 + $0x4a0] ss:$12 sps:$4 sm:$0xff]   ;;  %v12912_v18 = vld [vmem:[%s13811_s30 + $0x4b8] ss:$12 sps:$4 sm:$0xff]  }
 0x506   : > { %16508 = vst [vmem:[#allocation86_spill] sm:$0xff] %v15291_v10  ;;  %5359 = vst [vmem:[%s13524_s27 + $0x7c8] sm:$0xff] %v5083_v32  ;;  %v8477_v41 = vpop.f32.mrb[3].mxu1  ;;  %11858 = vmatmul.mubr.bf16.gmra.mrb[92].mxu0 %v12906_v31  ;;  %v16510_v10 = vld [vmem:[#allocation85_spill] sm:$0xff] }
 0x507   : > { %11861 = vmatprep.mubr.bf16.mxu0 %v12907_v6  ;;  %v12908_v6 = vld [vmem:[%s13811_s30 + $0x8a0] ss:$12 sps:$4 sm:$0xff]  }
 0x508   : > { %8687 = vmatmul.mubr.bf16.gmra.mrb[108].mxu1 %v12903_v20 }
 0x509   : > { %v4030_v16 = vpop.f32.mrb[244].mxu0  ;;  %8694 = vmatprep.mubr.bf16.mxu1 %v12910_v42  ;;  %v12915_v42 = vld [vmem:[%s13811_s30 + $0x8bc] ss:$12 sps:$4 sm:$0xff]  }
 0x50a   : > { %v5088_v27 = vadd.f32 %v16509_v40, %v4030_v16  ;;  %v4032_v54 = vpop.f32.mrb[245].mxu0 }
 0x50b   : > { %v15297_v58 = vpop.f32.mrb[4].mxu1  ;;  %v4033_v44 = vpop.f32.mrb[246].mxu0  ;;  %v12916_v54 = vld [vmem:[%s13811_s30 + $0x4d0] ss:$12 sps:$4 sm:$0xff]  }
 0x50c   : > { %5360 = vst [vmem:[%s13524_s27 + $0x7d0] sm:$0xff] %v5088_v27  ;;  %v5091_v32 = vadd.f32 %v16510_v10, %v4033_v44  ;;  %v8482_v41 = vpop.f32.mrb[5].mxu1  ;;  %v4035_v31 = vpop.f32.mrb[247].mxu0 }
 0x50d   : > { %v15303_v20 = vpop.f32.mrb[6].mxu1  ;;  %v12917_v31 = vld [vmem:[%s13811_s30 + $0x4e8] ss:$12 sps:$4 sm:$0xff]  }
 0x50e   : > { %5361 = vst [vmem:[%s13524_s27 + $0x7d8] sm:$0xff] %v5091_v32  ;;  %v8485_v16 = vpop.f32.mrb[7].mxu1  ;;  %11862 = vmatmul.mubr.bf16.gmra.mrb[96].mxu0 %v12911_v55 }
 0x50f   : > { %11865 = vmatprep.mubr.bf16.mxu0 %v12912_v18  ;;  %v12913_v18 = vld [vmem:[%s13811_s30 + $0x8b8] ss:$12 sps:$4 sm:$0xff]  }
 0x510   : > { %8695 = vmatmul.mubr.bf16.gmra.mrb[112].mxu1 %v12908_v6 }
 0x511   : > { %v4038_v40 = vpop.f32.mrb[248].mxu0  ;;  %8702 = vmatprep.mubr.bf16.mxu1 %v12915_v42  ;;  %v12920_v42 = vld [vmem:[%s13811_s30 + $0x8d4] ss:$12 sps:$4 sm:$0xff]  }
 0x512   : > { %v5096_v10 = vadd.f32 %v14506_v15, %v4038_v40  ;;  %v4040_v27 = vpop.f32.mrb[249].mxu0 }
 0x513   : > { %v15309_v44 = vpop.f32.mrb[8].mxu1  ;;  %v4041_v41 = vpop.f32.mrb[250].mxu0 }
 0x514   : > { %16511 = vst [vmem:[#allocation83_spill] sm:$0xff] %v15309_v44  ;;  %5362 = vst [vmem:[%s13524_s27 + $0x7e0] sm:$0xff] %v5096_v10  ;;  %v5099_v32 = vadd.f32 %v14513_v62, %v4041_v41  ;;  %v8490_v16 = vpop.f32.mrb[9].mxu1  ;;  %v4043_v55 = vpop.f32.mrb[251].mxu0  ;;  %v16513_v10 = vld [vmem:[#allocation18_spill] sm:$0xff] }
 0x515   : > { %v15315_v6 = vpop.f32.mrb[10].mxu1  ;;  %v12921_v41 = vld [vmem:[%s13811_s30 + $0x500] ss:$12 sps:$4 sm:$0xff]   ;;  %v12918_v44 = vld [vmem:[%s13811_s30 + $0x8d0] ss:$12 sps:$4 sm:$0xff]  }
 0x516   : > { %16512 = vst [vmem:[#allocation85_spill] sm:$0xff] %v15315_v6  ;;  %5363 = vst [vmem:[%s13524_s27 + $0x7e8] sm:$0xff] %v5099_v32  ;;  %v8493_v15 = vpop.f32.mrb[11].mxu1  ;;  %11866 = vmatmul.mubr.bf16.gmra.mrb[100].mxu0 %v12916_v54  ;;  %v12922_v6 = vld [vmem:[%s13811_s30 + $0x518] ss:$12 sps:$4 sm:$0xff]   ;;  %v16515_v32 = vld [vmem:[#allocation19_spill] sm:$0xff] }
 0x517   : > { %11869 = vmatprep.mubr.bf16.mxu0 %v12917_v31 }
 0x518   : > { %8703 = vmatmul.mubr.bf16.gmra.mrb[116].mxu1 %v12913_v18 }
 0x519   : > { %v4046_v40 = vpop.f32.mrb[252].mxu0  ;;  %8710 = vmatprep.mubr.bf16.mxu1 %v12920_v42  ;;  %v12925_v42 = vld [vmem:[%s13811_s30 + $0x8ec] ss:$12 sps:$4 sm:$0xff]  }
 0x51a   : > { %v5104_v62 = vadd.f32 %v16513_v10, %v4046_v40  ;;  %v4048_v27 = vpop.f32.mrb[253].mxu0 }
 0x51b   : > { %v15321_v16 = vpop.f32.mrb[12].mxu1  ;;  %v4049_v55 = vpop.f32.mrb[254].mxu0 }
 0x51c   : > { %16514 = vst [vmem:[#allocation18_spill] sm:$0xff] %v15321_v16  ;;  %5364 = vst [vmem:[%s13524_s27 + $0x7f0] sm:$0xff] %v5104_v62  ;;  %v5107_v15 = vadd.f32 %v16515_v32, %v4049_v55  ;;  %v8498_v54 = vpop.f32.mrb[13].mxu1  ;;  %v4051_v31 = vpop.f32.mrb[255].mxu0  ;;  %v12926_v55 = vld [vmem:[%s13811_s30 + $0x530] ss:$12 sps:$4 sm:$0xff]  }
 0x51d   : > { %v15327_v18 = vpop.f32.mrb[14].mxu1  ;;  %v12930_v16 = vld [vmem:[%s13811_s30 + $0x904] ss:$12 sps:$4 sm:$0xff]  }
 0x51e   : > { %16516 = vst [vmem:[#allocation19_spill] sm:$0xff] %v15327_v18  ;;  %5365 = vst [vmem:[%s13524_s27 + $0x7f8] sm:$0xff] %v5107_v15  ;;  %v8501_v40 = vpop.f32.mrb[15].mxu1  ;;  %11870 = vmatmul.mubr.bf16.gmra.mrb[104].mxu0 %v12921_v41  ;;  %v12927_v15 = vld [vmem:[%s13811_s30 + $0x548] ss:$12 sps:$4 sm:$0xff]  }
 0x51f   : > { %11873 = vmatprep.mubr.bf16.mxu0 %v12922_v6  ;;  %v16518_v6 = vld [vmem:[#allocation87_spill] sm:$0xff] }
 0x520   : > { %8711 = vmatmul.mubr.bf16.gmra.mrb[120].mxu1 %v12918_v44 }
 0x521   : > { %v11767_v10 = vpop.f32.mrb[0].mxu0  ;;  %8718 = vmatprep.mubr.bf16.mxu1 %v12925_v42  ;;  %v12923_v42 = vld [vmem:[%s13811_s30 + $0x8e8] ss:$12 sps:$4 sm:$0xff]  }
 0x522   : > { %v9026_v62 = vadd.f32 %v11767_v10, %v14529_v4  ;;  %v9017_v27 = vpop.f32.mrb[1].mxu0  ;;  %v16519_v4 = vld [vmem:[#allocation88_spill] sm:$0xff] }
 0x523   : > { %v15340_v41 = vpop.f32.mrb[16].mxu1  ;;  %v9018_v44 = vadd.f32 %v9017_v27, %v16518_v6  ;;  %v11768_v32 = vpop.f32.mrb[2].mxu0  ;;  %v12931_v6 = vld [vmem:[%s13811_s30 + $0x560] ss:$12 sps:$4 sm:$0xff]  }
 0x524   : > { %16517 = vst [vmem:[#allocation89_spill] sm:$0xff] %v15340_v41  ;;  %10042 = vst [vmem:[%s15336_s26 + $0x10] sm:$0xff] %v9026_v62  ;;  %v8506_v54 = vpop.f32.mrb[17].mxu1  ;;  %v9029_v31 = vadd.f32 %v11768_v32, %v14535_v46  ;;  %v9020_v40 = vpop.f32.mrb[3].mxu0  ;;  %v16520_v32 = vld [vmem:[#allocation20_spill] sm:$0xff] }
 0x525   : > { %10040 = vst [vmem:[%s15336_s26] sm:$0xff] %v9018_v44  ;;  %v15348_v18 = vpop.f32.mrb[18].mxu1  ;;  %v9021_v10 = vadd.f32 %v9020_v40, %v16519_v4 }
 0x526   : > { %10043 = vst [vmem:[%s15336_s26 + $0x18] sm:$0xff] %v9029_v31  ;;  %v8509_v41 = vpop.f32.mrb[19].mxu1  ;;  %11874 = vmatmul.mubr.bf16.gmra.mrb[108].mxu0 %v12926_v55  ;;  %v12932_v55 = vld [vmem:[%s13811_s30 + $0x578] ss:$12 sps:$4 sm:$0xff]  }
 0x527   : > { %10041 = vst [vmem:[%s15336_s26 + $0x8] sm:$0xff] %v9021_v10  ;;  %11877 = vmatprep.mubr.bf16.mxu0 %v12927_v15  ;;  %v12935_v10 = vld [vmem:[%s13811_s30 + $0x91c] ss:$12 sps:$4 sm:$0xff]  }
 0x528   : > { %8719 = vmatmul.mubr.bf16.gmra.mrb[124].mxu1 %v12923_v42 }
 0x529   : > { %v11771_v46 = vpop.f32.mrb[4].mxu0  ;;  %8726 = vmatprep.mubr.bf16.mxu1 %v12930_v16  ;;  %v12928_v16 = vld [vmem:[%s13811_s30 + $0x900] ss:$12 sps:$4 sm:$0xff]  }
 0x52a   : > { %v9042_v62 = vadd.f32 %v11771_v46, %v14553_v26  ;;  %v9033_v27 = vpop.f32.mrb[5].mxu0  ;;  %v16521_v26 = vld [vmem:[#allocation21_spill] sm:$0xff] }
 0x52b   : > { %v15356_v44 = vpop.f32.mrb[20].mxu1  ;;  %v9034_v54 = vadd.f32 %v9033_v27, %v16520_v32  ;;  %v11772_v41 = vpop.f32.mrb[6].mxu0  ;;  %v12936_v32 = vld [vmem:[%s13811_s30 + $0x590] ss:$12 sps:$4 sm:$0xff]  }
 0x52c   : > { %10046 = vst [vmem:[%s15336_s26 + $0x30] sm:$0xff] %v9042_v62  ;;  %v8514_v31 = vpop.f32.mrb[21].mxu1  ;;  %v9045_v15 = vadd.f32 %v11772_v41, %v14559_v37  ;;  %v9036_v40 = vpop.f32.mrb[7].mxu0  ;;  %v16522_v41 = vld [vmem:[#allocation22_spill] sm:$0xff] }
 0x52d   : > { %10044 = vst [vmem:[%s15336_s26 + $0x20] sm:$0xff] %v9034_v54  ;;  %v15364_v42 = vpop.f32.mrb[22].mxu1  ;;  %v9037_v4 = vadd.f32 %v9036_v40, %v16521_v26  ;;  %v12933_v26 = vld [vmem:[%s13811_s30 + $0x918] ss:$12 sps:$4 sm:$0xff]  }
 0x52e   : > { %10047 = vst [vmem:[%s15336_s26 + $0x38] sm:$0xff] %v9045_v15  ;;  %v8517_v46 = vpop.f32.mrb[23].mxu1  ;;  %11878 = vmatmul.mubr.bf16.gmra.mrb[112].mxu0 %v12931_v6  ;;  %v12937_v6 = vld [vmem:[%s13811_s30 + $0x5a8] ss:$12 sps:$4 sm:$0xff]  }
 0x52f   : > { %10045 = vst [vmem:[%s15336_s26 + $0x28] sm:$0xff] %v9037_v4  ;;  %11881 = vmatprep.mubr.bf16.mxu0 %v12932_v55  ;;  %v12940_v46 = vld [vmem:[%s13811_s30 + $0x934] ss:$12 sps:$4 sm:$0xff]  }
 0x530   : > { %8727 = vmatmul.mubr.bf16.gmra.mrb[128].mxu1 %v12928_v16 }
 0x531   : > { %v11775_v37 = vpop.f32.mrb[8].mxu0  ;;  %8734 = vmatprep.mubr.bf16.mxu1 %v12935_v10 }
 0x532   : > { %v9058_v62 = vadd.f32 %v11775_v37, %v14577_v5  ;;  %v9049_v27 = vpop.f32.mrb[9].mxu0  ;;  %v16523_v5 = vld [vmem:[#allocation23_spill] sm:$0xff] }
 0x533   : > { %v15372_v54 = vpop.f32.mrb[24].mxu1  ;;  %v9050_v31 = vadd.f32 %v9049_v27, %v16522_v41  ;;  %v11776_v15 = vpop.f32.mrb[10].mxu0  ;;  %v12941_v41 = vld [vmem:[%s13811_s30 + $0x5c0] ss:$12 sps:$4 sm:$0xff]  }
 0x534   : > { %10050 = vst [vmem:[%s15336_s26 + $0x50] sm:$0xff] %v9058_v62  ;;  %v8522_v40 = vpop.f32.mrb[25].mxu1  ;;  %v9061_v55 = vadd.f32 %v11776_v15, %v14583_v9  ;;  %v9052_v16 = vpop.f32.mrb[11].mxu0  ;;  %v16524_v15 = vld [vmem:[#allocation24_spill] sm:$0xff] }
 0x535   : > { %10048 = vst [vmem:[%s15336_s26 + $0x40] sm:$0xff] %v9050_v31  ;;  %v15380_v4 = vpop.f32.mrb[26].mxu1  ;;  %v9053_v10 = vadd.f32 %v9052_v16, %v16523_v5  ;;  %v12938_v5 = vld [vmem:[%s13811_s30 + $0x930] ss:$12 sps:$4 sm:$0xff]  }
 0x536   : > { %10051 = vst [vmem:[%s15336_s26 + $0x58] sm:$0xff] %v9061_v55  ;;  %v8525_v37 = vpop.f32.mrb[27].mxu1  ;;  %11882 = vmatmul.mubr.bf16.gmra.mrb[116].mxu0 %v12936_v32  ;;  %v12942_v32 = vld [vmem:[%s13811_s30 + $0x5d8] ss:$12 sps:$4 sm:$0xff]  }
 0x537   : > { %10049 = vst [vmem:[%s15336_s26 + $0x48] sm:$0xff] %v9053_v10  ;;  %11885 = vmatprep.mubr.bf16.mxu0 %v12937_v6  ;;  %v12945_v37 = vld [vmem:[%s13811_s30 + $0x94c] ss:$12 sps:$4 sm:$0xff]  }
 0x538   : > { %8735 = vmatmul.mubr.bf16.gmra.mrb[132].mxu1 %v12933_v26 }
 0x539   : > { %v11779_v9 = vpop.f32.mrb[12].mxu0  ;;  %8742 = vmatprep.mubr.bf16.mxu1 %v12940_v46 }
 0x53a   : > { %v9074_v62 = vadd.f32 %v11779_v9, %v14601_v59  ;;  %v9065_v27 = vpop.f32.mrb[13].mxu0  ;;  %v16525_v59 = vld [vmem:[#allocation25_spill] sm:$0xff] }
 0x53b   : > { %v15388_v31 = vpop.f32.mrb[28].mxu1  ;;  %v9066_v40 = vadd.f32 %v9065_v27, %v16524_v15  ;;  %v11780_v55 = vpop.f32.mrb[14].mxu0  ;;  %v12946_v15 = vld [vmem:[%s13811_s30 + $0x5f0] ss:$12 sps:$4 sm:$0xff]  }
 0x53c   : > { %10054 = vst [vmem:[%s15336_s26 + $0x70] sm:$0xff] %v9074_v62  ;;  %v8530_v16 = vpop.f32.mrb[29].mxu1  ;;  %v9077_v6 = vadd.f32 %v11780_v55, %v14607_v13  ;;  %v9068_v26 = vpop.f32.mrb[15].mxu0  ;;  %v16526_v55 = vld [vmem:[#allocation26_spill] sm:$0xff] }
 0x53d   : > { %10052 = vst [vmem:[%s15336_s26 + $0x60] sm:$0xff] %v9066_v40  ;;  %v15396_v10 = vpop.f32.mrb[30].mxu1  ;;  %v9069_v46 = vadd.f32 %v9068_v26, %v16525_v59  ;;  %v12943_v59 = vld [vmem:[%s13811_s30 + $0x948] ss:$12 sps:$4 sm:$0xff]  }
 0x53e   : > { %10055 = vst [vmem:[%s15336_s26 + $0x78] sm:$0xff] %v9077_v6  ;;  %v8533_v9 = vpop.f32.mrb[31].mxu1  ;;  %11886 = vmatmul.mubr.bf16.gmra.mrb[120].mxu0 %v12941_v41  ;;  %v12947_v41 = vld [vmem:[%s13811_s30 + $0x608] ss:$12 sps:$4 sm:$0xff]  }
 0x53f   : > { %10053 = vst [vmem:[%s15336_s26 + $0x68] sm:$0xff] %v9069_v46  ;;  %11889 = vmatprep.mubr.bf16.mxu0 %v12942_v32  ;;  %v12950_v9 = vld [vmem:[%s13811_s30 + $0x964] ss:$12 sps:$4 sm:$0xff]  }
 0x540   : > { %8743 = vmatmul.mubr.bf16.gmra.mrb[136].mxu1 %v12938_v5 }
 0x541   : > { %v11783_v13 = vpop.f32.mrb[16].mxu0  ;;  %8750 = vmatprep.mubr.bf16.mxu1 %v12945_v37 }
 0x542   : > { %v9090_v62 = vadd.f32 %v11783_v13, %v14625_v12  ;;  %v9081_v27 = vpop.f32.mrb[17].mxu0  ;;  %v16527_v12 = vld [vmem:[#allocation27_spill] sm:$0xff] }
 0x543   : > { %v15404_v40 = vpop.f32.mrb[32].mxu1  ;;  %v9082_v16 = vadd.f32 %v9081_v27, %v16526_v55  ;;  %v11784_v6 = vpop.f32.mrb[18].mxu0  ;;  %v12951_v55 = vld [vmem:[%s13811_s30 + $0x620] ss:$12 sps:$4 sm:$0xff]  }
 0x544   : > { %10058 = vst [vmem:[%s15336_s26 + $0x90] sm:$0xff] %v9090_v62  ;;  %v8538_v26 = vpop.f32.mrb[33].mxu1  ;;  %v9093_v32 = vadd.f32 %v11784_v6, %v14631_v57  ;;  %v9084_v5 = vpop.f32.mrb[19].mxu0  ;;  %v16528_v6 = vld [vmem:[#allocation28_spill] sm:$0xff] }
 0x545   : > { %10056 = vst [vmem:[%s15336_s26 + $0x80] sm:$0xff] %v9082_v16  ;;  %v15412_v46 = vpop.f32.mrb[34].mxu1  ;;  %v9085_v37 = vadd.f32 %v9084_v5, %v16527_v12  ;;  %v12948_v12 = vld [vmem:[%s13811_s30 + $0x960] ss:$12 sps:$4 sm:$0xff]  }
 0x546   : > { %10059 = vst [vmem:[%s15336_s26 + $0x98] sm:$0xff] %v9093_v32  ;;  %v8541_v13 = vpop.f32.mrb[35].mxu1  ;;  %11890 = vmatmul.mubr.bf16.gmra.mrb[124].mxu0 %v12946_v15  ;;  %v12952_v15 = vld [vmem:[%s13811_s30 + $0x638] ss:$12 sps:$4 sm:$0xff]  }
 0x547   : > { %10057 = vst [vmem:[%s15336_s26 + $0x88] sm:$0xff] %v9085_v37  ;;  %11893 = vmatprep.mubr.bf16.mxu0 %v12947_v41  ;;  %v12955_v13 = vld [vmem:[%s13811_s30 + $0x97c] ss:$12 sps:$4 sm:$0xff]  }
 0x548   : > { %8751 = vmatmul.mubr.bf16.gmra.mrb[140].mxu1 %v12943_v59 }
 0x549   : > { %v11787_v57 = vpop.f32.mrb[20].mxu0  ;;  %8758 = vmatprep.mubr.bf16.mxu1 %v12950_v9 }
 0x54a   : > { %v9106_v62 = vadd.f32 %v11787_v57, %v14649_v52  ;;  %v9097_v27 = vpop.f32.mrb[21].mxu0  ;;  %v16529_v52 = vld [vmem:[#allocation29_spill] sm:$0xff] }
 0x54b   : > { %v15420_v16 = vpop.f32.mrb[36].mxu1  ;;  %v9098_v26 = vadd.f32 %v9097_v27, %v16528_v6  ;;  %v11788_v32 = vpop.f32.mrb[22].mxu0  ;;  %v12956_v6 = vld [vmem:[%s13811_s30 + $0x650] ss:$12 sps:$4 sm:$0xff]  }
 0x54c   : > { %10062 = vst [vmem:[%s15336_s26 + $0xb0] sm:$0xff] %v9106_v62  ;;  %v8546_v5 = vpop.f32.mrb[37].mxu1  ;;  %v9109_v41 = vadd.f32 %v11788_v32, %v14655_v50  ;;  %v9100_v59 = vpop.f32.mrb[23].mxu0  ;;  %v16530_v32 = vld [vmem:[#allocation30_spill] sm:$0xff] }
 0x54d   : > { %10060 = vst [vmem:[%s15336_s26 + $0xa0] sm:$0xff] %v9098_v26  ;;  %v15428_v37 = vpop.f32.mrb[38].mxu1  ;;  %v9101_v9 = vadd.f32 %v9100_v59, %v16529_v52  ;;  %v12953_v52 = vld [vmem:[%s13811_s30 + $0x978] ss:$12 sps:$4 sm:$0xff]  }
 0x54e   : > { %10063 = vst [vmem:[%s15336_s26 + $0xb8] sm:$0xff] %v9109_v41  ;;  %v8549_v57 = vpop.f32.mrb[39].mxu1  ;;  %11894 = vmatmul.mubr.bf16.gmra.mrb[128].mxu0 %v12951_v55  ;;  %v12957_v55 = vld [vmem:[%s13811_s30 + $0x668] ss:$12 sps:$4 sm:$0xff]  }
 0x54f   : > { %10061 = vst [vmem:[%s15336_s26 + $0xa8] sm:$0xff] %v9101_v9  ;;  %11897 = vmatprep.mubr.bf16.mxu0 %v12952_v15  ;;  %v12960_v57 = vld [vmem:[%s13811_s30 + $0x994] ss:$12 sps:$4 sm:$0xff]  }
 0x550   : > { %8759 = vmatmul.mubr.bf16.gmra.mrb[144].mxu1 %v12948_v12 }
 0x551   : > { %v11791_v50 = vpop.f32.mrb[24].mxu0  ;;  %8766 = vmatprep.mubr.bf16.mxu1 %v12955_v13 }
 0x552   : > { %v9122_v62 = vadd.f32 %v11791_v50, %v14673_v38  ;;  %v9113_v27 = vpop.f32.mrb[25].mxu0  ;;  %v16531_v38 = vld [vmem:[#allocation31_spill] sm:$0xff] }
 0x553   : > { %v15436_v26 = vpop.f32.mrb[40].mxu1  ;;  %v9114_v5 = vadd.f32 %v9113_v27, %v16530_v32  ;;  %v11792_v41 = vpop.f32.mrb[26].mxu0  ;;  %v12961_v32 = vld [vmem:[%s13811_s30 + $0x680] ss:$12 sps:$4 sm:$0xff]  }
 0x554   : > { %10066 = vst [vmem:[%s15336_s26 + $0xd0] sm:$0xff] %v9122_v62  ;;  %v8554_v59 = vpop.f32.mrb[41].mxu1  ;;  %v9125_v15 = vadd.f32 %v11792_v41, %v14679_v17  ;;  %v9116_v12 = vpop.f32.mrb[27].mxu0 }
 0x555   : > { %10064 = vst [vmem:[%s15336_s26 + $0xc0] sm:$0xff] %v9114_v5  ;;  %v15444_v9 = vpop.f32.mrb[42].mxu1  ;;  %v9117_v13 = vadd.f32 %v9116_v12, %v16531_v38 }
 0x556   : > { %10067 = vst [vmem:[%s15336_s26 + $0xd8] sm:$0xff] %v9125_v15  ;;  %v8557_v50 = vpop.f32.mrb[43].mxu1  ;;  %11898 = vmatmul.mubr.bf16.gmra.mrb[132].mxu0 %v12956_v6  ;;  %v12962_v6 = vld [vmem:[%s13811_s30 + $0x698] ss:$12 sps:$4 sm:$0xff]  }
 0x557   : > { %10065 = vst [vmem:[%s15336_s26 + $0xc8] sm:$0xff] %v9117_v13  ;;  %11901 = vmatprep.mubr.bf16.mxu0 %v12957_v55 }
 0x558   : > { %8767 = vmatmul.mubr.bf16.gmra.mrb[148].mxu1 %v12953_v52  ;;  %v12958_v52 = vld [vmem:[%s13811_s30 + $0x990] ss:$12 sps:$4 sm:$0xff]  }
 0x559   : > { %v11795_v17 = vpop.f32.mrb[28].mxu0  ;;  %8774 = vmatprep.mubr.bf16.mxu1 %v12960_v57  ;;  %v12965_v57 = vld [vmem:[%s13811_s30 + $0x9ac] ss:$12 sps:$4 sm:$0xff]  }
 0x55a   : > { %v9138_v62 = vadd.f32 %v11795_v17, %v14697_v2  ;;  %v9129_v27 = vpop.f32.mrb[29].mxu0  ;;  %v16532_v2 = vld [vmem:[#allocation32_spill] sm:$0xff] }
 0x55b   : > { %v15452_v5 = vpop.f32.mrb[44].mxu1  ;;  %v9130_v41 = vadd.f32 %v9129_v27, %v14685_v47  ;;  %v11796_v59 = vpop.f32.mrb[30].mxu0 }
 0x55c   : > { %10070 = vst [vmem:[%s15336_s26 + $0xf0] sm:$0xff] %v9138_v62  ;;  %v8562_v15 = vpop.f32.mrb[45].mxu1  ;;  %v9141_v55 = vadd.f32 %v11796_v59, %v14703_v7  ;;  %v9132_v12 = vpop.f32.mrb[31].mxu0  ;;  %v12966_v62 = vld [vmem:[%s13811_s30 + $0x6b0] ss:$12 sps:$4 sm:$0xff]  }
 0x55d   : > { %10068 = vst [vmem:[%s15336_s26 + $0xe0] sm:$0xff] %v9130_v41  ;;  %v15460_v38 = vpop.f32.mrb[46].mxu1  ;;  %v9133_v13 = vadd.f32 %v9132_v12, %v16532_v2  ;;  %v16533_v41 = vld [vmem:[#allocation33_spill] sm:$0xff] }
 0x55e   : > { %10071 = vst [vmem:[%s15336_s26 + $0xf8] sm:$0xff] %v9141_v55  ;;  %v8565_v50 = vpop.f32.mrb[47].mxu1  ;;  %11902 = vmatmul.mubr.bf16.gmra.mrb[136].mxu0 %v12961_v32  ;;  %v12967_v32 = vld [vmem:[%s13811_s30 + $0x6c8] ss:$12 sps:$4 sm:$0xff]  }
 0x55f   : > { %10069 = vst [vmem:[%s15336_s26 + $0xe8] sm:$0xff] %v9133_v13  ;;  %11905 = vmatprep.mubr.bf16.mxu0 %v12962_v6 }
 0x560   : > { %8775 = vmatmul.mubr.bf16.gmra.mrb[152].mxu1 %v12958_v52  ;;  %v12963_v52 = vld [vmem:[%s13811_s30 + $0x9a8] ss:$12 sps:$4 sm:$0xff]  }
 0x561   : > { %v11799_v47 = vpop.f32.mrb[32].mxu0  ;;  %8782 = vmatprep.mubr.bf16.mxu1 %v12965_v57  ;;  %v12970_v57 = vld [vmem:[%s13811_s30 + $0x9c4] ss:$12 sps:$4 sm:$0xff]  }
 0x562   : > { %v9154_v7 = vadd.f32 %v11799_v47, %v14721_v22  ;;  %v9145_v17 = vpop.f32.mrb[33].mxu0  ;;  %v16534_v22 = vld [vmem:[#allocation34_spill] sm:$0xff] }
 0x563   : > { %v15468_v27 = vpop.f32.mrb[48].mxu1  ;;  %v9146_v59 = vadd.f32 %v9145_v17, %v16533_v41  ;;  %v11800_v15 = vpop.f32.mrb[34].mxu0  ;;  %v12971_v17 = vld [vmem:[%s13811_s30 + $0x6e0] ss:$12 sps:$4 sm:$0xff]  }
 0x564   : > { %10074 = vst [vmem:[%s15336_s26 + $0x110] sm:$0xff] %v9154_v7  ;;  %v8570_v55 = vpop.f32.mrb[49].mxu1  ;;  %v9157_v6 = vadd.f32 %v11800_v15, %v14727_v34  ;;  %v9148_v12 = vpop.f32.mrb[35].mxu0 }
 0x565   : > { %10072 = vst [vmem:[%s15336_s26 + $0x100] sm:$0xff] %v9146_v59  ;;  %v15476_v2 = vpop.f32.mrb[50].mxu1  ;;  %v9149_v13 = vadd.f32 %v9148_v12, %v16534_v22  ;;  %v16535_v59 = vld [vmem:[#allocation35_spill] sm:$0xff] }
 0x566   : > { %10075 = vst [vmem:[%s15336_s26 + $0x118] sm:$0xff] %v9157_v6  ;;  %v8573_v50 = vpop.f32.mrb[51].mxu1  ;;  %11906 = vmatmul.mubr.bf16.gmra.mrb[140].mxu0 %v12966_v62  ;;  %v12972_v62 = vld [vmem:[%s13811_s30 + $0x6f8] ss:$12 sps:$4 sm:$0xff]  }
 0x567   : > { %10073 = vst [vmem:[%s15336_s26 + $0x108] sm:$0xff] %v9149_v13  ;;  %11909 = vmatprep.mubr.bf16.mxu0 %v12967_v32 }
 0x568   : > { %8783 = vmatmul.mubr.bf16.gmra.mrb[156].mxu1 %v12963_v52  ;;  %v12968_v52 = vld [vmem:[%s13811_s30 + $0x9c0] ss:$12 sps:$4 sm:$0xff]  }
 0x569   : > { %v11803_v34 = vpop.f32.mrb[36].mxu0  ;;  %8790 = vmatprep.mubr.bf16.mxu1 %v12970_v57  ;;  %v12975_v57 = vld [vmem:[%s13811_s30 + $0x9dc] ss:$12 sps:$4 sm:$0xff]  }
 0x56a   : > { %v9170_v47 = vadd.f32 %v11803_v34, %v14745_v24  ;;  %v9161_v7 = vpop.f32.mrb[37].mxu0  ;;  %v16536_v24 = vld [vmem:[#allocation36_spill] sm:$0xff] }
 0x56b   : > { %v15484_v41 = vpop.f32.mrb[52].mxu1  ;;  %v9162_v15 = vadd.f32 %v9161_v7, %v16535_v59  ;;  %v11804_v55 = vpop.f32.mrb[38].mxu0  ;;  %v12976_v7 = vld [vmem:[%s13811_s30 + $0x710] ss:$12 sps:$4 sm:$0xff]  }
 0x56c   : > { %10078 = vst [vmem:[%s15336_s26 + $0x130] sm:$0xff] %v9170_v47  ;;  %v8578_v6 = vpop.f32.mrb[53].mxu1  ;;  %v9173_v32 = vadd.f32 %v11804_v55, %v14751_v19  ;;  %v9164_v12 = vpop.f32.mrb[39].mxu0 }
 0x56d   : > { %10076 = vst [vmem:[%s15336_s26 + $0x120] sm:$0xff] %v9162_v15  ;;  %v15492_v22 = vpop.f32.mrb[54].mxu1  ;;  %v9165_v13 = vadd.f32 %v9164_v12, %v16536_v24  ;;  %v16537_v15 = vld [vmem:[#allocation37_spill] sm:$0xff] }
 0x56e   : > { %10079 = vst [vmem:[%s15336_s26 + $0x138] sm:$0xff] %v9173_v32  ;;  %v8581_v50 = vpop.f32.mrb[55].mxu1  ;;  %11910 = vmatmul.mubr.bf16.gmra.mrb[144].mxu0 %v12971_v17  ;;  %v12977_v17 = vld [vmem:[%s13811_s30 + $0x728] ss:$12 sps:$4 sm:$0xff]   ;;  %v12973_v24 = vld [vmem:[%s13811_s30 + $0x9d8] ss:$12 sps:$4 sm:$0xff]  }
 0x56f   : > { %10077 = vst [vmem:[%s15336_s26 + $0x128] sm:$0xff] %v9165_v13  ;;  %11913 = vmatprep.mubr.bf16.mxu0 %v12972_v62  ;;  %v16538_v62 = vld [vmem:[#allocation39_spill] sm:$0xff]  ;;  %v12980_v50 = vld [vmem:[%s13811_s30 + $0x9f4] ss:$12 sps:$4 sm:$0xff]  }
 0x570   : > { %8791 = vmatmul.mubr.bf16.gmra.mrb[160].mxu1 %v12968_v52 }
 0x571   : > { %v11807_v19 = vpop.f32.mrb[40].mxu0  ;;  %8798 = vmatprep.mubr.bf16.mxu1 %v12975_v57 }
 0x572   : > { %v9186_v34 = vadd.f32 %v11807_v19, %v14769_v39  ;;  %v9177_v47 = vpop.f32.mrb[41].mxu0  ;;  %v16539_v39 = vld [vmem:[#allocation38_spill] sm:$0xff] }
 0x573   : > { %v15500_v59 = vpop.f32.mrb[56].mxu1  ;;  %v9178_v55 = vadd.f32 %v9177_v47, %v16537_v15  ;;  %v11808_v6 = vpop.f32.mrb[42].mxu0 }
 0x574   : > { %10082 = vst [vmem:[%s15336_s26 + $0x150] sm:$0xff] %v9186_v34  ;;  %v8586_v32 = vpop.f32.mrb[57].mxu1  ;;  %v9189_v12 = vadd.f32 %v11808_v6, %v16538_v62  ;;  %v9180_v52 = vpop.f32.mrb[43].mxu0 }
 0x575   : > { %10080 = vst [vmem:[%s15336_s26 + $0x140] sm:$0xff] %v9178_v55  ;;  %v15508_v13 = vpop.f32.mrb[58].mxu1  ;;  %v9181_v57 = vadd.f32 %v9180_v52, %v16539_v39  ;;  %v12981_v55 = vld [vmem:[%s13811_s30 + $0x740] ss:$12 sps:$4 sm:$0xff]   ;;  %v16540_v32 = vld [vmem:[#allocation40_spill] sm:$0xff] }
 0x576   : > { %10083 = vst [vmem:[%s15336_s26 + $0x158] sm:$0xff] %v9189_v12  ;;  %v8589_v19 = vpop.f32.mrb[59].mxu1  ;;  %11914 = vmatmul.mubr.bf16.gmra.mrb[148].mxu0 %v12976_v7  ;;  %v12982_v7 = vld [vmem:[%s13811_s30 + $0x758] ss:$12 sps:$4 sm:$0xff]   ;;  %v12978_v39 = vld [vmem:[%s13811_s30 + $0x9f0] ss:$12 sps:$4 sm:$0xff]  }
 0x577   : > { %10081 = vst [vmem:[%s15336_s26 + $0x148] sm:$0xff] %v9181_v57  ;;  %11917 = vmatprep.mubr.bf16.mxu0 %v12977_v17  ;;  %v12985_v19 = vld [vmem:[%s13811_s30 + $0xa0c] ss:$12 sps:$4 sm:$0xff]  }
 0x578   : > { %8799 = vmatmul.mubr.bf16.gmra.mrb[164].mxu1 %v12973_v24 }
 0x579   : > { %v11811_v34 = vpop.f32.mrb[44].mxu0  ;;  %8806 = vmatprep.mubr.bf16.mxu1 %v12980_v50 }
 0x57a   : > { %v9202_v47 = vadd.f32 %v11811_v34, %v14793_v0  ;;  %v9193_v15 = vpop.f32.mrb[45].mxu0  ;;  %v16541_v0 = vld [vmem:[#allocation43_spill] sm:$0xff] }
 0x57b   : > { %v15516_v6 = vpop.f32.mrb[60].mxu1  ;;  %v9194_v62 = vadd.f32 %v9193_v15, %v16540_v32  ;;  %v11812_v12 = vpop.f32.mrb[46].mxu0  ;;  %v12986_v32 = vld [vmem:[%s13811_s30 + $0x770] ss:$12 sps:$4 sm:$0xff]  }
 0x57c   : > { %10086 = vst [vmem:[%s15336_s26 + $0x170] sm:$0xff] %v9202_v47  ;;  %v8594_v52 = vpop.f32.mrb[61].mxu1  ;;  %v9205_v17 = vadd.f32 %v11812_v12, %v14799_v61  ;;  %v9196_v24 = vpop.f32.mrb[47].mxu0  ;;  %v16542_v12 = vld [vmem:[#allocation41_spill] sm:$0xff] }
 0x57d   : > { %10084 = vst [vmem:[%s15336_s26 + $0x160] sm:$0xff] %v9194_v62  ;;  %v15524_v57 = vpop.f32.mrb[62].mxu1  ;;  %v9197_v50 = vadd.f32 %v9196_v24, %v16541_v0  ;;  %v12983_v0 = vld [vmem:[%s13811_s30 + $0xa08] ss:$12 sps:$4 sm:$0xff]  }
 0x57e   : > { %10087 = vst [vmem:[%s15336_s26 + $0x178] sm:$0xff] %v9205_v17  ;;  %v8597_v34 = vpop.f32.mrb[63].mxu1  ;;  %11918 = vmatmul.mubr.bf16.gmra.mrb[152].mxu0 %v12981_v55  ;;  %v12987_v55 = vld [vmem:[%s13811_s30 + $0x788] ss:$12 sps:$4 sm:$0xff]  }
 0x57f   : > { %10085 = vst [vmem:[%s15336_s26 + $0x168] sm:$0xff] %v9197_v50  ;;  %11921 = vmatprep.mubr.bf16.mxu0 %v12982_v7  ;;  %v12990_v34 = vld [vmem:[%s13811_s30 + $0xa24] ss:$12 sps:$4 sm:$0xff]  }
 0x580   : > { %8807 = vmatmul.mubr.bf16.gmra.mrb[168].mxu1 %v12978_v39 }
 0x581   : > { %v11815_v61 = vpop.f32.mrb[48].mxu0  ;;  %8814 = vmatprep.mubr.bf16.mxu1 %v12985_v19 }
 0x582   : > { %v9218_v47 = vadd.f32 %v11815_v61, %v14817_v35  ;;  %v9209_v15 = vpop.f32.mrb[49].mxu0  ;;  %v16543_v35 = vld [vmem:[#allocation42_spill] sm:$0xff] }
 0x583   : > { %v15532_v62 = vpop.f32.mrb[64].mxu1  ;;  %v9210_v52 = vadd.f32 %v9209_v15, %v16542_v12  ;;  %v11816_v17 = vpop.f32.mrb[50].mxu0  ;;  %v12991_v12 = vld [vmem:[%s13811_s30 + $0x7a0] ss:$12 sps:$4 sm:$0xff]  }
 0x584   : > { %10090 = vst [vmem:[%s15336_s26 + $0x190] sm:$0xff] %v9218_v47  ;;  %v8602_v24 = vpop.f32.mrb[65].mxu1  ;;  %v9221_v7 = vadd.f32 %v11816_v17, %v14823_v8  ;;  %v9212_v39 = vpop.f32.mrb[51].mxu0  ;;  %v16544_v17 = vld [vmem:[#allocation44_spill] sm:$0xff] }
 0x585   : > { %10088 = vst [vmem:[%s15336_s26 + $0x180] sm:$0xff] %v9210_v52  ;;  %v15540_v50 = vpop.f32.mrb[66].mxu1  ;;  %v9213_v19 = vadd.f32 %v9212_v39, %v16543_v35  ;;  %v12988_v35 = vld [vmem:[%s13811_s30 + $0xa20] ss:$12 sps:$4 sm:$0xff]  }
 0x586   : > { %10091 = vst [vmem:[%s15336_s26 + $0x198] sm:$0xff] %v9221_v7  ;;  %v8605_v61 = vpop.f32.mrb[67].mxu1  ;;  %11922 = vmatmul.mubr.bf16.gmra.mrb[156].mxu0 %v12986_v32  ;;  %v12992_v32 = vld [vmem:[%s13811_s30 + $0x7b8] ss:$12 sps:$4 sm:$0xff]  }
 0x587   : > { %10089 = vst [vmem:[%s15336_s26 + $0x188] sm:$0xff] %v9213_v19  ;;  %11925 = vmatprep.mubr.bf16.mxu0 %v12987_v55  ;;  %v12995_v61 = vld [vmem:[%s13811_s30 + $0xa3c] ss:$12 sps:$4 sm:$0xff]  }
 0x588   : > { %8815 = vmatmul.mubr.bf16.gmra.mrb[172].mxu1 %v12983_v0 }
 0x589   : > { %v11819_v8 = vpop.f32.mrb[52].mxu0  ;;  %8822 = vmatprep.mubr.bf16.mxu1 %v12990_v34 }
 0x58a   : > { %v9234_v47 = vadd.f32 %v11819_v8, %v14841_v43  ;;  %v9225_v15 = vpop.f32.mrb[53].mxu0  ;;  %v16545_v43 = vld [vmem:[#allocation45_spill] sm:$0xff] }
 0x58b   : > { %v15548_v52 = vpop.f32.mrb[68].mxu1  ;;  %v9226_v24 = vadd.f32 %v9225_v15, %v16544_v17  ;;  %v11820_v7 = vpop.f32.mrb[54].mxu0  ;;  %v12996_v17 = vld [vmem:[%s13811_s30 + $0x7d0] ss:$12 sps:$4 sm:$0xff]  }
 0x58c   : > { %10094 = vst [vmem:[%s15336_s26 + $0x1b0] sm:$0xff] %v9234_v47  ;;  %v8610_v39 = vpop.f32.mrb[69].mxu1  ;;  %v9237_v55 = vadd.f32 %v11820_v7, %v14847_v36  ;;  %v9228_v0 = vpop.f32.mrb[55].mxu0  ;;  %v16547_v7 = vld [vmem:[#allocation46_spill] sm:$0xff] }
 0x58d   : > { %10092 = vst [vmem:[%s15336_s26 + $0x1a0] sm:$0xff] %v9226_v24  ;;  %v15556_v19 = vpop.f32.mrb[70].mxu1  ;;  %v9229_v34 = vadd.f32 %v9228_v0, %v16545_v43  ;;  %v12993_v43 = vld [vmem:[%s13811_s30 + $0xa38] ss:$12 sps:$4 sm:$0xff]  }
 0x58e   : > { %10095 = vst [vmem:[%s15336_s26 + $0x1b8] sm:$0xff] %v9237_v55  ;;  %v8613_v8 = vpop.f32.mrb[71].mxu1  ;;  %11926 = vmatmul.mubr.bf16.gmra.mrb[160].mxu0 %v12991_v12  ;;  %v12997_v12 = vld [vmem:[%s13811_s30 + $0x7e8] ss:$12 sps:$4 sm:$0xff]  }
 0x58f   : > { %10093 = vst [vmem:[%s15336_s26 + $0x1a8] sm:$0xff] %v9229_v34  ;;  %11929 = vmatprep.mubr.bf16.mxu0 %v12992_v32  ;;  %v13000_v8 = vld [vmem:[%s13811_s30 + $0xa54] ss:$12 sps:$4 sm:$0xff]  }
 0x590   : > { %8823 = vmatmul.mubr.bf16.gmra.mrb[176].mxu1 %v12988_v35 }
 0x591   : > { %v11823_v36 = vpop.f32.mrb[56].mxu0  ;;  %8830 = vmatprep.mubr.bf16.mxu1 %v12995_v61 }
 0x592   : > { %v9250_v47 = vadd.f32 %v11823_v36, %v14865_v1  ;;  %v9241_v15 = vpop.f32.mrb[57].mxu0  ;;  %v16549_v1 = vld [vmem:[#allocation47_spill] sm:$0xff] }
 0x593   : > { %v15564_v24 = vpop.f32.mrb[72].mxu1  ;;  %v9242_v39 = vadd.f32 %v9241_v15, %v16547_v7  ;;  %v11824_v55 = vpop.f32.mrb[58].mxu0 }
 0x594   : > { %16546 = vst [vmem:[#allocation87_spill] sm:$0xff] %v15564_v24  ;;  %10098 = vst [vmem:[%s15336_s26 + $0x1d0] sm:$0xff] %v9250_v47  ;;  %v8618_v0 = vpop.f32.mrb[73].mxu1  ;;  %v9253_v32 = vadd.f32 %v11824_v55, %v14871_v3  ;;  %v9244_v35 = vpop.f32.mrb[59].mxu0  ;;  %v16550_v47 = vld [vmem:[#allocation50_spill] sm:$0xff] }
 0x595   : > { %10096 = vst [vmem:[%s15336_s26 + $0x1c0] sm:$0xff] %v9242_v39  ;;  %v15572_v34 = vpop.f32.mrb[74].mxu1  ;;  %v9245_v61 = vadd.f32 %v9244_v35, %v16549_v1  ;;  %v13001_v39 = vld [vmem:[%s13811_s30 + $0x800] ss:$12 sps:$4 sm:$0xff]   ;;  %v16551_v0 = vld [vmem:[#allocation48_spill] sm:$0xff] }
 0x596   : > { %16548 = vst [vmem:[#allocation88_spill] sm:$0xff] %v15572_v34  ;;  %10099 = vst [vmem:[%s15336_s26 + $0x1d8] sm:$0xff] %v9253_v32  ;;  %v8621_v36 = vpop.f32.mrb[75].mxu1  ;;  %11930 = vmatmul.mubr.bf16.gmra.mrb[164].mxu0 %v12996_v17  ;;  %v13002_v17 = vld [vmem:[%s13811_s30 + $0x818] ss:$12 sps:$4 sm:$0xff]  }
 0x597   : > { %10097 = vst [vmem:[%s15336_s26 + $0x1c8] sm:$0xff] %v9245_v61  ;;  %11933 = vmatprep.mubr.bf16.mxu0 %v12997_v12  ;;  %v16552_v12 = vld [vmem:[#allocation51_spill] sm:$0xff] }
 0x598   : > { %8831 = vmatmul.mubr.bf16.gmra.mrb[180].mxu1 %v12993_v43  ;;  %v13005_v34 = vld [vmem:[%s13811_s30 + $0xa6c] ss:$12 sps:$4 sm:$0xff]  }
 0x599   : > { %v11827_v3 = vpop.f32.mrb[60].mxu0  ;;  %8838 = vmatprep.mubr.bf16.mxu1 %v13000_v8  ;;  %v12998_v8 = vld [vmem:[%s13811_s30 + $0xa50] ss:$12 sps:$4 sm:$0xff]  }
 0x59a   : > { %v9266_v15 = vadd.f32 %v11827_v3, %v16550_v47  ;;  %v9257_v7 = vpop.f32.mrb[61].mxu0  ;;  %v16553_v3 = vld [vmem:[#allocation49_spill] sm:$0xff] }
 0x59b   : > { %v15580_v55 = vpop.f32.mrb[76].mxu1  ;;  %v9258_v32 = vadd.f32 %v9257_v7, %v16551_v0  ;;  %v11828_v35 = vpop.f32.mrb[62].mxu0 }
 0x59c   : > { %10102 = vst [vmem:[%s15336_s26 + $0x1f0] sm:$0xff] %v9266_v15  ;;  %v8626_v1 = vpop.f32.mrb[77].mxu1  ;;  %v9269_v61 = vadd.f32 %v11828_v35, %v16552_v12  ;;  %v9260_v43 = vpop.f32.mrb[63].mxu0 }
 0x59d   : > { %10100 = vst [vmem:[%s15336_s26 + $0x1e0] sm:$0xff] %v9258_v32  ;;  %v15588_v36 = vpop.f32.mrb[78].mxu1  ;;  %v9261_v47 = vadd.f32 %v9260_v43, %v16553_v3  ;;  %v13006_v32 = vld [vmem:[%s13811_s30 + $0x830] ss:$12 sps:$4 sm:$0xff]  }
 0x59e   : > { %10103 = vst [vmem:[%s15336_s26 + $0x1f8] sm:$0xff] %v9269_v61  ;;  %v8629_v24 = vpop.f32.mrb[79].mxu1  ;;  %11934 = vmatmul.mubr.bf16.gmra.mrb[168].mxu0 %v13001_v39  ;;  %v16554_v1 = vld [vmem:[#allocation53_spill] sm:$0xff]  ;;  %v13007_v39 = vld [vmem:[%s13811_s30 + $0x848] ss:$12 sps:$4 sm:$0xff]  }
 0x59f   : > { %10101 = vst [vmem:[%s15336_s26 + $0x1e8] sm:$0xff] %v9261_v47  ;;  %11937 = vmatprep.mubr.bf16.mxu0 %v13002_v17  ;;  %v13010_v47 = vld [vmem:[%s13811_s30 + $0xa84] ss:$12 sps:$4 sm:$0xff]  }
 0x5a0   : > { %8839 = vmatmul.mubr.bf16.gmra.mrb[184].mxu1 %v12998_v8 }
 0x5a1   : > { %v11831_v15 = vpop.f32.mrb[64].mxu0  ;;  %8846 = vmatprep.mubr.bf16.mxu1 %v13005_v34  ;;  %v13003_v34 = vld [vmem:[%s13811_s30 + $0xa68] ss:$12 sps:$4 sm:$0xff]  }
 0x5a2   : > { %v9282_v7 = vadd.f32 %v11831_v15, %v14913_v49  ;;  %v9273_v0 = vpop.f32.mrb[65].mxu0  ;;  %v16556_v49 = vld [vmem:[#allocation55_spill] sm:$0xff] }
 0x5a3   : > { %v15596_v35 = vpop.f32.mrb[80].mxu1  ;;  %v9274_v12 = vadd.f32 %v9273_v0, %v16554_v1  ;;  %v11832_v24 = vpop.f32.mrb[66].mxu0  ;;  %v13011_v1 = vld [vmem:[%s13811_s30 + $0x860] ss:$12 sps:$4 sm:$0xff]  }
 0x5a4   : > { %10106 = vst [vmem:[%s15336_s26 + $0x210] sm:$0xff] %v9282_v7  ;;  %v8634_v61 = vpop.f32.mrb[81].mxu1  ;;  %v9285_v17 = vadd.f32 %v11832_v24, %v14919_v23  ;;  %v9276_v43 = vpop.f32.mrb[67].mxu0  ;;  %v16557_v24 = vld [vmem:[#allocation52_spill] sm:$0xff] }
 0x5a5   : > { %10104 = vst [vmem:[%s15336_s26 + $0x200] sm:$0xff] %v9274_v12  ;;  %v15604_v8 = vpop.f32.mrb[82].mxu1  ;;  %v9277_v3 = vadd.f32 %v9276_v43, %v16556_v49 }
 0x5a6   : > { %16555 = vst [vmem:[#allocation20_spill] sm:$0xff] %v15604_v8  ;;  %10107 = vst [vmem:[%s15336_s26 + $0x218] sm:$0xff] %v9285_v17  ;;  %v8637_v15 = vpop.f32.mrb[83].mxu1  ;;  %11938 = vmatmul.mubr.bf16.gmra.mrb[172].mxu0 %v13006_v32  ;;  %v13012_v32 = vld [vmem:[%s13811_s30 + $0x878] ss:$12 sps:$4 sm:$0xff]  }
 0x5a7   : > { %10105 = vst [vmem:[%s15336_s26 + $0x208] sm:$0xff] %v9277_v3  ;;  %11941 = vmatprep.mubr.bf16.mxu0 %v13007_v39  ;;  %v16558_v39 = vld [vmem:[#allocation2_spill] sm:$0xff] }
 0x5a8   : > { %8847 = vmatmul.mubr.bf16.gmra.mrb[188].mxu1 %v13003_v34  ;;  %v13008_v3 = vld [vmem:[%s13811_s30 + $0xa80] ss:$12 sps:$4 sm:$0xff]  }
 0x5a9   : > { %v11835_v23 = vpop.f32.mrb[68].mxu0  ;;  %8854 = vmatprep.mubr.bf16.mxu1 %v13010_v47 }
 0x5aa   : > { %v9298_v7 = vadd.f32 %v11835_v23, %v14937_v48  ;;  %v9289_v0 = vpop.f32.mrb[69].mxu0  ;;  %v16559_v48 = vld [vmem:[#allocation54_spill] sm:$0xff]  ;;  %v13015_v23 = vld [vmem:[%s13811_s30 + $0xa9c] ss:$12 sps:$4 sm:$0xff]  }
 0x5ab   : > { %v15612_v12 = vpop.f32.mrb[84].mxu1  ;;  %v9290_v61 = vadd.f32 %v9289_v0, %v16557_v24  ;;  %v11836_v17 = vpop.f32.mrb[70].mxu0 }
 0x5ac   : > { %10110 = vst [vmem:[%s15336_s26 + $0x230] sm:$0xff] %v9298_v7  ;;  %v8642_v43 = vpop.f32.mrb[85].mxu1  ;;  %v9301_v49 = vadd.f32 %v11836_v17, %v16558_v39  ;;  %v9292_v34 = vpop.f32.mrb[71].mxu0 }
 0x5ad   : > { %10108 = vst [vmem:[%s15336_s26 + $0x220] sm:$0xff] %v9290_v61  ;;  %v15620_v47 = vpop.f32.mrb[86].mxu1  ;;  %v9293_v15 = vadd.f32 %v9292_v34, %v16559_v48  ;;  %v13016_v61 = vld [vmem:[%s13811_s30 + $0x890] ss:$12 sps:$4 sm:$0xff]   ;;  %v16561_v43 = vld [vmem:[#allocation3_spill] sm:$0xff] }
 0x5ae   : > { %10111 = vst [vmem:[%s15336_s26 + $0x238] sm:$0xff] %v9301_v49  ;;  %v8645_v8 = vpop.f32.mrb[87].mxu1  ;;  %11942 = vmatmul.mubr.bf16.gmra.mrb[176].mxu0 %v13011_v1  ;;  %v13017_v1 = vld [vmem:[%s13811_s30 + $0x8a8] ss:$12 sps:$4 sm:$0xff]  }
 0x5af   : > { %10109 = vst [vmem:[%s15336_s26 + $0x228] sm:$0xff] %v9293_v15  ;;  %11945 = vmatprep.mubr.bf16.mxu0 %v13012_v32 }
 0x5b0   : > { %8855 = vmatmul.mubr.bf16.gmra.mrb[192].mxu1 %v13008_v3  ;;  %v13013_v3 = vld [vmem:[%s13811_s30 + $0xa98] ss:$12 sps:$4 sm:$0xff]  }
 0x5b1   : > { %v11839_v7 = vpop.f32.mrb[72].mxu0  ;;  %8862 = vmatprep.mubr.bf16.mxu1 %v13015_v23  ;;  %v13020_v23 = vld [vmem:[%s13811_s30 + $0xab4] ss:$12 sps:$4 sm:$0xff]  }
 0x5b2   : > { %v9314_v0 = vadd.f32 %v11839_v7, %v14961_v30  ;;  %v9305_v24 = vpop.f32.mrb[73].mxu0  ;;  %v16563_v30 = vld [vmem:[#allocation58_spill] sm:$0xff] }
 0x5b3   : > { %v15628_v17 = vpop.f32.mrb[88].mxu1  ;;  %v9306_v39 = vadd.f32 %v9305_v24, %v16561_v43  ;;  %v11840_v8 = vpop.f32.mrb[74].mxu0 }
 0x5b4   : > { %16560 = vst [vmem:[#allocation21_spill] sm:$0xff] %v15628_v17  ;;  %10114 = vst [vmem:[%s15336_s26 + $0x250] sm:$0xff] %v9314_v0  ;;  %v8650_v49 = vpop.f32.mrb[89].mxu1  ;;  %v9317_v32 = vadd.f32 %v11840_v8, %v14967_v56  ;;  %v9308_v34 = vpop.f32.mrb[75].mxu0  ;;  %v16564_v0 = vld [vmem:[#allocation4_spill] sm:$0xff] }
 0x5b5   : > { %10112 = vst [vmem:[%s15336_s26 + $0x240] sm:$0xff] %v9306_v39  ;;  %v15636_v48 = vpop.f32.mrb[90].mxu1  ;;  %v9309_v15 = vadd.f32 %v9308_v34, %v16563_v30  ;;  %v13021_v39 = vld [vmem:[%s13811_s30 + $0x8c0] ss:$12 sps:$4 sm:$0xff]   ;;  %v16565_v49 = vld [vmem:[#allocation56_spill] sm:$0xff] }
 0x5b6   : > { %16562 = vst [vmem:[#allocation22_spill] sm:$0xff] %v15636_v48  ;;  %10115 = vst [vmem:[%s15336_s26 + $0x258] sm:$0xff] %v9317_v32  ;;  %v8653_v7 = vpop.f32.mrb[91].mxu1  ;;  %11946 = vmatmul.mubr.bf16.gmra.mrb[180].mxu0 %v13016_v61  ;;  %v13022_v61 = vld [vmem:[%s13811_s30 + $0x8d8] ss:$12 sps:$4 sm:$0xff]  }
 0x5b7   : > { %10113 = vst [vmem:[%s15336_s26 + $0x248] sm:$0xff] %v9309_v15  ;;  %11949 = vmatprep.mubr.bf16.mxu0 %v13017_v1  ;;  %v16566_v1 = vld [vmem:[#allocation5_spill] sm:$0xff] }
 0x5b8   : > { %8863 = vmatmul.mubr.bf16.gmra.mrb[196].mxu1 %v13013_v3  ;;  %v13025_v48 = vld [vmem:[%s13811_s30 + $0xacc] ss:$12 sps:$4 sm:$0xff]  }
 0x5b9   : > { %v11843_v56 = vpop.f32.mrb[76].mxu0  ;;  %8870 = vmatprep.mubr.bf16.mxu1 %v13020_v23  ;;  %v13018_v23 = vld [vmem:[%s13811_s30 + $0xab0] ss:$12 sps:$4 sm:$0xff]  }
 0x5ba   : > { %v9330_v24 = vadd.f32 %v11843_v56, %v16564_v0  ;;  %v9321_v43 = vpop.f32.mrb[77].mxu0  ;;  %v16567_v56 = vld [vmem:[#allocation57_spill] sm:$0xff] }
 0x5bb   : > { %v15644_v8 = vpop.f32.mrb[92].mxu1  ;;  %v9322_v32 = vadd.f32 %v9321_v43, %v16565_v49  ;;  %v11844_v34 = vpop.f32.mrb[78].mxu0 }
 0x5bc   : > { %10118 = vst [vmem:[%s15336_s26 + $0x270] sm:$0xff] %v9330_v24  ;;  %v8658_v30 = vpop.f32.mrb[93].mxu1  ;;  %v9333_v15 = vadd.f32 %v11844_v34, %v16566_v1  ;;  %v9324_v3 = vpop.f32.mrb[79].mxu0 }
 0x5bd   : > { %10116 = vst [vmem:[%s15336_s26 + $0x260] sm:$0xff] %v9322_v32  ;;  %v15652_v7 = vpop.f32.mrb[94].mxu1  ;;  %v9325_v0 = vadd.f32 %v9324_v3, %v16567_v56  ;;  %v13026_v32 = vld [vmem:[%s13811_s30 + $0x8f0] ss:$12 sps:$4 sm:$0xff]  }
 0x5be   : > { %10119 = vst [vmem:[%s15336_s26 + $0x278] sm:$0xff] %v9333_v15  ;;  %v8661_v17 = vpop.f32.mrb[95].mxu1  ;;  %11950 = vmatmul.mubr.bf16.gmra.mrb[184].mxu0 %v13021_v39  ;;  %v16569_v30 = vld [vmem:[#allocation60_spill] sm:$0xff] }
 0x5bf   : > { %10117 = vst [vmem:[%s15336_s26 + $0x268] sm:$0xff] %v9325_v0  ;;  %11953 = vmatprep.mubr.bf16.mxu0 %v13022_v61  ;;  %v13027_v39 = vld [vmem:[%s13811_s30 + $0x908] ss:$12 sps:$4 sm:$0xff]   ;;  %v13030_v0 = vld [vmem:[%s13811_s30 + $0xae4] ss:$12 sps:$4 sm:$0xff]  }
 0x5c0   : > { %8871 = vmatmul.mubr.bf16.gmra.mrb[200].mxu1 %v13018_v23 }
 0x5c1   : > { %v11847_v24 = vpop.f32.mrb[80].mxu0  ;;  %8878 = vmatprep.mubr.bf16.mxu1 %v13025_v48  ;;  %v13023_v48 = vld [vmem:[%s13811_s30 + $0xac8] ss:$12 sps:$4 sm:$0xff]  }
 0x5c2   : > { %v9346_v43 = vadd.f32 %v11847_v24, %v15009_v21  ;;  %v9337_v49 = vpop.f32.mrb[81].mxu0  ;;  %v16571_v21 = vld [vmem:[#allocation62_spill] sm:$0xff] }
 0x5c3   : > { %v15660_v34 = vpop.f32.mrb[96].mxu1  ;;  %v9338_v1 = vadd.f32 %v9337_v49, %v16569_v30  ;;  %v11848_v17 = vpop.f32.mrb[82].mxu0 }
 0x5c4   : > { %16568 = vst [vmem:[#allocation23_spill] sm:$0xff] %v15660_v34  ;;  %10122 = vst [vmem:[%s15336_s26 + $0x290] sm:$0xff] %v9346_v43  ;;  %v8666_v15 = vpop.f32.mrb[97].mxu1  ;;  %v9349_v61 = vadd.f32 %v11848_v17, %v15015_v11  ;;  %v9340_v3 = vpop.f32.mrb[83].mxu0  ;;  %v16572_v43 = vld [vmem:[#allocation6_spill] sm:$0xff] }
 0x5c5   : > { %10120 = vst [vmem:[%s15336_s26 + $0x280] sm:$0xff] %v9338_v1  ;;  %v15668_v23 = vpop.f32.mrb[98].mxu1  ;;  %v9341_v56 = vadd.f32 %v9340_v3, %v16571_v21  ;;  %v13031_v1 = vld [vmem:[%s13811_s30 + $0x920] ss:$12 sps:$4 sm:$0xff]  }
 0x5c6   : > { %16570 = vst [vmem:[#allocation24_spill] sm:$0xff] %v15668_v23  ;;  %10123 = vst [vmem:[%s15336_s26 + $0x298] sm:$0xff] %v9349_v61  ;;  %v8669_v24 = vpop.f32.mrb[99].mxu1  ;;  %11954 = vmatmul.mubr.bf16.gmra.mrb[188].mxu0 %v13026_v32  ;;  %v16573_v15 = vld [vmem:[#allocation59_spill] sm:$0xff]  ;;  %v13032_v32 = vld [vmem:[%s13811_s30 + $0x938] ss:$12 sps:$4 sm:$0xff]  }
 0x5c7   : > { %10121 = vst [vmem:[%s15336_s26 + $0x288] sm:$0xff] %v9341_v56  ;;  %11957 = vmatprep.mubr.bf16.mxu0 %v13027_v39  ;;  %v16574_v39 = vld [vmem:[#allocation7_spill] sm:$0xff] }
 0x5c8   : > { %8879 = vmatmul.mubr.bf16.gmra.mrb[204].mxu1 %v13023_v48  ;;  %v13035_v23 = vld [vmem:[%s13811_s30 + $0xafc] ss:$12 sps:$4 sm:$0xff]  }
 0x5c9   : > { %v11851_v11 = vpop.f32.mrb[84].mxu0  ;;  %8886 = vmatprep.mubr.bf16.mxu1 %v13030_v0  ;;  %v13028_v0 = vld [vmem:[%s13811_s30 + $0xae0] ss:$12 sps:$4 sm:$0xff]  }
 0x5ca   : > { %v9362_v49 = vadd.f32 %v11851_v11, %v16572_v43  ;;  %v9353_v30 = vpop.f32.mrb[85].mxu0  ;;  %v16575_v11 = vld [vmem:[#allocation61_spill] sm:$0xff] }
 0x5cb   : > { %v15676_v17 = vpop.f32.mrb[100].mxu1  ;;  %v9354_v61 = vadd.f32 %v9353_v30, %v16573_v15  ;;  %v11852_v3 = vpop.f32.mrb[86].mxu0 }
 0x5cc   : > { %10126 = vst [vmem:[%s15336_s26 + $0x2b0] sm:$0xff] %v9362_v49  ;;  %v8674_v21 = vpop.f32.mrb[101].mxu1  ;;  %v9365_v56 = vadd.f32 %v11852_v3, %v16574_v39  ;;  %v9356_v48 = vpop.f32.mrb[87].mxu0 }
 0x5cd   : > { %10124 = vst [vmem:[%s15336_s26 + $0x2a0] sm:$0xff] %v9354_v61  ;;  %v15684_v24 = vpop.f32.mrb[102].mxu1  ;;  %v9357_v43 = vadd.f32 %v9356_v48, %v16575_v11  ;;  %v13036_v61 = vld [vmem:[%s13811_s30 + $0x950] ss:$12 sps:$4 sm:$0xff]  }
 0x5ce   : > { %10127 = vst [vmem:[%s15336_s26 + $0x2b8] sm:$0xff] %v9365_v56  ;;  %v8677_v34 = vpop.f32.mrb[103].mxu1  ;;  %11958 = vmatmul.mubr.bf16.gmra.mrb[192].mxu0 %v13031_v1  ;;  %v16577_v21 = vld [vmem:[#allocation64_spill] sm:$0xff] }
 0x5cf   : > { %10125 = vst [vmem:[%s15336_s26 + $0x2a8] sm:$0xff] %v9357_v43  ;;  %11961 = vmatprep.mubr.bf16.mxu0 %v13032_v32  ;;  %v13037_v1 = vld [vmem:[%s13811_s30 + $0x968] ss:$12 sps:$4 sm:$0xff]  }
 0x5d0   : > { %8887 = vmatmul.mubr.bf16.gmra.mrb[208].mxu1 %v13028_v0  ;;  %v13040_v43 = vld [vmem:[%s13811_s30 + $0xb14] ss:$12 sps:$4 sm:$0xff]  }
 0x5d1   : > { %v11855_v49 = vpop.f32.mrb[88].mxu0  ;;  %8894 = vmatprep.mubr.bf16.mxu1 %v13035_v23  ;;  %v13033_v23 = vld [vmem:[%s13811_s30 + $0xaf8] ss:$12 sps:$4 sm:$0xff]  }
 0x5d2   : > { %v9378_v30 = vadd.f32 %v11855_v49, %v15057_v14  ;;  %v9369_v15 = vpop.f32.mrb[89].mxu0  ;;  %v16579_v14 = vld [vmem:[#allocation66_spill] sm:$0xff] }
 0x5d3   : > { %v15692_v3 = vpop.f32.mrb[104].mxu1  ;;  %v9370_v39 = vadd.f32 %v9369_v15, %v16577_v21  ;;  %v11856_v34 = vpop.f32.mrb[90].mxu0 }
 0x5d4   : > { %16576 = vst [vmem:[#allocation25_spill] sm:$0xff] %v15692_v3  ;;  %10130 = vst [vmem:[%s15336_s26 + $0x2d0] sm:$0xff] %v9378_v30  ;;  %v8682_v56 = vpop.f32.mrb[105].mxu1  ;;  %v9381_v32 = vadd.f32 %v11856_v34, %v15063_v25  ;;  %v9372_v48 = vpop.f32.mrb[91].mxu0  ;;  %v16580_v30 = vld [vmem:[#allocation8_spill] sm:$0xff] }
 0x5d5   : > { %10128 = vst [vmem:[%s15336_s26 + $0x2c0] sm:$0xff] %v9370_v39  ;;  %v15700_v0 = vpop.f32.mrb[106].mxu1  ;;  %v9373_v11 = vadd.f32 %v9372_v48, %v16579_v14  ;;  %v13041_v39 = vld [vmem:[%s13811_s30 + $0x980] ss:$12 sps:$4 sm:$0xff]  }
 0x5d6   : > { %16578 = vst [vmem:[#allocation26_spill] sm:$0xff] %v15700_v0  ;;  %10131 = vst [vmem:[%s15336_s26 + $0x2d8] sm:$0xff] %v9381_v32  ;;  %v8685_v49 = vpop.f32.mrb[107].mxu1  ;;  %11962 = vmatmul.mubr.bf16.gmra.mrb[196].mxu0 %v13036_v61  ;;  %v16581_v56 = vld [vmem:[#allocation63_spill] sm:$0xff]  ;;  %v13042_v61 = vld [vmem:[%s13811_s30 + $0x998] ss:$12 sps:$4 sm:$0xff]  }
 0x5d7   : > { %10129 = vst [vmem:[%s15336_s26 + $0x2c8] sm:$0xff] %v9373_v11  ;;  %11965 = vmatprep.mubr.bf16.mxu0 %v13037_v1  ;;  %v16582_v1 = vld [vmem:[#allocation9_spill] sm:$0xff] }
 0x5d8   : > { %8895 = vmatmul.mubr.bf16.gmra.mrb[212].mxu1 %v13033_v23  ;;  %v13045_v0 = vld [vmem:[%s13811_s30 + $0xb2c] ss:$12 sps:$4 sm:$0xff]  }
 0x5d9   : > { %v11859_v25 = vpop.f32.mrb[92].mxu0  ;;  %8902 = vmatprep.mubr.bf16.mxu1 %v13040_v43  ;;  %v13038_v43 = vld [vmem:[%s13811_s30 + $0xb10] ss:$12 sps:$4 sm:$0xff]  }
 0x5da   : > { %v9394_v15 = vadd.f32 %v11859_v25, %v16580_v30  ;;  %v9385_v21 = vpop.f32.mrb[93].mxu0  ;;  %v16583_v25 = vld [vmem:[#allocation65_spill] sm:$0xff] }
 0x5db   : > { %v15708_v34 = vpop.f32.mrb[108].mxu1  ;;  %v9386_v32 = vadd.f32 %v9385_v21, %v16581_v56  ;;  %v11860_v48 = vpop.f32.mrb[94].mxu0 }
 0x5dc   : > { %10134 = vst [vmem:[%s15336_s26 + $0x2f0] sm:$0xff] %v9394_v15  ;;  %v8690_v14 = vpop.f32.mrb[109].mxu1  ;;  %v9397_v11 = vadd.f32 %v11860_v48, %v16582_v1  ;;  %v9388_v23 = vpop.f32.mrb[95].mxu0 }
 0x5dd   : > { %10132 = vst [vmem:[%s15336_s26 + $0x2e0] sm:$0xff] %v9386_v32  ;;  %v15716_v49 = vpop.f32.mrb[110].mxu1  ;;  %v9389_v30 = vadd.f32 %v9388_v23, %v16583_v25  ;;  %v13046_v32 = vld [vmem:[%s13811_s30 + $0x9b0] ss:$12 sps:$4 sm:$0xff]  }
 0x5de   : > { %10135 = vst [vmem:[%s15336_s26 + $0x2f8] sm:$0xff] %v9397_v11  ;;  %v8693_v3 = vpop.f32.mrb[111].mxu1  ;;  %11966 = vmatmul.mubr.bf16.gmra.mrb[200].mxu0 %v13041_v39  ;;  %v16585_v14 = vld [vmem:[#allocation68_spill] sm:$0xff] }
 0x5df   : > { %10133 = vst [vmem:[%s15336_s26 + $0x2e8] sm:$0xff] %v9389_v30  ;;  %11969 = vmatprep.mubr.bf16.mxu0 %v13042_v61  ;;  %v13047_v39 = vld [vmem:[%s13811_s30 + $0x9c8] ss:$12 sps:$4 sm:$0xff]   ;;  %v13050_v30 = vld [vmem:[%s13811_s30 + $0xb44] ss:$12 sps:$4 sm:$0xff]  }
 0x5e0   : > { %8903 = vmatmul.mubr.bf16.gmra.mrb[216].mxu1 %v13038_v43 }
 0x5e1   : > { %v11863_v15 = vpop.f32.mrb[96].mxu0  ;;  %8910 = vmatprep.mubr.bf16.mxu1 %v13045_v0  ;;  %v13043_v0 = vld [vmem:[%s13811_s30 + $0xb28] ss:$12 sps:$4 sm:$0xff]  }
 0x5e2   : > { %v9410_v21 = vadd.f32 %v11863_v15, %v15105_v28  ;;  %v9401_v56 = vpop.f32.mrb[97].mxu0  ;;  %v16587_v28 = vld [vmem:[#allocation70_spill] sm:$0xff] }
 0x5e3   : > { %v15724_v48 = vpop.f32.mrb[112].mxu1  ;;  %v9402_v1 = vadd.f32 %v9401_v56, %v16585_v14  ;;  %v11864_v3 = vpop.f32.mrb[98].mxu0 }
 0x5e4   : > { %16584 = vst [vmem:[#allocation27_spill] sm:$0xff] %v15724_v48  ;;  %10138 = vst [vmem:[%s15336_s26 + $0x310] sm:$0xff] %v9410_v21  ;;  %v8698_v11 = vpop.f32.mrb[113].mxu1  ;;  %v9413_v61 = vadd.f32 %v11864_v3, %v15111_v63  ;;  %v9404_v23 = vpop.f32.mrb[99].mxu0  ;;  %v16588_v21 = vld [vmem:[#allocation10_spill] sm:$0xff] }
 0x5e5   : > { %10136 = vst [vmem:[%s15336_s26 + $0x300] sm:$0xff] %v9402_v1  ;;  %v15732_v43 = vpop.f32.mrb[114].mxu1  ;;  %v9405_v25 = vadd.f32 %v9404_v23, %v16587_v28  ;;  %v13051_v1 = vld [vmem:[%s13811_s30 + $0x9e0] ss:$12 sps:$4 sm:$0xff]  }
 0x5e6   : > { %16586 = vst [vmem:[#allocation28_spill] sm:$0xff] %v15732_v43  ;;  %10139 = vst [vmem:[%s15336_s26 + $0x318] sm:$0xff] %v9413_v61  ;;  %v8701_v15 = vpop.f32.mrb[115].mxu1  ;;  %11970 = vmatmul.mubr.bf16.gmra.mrb[204].mxu0 %v13046_v32  ;;  %v16589_v11 = vld [vmem:[#allocation67_spill] sm:$0xff]  ;;  %v13052_v32 = vld [vmem:[%s13811_s30 + $0x9f8] ss:$12 sps:$4 sm:$0xff]  }
 0x5e7   : > { %10137 = vst [vmem:[%s15336_s26 + $0x308] sm:$0xff] %v9405_v25  ;;  %11973 = vmatprep.mubr.bf16.mxu0 %v13047_v39  ;;  %v16590_v39 = vld [vmem:[#allocation11_spill] sm:$0xff] }
 0x5e8   : > { %8911 = vmatmul.mubr.bf16.gmra.mrb[220].mxu1 %v13043_v0  ;;  %v13055_v43 = vld [vmem:[%s13811_s30 + $0xb5c] ss:$12 sps:$4 sm:$0xff]  }
 0x5e9   : > { %v11867_v63 = vpop.f32.mrb[100].mxu0  ;;  %8918 = vmatprep.mubr.bf16.mxu1 %v13050_v30  ;;  %v13048_v30 = vld [vmem:[%s13811_s30 + $0xb40] ss:$12 sps:$4 sm:$0xff]  }
 0x5ea   : > { %v9426_v56 = vadd.f32 %v11867_v63, %v16588_v21  ;;  %v9417_v14 = vpop.f32.mrb[101].mxu0  ;;  %v16591_v63 = vld [vmem:[#allocation69_spill] sm:$0xff] }
 0x5eb   : > { %v15740_v3 = vpop.f32.mrb[116].mxu1  ;;  %v9418_v61 = vadd.f32 %v9417_v14, %v16589_v11  ;;  %v11868_v23 = vpop.f32.mrb[102].mxu0 }
 0x5ec   : > { %10142 = vst [vmem:[%s15336_s26 + $0x330] sm:$0xff] %v9426_v56  ;;  %v8706_v28 = vpop.f32.mrb[117].mxu1  ;;  %v9429_v25 = vadd.f32 %v11868_v23, %v16590_v39  ;;  %v9420_v0 = vpop.f32.mrb[103].mxu0 }
 0x5ed   : > { %10140 = vst [vmem:[%s15336_s26 + $0x320] sm:$0xff] %v9418_v61  ;;  %v15748_v15 = vpop.f32.mrb[118].mxu1  ;;  %v9421_v21 = vadd.f32 %v9420_v0, %v16591_v63  ;;  %v13056_v61 = vld [vmem:[%s13811_s30 + $0xa10] ss:$12 sps:$4 sm:$0xff]  }
 0x5ee   : > { %10143 = vst [vmem:[%s15336_s26 + $0x338] sm:$0xff] %v9429_v25  ;;  %v8709_v48 = vpop.f32.mrb[119].mxu1  ;;  %11974 = vmatmul.mubr.bf16.gmra.mrb[208].mxu0 %v13051_v1  ;;  %v16593_v28 = vld [vmem:[#allocation72_spill] sm:$0xff] }
 0x5ef   : > { %10141 = vst [vmem:[%s15336_s26 + $0x328] sm:$0xff] %v9421_v21  ;;  %11977 = vmatprep.mubr.bf16.mxu0 %v13052_v32  ;;  %v13057_v1 = vld [vmem:[%s13811_s30 + $0xa28] ss:$12 sps:$4 sm:$0xff]  }
 0x5f0   : > { %8919 = vmatmul.mubr.bf16.gmra.mrb[224].mxu1 %v13048_v30  ;;  %v13060_v21 = vld [vmem:[%s13811_s30 + $0xb74] ss:$12 sps:$4 sm:$0xff]  }
 0x5f1   : > { %v11871_v56 = vpop.f32.mrb[104].mxu0  ;;  %8926 = vmatprep.mubr.bf16.mxu1 %v13055_v43  ;;  %v13053_v43 = vld [vmem:[%s13811_s30 + $0xb58] ss:$12 sps:$4 sm:$0xff]  }
 0x5f2   : > { %v9442_v14 = vadd.f32 %v11871_v56, %v15153_v33  ;;  %v9433_v11 = vpop.f32.mrb[105].mxu0  ;;  %v16595_v33 = vld [vmem:[#allocation74_spill] sm:$0xff] }
 0x5f3   : > { %v15756_v23 = vpop.f32.mrb[120].mxu1  ;;  %v9434_v39 = vadd.f32 %v9433_v11, %v16593_v28  ;;  %v11872_v48 = vpop.f32.mrb[106].mxu0 }
 0x5f4   : > { %16592 = vst [vmem:[#allocation29_spill] sm:$0xff] %v15756_v23  ;;  %10146 = vst [vmem:[%s15336_s26 + $0x350] sm:$0xff] %v9442_v14  ;;  %v8714_v25 = vpop.f32.mrb[121].mxu1  ;;  %v9445_v32 = vadd.f32 %v11872_v48, %v15159_v45  ;;  %v9436_v0 = vpop.f32.mrb[107].mxu0  ;;  %v16596_v14 = vld [vmem:[#allocation12_spill] sm:$0xff] }
 0x5f5   : > { %10144 = vst [vmem:[%s15336_s26 + $0x340] sm:$0xff] %v9434_v39  ;;  %v15764_v30 = vpop.f32.mrb[122].mxu1  ;;  %v9437_v63 = vadd.f32 %v9436_v0, %v16595_v33  ;;  %v13061_v39 = vld [vmem:[%s13811_s30 + $0xa40] ss:$12 sps:$4 sm:$0xff]  }
 0x5f6   : > { %16594 = vst [vmem:[#allocation30_spill] sm:$0xff] %v15764_v30  ;;  %10147 = vst [vmem:[%s15336_s26 + $0x358] sm:$0xff] %v9445_v32  ;;  %v8717_v56 = vpop.f32.mrb[123].mxu1  ;;  %11978 = vmatmul.mubr.bf16.gmra.mrb[212].mxu0 %v13056_v61  ;;  %v16597_v25 = vld [vmem:[#allocation71_spill] sm:$0xff]  ;;  %v13062_v61 = vld [vmem:[%s13811_s30 + $0xa58] ss:$12 sps:$4 sm:$0xff]  }
 0x5f7   : > { %10145 = vst [vmem:[%s15336_s26 + $0x348] sm:$0xff] %v9437_v63  ;;  %11981 = vmatprep.mubr.bf16.mxu0 %v13057_v1  ;;  %v16598_v1 = vld [vmem:[#allocation13_spill] sm:$0xff] }
 0x5f8   : > { %8927 = vmatmul.mubr.bf16.gmra.mrb[228].mxu1 %v13053_v43  ;;  %v13065_v30 = vld [vmem:[%s13811_s30 + $0xb8c] ss:$12 sps:$4 sm:$0xff]  }
 0x5f9   : > { %v11875_v45 = vpop.f32.mrb[108].mxu0  ;;  %8934 = vmatprep.mubr.bf16.mxu1 %v13060_v21  ;;  %v13058_v21 = vld [vmem:[%s13811_s30 + $0xb70] ss:$12 sps:$4 sm:$0xff]  }
 0x5fa   : > { %v9458_v11 = vadd.f32 %v11875_v45, %v16596_v14  ;;  %v9449_v28 = vpop.f32.mrb[109].mxu0  ;;  %v16599_v45 = vld [vmem:[#allocation73_spill] sm:$0xff] }
 0x5fb   : > { %v15772_v48 = vpop.f32.mrb[124].mxu1  ;;  %v9450_v32 = vadd.f32 %v9449_v28, %v16597_v25  ;;  %v11876_v0 = vpop.f32.mrb[110].mxu0 }
 0x5fc   : > { %10150 = vst [vmem:[%s15336_s26 + $0x370] sm:$0xff] %v9458_v11  ;;  %v8722_v33 = vpop.f32.mrb[125].mxu1  ;;  %v9461_v63 = vadd.f32 %v11876_v0, %v16598_v1  ;;  %v9452_v43 = vpop.f32.mrb[111].mxu0 }
 0x5fd   : > { %10148 = vst [vmem:[%s15336_s26 + $0x360] sm:$0xff] %v9450_v32  ;;  %v15780_v56 = vpop.f32.mrb[126].mxu1  ;;  %v9453_v14 = vadd.f32 %v9452_v43, %v16599_v45  ;;  %v13066_v32 = vld [vmem:[%s13811_s30 + $0xa70] ss:$12 sps:$4 sm:$0xff]  }
 0x5fe   : > { %10151 = vst [vmem:[%s15336_s26 + $0x378] sm:$0xff] %v9461_v63  ;;  %v8725_v23 = vpop.f32.mrb[127].mxu1  ;;  %11982 = vmatmul.mubr.bf16.gmra.mrb[216].mxu0 %v13061_v39  ;;  %v16601_v33 = vld [vmem:[#allocation76_spill] sm:$0xff] }
 0x5ff   : > { %10149 = vst [vmem:[%s15336_s26 + $0x368] sm:$0xff] %v9453_v14  ;;  %11985 = vmatprep.mubr.bf16.mxu0 %v13062_v61  ;;  %v13067_v39 = vld [vmem:[%s13811_s30 + $0xa88] ss:$12 sps:$4 sm:$0xff]   ;;  %v13070_v14 = vld [vmem:[%s13811_s30 + $0xba4] ss:$12 sps:$4 sm:$0xff]  }
 0x600   : > { %8935 = vmatmul.mubr.bf16.gmra.mrb[232].mxu1 %v13058_v21 }
 0x601   : > { %v11879_v11 = vpop.f32.mrb[112].mxu0  ;;  %8942 = vmatprep.mubr.bf16.mxu1 %v13065_v30  ;;  %v13063_v30 = vld [vmem:[%s13811_s30 + $0xb88] ss:$12 sps:$4 sm:$0xff]  }
 0x602   : > { %v9474_v28 = vadd.f32 %v11879_v11, %v15201_v53  ;;  %v9465_v25 = vpop.f32.mrb[113].mxu0  ;;  %v16603_v53 = vld [vmem:[#allocation78_spill] sm:$0xff] }
 0x603   : > { %v15788_v0 = vpop.f32.mrb[128].mxu1  ;;  %v9466_v1 = vadd.f32 %v9465_v25, %v16601_v33  ;;  %v11880_v23 = vpop.f32.mrb[114].mxu0 }
 0x604   : > { %16600 = vst [vmem:[#allocation31_spill] sm:$0xff] %v15788_v0  ;;  %10154 = vst [vmem:[%s15336_s26 + $0x390] sm:$0xff] %v9474_v28  ;;  %v8730_v63 = vpop.f32.mrb[129].mxu1  ;;  %v9477_v61 = vadd.f32 %v11880_v23, %v15207_v51  ;;  %v9468_v43 = vpop.f32.mrb[115].mxu0  ;;  %v16604_v28 = vld [vmem:[#allocation14_spill] sm:$0xff] }
 0x605   : > { %10152 = vst [vmem:[%s15336_s26 + $0x380] sm:$0xff] %v9466_v1  ;;  %v15796_v21 = vpop.f32.mrb[130].mxu1  ;;  %v9469_v45 = vadd.f32 %v9468_v43, %v16603_v53  ;;  %v13071_v1 = vld [vmem:[%s13811_s30 + $0xaa0] ss:$12 sps:$4 sm:$0xff]  }
 0x606   : > { %16602 = vst [vmem:[#allocation32_spill] sm:$0xff] %v15796_v21  ;;  %10155 = vst [vmem:[%s15336_s26 + $0x398] sm:$0xff] %v9477_v61  ;;  %v8733_v11 = vpop.f32.mrb[131].mxu1  ;;  %11986 = vmatmul.mubr.bf16.gmra.mrb[220].mxu0 %v13066_v32  ;;  %v16605_v63 = vld [vmem:[#allocation75_spill] sm:$0xff]  ;;  %v13072_v32 = vld [vmem:[%s13811_s30 + $0xab8] ss:$12 sps:$4 sm:$0xff]  }
 0x607   : > { %10153 = vst [vmem:[%s15336_s26 + $0x388] sm:$0xff] %v9469_v45  ;;  %11989 = vmatprep.mubr.bf16.mxu0 %v13067_v39  ;;  %v16606_v39 = vld [vmem:[#allocation15_spill] sm:$0xff] }
 0x608   : > { %8943 = vmatmul.mubr.bf16.gmra.mrb[236].mxu1 %v13063_v30  ;;  %v13075_v21 = vld [vmem:[%s13811_s30 + $0xbbc] ss:$12 sps:$4 sm:$0xff]  }
 0x609   : > { %v11883_v51 = vpop.f32.mrb[116].mxu0  ;;  %8950 = vmatprep.mubr.bf16.mxu1 %v13070_v14  ;;  %v13068_v14 = vld [vmem:[%s13811_s30 + $0xba0] ss:$12 sps:$4 sm:$0xff]  }
 0x60a   : > { %v9490_v25 = vadd.f32 %v11883_v51, %v16604_v28  ;;  %v9481_v33 = vpop.f32.mrb[117].mxu0  ;;  %v16607_v51 = vld [vmem:[#allocation77_spill] sm:$0xff] }
 0x60b   : > { %v15804_v23 = vpop.f32.mrb[132].mxu1  ;;  %v9482_v61 = vadd.f32 %v9481_v33, %v16605_v63  ;;  %v11884_v43 = vpop.f32.mrb[118].mxu0 }
 0x60c   : > { %10158 = vst [vmem:[%s15336_s26 + $0x3b0] sm:$0xff] %v9490_v25  ;;  %v8738_v53 = vpop.f32.mrb[133].mxu1  ;;  %v9493_v45 = vadd.f32 %v11884_v43, %v16606_v39  ;;  %v9484_v30 = vpop.f32.mrb[119].mxu0 }
 0x60d   : > { %10156 = vst [vmem:[%s15336_s26 + $0x3a0] sm:$0xff] %v9482_v61  ;;  %v15812_v11 = vpop.f32.mrb[134].mxu1  ;;  %v9485_v28 = vadd.f32 %v9484_v30, %v16607_v51  ;;  %v13076_v61 = vld [vmem:[%s13811_s30 + $0xad0] ss:$12 sps:$4 sm:$0xff]  }
 0x60e   : > { %10159 = vst [vmem:[%s15336_s26 + $0x3b8] sm:$0xff] %v9493_v45  ;;  %v8741_v0 = vpop.f32.mrb[135].mxu1  ;;  %11990 = vmatmul.mubr.bf16.gmra.mrb[224].mxu0 %v13071_v1  ;;  %v16609_v53 = vld [vmem:[#allocation80_spill] sm:$0xff] }
 0x60f   : > { %10157 = vst [vmem:[%s15336_s26 + $0x3a8] sm:$0xff] %v9485_v28  ;;  %11993 = vmatprep.mubr.bf16.mxu0 %v13072_v32  ;;  %v13077_v1 = vld [vmem:[%s13811_s30 + $0xae8] ss:$12 sps:$4 sm:$0xff]  }
 0x610   : > { %8951 = vmatmul.mubr.bf16.gmra.mrb[240].mxu1 %v13068_v14  ;;  %v13080_v28 = vld [vmem:[%s13811_s30 + $0xbd4] ss:$12 sps:$4 sm:$0xff]  }
 0x611   : > { %v11887_v25 = vpop.f32.mrb[120].mxu0  ;;  %8958 = vmatprep.mubr.bf16.mxu1 %v13075_v21  ;;  %v13073_v21 = vld [vmem:[%s13811_s30 + $0xbb8] ss:$12 sps:$4 sm:$0xff]  }
 0x612   : > { %v9506_v33 = vadd.f32 %v11887_v25, %v15249_v29  ;;  %v9497_v63 = vpop.f32.mrb[121].mxu0  ;;  %v16611_v29 = vld [vmem:[#allocation82_spill] sm:$0xff] }
 0x613   : > { %v15820_v43 = vpop.f32.mrb[136].mxu1  ;;  %v9498_v39 = vadd.f32 %v9497_v63, %v16609_v53  ;;  %v11888_v0 = vpop.f32.mrb[122].mxu0 }
 0x614   : > { %16608 = vst [vmem:[#allocation33_spill] sm:$0xff] %v15820_v43  ;;  %10162 = vst [vmem:[%s15336_s26 + $0x3d0] sm:$0xff] %v9506_v33  ;;  %v8746_v45 = vpop.f32.mrb[137].mxu1  ;;  %v9509_v32 = vadd.f32 %v11888_v0, %v15255_v60  ;;  %v9500_v30 = vpop.f32.mrb[123].mxu0  ;;  %v16612_v33 = vld [vmem:[#allocation16_spill] sm:$0xff] }
 0x615   : > { %10160 = vst [vmem:[%s15336_s26 + $0x3c0] sm:$0xff] %v9498_v39  ;;  %v15828_v14 = vpop.f32.mrb[138].mxu1  ;;  %v9501_v51 = vadd.f32 %v9500_v30, %v16611_v29  ;;  %v13081_v39 = vld [vmem:[%s13811_s30 + $0xb00] ss:$12 sps:$4 sm:$0xff]  }
 0x616   : > { %16610 = vst [vmem:[#allocation34_spill] sm:$0xff] %v15828_v14  ;;  %10163 = vst [vmem:[%s15336_s26 + $0x3d8] sm:$0xff] %v9509_v32  ;;  %v8749_v25 = vpop.f32.mrb[139].mxu1  ;;  %11994 = vmatmul.mubr.bf16.gmra.mrb[228].mxu0 %v13076_v61  ;;  %v16613_v45 = vld [vmem:[#allocation79_spill] sm:$0xff]  ;;  %v13082_v61 = vld [vmem:[%s13811_s30 + $0xb18] ss:$12 sps:$4 sm:$0xff]  }
 0x617   : > { %10161 = vst [vmem:[%s15336_s26 + $0x3c8] sm:$0xff] %v9501_v51  ;;  %11997 = vmatprep.mubr.bf16.mxu0 %v13077_v1  ;;  %v16614_v1 = vld [vmem:[#allocation17_spill] sm:$0xff] }
 0x618   : > { %8959 = vmatmul.mubr.bf16.gmra.mrb[244].mxu1 %v13073_v21  ;;  %v13085_v14 = vld [vmem:[%s13811_s30 + $0xbec] ss:$12 sps:$4 sm:$0xff]  }
 0x619   : > { %v11891_v60 = vpop.f32.mrb[124].mxu0  ;;  %8966 = vmatprep.mubr.bf16.mxu1 %v13080_v28  ;;  %v13078_v28 = vld [vmem:[%s13811_s30 + $0xbd0] ss:$12 sps:$4 sm:$0xff]  }
 0x61a   : > { %v9522_v63 = vadd.f32 %v11891_v60, %v16612_v33  ;;  %v9513_v53 = vpop.f32.mrb[125].mxu0  ;;  %v16615_v60 = vld [vmem:[#allocation81_spill] sm:$0xff] }
 0x61b   : > { %v15836_v0 = vpop.f32.mrb[140].mxu1  ;;  %v9514_v32 = vadd.f32 %v9513_v53, %v16613_v45  ;;  %v11892_v30 = vpop.f32.mrb[126].mxu0 }
 0x61c   : > { %10166 = vst [vmem:[%s15336_s26 + $0x3f0] sm:$0xff] %v9522_v63  ;;  %v8754_v29 = vpop.f32.mrb[141].mxu1  ;;  %v9525_v51 = vadd.f32 %v11892_v30, %v16614_v1  ;;  %v9516_v21 = vpop.f32.mrb[127].mxu0 }
 0x61d   : > { %10164 = vst [vmem:[%s15336_s26 + $0x3e0] sm:$0xff] %v9514_v32  ;;  %v15844_v25 = vpop.f32.mrb[142].mxu1  ;;  %v9517_v33 = vadd.f32 %v9516_v21, %v16615_v60  ;;  %v13086_v32 = vld [vmem:[%s13811_s30 + $0xb30] ss:$12 sps:$4 sm:$0xff]  }
 0x61e   : > { %10167 = vst [vmem:[%s15336_s26 + $0x3f8] sm:$0xff] %v9525_v51  ;;  %v8757_v43 = vpop.f32.mrb[143].mxu1  ;;  %11998 = vmatmul.mubr.bf16.gmra.mrb[232].mxu0 %v13081_v39  ;;  %v16617_v29 = vld [vmem:[#allocation84_spill] sm:$0xff] }
 0x61f   : > { %10165 = vst [vmem:[%s15336_s26 + $0x3e8] sm:$0xff] %v9517_v33  ;;  %12001 = vmatprep.mubr.bf16.mxu0 %v13082_v61  ;;  %v13087_v39 = vld [vmem:[%s13811_s30 + $0xb48] ss:$12 sps:$4 sm:$0xff]  }
 0x620   : > { %8967 = vmatmul.mubr.bf16.gmra.mrb[248].mxu1 %v13078_v28  ;;  %v13089_v33 = vld [vmem:[%s13811_s30 + $0xba8] ss:$12 sps:$4 sm:$0xff]  }
 0x621   : > { %v11895_v63 = vpop.f32.mrb[128].mxu0  ;;  %8974 = vmatprep.mubr.bf16.mxu1 %v13085_v14  ;;  %v13083_v14 = vld [vmem:[%s13811_s30 + $0xbe8] ss:$12 sps:$4 sm:$0xff]  }
 0x622   : > { %v9538_v53 = vadd.f32 %v11895_v63, %v15297_v58  ;;  %v9529_v45 = vpop.f32.mrb[129].mxu0  ;;  %v16619_v58 = vld [vmem:[#allocation86_spill] sm:$0xff] }
 0x623   : > { %v15852_v30 = vpop.f32.mrb[144].mxu1  ;;  %v9530_v1 = vadd.f32 %v9529_v45, %v16617_v29  ;;  %v11896_v43 = vpop.f32.mrb[130].mxu0 }
 0x624   : > { %16616 = vst [vmem:[#allocation35_spill] sm:$0xff] %v15852_v30  ;;  %10170 = vst [vmem:[%s15336_s26 + $0x410] sm:$0xff] %v9538_v53  ;;  %v8762_v51 = vpop.f32.mrb[145].mxu1  ;;  %v9541_v61 = vadd.f32 %v11896_v43, %v15303_v20  ;;  %v9532_v21 = vpop.f32.mrb[131].mxu0  ;;  %v16620_v53 = vld [vmem:[#allocation18_spill] sm:$0xff] }
 0x625   : > { %10168 = vst [vmem:[%s15336_s26 + $0x400] sm:$0xff] %v9530_v1  ;;  %v15860_v28 = vpop.f32.mrb[146].mxu1  ;;  %v9533_v60 = vadd.f32 %v9532_v21, %v16619_v58  ;;  %v13088_v1 = vld [vmem:[%s13811_s30 + $0xb60] ss:$12 sps:$4 sm:$0xff]  }
 0x626   : > { %16618 = vst [vmem:[#allocation36_spill] sm:$0xff] %v15860_v28  ;;  %10171 = vst [vmem:[%s15336_s26 + $0x418] sm:$0xff] %v9541_v61  ;;  %v8765_v63 = vpop.f32.mrb[147].mxu1  ;;  %12002 = vmatmul.mubr.bf16.gmra.mrb[236].mxu0 %v13086_v32  ;;  %v16621_v51 = vld [vmem:[#allocation83_spill] sm:$0xff]  ;;  %v13091_v32 = vld [vmem:[%s13811_s30 + $0xb78] ss:$12 sps:$4 sm:$0xff]  }
 0x627   : > { %10169 = vst [vmem:[%s15336_s26 + $0x408] sm:$0xff] %v9533_v60  ;;  %12005 = vmatprep.mubr.bf16.mxu0 %v13087_v39  ;;  %v16622_v39 = vld [vmem:[#allocation19_spill] sm:$0xff]  ;;  %v13093_v28 = vld [vmem:[%s13811_s30 + $0xbd8] ss:$12 sps:$4 sm:$0xff]  }
 0x628   : > { %8975 = vmatmul.mubr.bf16.gmra.mrb[252].mxu1 %v13083_v14 }
 0x629   : > { %v11899_v20 = vpop.f32.mrb[132].mxu0  ;;  %12013 = vmatprep.mubr.bf16.mxu1 %v13089_v33  ;;  %v13090_v33 = vld [vmem:[%s13811_s30 + $0xbc0] ss:$12 sps:$4 sm:$0xff]  }
 0x62a   : > { %v9554_v45 = vadd.f32 %v11899_v20, %v16620_v53  ;;  %v9545_v29 = vpop.f32.mrb[133].mxu0  ;;  %v16623_v20 = vld [vmem:[#allocation85_spill] sm:$0xff] }
 0x62b   : > { %v15868_v43 = vpop.f32.mrb[148].mxu1  ;;  %v9546_v61 = vadd.f32 %v9545_v29, %v16621_v51  ;;  %v11900_v21 = vpop.f32.mrb[134].mxu0 }
 0x62c   : > { %10174 = vst [vmem:[%s15336_s26 + $0x430] sm:$0xff] %v9554_v45  ;;  %v8770_v58 = vpop.f32.mrb[149].mxu1  ;;  %v9557_v60 = vadd.f32 %v11900_v21, %v16622_v39  ;;  %v9548_v14 = vpop.f32.mrb[135].mxu0 }
 0x62d   : > { %10172 = vst [vmem:[%s15336_s26 + $0x420] sm:$0xff] %v9546_v61  ;;  %v15876_v63 = vpop.f32.mrb[150].mxu1  ;;  %v9549_v53 = vadd.f32 %v9548_v14, %v16623_v20  ;;  %v13092_v61 = vld [vmem:[%s13811_s30 + $0xb90] ss:$12 sps:$4 sm:$0xff]  }
 0x62e   : > { %10175 = vst [vmem:[%s15336_s26 + $0x438] sm:$0xff] %v9557_v60  ;;  %v8773_v30 = vpop.f32.mrb[151].mxu1  ;;  %12006 = vmatmul.mubr.bf16.gmra.mrb[240].mxu0 %v13088_v1  ;;  %v16624_v58 = vld [vmem:[#allocation89_spill] sm:$0xff] }
 0x62f   : > { %10173 = vst [vmem:[%s15336_s26 + $0x428] sm:$0xff] %v9549_v53  ;;  %12009 = vmatprep.mubr.bf16.mxu0 %v13091_v32  ;;  %v13094_v32 = vld [vmem:[%s13811_s30 + $0xbf0] ss:$12 sps:$4 sm:$0xff]  }
 0x630   : > { %12014 = vmatmul.mubr.bf16.vlgmr.msra.gmra.mrb[0].mxu1 %v13090_v33 }
 0x631   : > { %v11903_v45 = vpop.f32.mrb[136].mxu0  ;;  %12017 = vmatprep.mubr.bf16.mxu1 %v13093_v28 }
 0x632   : > { %v9570_v29 = vadd.f32 %v11903_v45, %v15356_v44  ;;  %v9561_v51 = vpop.f32.mrb[137].mxu0 }
 0x633   : > { %v15884_v21 = vpop.f32.mrb[152].mxu1  ;;  %v9562_v39 = vadd.f32 %v9561_v51, %v16624_v58  ;;  %v11904_v60 = vpop.f32.mrb[138].mxu0 }
 0x634   : > { %10178 = vst [vmem:[%s15336_s26 + $0x450] sm:$0xff] %v9570_v29  ;;  %v8778_v30 = vpop.f32.mrb[153].mxu1  ;;  %v9573_v1 = vadd.f32 %v11904_v60, %v15364_v42  ;;  %v9564_v14 = vpop.f32.mrb[139].mxu0 }
 0x635   : > { %10176 = vst [vmem:[%s15336_s26 + $0x440] sm:$0xff] %v9562_v39  ;;  %v15891_v33 = vpop.f32.mrb[154].mxu1  ;;  %v9565_v44 = vadd.f32 %v9564_v14, %v15348_v18 }
 0x636   : > { %10179 = vst [vmem:[%s15336_s26 + $0x458] sm:$0xff] %v9573_v1  ;;  %v8781_v28 = vpop.f32.mrb[155].mxu1  ;;  %12010 = vmatmul.mubr.bf16.gmra.mrb[244].mxu0 %v13092_v61 }
 0x637   : > { %10177 = vst [vmem:[%s15336_s26 + $0x448] sm:$0xff] %v9565_v44 }
 0x638   : > { %12018 = vmatmul.mubr.bf16.gmra.mrb[4].mxu1 %v13094_v32 }
 0x639   : > { %v11907_v20 = vpop.f32.mrb[140].mxu0 }
 0x63a   : > { %v9586_v53 = vadd.f32 %v11907_v20, %v15388_v31  ;;  %v9577_v42 = vpop.f32.mrb[141].mxu0 }
 0x63b   : > { %v15897_v45 = vpop.f32.mrb[156].mxu1  ;;  %v9578_v29 = vadd.f32 %v9577_v42, %v15372_v54  ;;  %v11908_v51 = vpop.f32.mrb[142].mxu0 }
 0x63c   : > { %10182 = vst [vmem:[%s15336_s26 + $0x470] sm:$0xff] %v9586_v53  ;;  %v8786_v18 = vpop.f32.mrb[157].mxu1  ;;  %v9589_v58 = vadd.f32 %v11908_v51, %v15396_v10  ;;  %v9580_v39 = vpop.f32.mrb[143].mxu0 }
 0x63d   : > { %10180 = vst [vmem:[%s15336_s26 + $0x460] sm:$0xff] %v9578_v29  ;;  %v15903_v61 = vpop.f32.mrb[158].mxu1  ;;  %v9581_v60 = vadd.f32 %v9580_v39, %v15380_v4 }
 0x63e   : > { %10183 = vst [vmem:[%s15336_s26 + $0x478] sm:$0xff] %v9589_v58  ;;  %v8789_v31 = vpop.f32.mrb[159].mxu1 }
 0x63f   : > { %10181 = vst [vmem:[%s15336_s26 + $0x468] sm:$0xff] %v9581_v60 }
 0x641   : > { %v11911_v30 = vpop.f32.mrb[144].mxu0 }
 0x642   : > { %v9602_v54 = vadd.f32 %v11911_v30, %v15420_v16  ;;  %v9593_v1 = vpop.f32.mrb[145].mxu0 }
 0x643   : > { %v15909_v14 = vpop.f32.mrb[160].mxu1  ;;  %v9594_v10 = vadd.f32 %v9593_v1, %v15404_v40  ;;  %v11912_v32 = vpop.f32.mrb[146].mxu0 }
 0x644   : > { %10186 = vst [vmem:[%s15336_s26 + $0x490] sm:$0xff] %v9602_v54  ;;  %v8794_v44 = vpop.f32.mrb[161].mxu1  ;;  %v9605_v28 = vadd.f32 %v11912_v32, %v15428_v37  ;;  %v9596_v4 = vpop.f32.mrb[147].mxu0 }
 0x645   : > { %10184 = vst [vmem:[%s15336_s26 + $0x480] sm:$0xff] %v9594_v10  ;;  %v15915_v20 = vpop.f32.mrb[162].mxu1  ;;  %v9597_v53 = vadd.f32 %v9596_v4, %v15412_v46 }
 0x646   : > { %10187 = vst [vmem:[%s15336_s26 + $0x498] sm:$0xff] %v9605_v28  ;;  %v8797_v16 = vpop.f32.mrb[163].mxu1 }
 0x647   : > { %10185 = vst [vmem:[%s15336_s26 + $0x488] sm:$0xff] %v9597_v53 }
 0x649   : > { %v11915_v42 = vpop.f32.mrb[148].mxu0 }
 0x64a   : > { %v9618_v40 = vadd.f32 %v11915_v42, %v15452_v5  ;;  %v9609_v29 = vpop.f32.mrb[149].mxu0 }
 0x64b   : > { %v15921_v51 = vpop.f32.mrb[164].mxu1  ;;  %v9610_v37 = vadd.f32 %v9609_v29, %v15436_v26  ;;  %v11916_v18 = vpop.f32.mrb[150].mxu0 }
 0x64c   : > { %10190 = vst [vmem:[%s15336_s26 + $0x4b0] sm:$0xff] %v9618_v40  ;;  %v8802_v58 = vpop.f32.mrb[165].mxu1  ;;  %v9621_v39 = vadd.f32 %v11916_v18, %v15460_v38  ;;  %v9612_v46 = vpop.f32.mrb[151].mxu0 }
 0x64d   : > { %10188 = vst [vmem:[%s15336_s26 + $0x4a0] sm:$0xff] %v9610_v37  ;;  %v15927_v60 = vpop.f32.mrb[166].mxu1  ;;  %v9613_v31 = vadd.f32 %v9612_v46, %v15444_v9 }
 0x64e   : > { %10191 = vst [vmem:[%s15336_s26 + $0x4b8] sm:$0xff] %v9621_v39  ;;  %v8805_v5 = vpop.f32.mrb[167].mxu1 }
 0x64f   : > { %10189 = vst [vmem:[%s15336_s26 + $0x4a8] sm:$0xff] %v9613_v31 }
 0x651   : > { %v11919_v30 = vpop.f32.mrb[152].mxu0 }
 0x652   : > { %v9634_v26 = vadd.f32 %v11919_v30, %v15484_v41  ;;  %v9625_v54 = vpop.f32.mrb[153].mxu0 }
 0x653   : > { %v15933_v1 = vpop.f32.mrb[168].mxu1  ;;  %v9626_v38 = vadd.f32 %v9625_v54, %v15468_v27  ;;  %v11920_v10 = vpop.f32.mrb[154].mxu0 }
 0x654   : > { %10194 = vst [vmem:[%s15336_s26 + $0x4d0] sm:$0xff] %v9634_v26  ;;  %v8810_v32 = vpop.f32.mrb[169].mxu1  ;;  %v9637_v44 = vadd.f32 %v11920_v10, %v15492_v22  ;;  %v9628_v9 = vpop.f32.mrb[155].mxu0 }
 0x655   : > { %10192 = vst [vmem:[%s15336_s26 + $0x4c0] sm:$0xff] %v9626_v38  ;;  %v15939_v28 = vpop.f32.mrb[170].mxu1  ;;  %v9629_v4 = vadd.f32 %v9628_v9, %v15476_v2  ;;  %v16625_v9 = vld [vmem:[#allocation87_spill] sm:$0xff] }
 0x656   : > { %10195 = vst [vmem:[%s15336_s26 + $0x4d8] sm:$0xff] %v9637_v44  ;;  %v8813_v41 = vpop.f32.mrb[171].mxu1 }
 0x657   : > { %10193 = vst [vmem:[%s15336_s26 + $0x4c8] sm:$0xff] %v9629_v4 }
 0x659   : > { %v11923_v53 = vpop.f32.mrb[156].mxu0 }
 0x65a   : > { %v9650_v27 = vadd.f32 %v11923_v53, %v15516_v6  ;;  %v9641_v16 = vpop.f32.mrb[157].mxu0 }
 0x65b   : > { %v15945_v42 = vpop.f32.mrb[172].mxu1  ;;  %v9642_v22 = vadd.f32 %v9641_v16, %v15500_v59  ;;  %v11924_v40 = vpop.f32.mrb[158].mxu0  ;;  %v16626_v16 = vld [vmem:[#allocation88_spill] sm:$0xff] }
 0x65c   : > { %10198 = vst [vmem:[%s15336_s26 + $0x4f0] sm:$0xff] %v9650_v27  ;;  %v8818_v29 = vpop.f32.mrb[173].mxu1  ;;  %v9653_v37 = vadd.f32 %v11924_v40, %v15524_v57  ;;  %v9644_v2 = vpop.f32.mrb[159].mxu0 }
 0x65d   : > { %10196 = vst [vmem:[%s15336_s26 + $0x4e0] sm:$0xff] %v9642_v22  ;;  %v15951_v18 = vpop.f32.mrb[174].mxu1  ;;  %v9645_v58 = vadd.f32 %v9644_v2, %v15508_v13 }
 0x65e   : > { %10199 = vst [vmem:[%s15336_s26 + $0x4f8] sm:$0xff] %v9653_v37  ;;  %v8821_v6 = vpop.f32.mrb[175].mxu1 }
 0x65f   : > { %10197 = vst [vmem:[%s15336_s26 + $0x4e8] sm:$0xff] %v9645_v58 }
 0x661   : > { %v11927_v39 = vpop.f32.mrb[160].mxu0 }
 0x662   : > { %v9666_v59 = vadd.f32 %v11927_v39, %v15548_v52  ;;  %v9657_v46 = vpop.f32.mrb[161].mxu0 }
 0x663   : > { %v15957_v31 = vpop.f32.mrb[176].mxu1  ;;  %v9658_v57 = vadd.f32 %v9657_v46, %v15532_v62  ;;  %v11928_v5 = vpop.f32.mrb[162].mxu0 }
 0x664   : > { %10202 = vst [vmem:[%s15336_s26 + $0x510] sm:$0xff] %v9666_v59  ;;  %v8826_v30 = vpop.f32.mrb[177].mxu1  ;;  %v9669_v26 = vadd.f32 %v11928_v5, %v15556_v19  ;;  %v9660_v13 = vpop.f32.mrb[163].mxu0 }
 0x665   : > { %10200 = vst [vmem:[%s15336_s26 + $0x500] sm:$0xff] %v9658_v57  ;;  %v15963_v54 = vpop.f32.mrb[178].mxu1  ;;  %v9661_v38 = vadd.f32 %v9660_v13, %v15540_v50  ;;  %v16627_v57 = vld [vmem:[#allocation20_spill] sm:$0xff] }
 0x666   : > { %10203 = vst [vmem:[%s15336_s26 + $0x518] sm:$0xff] %v9669_v26  ;;  %v8829_v52 = vpop.f32.mrb[179].mxu1 }
 0x667   : > { %10201 = vst [vmem:[%s15336_s26 + $0x508] sm:$0xff] %v9661_v38  ;;  %v16628_v38 = vld [vmem:[#allocation21_spill] sm:$0xff] }
 0x669   : > { %v11931_v10 = vpop.f32.mrb[164].mxu0 }
 0x66a   : > { %v9682_v62 = vadd.f32 %v11931_v10, %v15580_v55  ;;  %v9673_v32 = vpop.f32.mrb[165].mxu0 }
 0x66b   : > { %v15969_v44 = vpop.f32.mrb[180].mxu1  ;;  %v9674_v19 = vadd.f32 %v9673_v32, %v16625_v9  ;;  %v11932_v4 = vpop.f32.mrb[166].mxu0 }
 0x66c   : > { %10206 = vst [vmem:[%s15336_s26 + $0x530] sm:$0xff] %v9682_v62  ;;  %v8834_v41 = vpop.f32.mrb[181].mxu1  ;;  %v9685_v53 = vadd.f32 %v11932_v4, %v15588_v36  ;;  %v9676_v50 = vpop.f32.mrb[167].mxu0 }
 0x66d   : > { %10204 = vst [vmem:[%s15336_s26 + $0x520] sm:$0xff] %v9674_v19  ;;  %v15975_v27 = vpop.f32.mrb[182].mxu1  ;;  %v9677_v22 = vadd.f32 %v9676_v50, %v16626_v16  ;;  %v16629_v19 = vld [vmem:[#allocation22_spill] sm:$0xff] }
 0x66e   : > { %10207 = vst [vmem:[%s15336_s26 + $0x538] sm:$0xff] %v9685_v53  ;;  %v8837_v55 = vpop.f32.mrb[183].mxu1 }
 0x66f   : > { %10205 = vst [vmem:[%s15336_s26 + $0x528] sm:$0xff] %v9677_v22  ;;  %v16630_v22 = vld [vmem:[#allocation23_spill] sm:$0xff] }
 0x671   : > { %v11935_v40 = vpop.f32.mrb[168].mxu0 }
 0x672   : > { %v9698_v29 = vadd.f32 %v11935_v40, %v15612_v12  ;;  %v9689_v37 = vpop.f32.mrb[169].mxu0 }
 0x673   : > { %v15981_v2 = vpop.f32.mrb[184].mxu1  ;;  %v9690_v36 = vadd.f32 %v9689_v37, %v15596_v35  ;;  %v11936_v58 = vpop.f32.mrb[170].mxu0 }
 0x674   : > { %10210 = vst [vmem:[%s15336_s26 + $0x550] sm:$0xff] %v9698_v29  ;;  %v8842_v6 = vpop.f32.mrb[185].mxu1  ;;  %v9701_v39 = vadd.f32 %v11936_v58, %v15620_v47  ;;  %v9692_v59 = vpop.f32.mrb[171].mxu0  ;;  %v16631_v58 = vld [vmem:[#allocation24_spill] sm:$0xff] }
 0x675   : > { %10208 = vst [vmem:[%s15336_s26 + $0x540] sm:$0xff] %v9690_v36  ;;  %v15987_v46 = vpop.f32.mrb[186].mxu1  ;;  %v9693_v5 = vadd.f32 %v9692_v59, %v16627_v57 }
 0x676   : > { %10211 = vst [vmem:[%s15336_s26 + $0x558] sm:$0xff] %v9701_v39  ;;  %v8845_v12 = vpop.f32.mrb[187].mxu1 }
 0x677   : > { %10209 = vst [vmem:[%s15336_s26 + $0x548] sm:$0xff] %v9693_v5  ;;  %v16632_v12 = vld [vmem:[#allocation25_spill] sm:$0xff] }
 0x679   : > { %v11939_v30 = vpop.f32.mrb[172].mxu0 }
 0x67a   : > { %v9714_v35 = vadd.f32 %v11939_v30, %v15644_v8  ;;  %v9705_v26 = vpop.f32.mrb[173].mxu0 }
 0x67b   : > { %v15993_v13 = vpop.f32.mrb[188].mxu1  ;;  %v9706_v47 = vadd.f32 %v9705_v26, %v16628_v38  ;;  %v11940_v52 = vpop.f32.mrb[174].mxu0 }
 0x67c   : > { %10214 = vst [vmem:[%s15336_s26 + $0x570] sm:$0xff] %v9714_v35  ;;  %v8850_v10 = vpop.f32.mrb[189].mxu1  ;;  %v9717_v62 = vadd.f32 %v11940_v52, %v15652_v7  ;;  %v9708_v32 = vpop.f32.mrb[175].mxu0  ;;  %v16633_v52 = vld [vmem:[#allocation26_spill] sm:$0xff] }
 0x67d   : > { %10212 = vst [vmem:[%s15336_s26 + $0x560] sm:$0xff] %v9706_v47  ;;  %v15999_v9 = vpop.f32.mrb[190].mxu1  ;;  %v9709_v4 = vadd.f32 %v9708_v32, %v16629_v19 }
 0x67e   : > { %10215 = vst [vmem:[%s15336_s26 + $0x578] sm:$0xff] %v9717_v62  ;;  %v8853_v8 = vpop.f32.mrb[191].mxu1 }
 0x67f   : > { %10213 = vst [vmem:[%s15336_s26 + $0x568] sm:$0xff] %v9709_v4  ;;  %v16634_v8 = vld [vmem:[#allocation27_spill] sm:$0xff] }
 0x681   : > { %v11943_v41 = vpop.f32.mrb[176].mxu0 }
 0x682   : > { %v9730_v53 = vadd.f32 %v11943_v41, %v15676_v17  ;;  %v9721_v50 = vpop.f32.mrb[177].mxu0 }
 0x683   : > { %v16005_v16 = vpop.f32.mrb[192].mxu1  ;;  %v9722_v7 = vadd.f32 %v9721_v50, %v16630_v22  ;;  %v11944_v55 = vpop.f32.mrb[178].mxu0 }
 0x684   : > { %10218 = vst [vmem:[%s15336_s26 + $0x590] sm:$0xff] %v9730_v53  ;;  %v8858_v40 = vpop.f32.mrb[193].mxu1  ;;  %v9733_v29 = vadd.f32 %v11944_v55, %v15684_v24  ;;  %v9724_v37 = vpop.f32.mrb[179].mxu0  ;;  %v16635_v55 = vld [vmem:[#allocation28_spill] sm:$0xff] }
 0x685   : > { %10216 = vst [vmem:[%s15336_s26 + $0x580] sm:$0xff] %v9722_v7  ;;  %v16011_v36 = vpop.f32.mrb[194].mxu1  ;;  %v9725_v6 = vadd.f32 %v9724_v37, %v16631_v58 }
 0x686   : > { %10219 = vst [vmem:[%s15336_s26 + $0x598] sm:$0xff] %v9733_v29  ;;  %v8861_v17 = vpop.f32.mrb[195].mxu1 }
 0x687   : > { %10217 = vst [vmem:[%s15336_s26 + $0x588] sm:$0xff] %v9725_v6  ;;  %v16636_v17 = vld [vmem:[#allocation29_spill] sm:$0xff] }
 0x689   : > { %v11947_v39 = vpop.f32.mrb[180].mxu0 }
 0x68a   : > { %v9746_v59 = vadd.f32 %v11947_v39, %v15708_v34  ;;  %v9737_v57 = vpop.f32.mrb[181].mxu0 }
 0x68b   : > { %v16017_v5 = vpop.f32.mrb[196].mxu1  ;;  %v9738_v24 = vadd.f32 %v9737_v57, %v16632_v12  ;;  %v11948_v30 = vpop.f32.mrb[182].mxu0 }
 0x68c   : > { %10222 = vst [vmem:[%s15336_s26 + $0x5b0] sm:$0xff] %v9746_v59  ;;  %v8866_v35 = vpop.f32.mrb[197].mxu1  ;;  %v9749_v26 = vadd.f32 %v11948_v30, %v15716_v49  ;;  %v9740_v38 = vpop.f32.mrb[183].mxu0  ;;  %v16637_v30 = vld [vmem:[#allocation30_spill] sm:$0xff] }
 0x68d   : > { %10220 = vst [vmem:[%s15336_s26 + $0x5a0] sm:$0xff] %v9738_v24  ;;  %v16023_v47 = vpop.f32.mrb[198].mxu1  ;;  %v9741_v10 = vadd.f32 %v9740_v38, %v16633_v52 }
 0x68e   : > { %10223 = vst [vmem:[%s15336_s26 + $0x5b8] sm:$0xff] %v9749_v26  ;;  %v8869_v34 = vpop.f32.mrb[199].mxu1 }
 0x68f   : > { %10221 = vst [vmem:[%s15336_s26 + $0x5a8] sm:$0xff] %v9741_v10  ;;  %v16638_v34 = vld [vmem:[#allocation31_spill] sm:$0xff] }
 0x691   : > { %v11951_v62 = vpop.f32.mrb[184].mxu0 }
 0x692   : > { %v9762_v32 = vadd.f32 %v11951_v62, %v15740_v3  ;;  %v9753_v19 = vpop.f32.mrb[185].mxu0 }
 0x693   : > { %v16029_v4 = vpop.f32.mrb[200].mxu1  ;;  %v9754_v49 = vadd.f32 %v9753_v19, %v16634_v8  ;;  %v11952_v41 = vpop.f32.mrb[186].mxu0 }
 0x694   : > { %10226 = vst [vmem:[%s15336_s26 + $0x5d0] sm:$0xff] %v9762_v32  ;;  %v8874_v53 = vpop.f32.mrb[201].mxu1  ;;  %v9765_v50 = vadd.f32 %v11952_v41, %v15748_v15  ;;  %v9756_v22 = vpop.f32.mrb[187].mxu0  ;;  %v16639_v41 = vld [vmem:[#allocation32_spill] sm:$0xff] }
 0x695   : > { %10224 = vst [vmem:[%s15336_s26 + $0x5c0] sm:$0xff] %v9754_v49  ;;  %v16035_v7 = vpop.f32.mrb[202].mxu1  ;;  %v9757_v40 = vadd.f32 %v9756_v22, %v16635_v55 }
 0x696   : > { %10227 = vst [vmem:[%s15336_s26 + $0x5d8] sm:$0xff] %v9765_v50  ;;  %v8877_v3 = vpop.f32.mrb[203].mxu1 }
 0x697   : > { %10225 = vst [vmem:[%s15336_s26 + $0x5c8] sm:$0xff] %v9757_v40  ;;  %v16640_v3 = vld [vmem:[#allocation33_spill] sm:$0xff] }
 0x699   : > { %v11955_v29 = vpop.f32.mrb[188].mxu0 }
 0x69a   : > { %v9778_v37 = vadd.f32 %v11955_v29, %v15772_v48  ;;  %v9769_v58 = vpop.f32.mrb[189].mxu0 }
 0x69b   : > { %v16041_v6 = vpop.f32.mrb[204].mxu1  ;;  %v9770_v15 = vadd.f32 %v9769_v58, %v16636_v17  ;;  %v11956_v39 = vpop.f32.mrb[190].mxu0 }
 0x69c   : > { %10230 = vst [vmem:[%s15336_s26 + $0x5f0] sm:$0xff] %v9778_v37  ;;  %v8882_v59 = vpop.f32.mrb[205].mxu1  ;;  %v9781_v57 = vadd.f32 %v11956_v39, %v15780_v56  ;;  %v9772_v12 = vpop.f32.mrb[191].mxu0  ;;  %v16641_v39 = vld [vmem:[#allocation34_spill] sm:$0xff] }
 0x69d   : > { %10228 = vst [vmem:[%s15336_s26 + $0x5e0] sm:$0xff] %v9770_v15  ;;  %v16047_v24 = vpop.f32.mrb[206].mxu1  ;;  %v9773_v35 = vadd.f32 %v9772_v12, %v16637_v30 }
 0x69e   : > { %10231 = vst [vmem:[%s15336_s26 + $0x5f8] sm:$0xff] %v9781_v57  ;;  %v8885_v48 = vpop.f32.mrb[207].mxu1 }
 0x69f   : > { %10229 = vst [vmem:[%s15336_s26 + $0x5e8] sm:$0xff] %v9773_v35  ;;  %v16642_v48 = vld [vmem:[#allocation35_spill] sm:$0xff] }
 0x6a1   : > { %v11959_v26 = vpop.f32.mrb[192].mxu0 }
 0x6a2   : > { %v9794_v38 = vadd.f32 %v11959_v26, %v15804_v23  ;;  %v9785_v52 = vpop.f32.mrb[193].mxu0 }
 0x6a3   : > { %v16053_v10 = vpop.f32.mrb[208].mxu1  ;;  %v9786_v56 = vadd.f32 %v9785_v52, %v16638_v34  ;;  %v11960_v62 = vpop.f32.mrb[194].mxu0 }
 0x6a4   : > { %10234 = vst [vmem:[%s15336_s26 + $0x610] sm:$0xff] %v9794_v38  ;;  %v8890_v32 = vpop.f32.mrb[209].mxu1  ;;  %v9797_v19 = vadd.f32 %v11960_v62, %v15812_v11  ;;  %v9788_v8 = vpop.f32.mrb[195].mxu0  ;;  %v16643_v62 = vld [vmem:[#allocation36_spill] sm:$0xff] }
 0x6a5   : > { %10232 = vst [vmem:[%s15336_s26 + $0x600] sm:$0xff] %v9786_v56  ;;  %v16059_v49 = vpop.f32.mrb[210].mxu1  ;;  %v9789_v53 = vadd.f32 %v9788_v8, %v16639_v41 }
 0x6a6   : > { %10235 = vst [vmem:[%s15336_s26 + $0x618] sm:$0xff] %v9797_v19  ;;  %v8893_v23 = vpop.f32.mrb[211].mxu1 }
 0x6a7   : > { %10233 = vst [vmem:[%s15336_s26 + $0x608] sm:$0xff] %v9789_v53 }
 0x6a9   : > { %v11963_v50 = vpop.f32.mrb[196].mxu0 }
 0x6aa   : > { %v9810_v22 = vadd.f32 %v11963_v50, %v15836_v0  ;;  %v9801_v55 = vpop.f32.mrb[197].mxu0 }
 0x6ab   : > { %v16065_v40 = vpop.f32.mrb[212].mxu1  ;;  %v9802_v11 = vadd.f32 %v9801_v55, %v16640_v3  ;;  %v11964_v29 = vpop.f32.mrb[198].mxu0 }
 0x6ac   : > { %10238 = vst [vmem:[%s15336_s26 + $0x630] sm:$0xff] %v9810_v22  ;;  %v8898_v37 = vpop.f32.mrb[213].mxu1  ;;  %v9813_v58 = vadd.f32 %v11964_v29, %v15844_v25  ;;  %v9804_v17 = vpop.f32.mrb[199].mxu0 }
 0x6ad   : > { %10236 = vst [vmem:[%s15336_s26 + $0x620] sm:$0xff] %v9802_v11  ;;  %v16071_v15 = vpop.f32.mrb[214].mxu1  ;;  %v9805_v59 = vadd.f32 %v9804_v17, %v16641_v39 }
 0x6ae   : > { %10239 = vst [vmem:[%s15336_s26 + $0x638] sm:$0xff] %v9813_v58  ;;  %v8901_v0 = vpop.f32.mrb[215].mxu1 }
 0x6af   : > { %10237 = vst [vmem:[%s15336_s26 + $0x628] sm:$0xff] %v9805_v59 }
 0x6b1   : > { %v11967_v57 = vpop.f32.mrb[200].mxu0 }
 0x6b2   : > { %v9826_v12 = vadd.f32 %v11967_v57, %v15868_v43  ;;  %v9817_v30 = vpop.f32.mrb[201].mxu0 }
 0x6b3   : > { %v16077_v35 = vpop.f32.mrb[216].mxu1  ;;  %v9818_v25 = vadd.f32 %v9817_v30, %v16642_v48  ;;  %v11968_v26 = vpop.f32.mrb[202].mxu0 }
 0x6b4   : > { %10242 = vst [vmem:[%s15336_s26 + $0x650] sm:$0xff] %v9826_v12  ;;  %v8906_v38 = vpop.f32.mrb[217].mxu1  ;;  %v9829_v52 = vadd.f32 %v11968_v26, %v15876_v63  ;;  %v9820_v34 = vpop.f32.mrb[203].mxu0 }
 0x6b5   : > { %10240 = vst [vmem:[%s15336_s26 + $0x640] sm:$0xff] %v9818_v25  ;;  %v16083_v56 = vpop.f32.mrb[218].mxu1  ;;  %v9821_v32 = vadd.f32 %v9820_v34, %v16643_v62 }
 0x6b6   : > { %10243 = vst [vmem:[%s15336_s26 + $0x658] sm:$0xff] %v9829_v52  ;;  %v8909_v43 = vpop.f32.mrb[219].mxu1 }
 0x6b7   : > { %10241 = vst [vmem:[%s15336_s26 + $0x648] sm:$0xff] %v9821_v32 }
 0x6b9   : > { %v11971_v19 = vpop.f32.mrb[204].mxu0 }
 0x6ba   : > { %v9842_v8 = vadd.f32 %v11971_v19, %v15897_v45  ;;  %v9833_v41 = vpop.f32.mrb[205].mxu0 }
 0x6bb   : > { %v16089_v53 = vpop.f32.mrb[220].mxu1  ;;  %v9834_v63 = vadd.f32 %v9833_v41, %v15884_v21  ;;  %v11972_v23 = vpop.f32.mrb[206].mxu0 }
 0x6bc   : > { %10246 = vst [vmem:[%s15336_s26 + $0x670] sm:$0xff] %v9842_v8  ;;  %v8914_v50 = vpop.f32.mrb[221].mxu1  ;;  %v9845_v22 = vadd.f32 %v11972_v23, %v15903_v61  ;;  %v9836_v55 = vpop.f32.mrb[207].mxu0 }
 0x6bd   : > { %10244 = vst [vmem:[%s15336_s26 + $0x660] sm:$0xff] %v9834_v63  ;;  %v16095_v3 = vpop.f32.mrb[222].mxu1  ;;  %v9837_v11 = vadd.f32 %v9836_v55, %v15891_v33 }
 0x6be   : > { %10247 = vst [vmem:[%s15336_s26 + $0x678] sm:$0xff] %v9845_v22  ;;  %v8917_v45 = vpop.f32.mrb[223].mxu1 }
 0x6bf   : > { %10245 = vst [vmem:[%s15336_s26 + $0x668] sm:$0xff] %v9837_v11 }
 0x6c1   : > { %v11975_v29 = vpop.f32.mrb[208].mxu0 }
 0x6c2   : > { %v9858_v21 = vadd.f32 %v11975_v29, %v15921_v51  ;;  %v9849_v37 = vpop.f32.mrb[209].mxu0 }
 0x6c3   : > { %v16101_v58 = vpop.f32.mrb[224].mxu1  ;;  %v9850_v61 = vadd.f32 %v9849_v37, %v15909_v14  ;;  %v11976_v17 = vpop.f32.mrb[210].mxu0 }
 0x6c4   : > { %10250 = vst [vmem:[%s15336_s26 + $0x690] sm:$0xff] %v9858_v21  ;;  %v8922_v39 = vpop.f32.mrb[225].mxu1  ;;  %v9861_v59 = vadd.f32 %v11976_v17, %v15927_v60  ;;  %v9852_v33 = vpop.f32.mrb[211].mxu0 }
 0x6c5   : > { %10248 = vst [vmem:[%s15336_s26 + $0x680] sm:$0xff] %v9850_v61  ;;  %v16107_v0 = vpop.f32.mrb[226].mxu1  ;;  %v9853_v57 = vadd.f32 %v9852_v33, %v15915_v20 }
 0x6c6   : > { %10251 = vst [vmem:[%s15336_s26 + $0x698] sm:$0xff] %v9861_v59  ;;  %v8925_v51 = vpop.f32.mrb[227].mxu1 }
 0x6c7   : > { %10249 = vst [vmem:[%s15336_s26 + $0x688] sm:$0xff] %v9853_v57 }
 0x6c9   : > { %v11979_v12 = vpop.f32.mrb[212].mxu0 }
 0x6ca   : > { %v9874_v14 = vadd.f32 %v11979_v12, %v15945_v42  ;;  %v9865_v30 = vpop.f32.mrb[213].mxu0 }
 0x6cb   : > { %v16113_v48 = vpop.f32.mrb[228].mxu1  ;;  %v9866_v60 = vadd.f32 %v9865_v30, %v15933_v1  ;;  %v11980_v25 = vpop.f32.mrb[214].mxu0 }
 0x6cc   : > { %10254 = vst [vmem:[%s15336_s26 + $0x6b0] sm:$0xff] %v9874_v14  ;;  %v8930_v26 = vpop.f32.mrb[229].mxu1  ;;  %v9877_v38 = vadd.f32 %v11980_v25, %v15951_v18  ;;  %v9868_v20 = vpop.f32.mrb[215].mxu0 }
 0x6cd   : > { %10252 = vst [vmem:[%s15336_s26 + $0x6a0] sm:$0xff] %v9866_v60  ;;  %v16119_v52 = vpop.f32.mrb[230].mxu1  ;;  %v9869_v34 = vadd.f32 %v9868_v20, %v15939_v28 }
 0x6ce   : > { %10255 = vst [vmem:[%s15336_s26 + $0x6b8] sm:$0xff] %v9877_v38  ;;  %v8933_v42 = vpop.f32.mrb[231].mxu1 }
 0x6cf   : > { %10253 = vst [vmem:[%s15336_s26 + $0x6a8] sm:$0xff] %v9869_v34 }
 0x6d1   : > { %v11983_v62 = vpop.f32.mrb[216].mxu0 }
 0x6d2   : > { %v9890_v1 = vadd.f32 %v11983_v62, %v15969_v44  ;;  %v9881_v32 = vpop.f32.mrb[217].mxu0 }
 0x6d3   : > { %v16125_v43 = vpop.f32.mrb[232].mxu1  ;;  %v9882_v18 = vadd.f32 %v9881_v32, %v15957_v31  ;;  %v11984_v19 = vpop.f32.mrb[218].mxu0 }
 0x6d4   : > { %10258 = vst [vmem:[%s15336_s26 + $0x6d0] sm:$0xff] %v9890_v1  ;;  %v8938_v8 = vpop.f32.mrb[233].mxu1  ;;  %v9893_v41 = vadd.f32 %v11984_v19, %v15975_v27  ;;  %v9884_v28 = vpop.f32.mrb[219].mxu0 }
 0x6d5   : > { %10256 = vst [vmem:[%s15336_s26 + $0x6c0] sm:$0xff] %v9882_v18  ;;  %v16131_v63 = vpop.f32.mrb[234].mxu1  ;;  %v9885_v23 = vadd.f32 %v9884_v28, %v15963_v54 }
 0x6d6   : > { %10259 = vst [vmem:[%s15336_s26 + $0x6d8] sm:$0xff] %v9893_v41  ;;  %v8941_v44 = vpop.f32.mrb[235].mxu1 }
 0x6d7   : > { %10257 = vst [vmem:[%s15336_s26 + $0x6c8] sm:$0xff] %v9885_v23 }
 0x6d9   : > { %v11987_v50 = vpop.f32.mrb[220].mxu0 }
 0x6da   : > { %v9906_v31 = vadd.f32 %v11987_v50, %v15993_v13  ;;  %v9897_v22 = vpop.f32.mrb[221].mxu0 }
 0x6db   : > { %v16137_v55 = vpop.f32.mrb[236].mxu1  ;;  %v9898_v27 = vadd.f32 %v9897_v22, %v15981_v2  ;;  %v11988_v11 = vpop.f32.mrb[222].mxu0 }
 0x6dc   : > { %10262 = vst [vmem:[%s15336_s26 + $0x6f0] sm:$0xff] %v9906_v31  ;;  %v8946_v45 = vpop.f32.mrb[237].mxu1  ;;  %v9909_v29 = vadd.f32 %v11988_v11, %v15999_v9  ;;  %v9900_v54 = vpop.f32.mrb[223].mxu0 }
 0x6dd   : > { %10260 = vst [vmem:[%s15336_s26 + $0x6e0] sm:$0xff] %v9898_v27  ;;  %v16143_v21 = vpop.f32.mrb[238].mxu1  ;;  %v9901_v37 = vadd.f32 %v9900_v54, %v15987_v46 }
 0x6de   : > { %10263 = vst [vmem:[%s15336_s26 + $0x6f8] sm:$0xff] %v9909_v29  ;;  %v8949_v13 = vpop.f32.mrb[239].mxu1 }
 0x6df   : > { %10261 = vst [vmem:[%s15336_s26 + $0x6e8] sm:$0xff] %v9901_v37 }
 0x6e1   : > { %v11991_v61 = vpop.f32.mrb[224].mxu0 }
 0x6e2   : > { %v9922_v2 = vadd.f32 %v11991_v61, %v16017_v5  ;;  %v9913_v17 = vpop.f32.mrb[225].mxu0 }
 0x6e3   : > { %v16149_v39 = vpop.f32.mrb[240].mxu1  ;;  %v9914_v9 = vadd.f32 %v9913_v17, %v16005_v16  ;;  %v11992_v59 = vpop.f32.mrb[226].mxu0 }
 0x6e4   : > { %10266 = vst [vmem:[%s15336_s26 + $0x710] sm:$0xff] %v9922_v2  ;;  %v8954_v33 = vpop.f32.mrb[241].mxu1  ;;  %v9925_v57 = vadd.f32 %v11992_v59, %v16023_v47  ;;  %v9916_v46 = vpop.f32.mrb[227].mxu0 }
 0x6e5   : > { %10264 = vst [vmem:[%s15336_s26 + $0x700] sm:$0xff] %v9914_v9  ;;  %v16155_v51 = vpop.f32.mrb[242].mxu1  ;;  %v9917_v12 = vadd.f32 %v9916_v46, %v16011_v36 }
 0x6e6   : > { %10267 = vst [vmem:[%s15336_s26 + $0x718] sm:$0xff] %v9925_v57  ;;  %v8957_v5 = vpop.f32.mrb[243].mxu1 }
 0x6e7   : > { %10265 = vst [vmem:[%s15336_s26 + $0x708] sm:$0xff] %v9917_v12 }
 0x6e9   : > { %v11995_v14 = vpop.f32.mrb[228].mxu0 }
 0x6ea   : > { %v9938_v16 = vadd.f32 %v11995_v14, %v16041_v6  ;;  %v9929_v30 = vpop.f32.mrb[229].mxu0 }
 0x6eb   : > { %v8960_v60 = vpop.f32.mrb[244].mxu1  ;;  %v9930_v25 = vadd.f32 %v9929_v30, %v16029_v4  ;;  %v11996_v47 = vpop.f32.mrb[230].mxu0 }
 0x6ec   : > { %10270 = vst [vmem:[%s15336_s26 + $0x730] sm:$0xff] %v9938_v16  ;;  %v8962_v26 = vpop.f32.mrb[245].mxu1  ;;  %v9941_v38 = vadd.f32 %v11996_v47, %v16047_v24  ;;  %v9932_v20 = vpop.f32.mrb[231].mxu0 }
 0x6ed   : > { %10268 = vst [vmem:[%s15336_s26 + $0x720] sm:$0xff] %v9930_v25  ;;  %v8963_v36 = vpop.f32.mrb[246].mxu1  ;;  %v9933_v34 = vadd.f32 %v9932_v20, %v16035_v7 }
 0x6ee   : > { %10271 = vst [vmem:[%s15336_s26 + $0x738] sm:$0xff] %v9941_v38  ;;  %v8965_v42 = vpop.f32.mrb[247].mxu1 }
 0x6ef   : > { %10269 = vst [vmem:[%s15336_s26 + $0x728] sm:$0xff] %v9933_v34 }
 0x6f1   : > { %v11999_v6 = vpop.f32.mrb[232].mxu0 }
 0x6f2   : > { %v9954_v4 = vadd.f32 %v11999_v6, %v16065_v40  ;;  %v9945_v62 = vpop.f32.mrb[233].mxu0 }
 0x6f3   : > { %v16169_v1 = vpop.f32.mrb[248].mxu1  ;;  %v9946_v32 = vadd.f32 %v9945_v62, %v16053_v10  ;;  %v12000_v24 = vpop.f32.mrb[234].mxu0 }
 0x6f4   : > { %10274 = vst [vmem:[%s15336_s26 + $0x750] sm:$0xff] %v9954_v4  ;;  %v8970_v18 = vpop.f32.mrb[249].mxu1  ;;  %v9957_v19 = vadd.f32 %v12000_v24, %v16071_v15  ;;  %v9948_v7 = vpop.f32.mrb[235].mxu0 }
 0x6f5   : > { %10272 = vst [vmem:[%s15336_s26 + $0x740] sm:$0xff] %v9946_v32  ;;  %v16175_v8 = vpop.f32.mrb[250].mxu1  ;;  %v9949_v41 = vadd.f32 %v9948_v7, %v16059_v49 }
 0x6f6   : > { %10275 = vst [vmem:[%s15336_s26 + $0x758] sm:$0xff] %v9957_v19  ;;  %v8973_v40 = vpop.f32.mrb[251].mxu1 }
 0x6f7   : > { %10273 = vst [vmem:[%s15336_s26 + $0x748] sm:$0xff] %v9949_v41 }
 0x6f9   : > { %v12003_v28 = vpop.f32.mrb[236].mxu0 }
 0x6fa   : > { %v9970_v10 = vadd.f32 %v12003_v28, %v16089_v53  ;;  %v9961_v23 = vpop.f32.mrb[237].mxu0 }
 0x6fb   : > { %v8976_v44 = vpop.f32.mrb[252].mxu1  ;;  %v9962_v50 = vadd.f32 %v9961_v23, %v16077_v35  ;;  %v12004_v15 = vpop.f32.mrb[238].mxu0 }
 0x6fc   : > { %10278 = vst [vmem:[%s15336_s26 + $0x770] sm:$0xff] %v9970_v10  ;;  %v8978_v31 = vpop.f32.mrb[253].mxu1  ;;  %v9973_v22 = vadd.f32 %v12004_v15, %v16095_v3  ;;  %v9964_v27 = vpop.f32.mrb[239].mxu0 }
 0x6fd   : > { %10276 = vst [vmem:[%s15336_s26 + $0x760] sm:$0xff] %v9962_v50  ;;  %v8979_v49 = vpop.f32.mrb[254].mxu1  ;;  %v9965_v11 = vadd.f32 %v9964_v27, %v16083_v56 }
 0x6fe   : > { %10279 = vst [vmem:[%s15336_s26 + $0x778] sm:$0xff] %v9973_v22  ;;  %v8981_v45 = vpop.f32.mrb[255].mxu1 }
 0x6ff   : > { %10277 = vst [vmem:[%s15336_s26 + $0x768] sm:$0xff] %v9965_v11 }
 0x701   : > { %v12007_v53 = vpop.f32.mrb[240].mxu0 }
 0x702   : > { %v9986_v35 = vadd.f32 %v12007_v53, %v16113_v48  ;;  %v9977_v29 = vpop.f32.mrb[241].mxu0 }
 0x703   : > { %v9978_v54 = vadd.f32 %v9977_v29, %v16101_v58  ;;  %v12015_v37 = vpop.f32.mrb[0].mxu1  ;;  %v12008_v3 = vpop.f32.mrb[242].mxu0 }
 0x704   : > { %10282 = vst [vmem:[%s15336_s26 + $0x790] sm:$0xff] %v9986_v35  ;;  %v10018_v13 = vadd.f32 %v12015_v37, %v8960_v60  ;;  %v9989_v56 = vadd.f32 %v12008_v3, %v16119_v52  ;;  %v10009_v61 = vpop.f32.mrb[1].mxu1  ;;  %v9980_v2 = vpop.f32.mrb[243].mxu0 }
 0x705   : > { %10280 = vst [vmem:[%s15336_s26 + $0x780] sm:$0xff] %v9978_v54  ;;  %v10010_v17 = vadd.f32 %v10009_v61, %v16149_v39  ;;  %v9981_v48 = vadd.f32 %v9980_v2, %v16107_v0  ;;  %v12016_v9 = vpop.f32.mrb[2].mxu1 }
 0x706   : > { %10290 = vst [vmem:[%s15336_s26 + $0x7d0] sm:$0xff] %v10018_v13  ;;  %10283 = vst [vmem:[%s15336_s26 + $0x798] sm:$0xff] %v9989_v56  ;;  %v10021_v58 = vadd.f32 %v12016_v9, %v8963_v36  ;;  %v10012_v59 = vpop.f32.mrb[3].mxu1 }
 0x707   : > { %10288 = vst [vmem:[%s15336_s26 + $0x7c0] sm:$0xff] %v10010_v17  ;;  %10281 = vst [vmem:[%s15336_s26 + $0x788] sm:$0xff] %v9981_v48  ;;  %v10013_v33 = vadd.f32 %v10012_v59, %v16155_v51 }
 0x708   : > { %10291 = vst [vmem:[%s15336_s26 + $0x7d8] sm:$0xff] %v10021_v58 }
 0x709   : > { %10289 = vst [vmem:[%s15336_s26 + $0x7c8] sm:$0xff] %v10013_v33  ;;  %v12011_v52 = vpop.f32.mrb[244].mxu0 }
 0x70a   : > { %v10002_v39 = vadd.f32 %v12011_v52, %v16137_v55  ;;  %v9993_v57 = vpop.f32.mrb[245].mxu0 }
 0x70b   : > { %v9994_v0 = vadd.f32 %v9993_v57, %v16125_v43  ;;  %v12019_v46 = vpop.f32.mrb[4].mxu1  ;;  %v12012_v12 = vpop.f32.mrb[246].mxu0 }
 0x70c   : > { %10286 = vst [vmem:[%s15336_s26 + $0x7b0] sm:$0xff] %v10002_v39  ;;  %v10034_v5 = vadd.f32 %v12019_v46, %v8976_v44  ;;  %v10005_v51 = vadd.f32 %v12012_v12, %v16143_v21  ;;  %v10025_v14 = vpop.f32.mrb[5].mxu1  ;;  %v9996_v16 = vpop.f32.mrb[247].mxu0 }
 0x70d   : > { %10284 = vst [vmem:[%s15336_s26 + $0x7a0] sm:$0xff] %v9994_v0  ;;  %v10026_v30 = vadd.f32 %v10025_v14, %v16169_v1  ;;  %v9997_v55 = vadd.f32 %v9996_v16, %v16131_v63  ;;  %v12020_v60 = vpop.f32.mrb[6].mxu1 }
 0x70e   : > { %10294 = vst [vmem:[%s15336_s26 + $0x7f0] sm:$0xff] %v10034_v5  ;;  %10287 = vst [vmem:[%s15336_s26 + $0x7b8] sm:$0xff] %v10005_v51  ;;  %v10037_v43 = vadd.f32 %v12020_v60, %v8979_v49  ;;  %v10028_v25 = vpop.f32.mrb[7].mxu1 }
 0x70f   : > { %10292 = vst [vmem:[%s15336_s26 + $0x7e0] sm:$0xff] %v10026_v30  ;;  %10285 = vst [vmem:[%s15336_s26 + $0x7a8] sm:$0xff] %v9997_v55  ;;  %v10029_v47 = vadd.f32 %v10028_v25, %v16175_v8 }
 0x710   : > { %10295 = vst [vmem:[%s15336_s26 + $0x7f8] sm:$0xff] %v10037_v43 }
 0x711   : > { %10293 = vst [vmem:[%s15336_s26 + $0x7e8] sm:$0xff] %v10029_v47 }
 0x712 PF: > { %s15_s15 = sadd.s32 1, %s13109_s15  }
 0x713   : > { %p12_p4 = scmp.ge.s32.totalorder %s15_s15, 4  }
 0x715   :  { %14 = sbr.rel (!%p12_p4) target bundleno = 1 (0x1), region = 77 }

// kernel: ms_swd_forward.5
= control target key start
LH: loop header
LB: loop body
LE: loop exit
PB: predicated region body
PF: predicated region fallthrough
CT: control target
= control target key end

     0   :  { %s786_s9 = smov 0   ;;  %s788_s10 = smov 0   ;;  %s1290_s0 = inlined_call_operand.vmem [shape: f32[2,1024,128], index: 0, kind: input, shape index: {}]   ;;  %s1291_s1 = inlined_call_operand.vmem [shape: f32[2,1024,128], index: 1, kind: input, shape index: {}]   ;;  %s1292_s2 = inlined_call_operand.vmem [shape: f32[2,2,8,128], index: 2, kind: output, shape index: {}]  }
   0x1   :  { %s790_s11 = smov 0   ;;  %s792_s12 = smov 0  }
   0x2   :  { %s794_s13 = smov 0  }
   0x3 LB: > { %s27_s14 = sadd.s32 1, %s761_s11  ;;  %s31_s15 = sadd.s32 1, %s765_s12  ;;  %s769_s13 = sphi %s794_s13, %s12_s13   ;;  %s765_s12 = sphi %s792_s12, %s1408_s12   ;;  %s761_s11 = sphi %s790_s11, %s1407_s11   ;;  %s757_s10 = sphi %s788_s10, %s1406_s10   ;;  %s753_s9 = sphi %s786_s9, %s1405_s9  }
   0x4   : > { %p29_p0 = scmp.ge.s32.totalorder %s27_s14, 2  ;;  %p680_p1 = scmp.ge.s32.totalorder %s769_s13, 1 }
   0x5   : > { %p165_p2 = scmp.lt.s32.totalorder %s769_s13, 5 }
   0x6   : > { %s1410_s14 = smov (%p29_p0, %s27_s14), 0  ;;  %s1412_s15 = smov (!%p29_p0, %s31_s15), %s765_s12 }
   0x7   : > { %p166_p3 = pnand %p680_p1, %p165_p2  ;;  %p33_p4 = scmp.ge.s32.totalorder %s1412_s15, 2 }
   0x9   : > { %s1414_s15 = smov (%p33_p4, %s1412_s15), 0  ;;  %169 = sbr.rel (%p166_p3) target bundleno = 174 (0xae), region = 28 }
  0x10   : > { %s681_s16 = sshll.u32 %s753_s9, 6  ;;  %p207_p5 = scmp.lt.s32.totalorder %s757_s10, 1 }
  0x11   : > { %p209_p6 = scmp.lt.s32.totalorder %s681_s16, 127  ;;  %p231_p7 = scmp.lt.s32.totalorder %s753_s9, 1 }
  0x12   : > { %s1416_s10 = smov (!%p207_p5, %s757_s10), 1 }
  0x13   : > { %s1418_s16 = smov (!%p209_p6, %s681_s16), 127  ;;  %s682_s17 = sshll.u32 %s1416_s10, 7 }
  0x14   : > { %s212_s18 = sadd.s32 %s682_s17, %s1418_s16  ;;  %s1420_s9 = smov (!%p231_p7, %s753_s9), 1 }
  0x15   : > { %s683_s19 = sshll.u32 %s212_s18, 3  ;;  %s687_s26 = sshll.u32 %s1416_s10, 1 }
  0x16   : > { %s825_s22 = scalar_lea.vmem %s1290_s0, %s683_s19  ;;  %s830_s25 = scalar_lea.vmem %s1291_s1, %s683_s19 }
  0x17   : > { %v833_v0 = vld [vmem:[%s825_s22 + $0x108] sm:$0xff]  ;;  %v836_v1 = vld [vmem:[%s825_s22 + $0x110] sm:$0xff]  ;;  %v839_v2 = vld [vmem:[%s825_s22 + $0x118] sm:$0xff]  ;;  %s234_s27 = sadd.s32 %s687_s26, %s1420_s9 }
  0x18   : > { %v842_v3 = vld [vmem:[%s825_s22 + $0x120] sm:$0xff]  ;;  %v845_v4 = vld [vmem:[%s825_s22 + $0x128] sm:$0xff]  ;;  %v851_v6 = vld [vmem:[%s825_s22 + $0x130] sm:$0xff]  ;;  %s688_s28 = sshll.u32 %s234_s27, 3 }
  0x19   : > { %v848_v5 = vld [vmem:[%s825_s22] sm:$0xff]  ;;  %v854_v7 = vld [vmem:[%s825_s22 + $0x138] sm:$0xff]  ;;  %v860_v9 = vld [vmem:[%s825_s22 + $0x8] sm:$0xff]  ;;  %s236_s3 = scalar_lea.vmem %s1292_s2, %s688_s28 }
  0x1a   : > { %v857_v8 = vld [vmem:[%s825_s22 + $0x140] sm:$0xff]  ;;  %v863_v10 = vld [vmem:[%s825_s22 + $0x148] sm:$0xff]  ;;  %v866_v11 = vld [vmem:[%s825_s22 + $0x150] sm:$0xff] }
  0x1b   : > { %v869_v12 = vld [vmem:[%s825_s22 + $0x158] sm:$0xff]  ;;  %v872_v13 = vld [vmem:[%s830_s25] sm:$0xff]  ;;  %v875_v14 = vld [vmem:[%s830_s25 + $0x8] sm:$0xff] }
  0x1c   : > { %v878_v15 = vld [vmem:[%s825_s22 + $0x10] sm:$0xff]  ;;  %v881_v16 = vld [vmem:[%s825_s22 + $0x160] sm:$0xff]  ;;  %v884_v17 = vld [vmem:[%s825_s22 + $0x168] sm:$0xff]  ;;  %v370_v47 = vsub.f32 %v848_v5, %v872_v13  ;;  %v371_v59 = vsub.f32 %v860_v9, %v875_v14 }
  0x1d   : > { %v887_v18 = vld [vmem:[%s825_s22 + $0x170] sm:$0xff]  ;;  %v893_v20 = vld [vmem:[%s830_s25 + $0x108] sm:$0xff]  ;;  %v899_v22 = vld [vmem:[%s825_s22 + $0x18] sm:$0xff] }
  0x1e   : > { %1320 = vst [vmem:[#allocation3_spill] sm:$0xff] %v887_v18  ;;  %v890_v19 = vld [vmem:[%s830_s25 + $0x10] sm:$0xff]  ;;  %v902_v23 = vld [vmem:[%s825_s22 + $0x178] sm:$0xff]  ;;  %v905_v24 = vld [vmem:[%s825_s22 + $0x180] sm:$0xff]  ;;  %v434_v49 = vand.u32 2147483647, %v370_v47 }
  0x1f   : > { %v896_v21 = vld [vmem:[%s830_s25 + $0x110] sm:$0xff]  ;;  %v908_v25 = vld [vmem:[%s825_s22 + $0x188] sm:$0xff]  ;;  %v911_v26 = vld [vmem:[%s830_s25 + $0x18] sm:$0xff]  ;;  %v372_v61 = vsub.f32 %v878_v15, %v890_v19  ;;  %v435_v62 = vand.u32 2147483647, %v371_v59 }
  0x20   : > { %1321 = vst [vmem:[#allocation4_spill] sm:$0xff] %v908_v25  ;;  %v914_v27 = vld [vmem:[%s830_s25 + $0x118] sm:$0xff]  ;;  %v917_v28 = vld [vmem:[%s830_s25 + $0x120] sm:$0xff]  ;;  %v920_v29 = vld [vmem:[%s830_s25 + $0x128] sm:$0xff]  ;;  %v373_v19 = vsub.f32 %v899_v22, %v911_v26 }
  0x21   : > { %v927_v32 = vld [vmem:[%s825_s22 + $0x190] sm:$0xff]  ;;  %v930_v33 = vld [vmem:[%s825_s22 + $0x198] sm:$0xff]  ;;  %v933_v34 = vld [vmem:[%s825_s22 + $0x1a0] sm:$0xff]  ;;  %v436_v22 = vand.u32 2147483647, %v372_v61 }
  0x22   : > { %1322 = vst [vmem:[#allocation5_spill] sm:$0xff] %v933_v34  ;;  %v936_v35 = vld [vmem:[%s830_s25 + $0x130] sm:$0xff]  ;;  %v939_v36 = vld [vmem:[%s830_s25 + $0x138] sm:$0xff]  ;;  %v942_v37 = vld [vmem:[%s830_s25 + $0x140] sm:$0xff] }
  0x23   : > { %v951_v41 = vld [vmem:[%s825_s22 + $0x1a8] sm:$0xff]  ;;  %v954_v42 = vld [vmem:[%s825_s22 + $0x1b0] sm:$0xff]  ;;  %v957_v43 = vld [vmem:[%s825_s22 + $0x1b8] sm:$0xff] }
  0x24   : > { %1323 = vst [vmem:[#allocation6_spill] sm:$0xff] %v957_v43  ;;  %v960_v44 = vld [vmem:[%s830_s25 + $0x148] sm:$0xff]  ;;  %v963_v45 = vld [vmem:[%s830_s25 + $0x150] sm:$0xff]  ;;  %v966_v46 = vld [vmem:[%s830_s25 + $0x158] sm:$0xff] }
  0x25   : > { %v977_v51 = vld [vmem:[%s825_s22 + $0x20] sm:$0xff]  ;;  %v983_v53 = vld [vmem:[%s825_s22 + $0x1c8] sm:$0xff]  ;;  %v986_v54 = vld [vmem:[%s825_s22 + $0x1d0] sm:$0xff] }
  0x26   : > { %v980_v52 = vld [vmem:[%s825_s22 + $0x1c0] sm:$0xff]  ;;  %1325 = vst [vmem:[#allocation8_spill] sm:$0xff] %v983_v53  ;;  %1326 = vst [vmem:[#allocation9_spill] sm:$0xff] %v986_v54  ;;  %v995_v57 = vld [vmem:[%s830_s25 + $0x168] sm:$0xff] }
  0x27   : > { %1324 = vst [vmem:[#allocation7_spill] sm:$0xff] %v980_v52  ;;  %v989_v55 = vld [vmem:[%s830_s25 + $0x20] sm:$0xff]  ;;  %1327 = vst [vmem:[#allocation10_spill] sm:$0xff] %v995_v57  ;;  %v998_v58 = vld [vmem:[%s830_s25 + $0x170] sm:$0xff] }
  0x28   : > { %v992_v56 = vld [vmem:[%s830_s25 + $0x160] sm:$0xff]  ;;  %1328 = vst [vmem:[#allocation11_spill] sm:$0xff] %v998_v58  ;;  %v1009_v63 = vld [vmem:[%s825_s22 + $0x1d8] sm:$0xff]  ;;  %v1015_v13 = vld [vmem:[%s825_s22 + $0x1e8] sm:$0xff] }
  0x29   : > { %1329 = vst [vmem:[#allocation12_spill] sm:$0xff] %v1009_v63  ;;  %v1012_v5 = vld [vmem:[%s825_s22 + $0x1e0] sm:$0xff]  ;;  %1331 = vst [vmem:[#allocation14_spill] sm:$0xff] %v1015_v13  ;;  %v1018_v50 = vld [vmem:[%s830_s25 + $0x178] sm:$0xff]  ;;  %v499_v63 = vadd.f32 %v435_v62, %v434_v49 }
  0x2a   : > { %1330 = vst [vmem:[#allocation13_spill] sm:$0xff] %v1012_v5  ;;  %v1021_v9 = vld [vmem:[%s830_s25 + $0x180] sm:$0xff]  ;;  %v1024_v14 = vld [vmem:[%s830_s25 + $0x188] sm:$0xff]  ;;  %v1035_v48 = vld [vmem:[%s825_s22 + $0x1f0] sm:$0xff] }
  0x2b   : > { %1332 = vst [vmem:[#allocation15_spill] sm:$0xff] %v1021_v9  ;;  %1333 = vst [vmem:[#allocation16_spill] sm:$0xff] %v1024_v14  ;;  %v1038_v40 = vld [vmem:[%s825_s22 + $0x1f8] sm:$0xff]  ;;  %v1041_v39 = vld [vmem:[%s830_s25 + $0x190] sm:$0xff]  ;;  %v500_v61 = vadd.f32 %v499_v63, %v436_v22 }
  0x2c   : > { %1334 = vst [vmem:[#allocation17_spill] sm:$0xff] %v1035_v48  ;;  %1335 = vst [vmem:[#allocation18_spill] sm:$0xff] %v1038_v40  ;;  %v1044_v38 = vld [vmem:[%s830_s25 + $0x198] sm:$0xff]  ;;  %v1047_v15 = vld [vmem:[%s830_s25 + $0x1a0] sm:$0xff] }
  0x2d   : > { %1336 = vst [vmem:[#allocation19_spill] sm:$0xff] %v1044_v38  ;;  %1337 = vst [vmem:[#allocation20_spill] sm:$0xff] %v1047_v15  ;;  %v247_v31 = vld [vmem:[%s825_s22 + $0x28] sm:$0xff]  ;;  %v1063_v18 = vld [vmem:[%s830_s25 + $0x1b0] sm:$0xff]  ;;  %v374_v38 = vsub.f32 %v977_v51, %v989_v55 }
  0x2e   : > { %v311_v30 = vld [vmem:[%s830_s25 + $0x28] sm:$0xff]  ;;  %v1066_v57 = vld [vmem:[%s830_s25 + $0x1b8] sm:$0xff]  ;;  %v1075_v60 = vld [vmem:[%s830_s25 + $0x1c0] sm:$0xff] }
  0x2f   : > { %v1060_v58 = vld [vmem:[%s830_s25 + $0x1a8] sm:$0xff]  ;;  %1338 = vst [vmem:[#allocation21_spill] sm:$0xff] %v1066_v57  ;;  %1339 = vst [vmem:[#allocation22_spill] sm:$0xff] %v1075_v60  ;;  %v1081_v25 = vld [vmem:[%s830_s25 + $0x1d0] sm:$0xff]  ;;  %v375_v43 = vsub.f32 %v247_v31, %v311_v30  ;;  %v438_v55 = vand.u32 2147483647, %v374_v38 }
  0x30   : > { %v1078_v14 = vld [vmem:[%s830_s25 + $0x1c8] sm:$0xff]  ;;  %1341 = vst [vmem:[#allocation24_spill] sm:$0xff] %v1081_v25  ;;  %v1090_v47 = vld [vmem:[%s830_s25 + $0x1d8] sm:$0xff]  ;;  %v1093_v15 = vld [vmem:[%s830_s25 + $0x1e0] sm:$0xff] }
  0x31   : > { %1340 = vst [vmem:[#allocation23_spill] sm:$0xff] %v1078_v14  ;;  %1342 = vst [vmem:[#allocation25_spill] sm:$0xff] %v1090_v47  ;;  %v1096_v34 = vld [vmem:[%s830_s25 + $0x1e8] sm:$0xff]  ;;  %v1107_v26 = vld [vmem:[%s830_s25 + $0x1f0] sm:$0xff]  ;;  %v437_v47 = vand.u32 2147483647, %v373_v19 }
  0x32   : > { %1343 = vst [vmem:[#allocation26_spill] sm:$0xff] %v1093_v15  ;;  %1344 = vst [vmem:[#allocation27_spill] sm:$0xff] %v1096_v34  ;;  %v1110_v57 = vld [vmem:[%s830_s25 + $0x1f8] sm:$0xff]  ;;  %v248_v9 = vld [vmem:[%s825_s22 + $0x30] sm:$0xff]  ;;  %v439_v59 = vand.u32 2147483647, %v375_v43 }
  0x33   : > { %1345 = vst [vmem:[#allocation28_spill] sm:$0xff] %v1107_v26  ;;  %1346 = vst [vmem:[#allocation29_spill] sm:$0xff] %v1110_v57  ;;  %v312_v14 = vld [vmem:[%s830_s25 + $0x30] sm:$0xff]  ;;  %v249_v51 = vld [vmem:[%s825_s22 + $0x38] sm:$0xff]  ;;  %v501_v26 = vadd.f32 %v500_v61, %v437_v47 }
  0x34   : > { %v313_v15 = vld [vmem:[%s830_s25 + $0x38] sm:$0xff]  ;;  %v376_v5 = vsub.f32 %v248_v9, %v312_v14  ;;  %v250_v34 = vld [vmem:[%s825_s22 + $0x40] sm:$0xff]  ;;  %v251_v48 = vld [vmem:[%s825_s22 + $0x48] sm:$0xff] }
  0x35   : > { %v314_v13 = vld [vmem:[%s830_s25 + $0x40] sm:$0xff]  ;;  %v377_v54 = vsub.f32 %v249_v51, %v313_v15  ;;  %v315_v30 = vld [vmem:[%s830_s25 + $0x48] sm:$0xff]  ;;  %v502_v62 = vadd.f32 %v501_v26, %v438_v55  ;;  %v252_v19 = vld [vmem:[%s825_s22 + $0x50] sm:$0xff] }
  0x36   : > { %v378_v31 = vsub.f32 %v250_v34, %v314_v13  ;;  %v440_v49 = vand.u32 2147483647, %v376_v5  ;;  %v316_v9 = vld [vmem:[%s830_s25 + $0x50] sm:$0xff]  ;;  %v379_v38 = vsub.f32 %v251_v48, %v315_v30  ;;  %v253_v22 = vld [vmem:[%s825_s22 + $0x58] sm:$0xff]  ;;  %v254_v61 = vld [vmem:[%s825_s22 + $0x60] sm:$0xff] }
  0x37   : > { %v441_v63 = vand.u32 2147483647, %v377_v54  ;;  %v503_v14 = vadd.f32 %v502_v62, %v439_v59  ;;  %v317_v15 = vld [vmem:[%s830_s25 + $0x58] sm:$0xff]  ;;  %v380_v43 = vsub.f32 %v252_v19, %v316_v9  ;;  %v318_v34 = vld [vmem:[%s830_s25 + $0x60] sm:$0xff]  ;;  %v255_v55 = vld [vmem:[%s825_s22 + $0x68] sm:$0xff] }
  0x38   : > { %v442_v47 = vand.u32 2147483647, %v378_v31  ;;  %v381_v5 = vsub.f32 %v253_v22, %v317_v15  ;;  %v443_v13 = vand.u32 2147483647, %v379_v38  ;;  %v319_v48 = vld [vmem:[%s830_s25 + $0x68] sm:$0xff]  ;;  %v382_v54 = vsub.f32 %v254_v61, %v318_v34  ;;  %v256_v62 = vld [vmem:[%s825_s22 + $0x70] sm:$0xff] }
  0x39   : > { %v504_v51 = vadd.f32 %v503_v14, %v440_v49  ;;  %v444_v59 = vand.u32 2147483647, %v380_v43  ;;  %v320_v19 = vld [vmem:[%s830_s25 + $0x70] sm:$0xff]  ;;  %v383_v31 = vsub.f32 %v255_v55, %v319_v48  ;;  %v257_v14 = vld [vmem:[%s825_s22 + $0x78] sm:$0xff]  ;;  %v322_v61 = vld [vmem:[%s830_s25 + $0x80] sm:$0xff] }
  0x3a   : > { %v445_v49 = vand.u32 2147483647, %v381_v5  ;;  %v321_v22 = vld [vmem:[%s830_s25 + $0x78] sm:$0xff]  ;;  %v384_v38 = vsub.f32 %v256_v62, %v320_v19  ;;  %v323_v55 = vld [vmem:[%s830_s25 + $0x88] sm:$0xff]  ;;  %v324_v62 = vld [vmem:[%s830_s25 + $0x90] sm:$0xff] }
  0x3b   : > { %v505_v26 = vadd.f32 %v504_v51, %v441_v63  ;;  %v446_v63 = vand.u32 2147483647, %v382_v54  ;;  %v258_v51 = vld [vmem:[%s825_s22 + $0x80] sm:$0xff]  ;;  %v385_v43 = vsub.f32 %v257_v14, %v321_v22  ;;  %v325_v14 = vld [vmem:[%s830_s25 + $0x98] sm:$0xff]  ;;  %v336_v25 = vld [vmem:[%s830_s25 + $0xf0] sm:$0xff] }
  0x3c   : > { %v386_v5 = vsub.f32 %v258_v51, %v322_v61  ;;  %v326_v51 = vld [vmem:[%s830_s25 + $0xa0] sm:$0xff] }
  0x3d   : > { %v506_v30 = vadd.f32 %v505_v26, %v442_v47  ;;  %v447_v47 = vand.u32 2147483647, %v383_v31  ;;  %v259_v26 = vld [vmem:[%s825_s22 + $0x88] sm:$0xff] }
  0x3e   : > { %v387_v54 = vsub.f32 %v259_v26, %v323_v55  ;;  %v327_v26 = vld [vmem:[%s830_s25 + $0xa8] sm:$0xff] }
  0x3f   : > { %v507_v9 = vadd.f32 %v506_v30, %v443_v13  ;;  %v448_v13 = vand.u32 2147483647, %v384_v38  ;;  %v260_v30 = vld [vmem:[%s825_s22 + $0x90] sm:$0xff] }
  0x40   : > { %v388_v31 = vsub.f32 %v260_v30, %v324_v62  ;;  %v328_v30 = vld [vmem:[%s830_s25 + $0xb0] sm:$0xff] }
  0x41   : > { %v508_v15 = vadd.f32 %v507_v9, %v444_v59  ;;  %v449_v59 = vand.u32 2147483647, %v385_v43  ;;  %v261_v9 = vld [vmem:[%s825_s22 + $0x98] sm:$0xff] }
  0x42   : > { %v389_v38 = vsub.f32 %v261_v9, %v325_v14  ;;  %v329_v9 = vld [vmem:[%s830_s25 + $0xb8] sm:$0xff] }
  0x43   : > { %v509_v34 = vadd.f32 %v508_v15, %v445_v49  ;;  %v450_v49 = vand.u32 2147483647, %v386_v5  ;;  %v262_v15 = vld [vmem:[%s825_s22 + $0xa0] sm:$0xff] }
  0x44   : > { %v390_v43 = vsub.f32 %v262_v15, %v326_v51  ;;  %v330_v15 = vld [vmem:[%s830_s25 + $0xc0] sm:$0xff] }
  0x45   : > { %v510_v48 = vadd.f32 %v509_v34, %v446_v63  ;;  %v451_v63 = vand.u32 2147483647, %v387_v54  ;;  %v263_v34 = vld [vmem:[%s825_s22 + $0xa8] sm:$0xff] }
  0x46   : > { %v391_v5 = vsub.f32 %v263_v34, %v327_v26  ;;  %v331_v34 = vld [vmem:[%s830_s25 + $0xc8] sm:$0xff] }
  0x47   : > { %v511_v19 = vadd.f32 %v510_v48, %v447_v47  ;;  %v452_v47 = vand.u32 2147483647, %v388_v31  ;;  %v264_v48 = vld [vmem:[%s825_s22 + $0xb0] sm:$0xff] }
  0x48   : > { %v392_v54 = vsub.f32 %v264_v48, %v328_v30  ;;  %v332_v48 = vld [vmem:[%s830_s25 + $0xd0] sm:$0xff] }
  0x49   : > { %v512_v22 = vadd.f32 %v511_v19, %v448_v13  ;;  %v453_v13 = vand.u32 2147483647, %v389_v38  ;;  %v265_v19 = vld [vmem:[%s825_s22 + $0xb8] sm:$0xff] }
  0x4a   : > { %v393_v31 = vsub.f32 %v265_v19, %v329_v9  ;;  %v333_v19 = vld [vmem:[%s830_s25 + $0xd8] sm:$0xff] }
  0x4b   : > { %v513_v61 = vadd.f32 %v512_v22, %v449_v59  ;;  %v454_v59 = vand.u32 2147483647, %v390_v43  ;;  %v266_v22 = vld [vmem:[%s825_s22 + $0xc0] sm:$0xff] }
  0x4c   : > { %v394_v38 = vsub.f32 %v266_v22, %v330_v15  ;;  %v334_v22 = vld [vmem:[%s830_s25 + $0xe0] sm:$0xff] }
  0x4d   : > { %v514_v55 = vadd.f32 %v513_v61, %v450_v49  ;;  %v455_v49 = vand.u32 2147483647, %v391_v5  ;;  %v267_v61 = vld [vmem:[%s825_s22 + $0xc8] sm:$0xff] }
  0x4e   : > { %v395_v43 = vsub.f32 %v267_v61, %v331_v34  ;;  %v335_v61 = vld [vmem:[%s830_s25 + $0xe8] sm:$0xff] }
  0x4f   : > { %v515_v62 = vadd.f32 %v514_v55, %v451_v63  ;;  %v456_v63 = vand.u32 2147483647, %v392_v54  ;;  %v268_v55 = vld [vmem:[%s825_s22 + $0xd0] sm:$0xff] }
  0x50   : > { %v396_v5 = vsub.f32 %v268_v55, %v332_v48  ;;  %v337_v48 = vld [vmem:[%s830_s25 + $0xf8] sm:$0xff] }
  0x51   : > { %v516_v14 = vadd.f32 %v515_v62, %v452_v47  ;;  %v457_v47 = vand.u32 2147483647, %v393_v31  ;;  %v269_v62 = vld [vmem:[%s825_s22 + $0xd8] sm:$0xff] }
  0x52   : > { %v397_v54 = vsub.f32 %v269_v62, %v333_v19  ;;  %v274_v62 = vld [vmem:[%s825_s22 + $0x100] sm:$0xff] }
  0x53   : > { %v517_v51 = vadd.f32 %v516_v14, %v453_v13  ;;  %v458_v13 = vand.u32 2147483647, %v394_v38  ;;  %v270_v14 = vld [vmem:[%s825_s22 + $0xe0] sm:$0xff] }
  0x54   : > { %v398_v31 = vsub.f32 %v270_v14, %v334_v22  ;;  %v461_v55 = vand.u32 2147483647, %v397_v54  ;;  %v1347_v54 = vsub.f32 %v833_v0, %v893_v20  ;;  %v1351_v0 = vsub.f32 %v845_v4, %v920_v29 }
  0x55   : > { %v518_v26 = vadd.f32 %v517_v51, %v454_v59  ;;  %v459_v59 = vand.u32 2147483647, %v395_v43  ;;  %v271_v51 = vld [vmem:[%s825_s22 + $0xe8] sm:$0xff]  ;;  %v338_v43 = vld [vmem:[%s830_s25 + $0x100] sm:$0xff]  ;;  %v1355_v4 = vsub.f32 %v863_v10, %v960_v44 }
  0x56   : > { %v399_v57 = vsub.f32 %v271_v51, %v335_v61  ;;  %v462_v40 = vand.u32 2147483647, %v398_v31  ;;  %v402_v60 = vsub.f32 %v274_v62, %v338_v43  ;;  %v471_v20 = vand.u32 2147483647, %v1351_v0  ;;  %v1359_v43 = vld [vmem:[#allocation10_spill] sm:$0xff] }
  0x57   : > { %v519_v30 = vadd.f32 %v518_v26, %v455_v49  ;;  %v460_v49 = vand.u32 2147483647, %v396_v5  ;;  %v272_v26 = vld [vmem:[%s825_s22 + $0xf0] sm:$0xff]  ;;  %v475_v29 = vand.u32 2147483647, %v1355_v4  ;;  %v1360_v10 = vsub.f32 %v884_v17, %v1359_v43 }
  0x58   : > { %v463_v19 = vand.u32 2147483647, %v399_v57  ;;  %v466_v22 = vand.u32 2147483647, %v402_v60  ;;  %v1376_v0 = vsub.f32 %v951_v41, %v1060_v58  ;;  %v1384_v41 = vld [vmem:[#allocation8_spill] sm:$0xff]  ;;  %v1385_v58 = vld [vmem:[#allocation23_spill] sm:$0xff] }
  0x59   : > { %v520_v9 = vadd.f32 %v519_v30, %v456_v63  ;;  %v273_v63 = vld [vmem:[%s825_s22 + $0xf8] sm:$0xff]  ;;  %v400_v30 = vsub.f32 %v272_v26, %v336_v25  ;;  %v1348_v25 = vsub.f32 %v836_v1, %v896_v21  ;;  %v1352_v1 = vsub.f32 %v851_v6, %v936_v35  ;;  %v1393_v43 = vld [vmem:[#allocation13_spill] sm:$0xff] }
  0x5a   : > { %v1356_v6 = vsub.f32 %v866_v11, %v963_v45  ;;  %v479_v44 = vand.u32 2147483647, %v1360_v10  ;;  %v1394_v10 = vld [vmem:[#allocation26_spill] sm:$0xff] }
  0x5b   : > { %v521_v15 = vadd.f32 %v520_v9, %v457_v47  ;;  %v401_v47 = vsub.f32 %v273_v63, %v337_v48  ;;  %v464_v52 = vand.u32 2147483647, %v400_v30  ;;  %v468_v61 = vand.u32 2147483647, %v1348_v25 }
  0x5c   : > { %v472_v21 = vand.u32 2147483647, %v1352_v1  ;;  %v476_v35 = vand.u32 2147483647, %v1356_v6  ;;  %v1370_v25 = vsub.f32 %v927_v32, %v1041_v39  ;;  %v1377_v39 = vsub.f32 %v954_v42, %v1063_v18  ;;  %v1388_v18 = vld [vmem:[#allocation24_spill] sm:$0xff] }
  0x5d   : > { %v522_v34 = vadd.f32 %v521_v15, %v458_v13  ;;  %v465_v5 = vand.u32 2147483647, %v401_v47 }
  0x5f   : > { %v523_v38 = vadd.f32 %v522_v34, %v459_v59  ;;  %v467_v59 = vand.u32 2147483647, %v1347_v54  ;;  %v1368_v54 = vld [vmem:[#allocation16_spill] sm:$0xff] }
  0x61   : > { %v524_v53 = vadd.f32 %v523_v38, %v460_v49 }
  0x63   : > { %v525_v9 = vadd.f32 %v524_v53, %v461_v55  ;;  %v1349_v53 = vsub.f32 %v839_v2, %v914_v27  ;;  %v1353_v2 = vsub.f32 %v854_v7, %v939_v36  ;;  %v1357_v7 = vsub.f32 %v869_v12, %v966_v46 }
  0x64   : > { %v1364_v12 = vsub.f32 %v902_v23, %v1018_v50  ;;  %v1371_v23 = vld [vmem:[#allocation19_spill] sm:$0xff] }
  0x65   : > { %v526_v14 = vadd.f32 %v525_v9, %v462_v40  ;;  %v469_v57 = vand.u32 2147483647, %v1349_v53  ;;  %v1350_v40 = vsub.f32 %v842_v3, %v917_v28  ;;  %v473_v27 = vand.u32 2147483647, %v1353_v2  ;;  %v1362_v9 = vld [vmem:[#allocation11_spill] sm:$0xff] }
  0x66   : > { %v1354_v3 = vsub.f32 %v857_v8, %v942_v37  ;;  %v477_v36 = vand.u32 2147483647, %v1357_v7  ;;  %v1358_v8 = vsub.f32 %v881_v16, %v992_v56  ;;  %v481_v46 = vand.u32 2147483647, %v1364_v12 }
  0x67   : > { %v527_v13 = vadd.f32 %v526_v14, %v463_v19  ;;  %v470_v60 = vand.u32 2147483647, %v1350_v40  ;;  %v1361_v19 = vld [vmem:[#allocation3_spill] sm:$0xff]  ;;  %v1372_v50 = vsub.f32 %v930_v33, %v1371_v23  ;;  %v1378_v33 = vld [vmem:[#allocation6_spill] sm:$0xff] }
  0x68   : > { %v474_v28 = vand.u32 2147483647, %v1354_v3  ;;  %v478_v37 = vand.u32 2147483647, %v1358_v8  ;;  %v1363_v11 = vsub.f32 %v1361_v19, %v1362_v9  ;;  %v1382_v3 = vld [vmem:[#allocation22_spill] sm:$0xff] }
  0x69   : > { %v528_v15 = vadd.f32 %v527_v13, %v464_v52  ;;  %v1365_v13 = vld [vmem:[#allocation15_spill] sm:$0xff]  ;;  %v485_v53 = vand.u32 2147483647, %v1372_v50  ;;  %v1396_v9 = vld [vmem:[#allocation14_spill] sm:$0xff] }
  0x6a   : > { %v480_v45 = vand.u32 2147483647, %v1363_v11  ;;  %v1366_v16 = vsub.f32 %v905_v24, %v1365_v13  ;;  %v1374_v24 = vld [vmem:[#allocation20_spill] sm:$0xff]  ;;  %v1397_v11 = vld [vmem:[#allocation27_spill] sm:$0xff] }
  0x6b   : > { %v529_v51 = vadd.f32 %v528_v15, %v465_v5  ;;  %v1367_v15 = vld [vmem:[#allocation4_spill] sm:$0xff] }
  0x6c   : > { %v482_v56 = vand.u32 2147483647, %v1366_v16  ;;  %v1369_v17 = vsub.f32 %v1367_v15, %v1368_v54  ;;  %v1403_v15 = vld [vmem:[#allocation29_spill] sm:$0xff] }
  0x6d   : > { %v530_v31 = vadd.f32 %v529_v51, %v466_v22 }
  0x6f   : > { %v531_v49 = vadd.f32 %v530_v31, %v467_v59  ;;  %v483_v59 = vand.u32 2147483647, %v1369_v17 }
  0x71   : > { %v532_v52 = vadd.f32 %v531_v49, %v468_v61  ;;  %v484_v61 = vand.u32 2147483647, %v1370_v25  ;;  %v1373_v49 = vld [vmem:[#allocation5_spill] sm:$0xff] }
  0x72   : > { %v1375_v40 = vsub.f32 %v1373_v49, %v1374_v24 }
  0x73   : > { %v533_v34 = vadd.f32 %v532_v52, %v469_v57 }
  0x75   : > { %v534_v26 = vadd.f32 %v533_v34, %v470_v60  ;;  %v486_v60 = vand.u32 2147483647, %v1375_v40  ;;  %v488_v34 = vand.u32 2147483647, %v1377_v39 }
  0x77   : > { %v535_v55 = vadd.f32 %v534_v26, %v471_v20  ;;  %v487_v20 = vand.u32 2147483647, %v1376_v0 }
  0x79   : > { %v536_v38 = vadd.f32 %v535_v55, %v472_v21  ;;  %v1379_v21 = vld [vmem:[#allocation21_spill] sm:$0xff]  ;;  %v1381_v55 = vld [vmem:[#allocation7_spill] sm:$0xff] }
  0x7a   : > { %v1380_v26 = vsub.f32 %v1378_v33, %v1379_v21 }
  0x7b   : > { %v537_v63 = vadd.f32 %v536_v38, %v473_v27 }
  0x7c   : > { %v489_v2 = vand.u32 2147483647, %v1380_v26 }
  0x7d   : > { %v538_v48 = vadd.f32 %v537_v63, %v474_v28  ;;  %v1383_v28 = vsub.f32 %v1381_v55, %v1382_v3 }
  0x7f   : > { %v539_v30 = vadd.f32 %v538_v48, %v475_v29  ;;  %v490_v38 = vand.u32 2147483647, %v1383_v28  ;;  %v1386_v29 = vsub.f32 %v1384_v41, %v1385_v58 }
  0x81   : > { %v540_v62 = vadd.f32 %v539_v30, %v476_v35  ;;  %v491_v63 = vand.u32 2147483647, %v1386_v29  ;;  %v1387_v35 = vld [vmem:[#allocation9_spill] sm:$0xff] }
  0x82   : > { %v1389_v42 = vsub.f32 %v1387_v35, %v1388_v18  ;;  %v1391_v30 = vld [vmem:[#allocation25_spill] sm:$0xff] }
  0x83   : > { %v541_v47 = vadd.f32 %v540_v62, %v477_v36  ;;  %v1390_v36 = vld [vmem:[#allocation12_spill] sm:$0xff] }
  0x84   : > { %v492_v48 = vand.u32 2147483647, %v1389_v42  ;;  %v1392_v8 = vsub.f32 %v1390_v36, %v1391_v30 }
  0x85   : > { %v542_v14 = vadd.f32 %v541_v47, %v478_v37 }
  0x86   : > { %v493_v37 = vand.u32 2147483647, %v1392_v8 }
  0x87   : > { %v543_v5 = vadd.f32 %v542_v14, %v479_v44  ;;  %v1395_v44 = vsub.f32 %v1393_v43, %v1394_v10 }
  0x89   : > { %v544_v22 = vadd.f32 %v543_v5, %v480_v45  ;;  %v494_v47 = vand.u32 2147483647, %v1395_v44  ;;  %v1398_v45 = vsub.f32 %v1396_v9, %v1397_v11  ;;  %v1400_v5 = vld [vmem:[#allocation28_spill] sm:$0xff] }
  0x8b   : > { %v545_v51 = vadd.f32 %v544_v22, %v481_v46  ;;  %v495_v14 = vand.u32 2147483647, %v1398_v45  ;;  %v1399_v46 = vld [vmem:[#allocation17_spill] sm:$0xff]  ;;  %v1402_v22 = vld [vmem:[#allocation18_spill] sm:$0xff] }
  0x8c   : > { %v1401_v13 = vsub.f32 %v1399_v46, %v1400_v5  ;;  %v1404_v54 = vsub.f32 %v1402_v22, %v1403_v15 }
  0x8d   : > { %v546_v31 = vadd.f32 %v545_v51, %v482_v56 }
  0x8e   : > { %v496_v16 = vand.u32 2147483647, %v1401_v13  ;;  %v497_v17 = vand.u32 2147483647, %v1404_v54 }
  0x8f   : > { %v547_v57 = vadd.f32 %v546_v31, %v483_v59 }
  0x91   : > { %v548_v52 = vadd.f32 %v547_v57, %v484_v61 }
  0x93   : > { %v549_v32 = vadd.f32 %v548_v52, %v485_v53 }
  0x95   : > { %v550_v1 = vadd.f32 %v549_v32, %v486_v60 }
  0x97   : > { %v551_v27 = vadd.f32 %v550_v1, %v487_v20 }
  0x99   : > { %v552_v4 = vadd.f32 %v551_v27, %v488_v34 }
  0x9b   : > { %v553_v6 = vadd.f32 %v552_v4, %v489_v2 }
  0x9d   : > { %v554_v7 = vadd.f32 %v553_v6, %v490_v38 }
  0x9f   : > { %v555_v62 = vadd.f32 %v554_v7, %v491_v63 }
  0xa1   : > { %v556_v19 = vadd.f32 %v555_v62, %v492_v48 }
  0xa3   : > { %v557_v12 = vadd.f32 %v556_v19, %v493_v37 }
  0xa5   : > { %v558_v56 = vadd.f32 %v557_v12, %v494_v47 }
  0xa7   : > { %v559_v59 = vadd.f32 %v558_v56, %v495_v14 }
  0xa9   : > { %v560_v51 = vadd.f32 %v559_v59, %v496_v16 }
  0xab   : > { %v561_v25 = vadd.f32 %v560_v51, %v497_v17 }
  0xad   : > { %568 = vst [vmem:[%s236_s3] sm:$0xff] %v561_v25 }
  0xae PF: > { %s12_s13 = sadd.s32 1, %s769_s13   ;;  %s1405_s9 = smov %s761_s11 }
  0xaf   : > { %p9_p8 = scmp.ge.s32.totalorder %s12_s13, 6   ;;  %s1406_s10 = smov %s765_s12 }
  0xb0   : > { %s1407_s11 = smov %s1410_s14  ;;  %s1408_s12 = smov %s1414_s15 }
  0xb1   :  { %11 = sbr.rel (!%p9_p8) target bundleno = 3 (0x3), region = 69 }

// kernel: ms_swd_forward.6
= control target key start
LH: loop header
LB: loop body
LE: loop exit
PB: predicated region body
PF: predicated region fallthrough
CT: control target
= control target key end

     0   :  { %s582_s9 = smov 0   ;;  %s584_s10 = smov 0   ;;  %s690_s0 = inlined_call_operand.vmem [shape: f32[2,256,128], index: 0, kind: input, shape index: {}]   ;;  %s691_s1 = inlined_call_operand.vmem [shape: f32[2,256,128], index: 1, kind: input, shape index: {}]   ;;  %s692_s2 = inlined_call_operand.vmem [shape: f32[2,1,8,128], index: 2, kind: output, shape index: {}]  }
   0x1   :  { %s586_s11 = smov 0  }
   0x2 LB: > { %s31_s12 = sadd.s32 1, %s561_s10  ;;  %p509_p0 = scmp.ge.s32.totalorder %s565_s11, 1  ;;  %s565_s11 = sphi %s586_s11, %s12_s11   ;;  %s561_s10 = sphi %s584_s10, %s694_s10   ;;  %s557_s9 = sphi %s582_s9, %s693_s9  }
   0x3   : > { %p33_p1 = scmp.ge.s32.totalorder %s31_s12, 2  ;;  %p165_p2 = scmp.lt.s32.totalorder %s565_s11, 3 }
   0x5   : > { %s696_s12 = smov (%p33_p1, %s31_s12), 0  ;;  %p166_p3 = pnand %p509_p0, %p165_p2 }
   0x6   : > { %p206_p4 = scmp.lt.s32.totalorder (!%p166_p3), %s557_s9, 1 }
   0x7   : > { %169 = sbr.rel (%p166_p3) target bundleno = 86 (0x56), region = 28 }
   0xe   : > { %s698_s9 = smov (!%p206_p4, %s557_s9), 1 }
   0xf   : > { %s517_s13 = sshll.u32 %s698_s9, 8  ;;  %s514_s20 = sshll.u32 %s698_s9, 3 }
  0x10   : > { %s606_s16 = scalar_lea.vmem %s690_s0, %s517_s13  ;;  %s611_s19 = scalar_lea.vmem %s691_s1, %s517_s13 }
  0x11   : > { %v240_v0 = vld [vmem:[%s606_s16] sm:$0xff]  ;;  %v241_v1 = vld [vmem:[%s606_s16 + $0x8] sm:$0xff]  ;;  %v242_v4 = vld [vmem:[%s606_s16 + $0x10] sm:$0xff]  ;;  %s234_s23 = scalar_lea.vmem %s692_s2, %s514_s20 }
  0x12   : > { %v272_v2 = vld [vmem:[%s611_s19] sm:$0xff]  ;;  %v273_v3 = vld [vmem:[%s611_s19 + $0x8] sm:$0xff]  ;;  %v274_v5 = vld [vmem:[%s611_s19 + $0x10] sm:$0xff] }
  0x13   : > { %v304_v6 = vsub.f32 %v240_v0, %v272_v2  ;;  %v305_v7 = vsub.f32 %v241_v1, %v273_v3  ;;  %v243_v8 = vld [vmem:[%s606_s16 + $0x18] sm:$0xff]  ;;  %v306_v10 = vsub.f32 %v242_v4, %v274_v5  ;;  %v244_v11 = vld [vmem:[%s606_s16 + $0x20] sm:$0xff]  ;;  %v245_v16 = vld [vmem:[%s606_s16 + $0x28] sm:$0xff] }
  0x14   : > { %v275_v9 = vld [vmem:[%s611_s19 + $0x18] sm:$0xff]  ;;  %v276_v12 = vld [vmem:[%s611_s19 + $0x20] sm:$0xff]  ;;  %v277_v17 = vld [vmem:[%s611_s19 + $0x28] sm:$0xff] }
  0x15   : > { %v307_v13 = vsub.f32 %v243_v8, %v275_v9  ;;  %v336_v14 = vand.u32 2147483647, %v304_v6  ;;  %v337_v15 = vand.u32 2147483647, %v305_v7  ;;  %v308_v18 = vsub.f32 %v244_v11, %v276_v12  ;;  %v246_v20 = vld [vmem:[%s606_s16 + $0x30] sm:$0xff]  ;;  %v247_v25 = vld [vmem:[%s606_s16 + $0x38] sm:$0xff] }
  0x16   : > { %v338_v19 = vand.u32 2147483647, %v306_v10  ;;  %v278_v21 = vld [vmem:[%s611_s19 + $0x30] sm:$0xff]  ;;  %v309_v22 = vsub.f32 %v245_v16, %v277_v17  ;;  %v279_v26 = vld [vmem:[%s611_s19 + $0x38] sm:$0xff]  ;;  %v248_v30 = vld [vmem:[%s606_s16 + $0x40] sm:$0xff] }
  0x17   : > { %v339_v23 = vand.u32 2147483647, %v307_v13  ;;  %v369_v24 = vadd.f32 %v337_v15, %v336_v14  ;;  %v310_v27 = vsub.f32 %v246_v20, %v278_v21  ;;  %v340_v28 = vand.u32 2147483647, %v308_v18  ;;  %v280_v31 = vld [vmem:[%s611_s19 + $0x40] sm:$0xff]  ;;  %v249_v35 = vld [vmem:[%s606_s16 + $0x48] sm:$0xff] }
  0x18   : > { %v311_v32 = vsub.f32 %v247_v25, %v279_v26  ;;  %v341_v33 = vand.u32 2147483647, %v309_v22  ;;  %v281_v36 = vld [vmem:[%s611_s19 + $0x48] sm:$0xff]  ;;  %v312_v37 = vsub.f32 %v248_v30, %v280_v31  ;;  %v250_v40 = vld [vmem:[%s606_s16 + $0x50] sm:$0xff]  ;;  %v251_v45 = vld [vmem:[%s606_s16 + $0x58] sm:$0xff] }
  0x19   : > { %v370_v29 = vadd.f32 %v369_v24, %v338_v19  ;;  %v342_v38 = vand.u32 2147483647, %v310_v27  ;;  %v282_v41 = vld [vmem:[%s611_s19 + $0x50] sm:$0xff]  ;;  %v313_v42 = vsub.f32 %v249_v35, %v281_v36  ;;  %v283_v46 = vld [vmem:[%s611_s19 + $0x58] sm:$0xff]  ;;  %v252_v50 = vld [vmem:[%s606_s16 + $0x60] sm:$0xff] }
  0x1a   : > { %v343_v43 = vand.u32 2147483647, %v311_v32  ;;  %v314_v47 = vsub.f32 %v250_v40, %v282_v41  ;;  %v344_v48 = vand.u32 2147483647, %v312_v37  ;;  %v284_v51 = vld [vmem:[%s611_s19 + $0x60] sm:$0xff]  ;;  %v315_v52 = vsub.f32 %v251_v45, %v283_v46  ;;  %v253_v55 = vld [vmem:[%s606_s16 + $0x68] sm:$0xff] }
  0x1b   : > { %v371_v34 = vadd.f32 %v370_v29, %v339_v23  ;;  %v345_v53 = vand.u32 2147483647, %v313_v42  ;;  %v285_v56 = vld [vmem:[%s611_s19 + $0x68] sm:$0xff]  ;;  %v316_v57 = vsub.f32 %v252_v50, %v284_v51  ;;  %v254_v60 = vld [vmem:[%s606_s16 + $0x70] sm:$0xff]  ;;  %v255_v1 = vld [vmem:[%s606_s16 + $0x78] sm:$0xff] }
  0x1c   : > { %v346_v58 = vand.u32 2147483647, %v314_v47  ;;  %v286_v61 = vld [vmem:[%s611_s19 + $0x70] sm:$0xff]  ;;  %v317_v62 = vsub.f32 %v253_v55, %v285_v56  ;;  %v347_v63 = vand.u32 2147483647, %v315_v52  ;;  %v287_v2 = vld [vmem:[%s611_s19 + $0x78] sm:$0xff] }
  0x1d   : > { %v372_v39 = vadd.f32 %v371_v34, %v340_v28  ;;  %v318_v3 = vsub.f32 %v254_v60, %v286_v61  ;;  %v348_v4 = vand.u32 2147483647, %v316_v57  ;;  %v256_v6 = vld [vmem:[%s606_s16 + $0x80] sm:$0xff]  ;;  %v319_v8 = vsub.f32 %v255_v1, %v287_v2  ;;  %v257_v11 = vld [vmem:[%s606_s16 + $0x88] sm:$0xff]  ;;  %v258_v16 = vld [vmem:[%s606_s16 + $0x90] sm:$0xff] }
  0x1e   : > { %v288_v7 = vld [vmem:[%s611_s19 + $0x80] sm:$0xff]  ;;  %v349_v9 = vand.u32 2147483647, %v317_v62  ;;  %v289_v12 = vld [vmem:[%s611_s19 + $0x88] sm:$0xff]  ;;  %v290_v17 = vld [vmem:[%s611_s19 + $0x90] sm:$0xff] }
  0x1f   : > { %v373_v44 = vadd.f32 %v372_v39, %v341_v33  ;;  %v320_v13 = vsub.f32 %v256_v6, %v288_v7  ;;  %v350_v14 = vand.u32 2147483647, %v318_v3  ;;  %v321_v18 = vsub.f32 %v257_v11, %v289_v12  ;;  %v259_v21 = vld [vmem:[%s606_s16 + $0x98] sm:$0xff]  ;;  %v260_v26 = vld [vmem:[%s606_s16 + $0xa0] sm:$0xff]  ;;  %v261_v31 = vld [vmem:[%s606_s16 + $0xa8] sm:$0xff] }
  0x20   : > { %v351_v19 = vand.u32 2147483647, %v319_v8  ;;  %v291_v22 = vld [vmem:[%s611_s19 + $0x98] sm:$0xff]  ;;  %v322_v23 = vsub.f32 %v258_v16, %v290_v17  ;;  %v292_v27 = vld [vmem:[%s611_s19 + $0xa0] sm:$0xff]  ;;  %v293_v32 = vld [vmem:[%s611_s19 + $0xa8] sm:$0xff] }
  0x21   : > { %v374_v49 = vadd.f32 %v373_v44, %v342_v38  ;;  %v352_v24 = vand.u32 2147483647, %v320_v13  ;;  %v323_v28 = vsub.f32 %v259_v21, %v291_v22  ;;  %v353_v29 = vand.u32 2147483647, %v321_v18  ;;  %v262_v36 = vld [vmem:[%s606_s16 + $0xb0] sm:$0xff]  ;;  %v263_v41 = vld [vmem:[%s606_s16 + $0xb8] sm:$0xff] }
  0x22   : > { %v324_v33 = vsub.f32 %v260_v26, %v292_v27  ;;  %v354_v34 = vand.u32 2147483647, %v322_v23  ;;  %v294_v37 = vld [vmem:[%s611_s19 + $0xb0] sm:$0xff]  ;;  %v325_v38 = vsub.f32 %v261_v31, %v293_v32  ;;  %v295_v42 = vld [vmem:[%s611_s19 + $0xb8] sm:$0xff]  ;;  %v264_v46 = vld [vmem:[%s606_s16 + $0xc0] sm:$0xff] }
  0x23   : > { %v375_v54 = vadd.f32 %v374_v49, %v343_v43  ;;  %v355_v39 = vand.u32 2147483647, %v323_v28  ;;  %v326_v43 = vsub.f32 %v262_v36, %v294_v37  ;;  %v296_v47 = vld [vmem:[%s611_s19 + $0xc0] sm:$0xff]  ;;  %v265_v51 = vld [vmem:[%s606_s16 + $0xc8] sm:$0xff]  ;;  %v266_v56 = vld [vmem:[%s606_s16 + $0xd0] sm:$0xff] }
  0x24   : > { %v356_v44 = vand.u32 2147483647, %v324_v33  ;;  %v357_v49 = vand.u32 2147483647, %v325_v38  ;;  %v297_v52 = vld [vmem:[%s611_s19 + $0xc8] sm:$0xff]  ;;  %v298_v57 = vld [vmem:[%s611_s19 + $0xd0] sm:$0xff] }
  0x25   : > { %v376_v59 = vadd.f32 %v375_v54, %v344_v48  ;;  %v327_v48 = vsub.f32 %v263_v41, %v295_v42  ;;  %v358_v54 = vand.u32 2147483647, %v326_v43  ;;  %v267_v61 = vld [vmem:[%s606_s16 + $0xd8] sm:$0xff]  ;;  %v268_v2 = vld [vmem:[%s606_s16 + $0xe0] sm:$0xff]  ;;  %v269_v7 = vld [vmem:[%s606_s16 + $0xe8] sm:$0xff] }
  0x26   : > { %v299_v62 = vld [vmem:[%s611_s19 + $0xd8] sm:$0xff]  ;;  %v300_v3 = vld [vmem:[%s611_s19 + $0xe0] sm:$0xff]  ;;  %v301_v8 = vld [vmem:[%s611_s19 + $0xe8] sm:$0xff] }
  0x27   : > { %v377_v0 = vadd.f32 %v376_v59, %v345_v53  ;;  %v328_v53 = vsub.f32 %v264_v46, %v296_v47  ;;  %v359_v59 = vand.u32 2147483647, %v327_v48  ;;  %v270_v12 = vld [vmem:[%s606_s16 + $0xf0] sm:$0xff]  ;;  %v271_v17 = vld [vmem:[%s606_s16 + $0xf8] sm:$0xff] }
  0x28   : > { %v302_v13 = vld [vmem:[%s611_s19 + $0xf0] sm:$0xff]  ;;  %v303_v18 = vld [vmem:[%s611_s19 + $0xf8] sm:$0xff] }
  0x29   : > { %v378_v5 = vadd.f32 %v377_v0, %v346_v58  ;;  %v329_v58 = vsub.f32 %v265_v51, %v297_v52  ;;  %v360_v0 = vand.u32 2147483647, %v328_v53  ;;  %v335_v22 = vsub.f32 %v271_v17, %v303_v18 }
  0x2b   : > { %v379_v10 = vadd.f32 %v378_v5, %v347_v63  ;;  %v330_v63 = vsub.f32 %v266_v56, %v298_v57  ;;  %v361_v5 = vand.u32 2147483647, %v329_v58  ;;  %v367_v27 = vand.u32 2147483647, %v335_v22 }
  0x2d   : > { %v380_v15 = vadd.f32 %v379_v10, %v348_v4  ;;  %v331_v4 = vsub.f32 %v267_v61, %v299_v62  ;;  %v362_v10 = vand.u32 2147483647, %v330_v63 }
  0x2f   : > { %v381_v20 = vadd.f32 %v380_v15, %v349_v9  ;;  %v332_v9 = vsub.f32 %v268_v2, %v300_v3  ;;  %v363_v15 = vand.u32 2147483647, %v331_v4 }
  0x31   : > { %v382_v25 = vadd.f32 %v381_v20, %v350_v14  ;;  %v333_v14 = vsub.f32 %v269_v7, %v301_v8  ;;  %v364_v20 = vand.u32 2147483647, %v332_v9 }
  0x33   : > { %v383_v30 = vadd.f32 %v382_v25, %v351_v19  ;;  %v334_v19 = vsub.f32 %v270_v12, %v302_v13  ;;  %v365_v23 = vand.u32 2147483647, %v333_v14 }
  0x35   : > { %v384_v35 = vadd.f32 %v383_v30, %v352_v24  ;;  %v366_v25 = vand.u32 2147483647, %v334_v19 }
  0x37   : > { %v385_v40 = vadd.f32 %v384_v35, %v353_v29 }
  0x39   : > { %v386_v45 = vadd.f32 %v385_v40, %v354_v34 }
  0x3b   : > { %v387_v50 = vadd.f32 %v386_v45, %v355_v39 }
  0x3d   : > { %v388_v55 = vadd.f32 %v387_v50, %v356_v44 }
  0x3f   : > { %v389_v60 = vadd.f32 %v388_v55, %v357_v49 }
  0x41   : > { %v390_v1 = vadd.f32 %v389_v60, %v358_v54 }
  0x43   : > { %v391_v6 = vadd.f32 %v390_v1, %v359_v59 }
  0x45   : > { %v392_v11 = vadd.f32 %v391_v6, %v360_v0 }
  0x47   : > { %v393_v16 = vadd.f32 %v392_v11, %v361_v5 }
  0x49   : > { %v394_v21 = vadd.f32 %v393_v16, %v362_v10 }
  0x4b   : > { %v395_v24 = vadd.f32 %v394_v21, %v363_v15 }
  0x4d   : > { %v396_v26 = vadd.f32 %v395_v24, %v364_v20 }
  0x4f   : > { %v397_v28 = vadd.f32 %v396_v26, %v365_v23 }
  0x51   : > { %v398_v29 = vadd.f32 %v397_v28, %v366_v25 }
  0x53   : > { %v399_v30 = vadd.f32 %v398_v29, %v367_v27 }
  0x55   : > { %406 = vst [vmem:[%s234_s23] sm:$0xff] %v399_v30 }
  0x56 PF: > { %s12_s11 = sadd.s32 1, %s565_s11   ;;  %s693_s9 = smov %s561_s10 }
  0x57   : > { %p9_p5 = scmp.ge.s32.totalorder %s12_s11, 4   ;;  %s694_s10 = smov %s696_s12 }
  0x59   :  { %11 = sbr.rel (!%p9_p5) target bundleno = 2 (0x2), region = 69 }

// kernel: ms_swd_forward.7
= control target key start
LH: loop header
LB: loop body
LE: loop exit
PB: predicated region body
PF: predicated region fallthrough
CT: control target
= control target key end

     0   :  { %s462_s9 = smov 0   ;;  %s464_s10 = smov 0   ;;  %s502_s0 = inlined_call_operand.vmem [shape: f32[2,64,128], index: 0, kind: input, shape index: {}]   ;;  %s503_s1 = inlined_call_operand.vmem [shape: f32[2,64,128], index: 1, kind: input, shape index: {}]   ;;  %s504_s2 = inlined_call_operand.vmem [shape: f32[2,1,8,128], index: 2, kind: output, shape index: {}]  }
   0x1   :  { %s466_s11 = smov 0  }
   0x2 LB: > { %s31_s12 = sadd.s32 1, %s441_s10  ;;  %p389_p0 = scmp.ge.s32.totalorder %s445_s11, 1  ;;  %s445_s11 = sphi %s466_s11, %s12_s11   ;;  %s441_s10 = sphi %s464_s10, %s506_s10   ;;  %s437_s9 = sphi %s462_s9, %s505_s9  }
   0x3   : > { %p33_p1 = scmp.ge.s32.totalorder %s31_s12, 2  ;;  %p165_p2 = scmp.lt.s32.totalorder %s445_s11, 3 }
   0x5   : > { %s508_s12 = smov (%p33_p1, %s31_s12), 0  ;;  %p166_p3 = pnand %p389_p0, %p165_p2 }
   0x6   : > { %p206_p4 = scmp.lt.s32.totalorder (!%p166_p3), %s437_s9, 1 }
   0x7   : > { %169 = sbr.rel (%p166_p3) target bundleno = 39 (0x27), region = 28 }
   0xe   : > { %s510_s9 = smov (!%p206_p4, %s437_s9), 1 }
   0xf   : > { %s397_s13 = sshll.u32 %s510_s9, 6  ;;  %s394_s20 = sshll.u32 %s510_s9, 3 }
  0x10   : > { %s213_s16 = scalar_lea.vmem %s502_s0, %s397_s13  ;;  %s225_s19 = scalar_lea.vmem %s503_s1, %s397_s13 }
  0x11   : > { %v240_v0 = vld [vmem:[%s213_s16] sm:$0xff]  ;;  %v241_v1 = vld [vmem:[%s213_s16 + $0x8] sm:$0xff]  ;;  %v242_v2 = vld [vmem:[%s213_s16 + $0x10] sm:$0xff]  ;;  %s234_s23 = scalar_lea.vmem %s504_s2, %s394_s20 }
  0x12   : > { %v243_v3 = vld [vmem:[%s213_s16 + $0x18] sm:$0xff]  ;;  %v244_v4 = vld [vmem:[%s213_s16 + $0x20] sm:$0xff]  ;;  %v249_v6 = vld [vmem:[%s225_s19 + $0x8] sm:$0xff] }
  0x13   : > { %v248_v5 = vld [vmem:[%s225_s19] sm:$0xff]  ;;  %v250_v7 = vld [vmem:[%s225_s19 + $0x10] sm:$0xff]  ;;  %v251_v8 = vld [vmem:[%s225_s19 + $0x18] sm:$0xff]  ;;  %v257_v11 = vsub.f32 %v241_v1, %v249_v6 }
  0x14   : > { %v256_v9 = vsub.f32 %v240_v0, %v248_v5  ;;  %v252_v10 = vld [vmem:[%s225_s19 + $0x20] sm:$0xff]  ;;  %v258_v12 = vsub.f32 %v242_v2, %v250_v7  ;;  %v259_v13 = vsub.f32 %v243_v3, %v251_v8  ;;  %v245_v14 = vld [vmem:[%s213_s16 + $0x28] sm:$0xff]  ;;  %v246_v20 = vld [vmem:[%s213_s16 + $0x30] sm:$0xff] }
  0x15   : > { %v253_v15 = vld [vmem:[%s225_s19 + $0x28] sm:$0xff]  ;;  %v260_v17 = vsub.f32 %v244_v4, %v252_v10  ;;  %v265_v18 = vand.u32 2147483647, %v257_v11  ;;  %v254_v21 = vld [vmem:[%s225_s19 + $0x30] sm:$0xff]  ;;  %v247_v25 = vld [vmem:[%s213_s16 + $0x38] sm:$0xff] }
  0x16   : > { %v264_v16 = vand.u32 2147483647, %v256_v9  ;;  %v266_v19 = vand.u32 2147483647, %v258_v12  ;;  %v261_v22 = vsub.f32 %v245_v14, %v253_v15  ;;  %v267_v23 = vand.u32 2147483647, %v259_v13 }
  0x17   : > { %v255_v26 = vld [vmem:[%s225_s19 + $0x38] sm:$0xff]  ;;  %v262_v27 = vsub.f32 %v246_v20, %v254_v21  ;;  %v268_v28 = vand.u32 2147483647, %v260_v17 }
  0x18   : > { %v273_v24 = vadd.f32 %v265_v18, %v264_v16  ;;  %v263_v30 = vsub.f32 %v247_v25, %v255_v26  ;;  %v269_v31 = vand.u32 2147483647, %v261_v22 }
  0x19   : > { %v270_v33 = vand.u32 2147483647, %v262_v27 }
  0x1a   : > { %v274_v29 = vadd.f32 %v273_v24, %v266_v19  ;;  %v271_v35 = vand.u32 2147483647, %v263_v30 }
  0x1c   : > { %v275_v32 = vadd.f32 %v274_v29, %v267_v23 }
  0x1e   : > { %v276_v34 = vadd.f32 %v275_v32, %v268_v28 }
  0x20   : > { %v277_v36 = vadd.f32 %v276_v34, %v269_v31 }
  0x22   : > { %v278_v37 = vadd.f32 %v277_v36, %v270_v33 }
  0x24   : > { %v279_v38 = vadd.f32 %v278_v37, %v271_v35 }
  0x26   : > { %286 = vst [vmem:[%s234_s23] sm:$0xff] %v279_v38 }
  0x27 PF: > { %s12_s11 = sadd.s32 1, %s445_s11   ;;  %s505_s9 = smov %s441_s10 }
  0x28   : > { %p9_p5 = scmp.ge.s32.totalorder %s12_s11, 4   ;;  %s506_s10 = smov %s508_s12 }
  0x2a   :  { %11 = sbr.rel (!%p9_p5) target bundleno = 2 (0x2), region = 69 }

</bundles_post_ra>
